<compile_context>
chip_gen: v7x
topology: tpu7x:2x2x1
jax: 0.10.0
libtpu: 0.0.40
codegen_flags: <defaults>
</compile_context>

<pallas_src>
import functools

import jax
import jax.numpy as jnp
from jax import lax
from jax.experimental import pallas as pl
from jax.experimental.pallas import tpu as pltpu

MATMUL_DTYPE = jnp.bfloat16        # MXU operand dtype; accumulation is f32
ACT_DTYPE = jnp.bfloat16           # inter-kernel activation storage dtype
VMEM_LIMIT = 32 * 1024 * 1024      # explicit scoped-VMEM cap (safe v5e/v6e/v7x)


def _pick_tile(dim, target, multiple):
    """Largest tile <= target that divides `dim` exactly and is a multiple of
    `multiple`; falls back to the full dim (valid: block == full array dim)."""
    if dim <= target:
        return dim
    t = (target // multiple) * multiple
    while t >= multiple:
        if dim % t == 0:
            return t
        t -= multiple
    return dim


def _row_tile_and_pad(M, target):
    """Row (sublane) tile: prefer an exact divisor <= target; otherwise use the
    target itself and pad the rows (avoids the silent whole-M block that could
    exceed VMEM on v7x)."""
    tm = _pick_tile(M, target, 8)
    if tm > target:                       # no clean divisor -> pad instead
        tm = max(8, (target // 8) * 8)
    Mp = ((M + tm - 1) // tm) * tm
    return tm, Mp


# ----------------------------------------------------------------------------
# Kernel 1: fused LayerNorm + Linear (+ optional GELU), tiled over (M, N).
# LN result is cached in a (tm, D) bf16 scratch and reused across the N tiles.
# ----------------------------------------------------------------------------

def _ln_linear_kernel(x_ref, g_ref, b_ref, w_ref, bias_ref, o_ref, ln_ref, *,
                      eps, activation):
    # j (N-tile axis) is the innermost grid axis -> LN computed once per (i).
    @pl.when(pl.program_id(1) == 0)
    def _():
        x = x_ref[...].astype(jnp.float32)                    # (tm, D)
        mu = jnp.mean(x, axis=-1, keepdims=True)
        var = jnp.mean(jnp.square(x - mu), axis=-1, keepdims=True)
        h = (x - mu) * lax.rsqrt(var + eps)
        h = h * g_ref[...].astype(jnp.float32) + b_ref[...].astype(jnp.float32)
        ln_ref[...] = h.astype(ln_ref.dtype)                  # bf16 MXU operand

    y = jnp.dot(ln_ref[...], w_ref[...], preferred_element_type=jnp.float32)
    y = y + bias_ref[...].astype(jnp.float32)
    if activation == "gelu":
        # TODO(synk): PyTorch default is exact erf GELU; tanh approximation used.
        y = jax.nn.gelu(y, approximate=True)
    o_ref[...] = y.astype(o_ref.dtype)


def pallas_ln_linear(x, gamma, beta, w, bias, *, eps, activation=None,
                     tm_target=512, tn_target=512):
    """y = act(LN(x) @ w + bias); x:(M,D), w:(D,N) (bf16). LN needs full rows,
    so K(=D) is kept whole and the grid tiles (M, N)."""
    M, D = x.shape
    N = w.shape[1]
    tm, Mp = _row_tile_and_pad(M, tm_target)
    if Mp != M:
        x = jnp.pad(x, ((0, Mp - M), (0, 0)))
    tn = _pick_tile(N, tn_target, 128)
    out = pl.pallas_call(
        functools.partial(_ln_linear_kernel, eps=eps, activation=activation),
        out_shape=jax.ShapeDtypeStruct((Mp, N), ACT_DTYPE),
        grid=(Mp // tm, N // tn),
        in_specs=[
            pl.BlockSpec((tm, D), lambda i, j: (i, 0)),
            pl.BlockSpec((1, D), lambda i, j: (0, 0)),
            pl.BlockSpec((1, D), lambda i, j: (0, 0)),
            pl.BlockSpec((D, tn), lambda i, j: (0, j)),
            pl.BlockSpec((1, tn), lambda i, j: (0, j)),
        ],
        out_specs=pl.BlockSpec((tm, tn), lambda i, j: (i, j)),
        scratch_shapes=[pltpu.VMEM((tm, D), MATMUL_DTYPE)],
        compiler_params=pltpu.CompilerParams(
            dimension_semantics=("parallel", "arbitrary"),
            vmem_limit_bytes=VMEM_LIMIT),
    )(x, gamma.reshape(1, D), beta.reshape(1, D), w, bias.reshape(1, N))
    return out[:M] if Mp != M else out


# ----------------------------------------------------------------------------
# Kernel 2: tiled Linear + bias + residual add, K-reduction accumulator.
# ----------------------------------------------------------------------------

def _linear_residual_kernel(x_ref, w_ref, bias_ref, res_ref, o_ref, acc_ref):
    k = pl.program_id(2)

    @pl.when(k == 0)
    def _():
        acc_ref[...] = jnp.zeros_like(acc_ref)

    acc_ref[...] += jnp.dot(x_ref[...].astype(MATMUL_DTYPE), w_ref[...],
                            preferred_element_type=jnp.float32)

    @pl.when(k == pl.num_programs(2) - 1)
    def _():
        y = (acc_ref[...] + bias_ref[...].astype(jnp.float32)
             + res_ref[...].astype(jnp.float32))
        o_ref[...] = y.astype(o_ref.dtype)


def pallas_linear_residual(x, w, bias, residual, *,
                           tm_target=512, tn_target=512, tk_target=512):
    """y = x @ w + bias + residual; x:(M,K), w:(K,N) (bf16), residual:(M,N)."""
    M, K = x.shape
    N = w.shape[1]
    tm, Mp = _row_tile_and_pad(M, tm_target)
    if Mp != M:
        x = jnp.pad(x, ((0, Mp - M), (0, 0)))
        residual = jnp.pad(residual, ((0, Mp - M), (0, 0)))
    tn = _pick_tile(N, tn_target, 128)
    tk = _pick_tile(K, tk_target, 128)
    out = pl.pallas_call(
        _linear_residual_kernel,
        out_shape=jax.ShapeDtypeStruct((Mp, N), ACT_DTYPE),
        grid=(Mp // tm, N // tn, K // tk),
        in_specs=[
            pl.BlockSpec((tm, tk), lambda i, j, k: (i, k)),
            pl.BlockSpec((tk, tn), lambda i, j, k: (k, j)),
            pl.BlockSpec((1, tn), lambda i, j, k: (0, j)),
            pl.BlockSpec((tm, tn), lambda i, j, k: (i, j)),
        ],
        out_specs=pl.BlockSpec((tm, tn), lambda i, j, k: (i, j)),
        scratch_shapes=[pltpu.VMEM((tm, tn), jnp.float32)],
        compiler_params=pltpu.CompilerParams(
            dimension_semantics=("parallel", "parallel", "arbitrary"),
            vmem_limit_bytes=VMEM_LIMIT),
    )(x, w, bias.reshape(1, N), residual)
    return out[:M] if Mp != M else out


# ----------------------------------------------------------------------------
# Kernel 3: flash-style multi-head self-attention.
# Grid = (batch, q-tile, head, kv-tile); online softmax with f32 m/l/acc
# scratch; q/k/v head slices come straight from the row-major (B,S,3D) qkv
# buffer via BlockSpec (no in-kernel slab materialization).  Output is the
# per-head context written into its (tq, Dh) block of a (B,S,D) bf16 tensor;
# the output projection (single K=D matmul) + residual runs in kernel 2.
# ----------------------------------------------------------------------------

def _flash_attn_kernel(q_ref, k_ref, v_ref, o_ref, m_ref, l_ref, acc_ref, *,
                       scale):
    kv = pl.program_id(3)

    @pl.when(kv == 0)
    def _():
        m_ref[...] = jnp.full(m_ref.shape, -jnp.inf, dtype=m_ref.dtype)
        l_ref[...] = jnp.zeros_like(l_ref)
        acc_ref[...] = jnp.zeros_like(acc_ref)

    # q @ k^T via dot_general contracting last dims -> no XLU transpose.
    s = lax.dot_general(q_ref[0], k_ref[0], (((1,), (1,)), ((), ())),
                        preferred_element_type=jnp.float32) * scale
    m_prev = m_ref[...]
    m_new = jnp.maximum(m_prev, jnp.max(s, axis=-1, keepdims=True))
    alpha = jnp.exp(m_prev - m_new)
    p = jnp.exp(s - m_new)
    l_ref[...] = alpha * l_ref[...] + jnp.sum(p, axis=-1, keepdims=True)
    acc_ref[...] = alpha * acc_ref[...] + jnp.dot(
        p.astype(MATMUL_DTYPE), v_ref[0], preferred_element_type=jnp.float32)
    m_ref[...] = m_new

    @pl.when(kv == pl.num_programs(3) - 1)
    def _():
        # Exact divide (not approx reciprocal) for closer reference parity.
        o_ref[0] = (acc_ref[...] / l_ref[...]).astype(o_ref.dtype)


def pallas_flash_attention(qkv, *, heads, tq_target=128, tkv_target=256):
    """qkv:(B,S,3D) bf16, column layout [q_heads | k_heads | v_heads] ->
    context (B,S,D) bf16 (heads concatenated along the last dim)."""
    B, S, D3 = qkv.shape
    D = D3 // 3
    Dh = D // heads
    # TODO(synk): group heads per program when Dh < 128 (e.g. real VideoMAE
    # large has Dh=64); the demo config uses Dh=128.
    assert Dh % 128 == 0, "head_dim must be a multiple of 128 lanes"
    scale = 1.0 / (Dh ** 0.5)
    tq = _pick_tile(S, tq_target, 8)
    tkv = _pick_tile(S, tkv_target, 8)
    return pl.pallas_call(
        functools.partial(_flash_attn_kernel, scale=scale),
        out_shape=jax.ShapeDtypeStruct((B, S, D), ACT_DTYPE),
        grid=(B, S // tq, heads, S // tkv),
        in_specs=[
            # q / k / v head slices of the same row-major qkv buffer.
            pl.BlockSpec((1, tq, Dh), lambda b, qi, h, kv: (b, qi, h)),
            pl.BlockSpec((1, tkv, Dh), lambda b, qi, h, kv: (b, kv, heads + h)),
            pl.BlockSpec((1, tkv, Dh), lambda b, qi, h, kv: (b, kv, 2 * heads + h)),
        ],
        out_specs=pl.BlockSpec((1, tq, Dh), lambda b, qi, h, kv: (b, qi, h)),
        scratch_shapes=[
            pltpu.VMEM((tq, 1), jnp.float32),    # running max
            pltpu.VMEM((tq, 1), jnp.float32),    # running denom
            pltpu.VMEM((tq, Dh), jnp.float32),   # running numerator
        ],
        compiler_params=pltpu.CompilerParams(
            dimension_semantics=("parallel", "parallel", "parallel", "arbitrary"),
            vmem_limit_bytes=VMEM_LIMIT),
    )(qkv, qkv, qkv)


# ----------------------------------------------------------------------------
# Kernel 4: fused head: mean over seq -> LayerNorm -> Linear -> tanh.
# One program per batch row (parallel axis -> megacore friendly on v7x).
# ----------------------------------------------------------------------------

def _head_kernel(x_ref, g_ref, b_ref, w_ref, bias_ref, o_ref, *, eps):
    x = x_ref[0].astype(jnp.float32)                          # (S, D)
    m = jnp.mean(x, axis=0, keepdims=True)                    # (1, D) seq mean
    mu = jnp.mean(m, axis=-1, keepdims=True)
    var = jnp.mean(jnp.square(m - mu), axis=-1, keepdims=True)
    y = (m - mu) * lax.rsqrt(var + eps)
    y = y * g_ref[...].astype(jnp.float32) + b_ref[...].astype(jnp.float32)
    z = jnp.dot(y.astype(MATMUL_DTYPE), w_ref[...],
                preferred_element_type=jnp.float32)
    z = z + bias_ref[...].astype(jnp.float32)
    o_ref[0] = jnp.tanh(z).astype(o_ref.dtype)


def pallas_head(x, gamma, beta, w, bias, *, eps=1e-5):
    """x:(B,S,D) -> tanh(LN(mean_seq(x)) @ w + bias) : (B, O).
    TODO(synk): for very large S, tile S as a reduction axis with a (1,D)
    accumulator instead of loading a full (S,D) slab per batch element."""
    B, S, D = x.shape
    O = w.shape[1]
    out = pl.pallas_call(
        functools.partial(_head_kernel, eps=eps),
        out_shape=jax.ShapeDtypeStruct((B, 1, O), jnp.float32),
        grid=(B,),
        in_specs=[
            pl.BlockSpec((1, S, D), lambda b: (b, 0, 0)),
            pl.BlockSpec((1, D), lambda b: (0, 0)),
            pl.BlockSpec((1, D), lambda b: (0, 0)),
            pl.BlockSpec((D, O), lambda b: (0, 0)),
            pl.BlockSpec((1, O), lambda b: (0, 0)),
        ],
        out_specs=pl.BlockSpec((1, 1, O), lambda b: (b, 0, 0)),
        compiler_params=pltpu.CompilerParams(
            dimension_semantics=("parallel",),
            vmem_limit_bytes=VMEM_LIMIT),
    )(x, gamma.reshape(1, D), beta.reshape(1, D), w, bias.reshape(1, O))
    return out.reshape(B, O)


# ----------------------------------------------------------------------------
# Model glue (parameter plumbing + one-time patchify reshape; no XLA work on
# the transformer hot path)
# ----------------------------------------------------------------------------

def sinusoid_table(n_pos, d):
    pos = jnp.arange(n_pos, dtype=jnp.float32)[:, None]
    i = jnp.arange(d, dtype=jnp.float32)[None, :]
    angle = pos / jnp.power(10000.0, (2.0 * jnp.floor(i / 2.0)) / d)
    even = (jnp.arange(d) % 2 == 0)[None, :]
    return jnp.where(even, jnp.sin(angle), jnp.cos(angle)).astype(jnp.float32)


def transformer_block(x, lp, heads):
    B, S, D = x.shape
    x2 = x.reshape(B * S, D)

    # Pre-LN self-attention: (LN1 + QKV) fused, flash attention over tiles,
    # then one (output proj K=D + residual) tiled matmul.
    qkv = pallas_ln_linear(x2, lp["ln1_g"], lp["ln1_b"],
                           lp["qkv_w"], lp["qkv_b"], eps=1e-12)
    ctx = pallas_flash_attention(qkv.reshape(B, S, 3 * D), heads=heads)
    x2 = pallas_linear_residual(ctx.reshape(B * S, D),
                                lp["proj_w"], lp["proj_b"], x2)

    # Pre-LN MLP: (LN2 + fc1 + GELU) fused, then (fc2 + residual) fused.
    h = pallas_ln_linear(x2, lp["ln2_g"], lp["ln2_b"],
                         lp["fc1_w"], lp["fc1_b"], eps=1e-12, activation="gelu")
    x2 = pallas_linear_residual(h, lp["fc2_w"], lp["fc2_b"], x2)
    return x2.reshape(B, S, D)


def timesformer_encoder_forward(videos, lengths, params, cfg):
    """videos: (B, T, H, W, C), lengths: (B,) — lengths is unused (as in torch)."""
    del lengths  # the reference forward never uses it
    B, T, H, W, C = videos.shape
    t, p = cfg["tubelet"], cfg["patch"]
    Tp, Hp, Wp = T // t, H // p, W // p
    S = Tp * Hp * Wp
    D = cfg["hidden"]

    # Tubelet embedding == Conv3d(C, D, kernel=(t,p,p), stride=(t,p,p)); the
    # torch NCTHW flattening order is reproduced exactly.
    x = videos.transpose(0, 4, 1, 2, 3)                        # NCTHW
    x = x.reshape(B, C, Tp, t, Hp, p, Wp, p)
    x = x.transpose(0, 2, 4, 6, 1, 3, 5, 7)                    # (B,Tp,Hp,Wp,C,t,p,p)
    x = x.reshape(B * S, C * t * p * p)

    # Patch matmul with the fixed sinusoidal position embedding folded in as
    # the kernel's residual input (no separate XLA add).
    pos = jnp.broadcast_to(params["pos_emb"][None], (B, S, D))
    pos = pos.reshape(B * S, D).astype(ACT_DTYPE)
    x = pallas_linear_residual(x, params["patch_w"], params["patch_b"], pos)
    x = x.reshape(B, S, D)

    for lp in params["layers"]:
        x = transformer_block(x, lp, cfg["heads"])

    # dropout(p) in eval mode == identity
    # mean over sequence -> LayerNorm -> Linear -> tanh  (fused kernel)
    # TODO(synk): verify against the real VideoMAE head ordering (fc_norm vs
    # final per-token LayerNorm) when loading pretrained weights.
    return pallas_head(x, params["norm_g"], params["norm_b"],
                       params["lin_w"], params["lin_b"], eps=1e-5)


def init_params(key, cfg):
    def nrm(k, shape, scale=0.02):
        return (scale * jax.random.normal(k, shape)).astype(jnp.float32)

    def wcast(x):  # weights are stored bf16 once in HBM (half the DMA bytes)
        return x.astype(MATMUL_DTYPE)

    ks = iter(jax.random.split(key, 64))
    D, F, O = cfg["hidden"], cfg["mlp"], cfg["output_size"]
    tub_dim = cfg["channels"] * cfg["tubelet"] * cfg["patch"] ** 2

    params = {
        "patch_w": wcast(nrm(next(ks), (tub_dim, D))),
        "patch_b": jnp.zeros((D,), jnp.float32),
        "pos_emb": sinusoid_table(cfg["seq_len"], D),
        "layers": [],
        "norm_g": jnp.ones((D,), jnp.float32),
        "norm_b": jnp.zeros((D,), jnp.float32),
        "lin_w": wcast(nrm(next(ks), (D, O))),
        "lin_b": jnp.zeros((O,), jnp.float32),
    }
    for _ in range(cfg["layers_n"]):
        params["layers"].append({
            "ln1_g": jnp.ones((D,), jnp.float32),
            "ln1_b": jnp.zeros((D,), jnp.float32),
            # qkv_w output cols = [q_heads | k_heads | v_heads], each heads*Dh
            "qkv_w": wcast(nrm(next(ks), (D, 3 * D))),
            "qkv_b": jnp.zeros((3 * D,), jnp.float32),
            "proj_w": wcast(nrm(next(ks), (D, D))),
            "proj_b": jnp.zeros((D,), jnp.float32),
            "ln2_g": jnp.ones((D,), jnp.float32),
            "ln2_b": jnp.zeros((D,), jnp.float32),
            "fc1_w": wcast(nrm(next(ks), (D, F))),
            "fc1_b": jnp.zeros((F,), jnp.float32),
            "fc2_w": wcast(nrm(next(ks), (F, D))),
            "fc2_b": jnp.zeros((D,), jnp.float32),
        })
    return params


if __name__ == "__main__":
    # Small synthetic config (VideoMAE-large is hidden=1024 / 24 layers; scaled
    # down but lane-aligned: D=256, Dh=128, O=128).
    cfg = dict(channels=3, tubelet=2, patch=4, hidden=256, heads=2,
               mlp=512, layers_n=2, output_size=128)
    B, T, H, W, C = 2, 8, 16, 16, cfg["channels"]
    cfg["seq_len"] = (T // cfg["tubelet"]) * (H // cfg["patch"]) * (W // cfg["patch"])

    key = jax.random.PRNGKey(0)
    k_param, k_video = jax.random.split(key)
    params = init_params(k_param, cfg)

    videos = jax.random.normal(k_video, (B, T, H, W, C), dtype=jnp.float32)
    lengths = jnp.full((B,), T, dtype=jnp.int32)

    fwd = jax.jit(functools.partial(timesformer_encoder_forward, cfg=cfg))
    out = fwd(videos, lengths, params)
    jax.block_until_ready(out)

    assert out.shape == (B, cfg["output_size"])
    assert bool(jnp.all(jnp.isfinite(out)))
    print("KERNEL_OK")
</pallas_src>

<mosaic_0001>
module attributes {stable_mosaic.version = 11 : i64} {
  func.func @_linear_residual_kernel(%arg0: i32, %arg1: i32, %arg2: i32, %arg3: memref<128x96xf32, #tpu.memory_space<vmem>>, %arg4: memref<96x256xbf16, #tpu.memory_space<vmem>>, %arg5: memref<1x256xf32, #tpu.memory_space<vmem>>, %arg6: memref<128x256xbf16, #tpu.memory_space<vmem>>, %arg7: memref<128x256xbf16, #tpu.memory_space<vmem>>, %arg8: memref<128x256xf32, #tpu.memory_space<vmem>>) attributes {dimension_semantics = [#tpu.dimension_semantics<parallel>, #tpu.dimension_semantics<parallel>, #tpu.dimension_semantics<arbitrary>], iteration_bounds = array<i64: 1, 1, 1>, scalar_prefetch = 0 : i64, scratch_operands = 1 : i64, tpu.core_type = #tpu.core_type<tc>, window_params = [{transform_indices = @transform_0, window_bounds = array<i64: 128, 96>}, {transform_indices = @transform_1, window_bounds = array<i64: 96, 256>}, {transform_indices = @transform_2, window_bounds = array<i64: 1, 256>}, {transform_indices = @transform_3, window_bounds = array<i64: 128, 256>}, {transform_indices = @transform_4, window_bounds = array<i64: 128, 256>}]} {
    %c0_i32 = arith.constant 0 : i32
    %0 = arith.cmpi eq, %arg2, %c0_i32 : i32
    %1 = arith.extui %0 : i1 to i32
    %c0_i32_0 = arith.constant 0 : i32
    %2 = arith.cmpi ne, %1, %c0_i32_0 : i32
    scf.if %2 {
      %cst_10 = arith.constant 0.000000e+00 : f32
      %13 = vector.broadcast %cst_10 : f32 to vector<128x256xf32>
      %c0_11 = arith.constant 0 : index
      %c0_12 = arith.constant 0 : index
      %14 = vector.load %arg8[%c0_11, %c0_12] : memref<128x256xf32, #tpu.memory_space<vmem>>, vector<128x256xf32>
      tpu.vector_store %arg8[%c0_11, %c0_12], %13 {strides = array<i32>} : memref<128x256xf32, #tpu.memory_space<vmem>>, vector<128x256xf32>,
    } else {
    }
    %c0 = arith.constant 0 : index
    %c0_1 = arith.constant 0 : index
    %3 = vector.load %arg8[%c0, %c0_1] : memref<128x256xf32, #tpu.memory_space<vmem>>, vector<128x256xf32>
    %c0_2 = arith.constant 0 : index
    %c0_3 = arith.constant 0 : index
    %4 = vector.load %arg3[%c0_2, %c0_3] : memref<128x96xf32, #tpu.memory_space<vmem>>, vector<128x96xf32>
    %5 = arith.truncf %4 : vector<128x96xf32> to vector<128x96xbf16>
    %c0_4 = arith.constant 0 : index
    %c0_5 = arith.constant 0 : index
    %6 = vector.load %arg4[%c0_4, %c0_5] : memref<96x256xbf16, #tpu.memory_space<vmem>>, vector<96x256xbf16>
    %cst = arith.constant dense<0.000000e+00> : vector<128x256xf32>
    %7 = tpu.matmul %5, %6, %cst {dimension_numbers = #tpu.dot_dimension_numbers<[1], [0], [0], [1], [0, 0, 1, 1], [], []>} : vector<128x96xbf16>, vector<96x256xbf16>, vector<128x256xf32> -> vector<128x256xf32>
    %8 = arith.addf %3, %7 : vector<128x256xf32>
    %c0_6 = arith.constant 0 : index
    %c0_7 = arith.constant 0 : index
    %9 = vector.load %arg8[%c0_6, %c0_7] : memref<128x256xf32, #tpu.memory_space<vmem>>, vector<128x256xf32>
    tpu.vector_store %arg8[%c0_6, %c0_7], %8 {strides = array<i32>} : memref<128x256xf32, #tpu.memory_space<vmem>>, vector<128x256xf32>,
    %c0_i32_8 = arith.constant 0 : i32
    %10 = arith.cmpi eq, %arg2, %c0_i32_8 : i32
    %11 = arith.extui %10 : i1 to i32
    %c0_i32_9 = arith.constant 0 : i32
    %12 = arith.cmpi ne, %11, %c0_i32_9 : i32
    scf.if %12 {
      %c0_10 = arith.constant 0 : index
      %c0_11 = arith.constant 0 : index
      %13 = vector.load %arg8[%c0_10, %c0_11] : memref<128x256xf32, #tpu.memory_space<vmem>>, vector<128x256xf32>
      %c0_12 = arith.constant 0 : index
      %c0_13 = arith.constant 0 : index
      %14 = vector.load %arg5[%c0_12, %c0_13] : memref<1x256xf32, #tpu.memory_space<vmem>>, vector<1x256xf32>
      %15 = vector.broadcast %14 : vector<1x256xf32> to vector<128x256xf32>
      %16 = arith.addf %13, %15 : vector<128x256xf32>
      %c0_14 = arith.constant 0 : index
      %c0_15 = arith.constant 0 : index
      %17 = vector.load %arg6[%c0_14, %c0_15] : memref<128x256xbf16, #tpu.memory_space<vmem>>, vector<128x256xbf16>
      %18 = arith.extf %17 : vector<128x256xbf16> to vector<128x256xf32>
      %19 = arith.addf %16, %18 : vector<128x256xf32>
      %20 = arith.truncf %19 : vector<128x256xf32> to vector<128x256xbf16>
      %c0_16 = arith.constant 0 : index
      %c0_17 = arith.constant 0 : index
      %21 = vector.load %arg7[%c0_16, %c0_17] : memref<128x256xbf16, #tpu.memory_space<vmem>>, vector<128x256xbf16>
      tpu.vector_store %arg7[%c0_16, %c0_17], %20 {strides = array<i32>} : memref<128x256xbf16, #tpu.memory_space<vmem>>, vector<128x256xbf16>,
    } else {
    }
    return
  }
  func.func @transform_0(%arg0: i32, %arg1: i32, %arg2: i32) -> (i32, i32) {
    %c0_i32 = arith.constant 0 : i32
    return %arg0, %arg2 : i32, i32
  }
  func.func @transform_1(%arg0: i32, %arg1: i32, %arg2: i32) -> (i32, i32) {
    %c0_i32 = arith.constant 0 : i32
    return %arg2, %arg1 : i32, i32
  }
  func.func @transform_2(%arg0: i32, %arg1: i32, %arg2: i32) -> (i32, i32) {
    %c0_i32 = arith.constant 0 : i32
    %c0_i32_0 = arith.constant 0 : i32
    return %c0_i32, %arg1 : i32, i32
  }
  func.func @transform_3(%arg0: i32, %arg1: i32, %arg2: i32) -> (i32, i32) {
    %c0_i32 = arith.constant 0 : i32
    return %arg0, %arg1 : i32, i32
  }
  func.func @transform_4(%arg0: i32, %arg1: i32, %arg2: i32) -> (i32, i32) {
    %c0_i32 = arith.constant 0 : i32
    return %arg0, %arg1 : i32, i32
  }
}

module attributes {stable_mosaic.version = 11 : i64} {
  func.func @_ln_linear_kernel(%arg0: i32, %arg1: i32, %arg2: memref<128x256xbf16, #tpu.memory_space<vmem>>, %arg3: memref<1x256xf32, #tpu.memory_space<vmem>>, %arg4: memref<1x256xf32, #tpu.memory_space<vmem>>, %arg5: memref<256x384xbf16, #tpu.memory_space<vmem>>, %arg6: memref<1x384xf32, #tpu.memory_space<vmem>>, %arg7: memref<128x384xbf16, #tpu.memory_space<vmem>>, %arg8: memref<128x256xbf16, #tpu.memory_space<vmem>>) attributes {dimension_semantics = [#tpu.dimension_semantics<parallel>, #tpu.dimension_semantics<arbitrary>], iteration_bounds = array<i64: 1, 2>, scalar_prefetch = 0 : i64, scratch_operands = 1 : i64, tpu.core_type = #tpu.core_type<tc>, window_params = [{transform_indices = @transform_0, window_bounds = array<i64: 128, 256>}, {pipeline_mode = #tpu.pipeline_mode<synchronous>, transform_indices = @transform_1, window_bounds = array<i64: 1, 256>}, {pipeline_mode = #tpu.pipeline_mode<synchronous>, transform_indices = @transform_2, window_bounds = array<i64: 1, 256>}, {transform_indices = @transform_3, window_bounds = array<i64: 256, 384>}, {transform_indices = @transform_4, window_bounds = array<i64: 1, 384>}, {transform_indices = @transform_5, window_bounds = array<i64: 128, 384>}]} {
    %c0_i32 = arith.constant 0 : i32
    %0 = arith.cmpi eq, %arg1, %c0_i32 : i32
    %1 = arith.extui %0 : i1 to i32
    %c0_i32_0 = arith.constant 0 : i32
    %2 = arith.cmpi ne, %1, %c0_i32_0 : i32
    scf.if %2 {
      %c0_8 = arith.constant 0 : index
      %c0_9 = arith.constant 0 : index
      %11 = vector.load %arg2[%c0_8, %c0_9] : memref<128x256xbf16, #tpu.memory_space<vmem>>, vector<128x256xbf16>
      %12 = arith.extf %11 : vector<128x256xbf16> to vector<128x256xf32>
      %cst_10 = arith.constant dense<0.000000e+00> : vector<128xf32>
      %13 = vector.multi_reduction <add>, %12, %cst_10 [1] : vector<128x256xf32> to vector<128xf32>
      %14 = vector.shape_cast %13 : vector<128xf32> to vector<128x1xf32>
      %cst_11 = arith.constant 2.560000e+02 : f32
      %15 = vector.broadcast %cst_11 : f32 to vector<128x1xf32>
      %16 = arith.divf %14, %15 : vector<128x1xf32>
      %17 = vector.broadcast %16 : vector<128x1xf32> to vector<128x256xf32>
      %18 = arith.subf %12, %17 : vector<128x256xf32>
      %19 = arith.mulf %18, %18 : vector<128x256xf32>
      %cst_12 = arith.constant dense<0.000000e+00> : vector<128xf32>
      %20 = vector.multi_reduction <add>, %19, %cst_12 [1] : vector<128x256xf32> to vector<128xf32>
      %21 = vector.shape_cast %20 : vector<128xf32> to vector<128x1xf32>
      %cst_13 = arith.constant 2.560000e+02 : f32
      %22 = vector.broadcast %cst_13 : f32 to vector<128x1xf32>
      %23 = arith.divf %21, %22 : vector<128x1xf32>
      %24 = vector.broadcast %16 : vector<128x1xf32> to vector<128x256xf32>
      %25 = arith.subf %12, %24 : vector<128x256xf32>
      %cst_14 = arith.constant 9.99999996E-13 : f32
      %26 = vector.broadcast %cst_14 : f32 to vector<128x1xf32>
      %27 = arith.addf %23, %26 : vector<128x1xf32>
      %28 = math.rsqrt %27 : vector<128x1xf32>
      %29 = vector.broadcast %28 : vector<128x1xf32> to vector<128x256xf32>
      %30 = arith.mulf %25, %29 : vector<128x256xf32>
      %c0_15 = arith.constant 0 : index
      %c0_16 = arith.constant 0 : index
      %31 = vector.load %arg3[%c0_15, %c0_16] : memref<1x256xf32, #tpu.memory_space<vmem>>, vector<1x256xf32>
      %32 = vector.broadcast %31 : vector<1x256xf32> to vector<128x256xf32>
      %33 = arith.mulf %30, %32 : vector<128x256xf32>
      %c0_17 = arith.constant 0 : index
      %c0_18 = arith.constant 0 : index
      %34 = vector.load %arg4[%c0_17, %c0_18] : memref<1x256xf32, #tpu.memory_space<vmem>>, vector<1x256xf32>
      %35 = vector.broadcast %34 : vector<1x256xf32> to vector<128x256xf32>
      %36 = arith.addf %33, %35 : vector<128x256xf32>
      %37 = arith.truncf %36 : vector<128x256xf32> to vector<128x256xbf16>
      %c0_19 = arith.constant 0 : index
      %c0_20 = arith.constant 0 : index
      %38 = vector.load %arg8[%c0_19, %c0_20] : memref<128x256xbf16, #tpu.memory_space<vmem>>, vector<128x256xbf16>
      tpu.vector_store %arg8[%c0_19, %c0_20], %37 {strides = array<i32>} : memref<128x256xbf16, #tpu.memory_space<vmem>>, vector<128x256xbf16>,
    } else {
    }
    %c0 = arith.constant 0 : index
    %c0_1 = arith.constant 0 : index
    %3 = vector.load %arg8[%c0, %c0_1] : memref<128x256xbf16, #tpu.memory_space<vmem>>, vector<128x256xbf16>
    %c0_2 = arith.constant 0 : index
    %c0_3 = arith.constant 0 : index
    %4 = vector.load %arg5[%c0_2, %c0_3] : memref<256x384xbf16, #tpu.memory_space<vmem>>, vector<256x384xbf16>
    %cst = arith.constant dense<0.000000e+00> : vector<128x384xf32>
    %5 = tpu.matmul %3, %4, %cst {dimension_numbers = #tpu.dot_dimension_numbers<[1], [0], [0], [1], [0, 0, 1, 1], [], []>} : vector<128x256xbf16>, vector<256x384xbf16>, vector<128x384xf32> -> vector<128x384xf32>
    %c0_4 = arith.constant 0 : index
    %c0_5 = arith.constant 0 : index
    %6 = vector.load %arg6[%c0_4, %c0_5] : memref<1x384xf32, #tpu.memory_space<vmem>>, vector<1x384xf32>
    %7 = vector.broadcast %6 : vector<1x384xf32> to vector<128x384xf32>
    %8 = arith.addf %5, %7 : vector<128x384xf32>
    %9 = arith.truncf %8 : vector<128x384xf32> to vector<128x384xbf16>
    %c0_6 = arith.constant 0 : index
    %c0_7 = arith.constant 0 : index
    %10 = vector.load %arg7[%c0_6, %c0_7] : memref<128x384xbf16, #tpu.memory_space<vmem>>, vector<128x384xbf16>
    tpu.vector_store %arg7[%c0_6, %c0_7], %9 {strides = array<i32>} : memref<128x384xbf16, #tpu.memory_space<vmem>>, vector<128x384xbf16>,
    return
  }
  func.func @transform_0(%arg0: i32, %arg1: i32) -> (i32, i32) {
    %c0_i32 = arith.constant 0 : i32
    %c0_i32_0 = arith.constant 0 : i32
    return %arg0, %c0_i32 : i32, i32
  }
  func.func @transform_1(%arg0: i32, %arg1: i32) -> (i32, i32) {
    %c0_i32 = arith.constant 0 : i32
    %c0_i32_0 = arith.constant 0 : i32
    %c0_i32_1 = arith.constant 0 : i32
    return %c0_i32, %c0_i32_0 : i32, i32
  }
  func.func @transform_2(%arg0: i32, %arg1: i32) -> (i32, i32) {
    %c0_i32 = arith.constant 0 : i32
    %c0_i32_0 = arith.constant 0 : i32
    %c0_i32_1 = arith.constant 0 : i32
    return %c0_i32, %c0_i32_0 : i32, i32
  }
  func.func @transform_3(%arg0: i32, %arg1: i32) -> (i32, i32) {
    %c0_i32 = arith.constant 0 : i32
    %c0_i32_0 = arith.constant 0 : i32
    return %c0_i32, %arg1 : i32, i32
  }
  func.func @transform_4(%arg0: i32, %arg1: i32) -> (i32, i32) {
    %c0_i32 = arith.constant 0 : i32
    %c0_i32_0 = arith.constant 0 : i32
    return %c0_i32, %arg1 : i32, i32
  }
  func.func @transform_5(%arg0: i32, %arg1: i32) -> (i32, i32) {
    %c0_i32 = arith.constant 0 : i32
    return %arg0, %arg1 : i32, i32
  }
}

module attributes {stable_mosaic.version = 11 : i64} {
  func.func @_flash_attn_kernel(%arg0: i32, %arg1: i32, %arg2: i32, %arg3: i32, %arg4: memref<1x64x128xbf16, #tpu.memory_space<vmem>>, %arg5: memref<1x64x128xbf16, #tpu.memory_space<vmem>>, %arg6: memref<1x64x128xbf16, #tpu.memory_space<vmem>>, %arg7: memref<1x64x128xbf16, #tpu.memory_space<vmem>>, %arg8: memref<64x1xf32, #tpu.memory_space<vmem>>, %arg9: memref<64x1xf32, #tpu.memory_space<vmem>>, %arg10: memref<64x128xf32, #tpu.memory_space<vmem>>) attributes {dimension_semantics = [#tpu.dimension_semantics<parallel>, #tpu.dimension_semantics<parallel>, #tpu.dimension_semantics<parallel>, #tpu.dimension_semantics<arbitrary>], iteration_bounds = array<i64: 2, 1, 2, 1>, scalar_prefetch = 0 : i64, scratch_operands = 3 : i64, tpu.core_type = #tpu.core_type<tc>, window_params = [{transform_indices = @transform_0, window_bounds = array<i64: 1, 64, 128>}, {transform_indices = @transform_1, window_bounds = array<i64: 1, 64, 128>}, {transform_indices = @transform_2, window_bounds = array<i64: 1, 64, 128>}, {transform_indices = @transform_3, window_bounds = array<i64: 1, 64, 128>}]} {
    %c0_i32 = arith.constant 0 : i32
    %0 = arith.cmpi eq, %arg3, %c0_i32 : i32
    %1 = arith.extui %0 : i1 to i32
    %c0_i32_0 = arith.constant 0 : i32
    %2 = arith.cmpi ne, %1, %c0_i32_0 : i32
    scf.if %2 {
      %cst_27 = arith.constant 0xFF800000 : f32
      %38 = vector.broadcast %cst_27 : f32 to vector<64x1xf32>
      %c0_28 = arith.constant 0 : index
      %c0_29 = arith.constant 0 : index
      %39 = vector.load %arg8[%c0_28, %c0_29] : memref<64x1xf32, #tpu.memory_space<vmem>>, vector<64x1xf32>
      tpu.vector_store %arg8[%c0_28, %c0_29], %38 {strides = array<i32>} : memref<64x1xf32, #tpu.memory_space<vmem>>, vector<64x1xf32>,
      %cst_30 = arith.constant 0.000000e+00 : f32
      %40 = vector.broadcast %cst_30 : f32 to vector<64x1xf32>
      %c0_31 = arith.constant 0 : index
      %c0_32 = arith.constant 0 : index
      %41 = vector.load %arg9[%c0_31, %c0_32] : memref<64x1xf32, #tpu.memory_space<vmem>>, vector<64x1xf32>
      tpu.vector_store %arg9[%c0_31, %c0_32], %40 {strides = array<i32>} : memref<64x1xf32, #tpu.memory_space<vmem>>, vector<64x1xf32>,
      %cst_33 = arith.constant 0.000000e+00 : f32
      %42 = vector.broadcast %cst_33 : f32 to vector<64x128xf32>
      %c0_34 = arith.constant 0 : index
      %c0_35 = arith.constant 0 : index
      %43 = vector.load %arg10[%c0_34, %c0_35] : memref<64x128xf32, #tpu.memory_space<vmem>>, vector<64x128xf32>
      tpu.vector_store %arg10[%c0_34, %c0_35], %42 {strides = array<i32>} : memref<64x128xf32, #tpu.memory_space<vmem>>, vector<64x128xf32>,
    } else {
    }
    %c0 = arith.constant 0 : index
    %c0_1 = arith.constant 0 : index
    %c0_2 = arith.constant 0 : index
    %3 = vector.load %arg4[%c0, %c0_1, %c0_2] : memref<1x64x128xbf16, #tpu.memory_space<vmem>>, vector<1x64x128xbf16>
    %4 = vector.shape_cast %3 : vector<1x64x128xbf16> to vector<64x128xbf16>
    %c0_3 = arith.constant 0 : index
    %c0_4 = arith.constant 0 : index
    %c0_5 = arith.constant 0 : index
    %5 = vector.load %arg5[%c0_3, %c0_4, %c0_5] : memref<1x64x128xbf16, #tpu.memory_space<vmem>>, vector<1x64x128xbf16>
    %6 = vector.shape_cast %5 : vector<1x64x128xbf16> to vector<64x128xbf16>
    %cst = arith.constant dense<0.000000e+00> : vector<64x64xf32>
    %7 = tpu.matmul %4, %6, %cst {dimension_numbers = #tpu.dot_dimension_numbers<[1], [1], [0], [0], [0, 0, 1, 0], [], []>} : vector<64x128xbf16>, vector<64x128xbf16>, vector<64x64xf32> -> vector<64x64xf32>
    %cst_6 = arith.constant 0.0883883461 : f32
    %8 = vector.broadcast %cst_6 : f32 to vector<64x64xf32>
    %9 = arith.mulf %7, %8 : vector<64x64xf32>
    %c0_7 = arith.constant 0 : index
    %c0_8 = arith.constant 0 : index
    %10 = vector.load %arg8[%c0_7, %c0_8] : memref<64x1xf32, #tpu.memory_space<vmem>>, vector<64x1xf32>
    %cst_9 = arith.constant dense<0xFF800000> : vector<64xf32>
    %11 = vector.multi_reduction <maximumf>, %9, %cst_9 [1] : vector<64x64xf32> to vector<64xf32>
    %12 = vector.shape_cast %11 : vector<64xf32> to vector<64x1xf32>
    %13 = arith.maximumf %10, %12 : vector<64x1xf32>
    %14 = arith.subf %10, %13 : vector<64x1xf32>
    %15 = math.exp %14 : vector<64x1xf32>
    %16 = vector.broadcast %13 : vector<64x1xf32> to vector<64x64xf32>
    %17 = arith.subf %9, %16 : vector<64x64xf32>
    %18 = math.exp %17 : vector<64x64xf32>
    %c0_10 = arith.constant 0 : index
    %c0_11 = arith.constant 0 : index
    %19 = vector.load %arg9[%c0_10, %c0_11] : memref<64x1xf32, #tpu.memory_space<vmem>>, vector<64x1xf32>
    %20 = arith.mulf %15, %19 : vector<64x1xf32>
    %cst_12 = arith.constant dense<0.000000e+00> : vector<64xf32>
    %21 = vector.multi_reduction <add>, %18, %cst_12 [1] : vector<64x64xf32> to vector<64xf32>
    %22 = vector.shape_cast %21 : vector<64xf32> to vector<64x1xf32>
    %23 = arith.addf %20, %22 : vector<64x1xf32>
    %c0_13 = arith.constant 0 : index
    %c0_14 = arith.constant 0 : index
    %24 = vector.load %arg9[%c0_13, %c0_14] : memref<64x1xf32, #tpu.memory_space<vmem>>, vector<64x1xf32>
    tpu.vector_store %arg9[%c0_13, %c0_14], %23 {strides = array<i32>} : memref<64x1xf32, #tpu.memory_space<vmem>>, vector<64x1xf32>,
    %c0_15 = arith.constant 0 : index
    %c0_16 = arith.constant 0 : index
    %25 = vector.load %arg10[%c0_15, %c0_16] : memref<64x128xf32, #tpu.memory_space<vmem>>, vector<64x128xf32>
    %26 = vector.broadcast %15 : vector<64x1xf32> to vector<64x128xf32>
    %27 = arith.mulf %26, %25 : vector<64x128xf32>
    %28 = arith.truncf %18 : vector<64x64xf32> to vector<64x64xbf16>
    %c0_17 = arith.constant 0 : index
    %c0_18 = arith.constant 0 : index
    %c0_19 = arith.constant 0 : index
    %29 = vector.load %arg6[%c0_17, %c0_18, %c0_19] : memref<1x64x128xbf16, #tpu.memory_space<vmem>>, vector<1x64x128xbf16>
    %30 = vector.shape_cast %29 : vector<1x64x128xbf16> to vector<64x128xbf16>
    %cst_20 = arith.constant dense<0.000000e+00> : vector<64x128xf32>
    %31 = tpu.matmul %28, %30, %cst_20 {dimension_numbers = #tpu.dot_dimension_numbers<[1], [0], [0], [1], [0, 0, 1, 1], [], []>} : vector<64x64xbf16>, vector<64x128xbf16>, vector<64x128xf32> -> vector<64x128xf32>
    %32 = arith.addf %27, %31 : vector<64x128xf32>
    %c0_21 = arith.constant 0 : index
    %c0_22 = arith.constant 0 : index
    %33 = vector.load %arg10[%c0_21, %c0_22] : memref<64x128xf32, #tpu.memory_space<vmem>>, vector<64x128xf32>
    tpu.vector_store %arg10[%c0_21, %c0_22], %32 {strides = array<i32>} : memref<64x128xf32, #tpu.memory_space<vmem>>, vector<64x128xf32>,
    %c0_23 = arith.constant 0 : index
    %c0_24 = arith.constant 0 : index
    %34 = vector.load %arg8[%c0_23, %c0_24] : memref<64x1xf32, #tpu.memory_space<vmem>>, vector<64x1xf32>
    tpu.vector_store %arg8[%c0_23, %c0_24], %13 {strides = array<i32>} : memref<64x1xf32, #tpu.memory_space<vmem>>, vector<64x1xf32>,
    %c0_i32_25 = arith.constant 0 : i32
    %35 = arith.cmpi eq, %arg3, %c0_i32_25 : i32
    %36 = arith.extui %35 : i1 to i32
    %c0_i32_26 = arith.constant 0 : i32
    %37 = arith.cmpi ne, %36, %c0_i32_26 : i32
    scf.if %37 {
      %c0_27 = arith.constant 0 : index
      %c0_28 = arith.constant 0 : index
      %38 = vector.load %arg10[%c0_27, %c0_28] : memref<64x128xf32, #tpu.memory_space<vmem>>, vector<64x128xf32>
      %c0_29 = arith.constant 0 : index
      %c0_30 = arith.constant 0 : index
      %39 = vector.load %arg9[%c0_29, %c0_30] : memref<64x1xf32, #tpu.memory_space<vmem>>, vector<64x1xf32>
      %40 = vector.broadcast %39 : vector<64x1xf32> to vector<64x128xf32>
      %41 = arith.divf %38, %40 : vector<64x128xf32>
      %42 = arith.truncf %41 : vector<64x128xf32> to vector<64x128xbf16>
      %c0_31 = arith.constant 0 : index
      %c0_32 = arith.constant 0 : index
      %c0_33 = arith.constant 0 : index
      %43 = vector.load %arg7[%c0_31, %c0_32, %c0_33] : memref<1x64x128xbf16, #tpu.memory_space<vmem>>, vector<1x64x128xbf16>
      %44 = vector.shape_cast %43 : vector<1x64x128xbf16> to vector<64x128xbf16>
      %45 = vector.shape_cast %42 : vector<64x128xbf16> to vector<1x64x128xbf16>
      tpu.vector_store %arg7[%c0_31, %c0_32, %c0_33], %45 {strides = array<i32>} : memref<1x64x128xbf16, #tpu.memory_space<vmem>>, vector<1x64x128xbf16>,
    } else {
    }
    return
  }
  func.func @transform_0(%arg0: i32, %arg1: i32, %arg2: i32, %arg3: i32) -> (i32, i32, i32) {
    %c0_i32 = arith.constant 0 : i32
    return %arg0, %arg1, %arg2 : i32, i32, i32
  }
  func.func @transform_1(%arg0: i32, %arg1: i32, %arg2: i32, %arg3: i32) -> (i32, i32, i32) {
    %c2_i32 = arith.constant 2 : i32
    %0 = arith.addi %c2_i32, %arg2 : i32
    %c0_i32 = arith.constant 0 : i32
    return %arg0, %arg3, %0 : i32, i32, i32
  }
  func.func @transform_2(%arg0: i32, %arg1: i32, %arg2: i32, %arg3: i32) -> (i32, i32, i32) {
    %c4_i32 = arith.constant 4 : i32
    %0 = arith.addi %c4_i32, %arg2 : i32
    %c0_i32 = arith.constant 0 : i32
    return %arg0, %arg3, %0 : i32, i32, i32
  }
  func.func @transform_3(%arg0: i32, %arg1: i32, %arg2: i32, %arg3: i32) -> (i32, i32, i32) {
    %c0_i32 = arith.constant 0 : i32
    return %arg0, %arg1, %arg2 : i32, i32, i32
  }
}

module attributes {stable_mosaic.version = 11 : i64} {
  func.func @_linear_residual_kernel(%arg0: i32, %arg1: i32, %arg2: i32, %arg3: memref<128x256xbf16, #tpu.memory_space<vmem>>, %arg4: memref<256x256xbf16, #tpu.memory_space<vmem>>, %arg5: memref<1x256xf32, #tpu.memory_space<vmem>>, %arg6: memref<128x256xbf16, #tpu.memory_space<vmem>>, %arg7: memref<128x256xbf16, #tpu.memory_space<vmem>>, %arg8: memref<128x256xf32, #tpu.memory_space<vmem>>) attributes {dimension_semantics = [#tpu.dimension_semantics<parallel>, #tpu.dimension_semantics<parallel>, #tpu.dimension_semantics<arbitrary>], iteration_bounds = array<i64: 1, 1, 1>, scalar_prefetch = 0 : i64, scratch_operands = 1 : i64, tpu.core_type = #tpu.core_type<tc>, window_params = [{transform_indices = @transform_0, window_bounds = array<i64: 128, 256>}, {transform_indices = @transform_1, window_bounds = array<i64: 256, 256>}, {transform_indices = @transform_2, window_bounds = array<i64: 1, 256>}, {transform_indices = @transform_3, window_bounds = array<i64: 128, 256>}, {transform_indices = @transform_4, window_bounds = array<i64: 128, 256>}]} {
    %c0_i32 = arith.constant 0 : i32
    %0 = arith.cmpi eq, %arg2, %c0_i32 : i32
    %1 = arith.extui %0 : i1 to i32
    %c0_i32_0 = arith.constant 0 : i32
    %2 = arith.cmpi ne, %1, %c0_i32_0 : i32
    scf.if %2 {
      %cst_10 = arith.constant 0.000000e+00 : f32
      %12 = vector.broadcast %cst_10 : f32 to vector<128x256xf32>
      %c0_11 = arith.constant 0 : index
      %c0_12 = arith.constant 0 : index
      %13 = vector.load %arg8[%c0_11, %c0_12] : memref<128x256xf32, #tpu.memory_space<vmem>>, vector<128x256xf32>
      tpu.vector_store %arg8[%c0_11, %c0_12], %12 {strides = array<i32>} : memref<128x256xf32, #tpu.memory_space<vmem>>, vector<128x256xf32>,
    } else {
    }
    %c0 = arith.constant 0 : index
    %c0_1 = arith.constant 0 : index
    %3 = vector.load %arg8[%c0, %c0_1] : memref<128x256xf32, #tpu.memory_space<vmem>>, vector<128x256xf32>
    %c0_2 = arith.constant 0 : index
    %c0_3 = arith.constant 0 : index
    %4 = vector.load %arg3[%c0_2, %c0_3] : memref<128x256xbf16, #tpu.memory_space<vmem>>, vector<128x256xbf16>
    %c0_4 = arith.constant 0 : index
    %c0_5 = arith.constant 0 : index
    %5 = vector.load %arg4[%c0_4, %c0_5] : memref<256x256xbf16, #tpu.memory_space<vmem>>, vector<256x256xbf16>
    %cst = arith.constant dense<0.000000e+00> : vector<128x256xf32>
    %6 = tpu.matmul %4, %5, %cst {dimension_numbers = #tpu.dot_dimension_numbers<[1], [0], [0], [1], [0, 0, 1, 1], [], []>} : vector<128x256xbf16>, vector<256x256xbf16>, vector<128x256xf32> -> vector<128x256xf32>
    %7 = arith.addf %3, %6 : vector<128x256xf32>
    %c0_6 = arith.constant 0 : index
    %c0_7 = arith.constant 0 : index
    %8 = vector.load %arg8[%c0_6, %c0_7] : memref<128x256xf32, #tpu.memory_space<vmem>>, vector<128x256xf32>
    tpu.vector_store %arg8[%c0_6, %c0_7], %7 {strides = array<i32>} : memref<128x256xf32, #tpu.memory_space<vmem>>, vector<128x256xf32>,
    %c0_i32_8 = arith.constant 0 : i32
    %9 = arith.cmpi eq, %arg2, %c0_i32_8 : i32
    %10 = arith.extui %9 : i1 to i32
    %c0_i32_9 = arith.constant 0 : i32
    %11 = arith.cmpi ne, %10, %c0_i32_9 : i32
    scf.if %11 {
      %c0_10 = arith.constant 0 : index
      %c0_11 = arith.constant 0 : index
      %12 = vector.load %arg8[%c0_10, %c0_11] : memref<128x256xf32, #tpu.memory_space<vmem>>, vector<128x256xf32>
      %c0_12 = arith.constant 0 : index
      %c0_13 = arith.constant 0 : index
      %13 = vector.load %arg5[%c0_12, %c0_13] : memref<1x256xf32, #tpu.memory_space<vmem>>, vector<1x256xf32>
      %14 = vector.broadcast %13 : vector<1x256xf32> to vector<128x256xf32>
      %15 = arith.addf %12, %14 : vector<128x256xf32>
      %c0_14 = arith.constant 0 : index
      %c0_15 = arith.constant 0 : index
      %16 = vector.load %arg6[%c0_14, %c0_15] : memref<128x256xbf16, #tpu.memory_space<vmem>>, vector<128x256xbf16>
      %17 = arith.extf %16 : vector<128x256xbf16> to vector<128x256xf32>
      %18 = arith.addf %15, %17 : vector<128x256xf32>
      %19 = arith.truncf %18 : vector<128x256xf32> to vector<128x256xbf16>
      %c0_16 = arith.constant 0 : index
      %c0_17 = arith.constant 0 : index
      %20 = vector.load %arg7[%c0_16, %c0_17] : memref<128x256xbf16, #tpu.memory_space<vmem>>, vector<128x256xbf16>
      tpu.vector_store %arg7[%c0_16, %c0_17], %19 {strides = array<i32>} : memref<128x256xbf16, #tpu.memory_space<vmem>>, vector<128x256xbf16>,
    } else {
    }
    return
  }
  func.func @transform_0(%arg0: i32, %arg1: i32, %arg2: i32) -> (i32, i32) {
    %c0_i32 = arith.constant 0 : i32
    return %arg0, %arg2 : i32, i32
  }
  func.func @transform_1(%arg0: i32, %arg1: i32, %arg2: i32) -> (i32, i32) {
    %c0_i32 = arith.constant 0 : i32
    return %arg2, %arg1 : i32, i32
  }
  func.func @transform_2(%arg0: i32, %arg1: i32, %arg2: i32) -> (i32, i32) {
    %c0_i32 = arith.constant 0 : i32
    %c0_i32_0 = arith.constant 0 : i32
    return %c0_i32, %arg1 : i32, i32
  }
  func.func @transform_3(%arg0: i32, %arg1: i32, %arg2: i32) -> (i32, i32) {
    %c0_i32 = arith.constant 0 : i32
    return %arg0, %arg1 : i32, i32
  }
  func.func @transform_4(%arg0: i32, %arg1: i32, %arg2: i32) -> (i32, i32) {
    %c0_i32 = arith.constant 0 : i32
    return %arg0, %arg1 : i32, i32
  }
}

module attributes {stable_mosaic.version = 11 : i64} {
  func.func @_ln_linear_kernel(%arg0: i32, %arg1: i32, %arg2: memref<128x256xbf16, #tpu.memory_space<vmem>>, %arg3: memref<1x256xf32, #tpu.memory_space<vmem>>, %arg4: memref<1x256xf32, #tpu.memory_space<vmem>>, %arg5: memref<256x512xbf16, #tpu.memory_space<vmem>>, %arg6: memref<1x512xf32, #tpu.memory_space<vmem>>, %arg7: memref<128x512xbf16, #tpu.memory_space<vmem>>, %arg8: memref<128x256xbf16, #tpu.memory_space<vmem>>) attributes {dimension_semantics = [#tpu.dimension_semantics<parallel>, #tpu.dimension_semantics<arbitrary>], iteration_bounds = array<i64: 1, 1>, scalar_prefetch = 0 : i64, scratch_operands = 1 : i64, tpu.core_type = #tpu.core_type<tc>, window_params = [{transform_indices = @transform_0, window_bounds = array<i64: 128, 256>}, {pipeline_mode = #tpu.pipeline_mode<synchronous>, transform_indices = @transform_1, window_bounds = array<i64: 1, 256>}, {pipeline_mode = #tpu.pipeline_mode<synchronous>, transform_indices = @transform_2, window_bounds = array<i64: 1, 256>}, {transform_indices = @transform_3, window_bounds = array<i64: 256, 512>}, {transform_indices = @transform_4, window_bounds = array<i64: 1, 512>}, {transform_indices = @transform_5, window_bounds = array<i64: 128, 512>}]} {
    %c0_i32 = arith.constant 0 : i32
    %0 = arith.cmpi eq, %arg1, %c0_i32 : i32
    %1 = arith.extui %0 : i1 to i32
    %c0_i32_0 = arith.constant 0 : i32
    %2 = arith.cmpi ne, %1, %c0_i32_0 : i32
    scf.if %2 {
      %c0_12 = arith.constant 0 : index
      %c0_13 = arith.constant 0 : index
      %24 = vector.load %arg2[%c0_12, %c0_13] : memref<128x256xbf16, #tpu.memory_space<vmem>>, vector<128x256xbf16>
      %25 = arith.extf %24 : vector<128x256xbf16> to vector<128x256xf32>
      %cst_14 = arith.constant dense<0.000000e+00> : vector<128xf32>
      %26 = vector.multi_reduction <add>, %25, %cst_14 [1] : vector<128x256xf32> to vector<128xf32>
      %27 = vector.shape_cast %26 : vector<128xf32> to vector<128x1xf32>
      %cst_15 = arith.constant 2.560000e+02 : f32
      %28 = vector.broadcast %cst_15 : f32 to vector<128x1xf32>
      %29 = arith.divf %27, %28 : vector<128x1xf32>
      %30 = vector.broadcast %29 : vector<128x1xf32> to vector<128x256xf32>
      %31 = arith.subf %25, %30 : vector<128x256xf32>
      %32 = arith.mulf %31, %31 : vector<128x256xf32>
      %cst_16 = arith.constant dense<0.000000e+00> : vector<128xf32>
      %33 = vector.multi_reduction <add>, %32, %cst_16 [1] : vector<128x256xf32> to vector<128xf32>
      %34 = vector.shape_cast %33 : vector<128xf32> to vector<128x1xf32>
      %cst_17 = arith.constant 2.560000e+02 : f32
      %35 = vector.broadcast %cst_17 : f32 to vector<128x1xf32>
      %36 = arith.divf %34, %35 : vector<128x1xf32>
      %37 = vector.broadcast %29 : vector<128x1xf32> to vector<128x256xf32>
      %38 = arith.subf %25, %37 : vector<128x256xf32>
      %cst_18 = arith.constant 9.99999996E-13 : f32
      %39 = vector.broadcast %cst_18 : f32 to vector<128x1xf32>
      %40 = arith.addf %36, %39 : vector<128x1xf32>
      %41 = math.rsqrt %40 : vector<128x1xf32>
      %42 = vector.broadcast %41 : vector<128x1xf32> to vector<128x256xf32>
      %43 = arith.mulf %38, %42 : vector<128x256xf32>
      %c0_19 = arith.constant 0 : index
      %c0_20 = arith.constant 0 : index
      %44 = vector.load %arg3[%c0_19, %c0_20] : memref<1x256xf32, #tpu.memory_space<vmem>>, vector<1x256xf32>
      %45 = vector.broadcast %44 : vector<1x256xf32> to vector<128x256xf32>
      %46 = arith.mulf %43, %45 : vector<128x256xf32>
      %c0_21 = arith.constant 0 : index
      %c0_22 = arith.constant 0 : index
      %47 = vector.load %arg4[%c0_21, %c0_22] : memref<1x256xf32, #tpu.memory_space<vmem>>, vector<1x256xf32>
      %48 = vector.broadcast %47 : vector<1x256xf32> to vector<128x256xf32>
      %49 = arith.addf %46, %48 : vector<128x256xf32>
      %50 = arith.truncf %49 : vector<128x256xf32> to vector<128x256xbf16>
      %c0_23 = arith.constant 0 : index
      %c0_24 = arith.constant 0 : index
      %51 = vector.load %arg8[%c0_23, %c0_24] : memref<128x256xbf16, #tpu.memory_space<vmem>>, vector<128x256xbf16>
      tpu.vector_store %arg8[%c0_23, %c0_24], %50 {strides = array<i32>} : memref<128x256xbf16, #tpu.memory_space<vmem>>, vector<128x256xbf16>,
    } else {
    }
    %c0 = arith.constant 0 : index
    %c0_1 = arith.constant 0 : index
    %3 = vector.load %arg8[%c0, %c0_1] : memref<128x256xbf16, #tpu.memory_space<vmem>>, vector<128x256xbf16>
    %c0_2 = arith.constant 0 : index
    %c0_3 = arith.constant 0 : index
    %4 = vector.load %arg5[%c0_2, %c0_3] : memref<256x512xbf16, #tpu.memory_space<vmem>>, vector<256x512xbf16>
    %cst = arith.constant dense<0.000000e+00> : vector<128x512xf32>
    %5 = tpu.matmul %3, %4, %cst {dimension_numbers = #tpu.dot_dimension_numbers<[1], [0], [0], [1], [0, 0, 1, 1], [], []>} : vector<128x256xbf16>, vector<256x512xbf16>, vector<128x512xf32> -> vector<128x512xf32>
    %c0_4 = arith.constant 0 : index
    %c0_5 = arith.constant 0 : index
    %6 = vector.load %arg6[%c0_4, %c0_5] : memref<1x512xf32, #tpu.memory_space<vmem>>, vector<1x512xf32>
    %7 = vector.broadcast %6 : vector<1x512xf32> to vector<128x512xf32>
    %8 = arith.addf %5, %7 : vector<128x512xf32>
    %9 = arith.mulf %8, %8 : vector<128x512xf32>
    %10 = arith.mulf %8, %9 : vector<128x512xf32>
    %cst_6 = arith.constant 4.471500e-02 : f32
    %11 = vector.broadcast %cst_6 : f32 to vector<128x512xf32>
    %12 = arith.mulf %11, %10 : vector<128x512xf32>
    %13 = arith.addf %8, %12 : vector<128x512xf32>
    %cst_7 = arith.constant 0.797884583 : f32
    %14 = vector.broadcast %cst_7 : f32 to vector<128x512xf32>
    %15 = arith.mulf %14, %13 : vector<128x512xf32>
    %16 = math.tanh %15 : vector<128x512xf32>
    %cst_8 = arith.constant 1.000000e+00 : f32
    %17 = vector.broadcast %cst_8 : f32 to vector<128x512xf32>
    %18 = arith.addf %17, %16 : vector<128x512xf32>
    %cst_9 = arith.constant 5.000000e-01 : f32
    %19 = vector.broadcast %cst_9 : f32 to vector<128x512xf32>
    %20 = arith.mulf %19, %18 : vector<128x512xf32>
    %21 = arith.mulf %8, %20 : vector<128x512xf32>
    %22 = arith.truncf %21 : vector<128x512xf32> to vector<128x512xbf16>
    %c0_10 = arith.constant 0 : index
    %c0_11 = arith.constant 0 : index
    %23 = vector.load %arg7[%c0_10, %c0_11] : memref<128x512xbf16, #tpu.memory_space<vmem>>, vector<128x512xbf16>
    tpu.vector_store %arg7[%c0_10, %c0_11], %22 {strides = array<i32>} : memref<128x512xbf16, #tpu.memory_space<vmem>>, vector<128x512xbf16>,
    return
  }
  func.func @transform_0(%arg0: i32, %arg1: i32) -> (i32, i32) {
    %c0_i32 = arith.constant 0 : i32
    %c0_i32_0 = arith.constant 0 : i32
    return %arg0, %c0_i32 : i32, i32
  }
  func.func @transform_1(%arg0: i32, %arg1: i32) -> (i32, i32) {
    %c0_i32 = arith.constant 0 : i32
    %c0_i32_0 = arith.constant 0 : i32
    %c0_i32_1 = arith.constant 0 : i32
    return %c0_i32, %c0_i32_0 : i32, i32
  }
  func.func @transform_2(%arg0: i32, %arg1: i32) -> (i32, i32) {
    %c0_i32 = arith.constant 0 : i32
    %c0_i32_0 = arith.constant 0 : i32
    %c0_i32_1 = arith.constant 0 : i32
    return %c0_i32, %c0_i32_0 : i32, i32
  }
  func.func @transform_3(%arg0: i32, %arg1: i32) -> (i32, i32) {
    %c0_i32 = arith.constant 0 : i32
    %c0_i32_0 = arith.constant 0 : i32
    return %c0_i32, %arg1 : i32, i32
  }
  func.func @transform_4(%arg0: i32, %arg1: i32) -> (i32, i32) {
    %c0_i32 = arith.constant 0 : i32
    %c0_i32_0 = arith.constant 0 : i32
    return %c0_i32, %arg1 : i32, i32
  }
  func.func @transform_5(%arg0: i32, %arg1: i32) -> (i32, i32) {
    %c0_i32 = arith.constant 0 : i32
    return %arg0, %arg1 : i32, i32
  }
}

module attributes {stable_mosaic.version = 11 : i64} {
  func.func @_linear_residual_kernel(%arg0: i32, %arg1: i32, %arg2: i32, %arg3: memref<128x512xbf16, #tpu.memory_space<vmem>>, %arg4: memref<512x256xbf16, #tpu.memory_space<vmem>>, %arg5: memref<1x256xf32, #tpu.memory_space<vmem>>, %arg6: memref<128x256xbf16, #tpu.memory_space<vmem>>, %arg7: memref<128x256xbf16, #tpu.memory_space<vmem>>, %arg8: memref<128x256xf32, #tpu.memory_space<vmem>>) attributes {dimension_semantics = [#tpu.dimension_semantics<parallel>, #tpu.dimension_semantics<parallel>, #tpu.dimension_semantics<arbitrary>], iteration_bounds = array<i64: 1, 1, 1>, scalar_prefetch = 0 : i64, scratch_operands = 1 : i64, tpu.core_type = #tpu.core_type<tc>, window_params = [{transform_indices = @transform_0, window_bounds = array<i64: 128, 512>}, {transform_indices = @transform_1, window_bounds = array<i64: 512, 256>}, {transform_indices = @transform_2, window_bounds = array<i64: 1, 256>}, {transform_indices = @transform_3, window_bounds = array<i64: 128, 256>}, {transform_indices = @transform_4, window_bounds = array<i64: 128, 256>}]} {
    %c0_i32 = arith.constant 0 : i32
    %0 = arith.cmpi eq, %arg2, %c0_i32 : i32
    %1 = arith.extui %0 : i1 to i32
    %c0_i32_0 = arith.constant 0 : i32
    %2 = arith.cmpi ne, %1, %c0_i32_0 : i32
    scf.if %2 {
      %cst_10 = arith.constant 0.000000e+00 : f32
      %12 = vector.broadcast %cst_10 : f32 to vector<128x256xf32>
      %c0_11 = arith.constant 0 : index
      %c0_12 = arith.constant 0 : index
      %13 = vector.load %arg8[%c0_11, %c0_12] : memref<128x256xf32, #tpu.memory_space<vmem>>, vector<128x256xf32>
      tpu.vector_store %arg8[%c0_11, %c0_12], %12 {strides = array<i32>} : memref<128x256xf32, #tpu.memory_space<vmem>>, vector<128x256xf32>,
    } else {
    }
    %c0 = arith.constant 0 : index
    %c0_1 = arith.constant 0 : index
    %3 = vector.load %arg8[%c0, %c0_1] : memref<128x256xf32, #tpu.memory_space<vmem>>, vector<128x256xf32>
    %c0_2 = arith.constant 0 : index
    %c0_3 = arith.constant 0 : index
    %4 = vector.load %arg3[%c0_2, %c0_3] : memref<128x512xbf16, #tpu.memory_space<vmem>>, vector<128x512xbf16>
    %c0_4 = arith.constant 0 : index
    %c0_5 = arith.constant 0 : index
    %5 = vector.load %arg4[%c0_4, %c0_5] : memref<512x256xbf16, #tpu.memory_space<vmem>>, vector<512x256xbf16>
    %cst = arith.constant dense<0.000000e+00> : vector<128x256xf32>
    %6 = tpu.matmul %4, %5, %cst {dimension_numbers = #tpu.dot_dimension_numbers<[1], [0], [0], [1], [0, 0, 1, 1], [], []>} : vector<128x512xbf16>, vector<512x256xbf16>, vector<128x256xf32> -> vector<128x256xf32>
    %7 = arith.addf %3, %6 : vector<128x256xf32>
    %c0_6 = arith.constant 0 : index
    %c0_7 = arith.constant 0 : index
    %8 = vector.load %arg8[%c0_6, %c0_7] : memref<128x256xf32, #tpu.memory_space<vmem>>, vector<128x256xf32>
    tpu.vector_store %arg8[%c0_6, %c0_7], %7 {strides = array<i32>} : memref<128x256xf32, #tpu.memory_space<vmem>>, vector<128x256xf32>,
    %c0_i32_8 = arith.constant 0 : i32
    %9 = arith.cmpi eq, %arg2, %c0_i32_8 : i32
    %10 = arith.extui %9 : i1 to i32
    %c0_i32_9 = arith.constant 0 : i32
    %11 = arith.cmpi ne, %10, %c0_i32_9 : i32
    scf.if %11 {
      %c0_10 = arith.constant 0 : index
      %c0_11 = arith.constant 0 : index
      %12 = vector.load %arg8[%c0_10, %c0_11] : memref<128x256xf32, #tpu.memory_space<vmem>>, vector<128x256xf32>
      %c0_12 = arith.constant 0 : index
      %c0_13 = arith.constant 0 : index
      %13 = vector.load %arg5[%c0_12, %c0_13] : memref<1x256xf32, #tpu.memory_space<vmem>>, vector<1x256xf32>
      %14 = vector.broadcast %13 : vector<1x256xf32> to vector<128x256xf32>
      %15 = arith.addf %12, %14 : vector<128x256xf32>
      %c0_14 = arith.constant 0 : index
      %c0_15 = arith.constant 0 : index
      %16 = vector.load %arg6[%c0_14, %c0_15] : memref<128x256xbf16, #tpu.memory_space<vmem>>, vector<128x256xbf16>
      %17 = arith.extf %16 : vector<128x256xbf16> to vector<128x256xf32>
      %18 = arith.addf %15, %17 : vector<128x256xf32>
      %19 = arith.truncf %18 : vector<128x256xf32> to vector<128x256xbf16>
      %c0_16 = arith.constant 0 : index
      %c0_17 = arith.constant 0 : index
      %20 = vector.load %arg7[%c0_16, %c0_17] : memref<128x256xbf16, #tpu.memory_space<vmem>>, vector<128x256xbf16>
      tpu.vector_store %arg7[%c0_16, %c0_17], %19 {strides = array<i32>} : memref<128x256xbf16, #tpu.memory_space<vmem>>, vector<128x256xbf16>,
    } else {
    }
    return
  }
  func.func @transform_0(%arg0: i32, %arg1: i32, %arg2: i32) -> (i32, i32) {
    %c0_i32 = arith.constant 0 : i32
    return %arg0, %arg2 : i32, i32
  }
  func.func @transform_1(%arg0: i32, %arg1: i32, %arg2: i32) -> (i32, i32) {
    %c0_i32 = arith.constant 0 : i32
    return %arg2, %arg1 : i32, i32
  }
  func.func @transform_2(%arg0: i32, %arg1: i32, %arg2: i32) -> (i32, i32) {
    %c0_i32 = arith.constant 0 : i32
    %c0_i32_0 = arith.constant 0 : i32
    return %c0_i32, %arg1 : i32, i32
  }
  func.func @transform_3(%arg0: i32, %arg1: i32, %arg2: i32) -> (i32, i32) {
    %c0_i32 = arith.constant 0 : i32
    return %arg0, %arg1 : i32, i32
  }
  func.func @transform_4(%arg0: i32, %arg1: i32, %arg2: i32) -> (i32, i32) {
    %c0_i32 = arith.constant 0 : i32
    return %arg0, %arg1 : i32, i32
  }
}

module attributes {stable_mosaic.version = 11 : i64} {
  func.func @_head_kernel(%arg0: i32, %arg1: memref<1x64x256xbf16, #tpu.memory_space<vmem>>, %arg2: memref<1x256xf32, #tpu.memory_space<vmem>>, %arg3: memref<1x256xf32, #tpu.memory_space<vmem>>, %arg4: memref<256x128xbf16, #tpu.memory_space<vmem>>, %arg5: memref<1x128xf32, #tpu.memory_space<vmem>>, %arg6: memref<1x1x128xf32, #tpu.memory_space<vmem>>) attributes {dimension_semantics = [#tpu.dimension_semantics<parallel>], iteration_bounds = array<i64: 2>, scalar_prefetch = 0 : i64, scratch_operands = 0 : i64, tpu.core_type = #tpu.core_type<tc>, window_params = [{transform_indices = @transform_0, window_bounds = array<i64: 1, 64, 256>}, {pipeline_mode = #tpu.pipeline_mode<synchronous>, transform_indices = @transform_1, window_bounds = array<i64: 1, 256>}, {pipeline_mode = #tpu.pipeline_mode<synchronous>, transform_indices = @transform_2, window_bounds = array<i64: 1, 256>}, {pipeline_mode = #tpu.pipeline_mode<synchronous>, transform_indices = @transform_3, window_bounds = array<i64: 256, 128>}, {pipeline_mode = #tpu.pipeline_mode<synchronous>, transform_indices = @transform_4, window_bounds = array<i64: 1, 128>}, {transform_indices = @transform_5, window_bounds = array<i64: 1, 1, 128>}]} {
    %c0 = arith.constant 0 : index
    %c0_0 = arith.constant 0 : index
    %c0_1 = arith.constant 0 : index
    %0 = vector.load %arg1[%c0, %c0_0, %c0_1] : memref<1x64x256xbf16, #tpu.memory_space<vmem>>, vector<1x64x256xbf16>
    %1 = vector.shape_cast %0 : vector<1x64x256xbf16> to vector<64x256xbf16>
    %2 = arith.extf %1 : vector<64x256xbf16> to vector<64x256xf32>
    %cst = arith.constant dense<0.000000e+00> : vector<256xf32>
    %3 = vector.multi_reduction <add>, %2, %cst [0] : vector<64x256xf32> to vector<256xf32>
    %4 = vector.shape_cast %3 : vector<256xf32> to vector<1x256xf32>
    %cst_2 = arith.constant 6.400000e+01 : f32
    %5 = vector.broadcast %cst_2 : f32 to vector<1x256xf32>
    %6 = arith.divf %4, %5 : vector<1x256xf32>
    %cst_3 = arith.constant dense<0.000000e+00> : vector<1xf32>
    %7 = vector.multi_reduction <add>, %6, %cst_3 [1] : vector<1x256xf32> to vector<1xf32>
    %8 = vector.shape_cast %7 : vector<1xf32> to vector<1x1xf32>
    %cst_4 = arith.constant 2.560000e+02 : f32
    %9 = vector.broadcast %cst_4 : f32 to vector<1x1xf32>
    %10 = arith.divf %8, %9 : vector<1x1xf32>
    %11 = vector.broadcast %10 : vector<1x1xf32> to vector<1x256xf32>
    %12 = arith.subf %6, %11 : vector<1x256xf32>
    %13 = arith.mulf %12, %12 : vector<1x256xf32>
    %cst_5 = arith.constant dense<0.000000e+00> : vector<1xf32>
    %14 = vector.multi_reduction <add>, %13, %cst_5 [1] : vector<1x256xf32> to vector<1xf32>
    %15 = vector.shape_cast %14 : vector<1xf32> to vector<1x1xf32>
    %cst_6 = arith.constant 2.560000e+02 : f32
    %16 = vector.broadcast %cst_6 : f32 to vector<1x1xf32>
    %17 = arith.divf %15, %16 : vector<1x1xf32>
    %18 = vector.broadcast %10 : vector<1x1xf32> to vector<1x256xf32>
    %19 = arith.subf %6, %18 : vector<1x256xf32>
    %cst_7 = arith.constant 9.99999974E-6 : f32
    %20 = vector.broadcast %cst_7 : f32 to vector<1x1xf32>
    %21 = arith.addf %17, %20 : vector<1x1xf32>
    %22 = math.rsqrt %21 : vector<1x1xf32>
    %23 = vector.broadcast %22 : vector<1x1xf32> to vector<1x256xf32>
    %24 = arith.mulf %19, %23 : vector<1x256xf32>
    %c0_8 = arith.constant 0 : index
    %c0_9 = arith.constant 0 : index
    %25 = vector.load %arg2[%c0_8, %c0_9] : memref<1x256xf32, #tpu.memory_space<vmem>>, vector<1x256xf32>
    %26 = arith.mulf %24, %25 : vector<1x256xf32>
    %c0_10 = arith.constant 0 : index
    %c0_11 = arith.constant 0 : index
    %27 = vector.load %arg3[%c0_10, %c0_11] : memref<1x256xf32, #tpu.memory_space<vmem>>, vector<1x256xf32>
    %28 = arith.addf %26, %27 : vector<1x256xf32>
    %29 = arith.truncf %28 : vector<1x256xf32> to vector<1x256xbf16>
    %c0_12 = arith.constant 0 : index
    %c0_13 = arith.constant 0 : index
    %30 = vector.load %arg4[%c0_12, %c0_13] : memref<256x128xbf16, #tpu.memory_space<vmem>>, vector<256x128xbf16>
    %cst_14 = arith.constant dense<0.000000e+00> : vector<1x128xf32>
    %31 = tpu.matmul %29, %30, %cst_14 {dimension_numbers = #tpu.dot_dimension_numbers<[1], [0], [0], [1], [0, 0, 1, 1], [], []>} : vector<1x256xbf16>, vector<256x128xbf16>, vector<1x128xf32> -> vector<1x128xf32>
    %c0_15 = arith.constant 0 : index
    %c0_16 = arith.constant 0 : index
    %32 = vector.load %arg5[%c0_15, %c0_16] : memref<1x128xf32, #tpu.memory_space<vmem>>, vector<1x128xf32>
    %33 = arith.addf %31, %32 : vector<1x128xf32>
    %34 = math.tanh %33 : vector<1x128xf32>
    %c0_17 = arith.constant 0 : index
    %c0_18 = arith.constant 0 : index
    %c0_19 = arith.constant 0 : index
    %35 = vector.load %arg6[%c0_17, %c0_18, %c0_19] : memref<1x1x128xf32, #tpu.memory_space<vmem>>, vector<1x1x128xf32>
    %36 = vector.shape_cast %35 : vector<1x1x128xf32> to vector<1x128xf32>
    %37 = vector.shape_cast %34 : vector<1x128xf32> to vector<1x1x128xf32>
    tpu.vector_store %arg6[%c0_17, %c0_18, %c0_19], %37 {strides = array<i32>} : memref<1x1x128xf32, #tpu.memory_space<vmem>>, vector<1x1x128xf32>,
    return
  }
  func.func @transform_0(%arg0: i32) -> (i32, i32, i32) {
    %c0_i32 = arith.constant 0 : i32
    %c0_i32_0 = arith.constant 0 : i32
    %c0_i32_1 = arith.constant 0 : i32
    return %arg0, %c0_i32, %c0_i32_0 : i32, i32, i32
  }
  func.func @transform_1(%arg0: i32) -> (i32, i32) {
    %c0_i32 = arith.constant 0 : i32
    %c0_i32_0 = arith.constant 0 : i32
    %c0_i32_1 = arith.constant 0 : i32
    return %c0_i32, %c0_i32_0 : i32, i32
  }
  func.func @transform_2(%arg0: i32) -> (i32, i32) {
    %c0_i32 = arith.constant 0 : i32
    %c0_i32_0 = arith.constant 0 : i32
    %c0_i32_1 = arith.constant 0 : i32
    return %c0_i32, %c0_i32_0 : i32, i32
  }
  func.func @transform_3(%arg0: i32) -> (i32, i32) {
    %c0_i32 = arith.constant 0 : i32
    %c0_i32_0 = arith.constant 0 : i32
    %c0_i32_1 = arith.constant 0 : i32
    return %c0_i32, %c0_i32_0 : i32, i32
  }
  func.func @transform_4(%arg0: i32) -> (i32, i32) {
    %c0_i32 = arith.constant 0 : i32
    %c0_i32_0 = arith.constant 0 : i32
    %c0_i32_1 = arith.constant 0 : i32
    return %c0_i32, %c0_i32_0 : i32, i32
  }
  func.func @transform_5(%arg0: i32) -> (i32, i32, i32) {
    %c0_i32 = arith.constant 0 : i32
    %c0_i32_0 = arith.constant 0 : i32
    %c0_i32_1 = arith.constant 0 : i32
    return %arg0, %c0_i32, %c0_i32_0 : i32, i32, i32
  }
}

</mosaic_0001>

<bundles_post_ra>
// kernel: timesformer_encoder_forward.12
= control target key start
LH: loop header
LB: loop body
LE: loop exit
PB: predicated region body
PF: predicated region fallthrough
CT: control target
= control target key end

     0   :  { %v742_v1 = vmov 0   ;;  %vm182_vm0 = vcmask 785408   ;;  %v421_v37 = vlaneseq  ;;  %s1003_s1 = inlined_call_operand.vmem [shape: bf16[96,256], index: 1, kind: input, shape index: {}]   ;;  %s1004_s0 = inlined_call_operand.vmem [shape: f32[128,96], index: 0, kind: input, shape index: {}]   ;;  %s1005_s2 = inlined_call_operand.vmem [shape: f32[1,256], index: 2, kind: input, shape index: {}]   ;;  %s1006_s3 = inlined_call_operand.vmem [shape: bf16[128,256], index: 3, kind: input, shape index: {}]   ;;  %s1007_s4 = inlined_call_operand.vmem [shape: bf16[128,256], index: 4, kind: output, shape index: {}]  }
   0x1   :  { %v724_v0 = vld [vmem:[%s1003_s1 + $0x4] ss:$8 sps:$4 sm:$0xff]   ;;  %239 = vmatprep.mubr.bf16.mxu0 %v742_v1  ;;  %279 = vmatprep.mubr.bf16.mxu1 %v742_v1  ;;  %v726_v2 = vld [vmem:[%s1003_s1] ss:$8 sps:$4 sm:$0xff]   ;;  %v727_v3 = vld [vmem:[%s1003_s1 + $0x14] ss:$8 sps:$4 sm:$0xff]  }
   0x2   :  { %207 = vmatprep.subr.bf16.mxu0 %v724_v0  ;;  %711 = vmatprep.subr.bf16.mxu1 %v724_v0  ;;  %v729_v4 = vld [vmem:[%s1003_s1 + $0x10] ss:$8 sps:$4 sm:$0xff]   ;;  %v730_v5 = vld [vmem:[%s1003_s1 + $0x24] ss:$8 sps:$4 sm:$0xff]   ;;  %v732_v6 = vld [vmem:[%s1003_s1 + $0x20] ss:$8 sps:$4 sm:$0xff]  }
   0x3   :  { %208 = vmatpush1.bf16.msra.mxu0 %v726_v2  ;;  %717 = vmatpush1.bf16.msra.mxu1 %v726_v2  ;;  %v733_v7 = vld [vmem:[%s1003_s1 + $0x34] ss:$8 sps:$4 sm:$0xff]   ;;  %v735_v8 = vld [vmem:[%s1003_s1 + $0x30] ss:$8 sps:$4 sm:$0xff]   ;;  %v736_v9 = vld [vmem:[%s1003_s1 + $0x44] ss:$8 sps:$4 sm:$0xff]  }
   0x4   :  { %209 = vmatprep.subr.bf16.mxu0 %v727_v3  ;;  %712 = vmatprep.subr.bf16.mxu1 %v727_v3  ;;  %v738_v10 = vld [vmem:[%s1003_s1 + $0x40] ss:$8 sps:$4 sm:$0xff]   ;;  %v739_v11 = vld [vmem:[%s1003_s1 + $0x54] ss:$8 sps:$4 sm:$0xff]   ;;  %v741_v12 = vld [vmem:[%s1003_s1 + $0x50] ss:$8 sps:$4 sm:$0xff]  }
   0x5   :  { %v86_v13 = vld [vmem:[%s1004_s0] sm:$0xff]  ;;  %v87_v14 = vld [vmem:[%s1004_s0 + $0x8] sm:$0xff]  ;;  %v88_v19 = vld [vmem:[%s1004_s0 + $0x10] sm:$0xff]  ;;  %v422_v38 = vshrl.u32 %v421_v37, 7 }
   0x6   :  { %v94_v15 = vld [vmem:[%s1004_s0 + $0x40] sm:$0xff]  ;;  %v95_v16 = vld [vmem:[%s1004_s0 + $0x48] sm:$0xff]  ;;  %v102_v17 = vpack.c.bf16 %v87_v14, %v86_v13  ;;  %v89_v20 = vld [vmem:[%s1004_s0 + $0x18] sm:$0xff] }
   0x7   :  { %210 = vmatpush1.bf16.msra.mxu0 %v729_v4  ;;  %718 = vmatpush1.bf16.msra.mxu1 %v729_v4  ;;  %v106_v18 = vpack.c.bf16 %v95_v16, %v94_v15  ;;  %v96_v21 = vld [vmem:[%s1004_s0 + $0x50] sm:$0xff]  ;;  %v97_v22 = vld [vmem:[%s1004_s0 + $0x58] sm:$0xff]  ;;  %v103_v23 = vpack.c.bf16 %v89_v20, %v88_v19  ;;  %v90_v25 = vld [vmem:[%s1004_s0 + $0x20] sm:$0xff]  ;;  %v423_v39 = vsub.s32 0, %v422_v38  ;;  %v427_v41 = vsub.s32 1, %v422_v38 }
   0x8   :  { %211 = vmatprep.subr.bf16.mxu0 %v730_v5  ;;  %713 = vmatprep.subr.bf16.mxu1 %v730_v5  ;;  %v107_v24 = vpack.c.bf16 %v97_v22, %v96_v21  ;;  %v91_v26 = vld [vmem:[%s1004_s0 + $0x28] sm:$0xff]  ;;  %v98_v27 = vld [vmem:[%s1004_s0 + $0x60] sm:$0xff]  ;;  %v92_v31 = vld [vmem:[%s1004_s0 + $0x30] sm:$0xff] }
   0x9   :  { %v99_v28 = vld [vmem:[%s1004_s0 + $0x68] sm:$0xff]  ;;  %v104_v29 = vpack.c.bf16 %v91_v26, %v90_v25  ;;  %v93_v32 = vld [vmem:[%s1004_s0 + $0x38] sm:$0xff]  ;;  %v100_v33 = vld [vmem:[%s1004_s0 + $0x70] sm:$0xff] }
   0xa   :  { %v108_v30 = vpack.c.bf16 %v99_v28, %v98_v27  ;;  %v101_v34 = vld [vmem:[%s1004_s0 + $0x78] sm:$0xff]  ;;  %v105_v35 = vpack.c.bf16 %v93_v32, %v92_v31  ;;  %v419_v40 = vld [vmem:[%s1005_s2] sm:$0x3]  ;;  %v464_v46 = vld [vmem:[%s1006_s3 + $0x8] sm:$0xff] }
   0xb   :  { %212 = vmatpush1.bf16.msra.mxu0 %v732_v6  ;;  %719 = vmatpush1.bf16.msra.mxu1 %v732_v6  ;;  %v109_v36 = vpack.c.bf16 %v101_v34, %v100_v33  ;;  %v463_v42 = vld [vmem:[%s1006_s3] sm:$0xff]  ;;  %v877_v44 = vrot.slane %v419_v40, %v423_v39  ;;  %v879_v45 = vrot.slane %v419_v40, %v427_v41  ;;  %v472_v47 = vld [vmem:[%s1006_s3 + $0x48] sm:$0xff]  ;;  %v481_v58 = vunpack.c.l.bf16 %v464_v46  ;;  %v473_v13 = vld [vmem:[%s1006_s3 + $0x50] sm:$0xff] }
   0xc   :  { %213 = vmatprep.subr.bf16.mxu0 %v733_v7  ;;  %714 = vmatprep.subr.bf16.mxu1 %v733_v7  ;;  %v471_v43 = vld [vmem:[%s1006_s3 + $0x40] sm:$0xff]  ;;  %v479_v48 = vunpack.c.l.bf16 %v463_v42  ;;  %v480_v52 = vunpack.c.h.bf16 %v463_v42  ;;  %v497_v59 = vunpack.c.l.bf16 %v472_v47  ;;  %v482_v0 = vunpack.c.h.bf16 %v464_v46  ;;  %v466_v20 = vld [vmem:[%s1006_s3 + $0x18] sm:$0xff] }
   0xd   :  { %v495_v49 = vunpack.c.l.bf16 %v471_v43  ;;  %v496_v53 = vunpack.c.h.bf16 %v471_v43  ;;  %v474_v21 = vld [vmem:[%s1006_s3 + $0x58] sm:$0xff]  ;;  %v485_v34 = vunpack.c.l.bf16 %v466_v20  ;;  %v486_v40 = vunpack.c.h.bf16 %v466_v20 }
   0xe   :  { %v502_v41 = vunpack.c.h.bf16 %v474_v21 }
   0xf   :  { %214 = vmatpush1.bf16.msra.mxu0 %v735_v8  ;;  %720 = vmatpush1.bf16.msra.mxu1 %v735_v8 }
  0x10   :  { %215 = vmatprep.subr.bf16.mxu0 %v736_v9  ;;  %715 = vmatprep.subr.bf16.mxu1 %v736_v9 }
  0x13   :  { %216 = vmatpush1.bf16.msra.mxu0 %v738_v10  ;;  %721 = vmatpush1.bf16.msra.mxu1 %v738_v10 }
  0x14   :  { %217 = vmatprep.subr.bf16.mxu0 %v739_v11  ;;  %716 = vmatprep.subr.bf16.mxu1 %v739_v11 }
  0x17   :  { %218 = vmatpush1.bf16.msra.mxu0 %v741_v12  ;;  %722 = vmatpush1.bf16.msra.mxu1 %v741_v12  ;;  %v465_v12 = vld [vmem:[%s1006_s3 + $0x10] sm:$0xff] }
  0x18   :  { %v483_v22 = vunpack.c.l.bf16 %v465_v12  ;;  %v484_v28 = vunpack.c.h.bf16 %v465_v12 }
  0x1a   :  { %671 = vmatmul.mubr.msk.bf16.vlgmr.msra.gmra.mrb[0].mxu0 %vm182_vm0, %v102_v17  ;;  %675 = vmatmul.mubr.msk.bf16.vlgmr.msra.gmra.mrb[0].mxu1 %vm182_vm0, %v106_v18 }
  0x1b   :  { %249 = vmatprep.mubr.bf16.mxu0 %v742_v1  ;;  %289 = vmatprep.mubr.bf16.mxu1 %v742_v1 }
  0x22   :  { %672 = vmatmul.mubr.msk.bf16.gmra.mrb[4].mxu0 %vm182_vm0, %v103_v23  ;;  %676 = vmatmul.mubr.msk.bf16.gmra.mrb[4].mxu1 %vm182_vm0, %v107_v24  ;;  %v499_v23 = vunpack.c.l.bf16 %v473_v13 }
  0x23   :  { %259 = vmatprep.mubr.bf16.mxu0 %v742_v1  ;;  %299 = vmatprep.mubr.bf16.mxu1 %v742_v1 }
  0x2a   :  { %673 = vmatmul.mubr.msk.bf16.gmra.mrb[8].mxu0 %vm182_vm0, %v104_v29  ;;  %677 = vmatmul.mubr.msk.bf16.gmra.mrb[8].mxu1 %vm182_vm0, %v108_v30  ;;  %v500_v29 = vunpack.c.h.bf16 %v473_v13 }
  0x2b   :  { %269 = vmatprep.mubr.bf16.mxu0 %v742_v1  ;;  %309 = vmatprep.mubr.bf16.mxu1 %v742_v1  ;;  %v498_v1 = vunpack.c.h.bf16 %v472_v47 }
  0x32   :  { %674 = vmatmul.mubr.msk.bf16.gmra.mrb[12].mxu0 %vm182_vm0, %v105_v35  ;;  %678 = vmatmul.mubr.msk.bf16.gmra.mrb[12].mxu1 %vm182_vm0, %v109_v36  ;;  %v501_v35 = vunpack.c.l.bf16 %v474_v21 }
  0xed   :  { %v241_v50 = vpop.f32.mrb[0].mxu0  ;;  %v281_v51 = vpop.f32.mrb[0].mxu1 }
  0xee   :  { %v431_v54 = vadd.f32 %v877_v44, %v241_v50  ;;  %v447_v55 = vadd.f32 %v877_v44, %v281_v51  ;;  %v243_v56 = vpop.f32.mrb[1].mxu0  ;;  %v283_v57 = vpop.f32.mrb[1].mxu1 }
  0xef   :  { %v432_v60 = vadd.f32 %v879_v45, %v243_v56  ;;  %v448_v61 = vadd.f32 %v879_v45, %v283_v57  ;;  %v245_v62 = vpop.f32.mrb[2].mxu0  ;;  %v285_v63 = vpop.f32.mrb[2].mxu1 }
  0xf0   :  { %v511_v2 = vadd.f32 %v479_v48, %v431_v54  ;;  %v527_v3 = vadd.f32 %v495_v49, %v447_v55  ;;  %v433_v4 = vadd.f32 %v877_v44, %v245_v62  ;;  %v449_v5 = vadd.f32 %v877_v44, %v285_v63  ;;  %v247_v6 = vpop.f32.mrb[3].mxu0  ;;  %v287_v7 = vpop.f32.mrb[3].mxu1  ;;  %v467_v54 = vld [vmem:[%s1006_s3 + $0x20] sm:$0xff]  ;;  %v468_v62 = vld [vmem:[%s1006_s3 + $0x28] sm:$0xff] }
  0xf1   :  { %v512_v8 = vadd.f32 %v480_v52, %v432_v60  ;;  %v528_v9 = vadd.f32 %v496_v53, %v448_v61  ;;  %v434_v10 = vadd.f32 %v879_v45, %v247_v6  ;;  %v450_v11 = vadd.f32 %v879_v45, %v287_v7  ;;  %v475_v55 = vld [vmem:[%s1006_s3 + $0x60] sm:$0xff]  ;;  %v476_v63 = vld [vmem:[%s1006_s3 + $0x68] sm:$0xff] }
  0xf2   :  { %v513_v14 = vadd.f32 %v481_v58, %v433_v4  ;;  %v529_v15 = vadd.f32 %v497_v59, %v449_v5  ;;  %v488_v6 = vunpack.c.h.bf16 %v467_v54  ;;  %v504_v7 = vunpack.c.h.bf16 %v475_v55 }
  0xf3   :  { %v695_v16 = vpack.c.bf16 %v512_v8, %v511_v2  ;;  %v703_v17 = vpack.c.bf16 %v528_v9, %v527_v3  ;;  %v514_v18 = vadd.f32 %v482_v0, %v434_v10  ;;  %v530_v19 = vadd.f32 %v498_v1, %v450_v11 }
  0xf4   :  { %v487_v0 = vunpack.c.l.bf16 %v467_v54  ;;  %v503_v1 = vunpack.c.l.bf16 %v475_v55  ;;  %v489_v12 = vunpack.c.l.bf16 %v468_v62  ;;  %v505_v13 = vunpack.c.l.bf16 %v476_v63 }
  0xf5   :  { %639 = vst [vmem:[%s1007_s4] sm:$0xff] %v695_v16  ;;  %647 = vst [vmem:[%s1007_s4 + $0x40] sm:$0xff] %v703_v17  ;;  %v696_v24 = vpack.c.bf16 %v514_v18, %v513_v14  ;;  %v704_v25 = vpack.c.bf16 %v530_v19, %v529_v15  ;;  %v251_v26 = vpop.f32.mrb[4].mxu0  ;;  %v291_v27 = vpop.f32.mrb[4].mxu1  ;;  %v490_v18 = vunpack.c.h.bf16 %v468_v62  ;;  %v506_v19 = vunpack.c.h.bf16 %v476_v63 }
  0xf6   :  { %v435_v30 = vadd.f32 %v877_v44, %v251_v26  ;;  %v451_v31 = vadd.f32 %v877_v44, %v291_v27  ;;  %v253_v32 = vpop.f32.mrb[5].mxu0  ;;  %v293_v33 = vpop.f32.mrb[5].mxu1 }
  0xf7   :  { %640 = vst [vmem:[%s1007_s4 + $0x8] sm:$0xff] %v696_v24  ;;  %648 = vst [vmem:[%s1007_s4 + $0x48] sm:$0xff] %v704_v25  ;;  %v436_v36 = vadd.f32 %v879_v45, %v253_v32  ;;  %v452_v37 = vadd.f32 %v879_v45, %v293_v33  ;;  %v255_v38 = vpop.f32.mrb[6].mxu0  ;;  %v295_v39 = vpop.f32.mrb[6].mxu1 }
  0xf8   :  { %v515_v42 = vadd.f32 %v483_v22, %v435_v30  ;;  %v531_v43 = vadd.f32 %v499_v23, %v451_v31  ;;  %v437_v46 = vadd.f32 %v877_v44, %v255_v38  ;;  %v453_v47 = vadd.f32 %v877_v44, %v295_v39  ;;  %v257_v48 = vpop.f32.mrb[7].mxu0  ;;  %v297_v49 = vpop.f32.mrb[7].mxu1  ;;  %v469_v30 = vld [vmem:[%s1006_s3 + $0x30] sm:$0xff]  ;;  %v470_v38 = vld [vmem:[%s1006_s3 + $0x38] sm:$0xff] }
  0xf9   :  { %v516_v50 = vadd.f32 %v484_v28, %v436_v36  ;;  %v532_v51 = vadd.f32 %v500_v29, %v452_v37  ;;  %v438_v52 = vadd.f32 %v879_v45, %v257_v48  ;;  %v454_v53 = vadd.f32 %v879_v45, %v297_v49  ;;  %v477_v31 = vld [vmem:[%s1006_s3 + $0x70] sm:$0xff]  ;;  %v478_v39 = vld [vmem:[%s1006_s3 + $0x78] sm:$0xff] }
  0xfa   :  { %v517_v56 = vadd.f32 %v485_v34, %v437_v46  ;;  %v533_v57 = vadd.f32 %v501_v35, %v453_v47  ;;  %v492_v48 = vunpack.c.h.bf16 %v469_v30  ;;  %v508_v49 = vunpack.c.h.bf16 %v477_v31 }
  0xfb   :  { %v697_v58 = vpack.c.bf16 %v516_v50, %v515_v42  ;;  %v705_v59 = vpack.c.bf16 %v532_v51, %v531_v43  ;;  %v518_v60 = vadd.f32 %v486_v40, %v438_v52  ;;  %v534_v61 = vadd.f32 %v502_v41, %v454_v53 }
  0xfc   :  { %v491_v40 = vunpack.c.l.bf16 %v469_v30  ;;  %v507_v41 = vunpack.c.l.bf16 %v477_v31  ;;  %v493_v54 = vunpack.c.l.bf16 %v470_v38  ;;  %v509_v55 = vunpack.c.l.bf16 %v478_v39 }
  0xfd   :  { %641 = vst [vmem:[%s1007_s4 + $0x10] sm:$0xff] %v697_v58  ;;  %649 = vst [vmem:[%s1007_s4 + $0x50] sm:$0xff] %v705_v59  ;;  %v698_v2 = vpack.c.bf16 %v518_v60, %v517_v56  ;;  %v706_v3 = vpack.c.bf16 %v534_v61, %v533_v57  ;;  %v261_v4 = vpop.f32.mrb[8].mxu0  ;;  %v301_v5 = vpop.f32.mrb[8].mxu1  ;;  %v494_v60 = vunpack.c.h.bf16 %v470_v38  ;;  %v510_v61 = vunpack.c.h.bf16 %v478_v39 }
  0xfe   :  { %v439_v8 = vadd.f32 %v877_v44, %v261_v4  ;;  %v455_v9 = vadd.f32 %v877_v44, %v301_v5  ;;  %v263_v10 = vpop.f32.mrb[9].mxu0  ;;  %v303_v11 = vpop.f32.mrb[9].mxu1 }
  0xff   :  { %642 = vst [vmem:[%s1007_s4 + $0x18] sm:$0xff] %v698_v2  ;;  %650 = vst [vmem:[%s1007_s4 + $0x58] sm:$0xff] %v706_v3  ;;  %v440_v14 = vadd.f32 %v879_v45, %v263_v10  ;;  %v456_v15 = vadd.f32 %v879_v45, %v303_v11  ;;  %v265_v16 = vpop.f32.mrb[10].mxu0  ;;  %v305_v17 = vpop.f32.mrb[10].mxu1 }
 0x100   :  { %v519_v20 = vadd.f32 %v487_v0, %v439_v8  ;;  %v535_v21 = vadd.f32 %v503_v1, %v455_v9  ;;  %v441_v22 = vadd.f32 %v877_v44, %v265_v16  ;;  %v457_v23 = vadd.f32 %v877_v44, %v305_v17  ;;  %v267_v24 = vpop.f32.mrb[11].mxu0  ;;  %v307_v25 = vpop.f32.mrb[11].mxu1 }
 0x101   :  { %v520_v26 = vadd.f32 %v488_v6, %v440_v14  ;;  %v536_v27 = vadd.f32 %v504_v7, %v456_v15  ;;  %v442_v28 = vadd.f32 %v879_v45, %v267_v24  ;;  %v458_v29 = vadd.f32 %v879_v45, %v307_v25 }
 0x102   :  { %v521_v32 = vadd.f32 %v489_v12, %v441_v22  ;;  %v537_v33 = vadd.f32 %v505_v13, %v457_v23 }
 0x103   :  { %v699_v34 = vpack.c.bf16 %v520_v26, %v519_v20  ;;  %v707_v35 = vpack.c.bf16 %v536_v27, %v535_v21  ;;  %v522_v36 = vadd.f32 %v490_v18, %v442_v28  ;;  %v538_v37 = vadd.f32 %v506_v19, %v458_v29 }
 0x105   :  { %643 = vst [vmem:[%s1007_s4 + $0x20] sm:$0xff] %v699_v34  ;;  %651 = vst [vmem:[%s1007_s4 + $0x60] sm:$0xff] %v707_v35  ;;  %v700_v42 = vpack.c.bf16 %v522_v36, %v521_v32  ;;  %v708_v43 = vpack.c.bf16 %v538_v37, %v537_v33  ;;  %v271_v46 = vpop.f32.mrb[12].mxu0  ;;  %v311_v47 = vpop.f32.mrb[12].mxu1 }
 0x106   :  { %v443_v50 = vadd.f32 %v877_v44, %v271_v46  ;;  %v459_v51 = vadd.f32 %v877_v44, %v311_v47  ;;  %v273_v52 = vpop.f32.mrb[13].mxu0  ;;  %v313_v53 = vpop.f32.mrb[13].mxu1 }
 0x107   :  { %644 = vst [vmem:[%s1007_s4 + $0x28] sm:$0xff] %v700_v42  ;;  %652 = vst [vmem:[%s1007_s4 + $0x68] sm:$0xff] %v708_v43  ;;  %v444_v56 = vadd.f32 %v879_v45, %v273_v52  ;;  %v460_v57 = vadd.f32 %v879_v45, %v313_v53  ;;  %v275_v58 = vpop.f32.mrb[14].mxu0  ;;  %v315_v59 = vpop.f32.mrb[14].mxu1 }
 0x108   :  { %v523_v62 = vadd.f32 %v491_v40, %v443_v50  ;;  %v539_v63 = vadd.f32 %v507_v41, %v459_v51  ;;  %v445_v0 = vadd.f32 %v877_v44, %v275_v58  ;;  %v461_v1 = vadd.f32 %v877_v44, %v315_v59  ;;  %v277_v2 = vpop.f32.mrb[15].mxu0  ;;  %v317_v3 = vpop.f32.mrb[15].mxu1 }
 0x109   :  { %v524_v4 = vadd.f32 %v492_v48, %v444_v56  ;;  %v540_v5 = vadd.f32 %v508_v49, %v460_v57  ;;  %v446_v6 = vadd.f32 %v879_v45, %v277_v2  ;;  %v462_v7 = vadd.f32 %v879_v45, %v317_v3 }
 0x10a   :  { %v525_v8 = vadd.f32 %v493_v54, %v445_v0  ;;  %v541_v9 = vadd.f32 %v509_v55, %v461_v1 }
 0x10b   :  { %v701_v10 = vpack.c.bf16 %v524_v4, %v523_v62  ;;  %v709_v11 = vpack.c.bf16 %v540_v5, %v539_v63  ;;  %v526_v12 = vadd.f32 %v494_v60, %v446_v6  ;;  %v542_v13 = vadd.f32 %v510_v61, %v462_v7 }
 0x10d   :  { %645 = vst [vmem:[%s1007_s4 + $0x30] sm:$0xff] %v701_v10  ;;  %653 = vst [vmem:[%s1007_s4 + $0x70] sm:$0xff] %v709_v11  ;;  %v702_v44 = vpack.c.bf16 %v526_v12, %v525_v8  ;;  %v710_v14 = vpack.c.bf16 %v542_v13, %v541_v9 }
 0x10f   :  { %646 = vst [vmem:[%s1007_s4 + $0x38] sm:$0xff] %v702_v44  ;;  %654 = vst [vmem:[%s1007_s4 + $0x78] sm:$0xff] %v710_v14 }

// kernel: timesformer_encoder_forward.13
= control target key start
LH: loop header
LB: loop body
LE: loop exit
PB: predicated region body
PF: predicated region fallthrough
CT: control target
= control target key end

     0   :  { %s2315_s18 = smov 0   ;;  %s2317_s19 = smov 0   ;;  %s3214_s0 = inlined_call_operand.vmem [shape: bf16[128,256], index: 0, kind: input, shape index: {}]   ;;  %s3215_s1 = inlined_call_operand.vmem [shape: f32[1,256], index: 1, kind: input, shape index: {}]   ;;  %s3216_s2 = inlined_call_operand.vmem [shape: f32[1,256], index: 2, kind: input, shape index: {}]   ;;  %s3217_s3 = inlined_call_operand.vmem [shape: bf16[256,768], index: 3, kind: input, shape index: {}]   ;;  %s3218_s4 = inlined_call_operand.vmem [shape: f32[1,768], index: 4, kind: input, shape index: {}]   ;;  %s3219_s5 = inlined_call_operand.vmem [shape: bf16[128,768], index: 5, kind: output, shape index: {}]  }
   0x1   :  { %s2319_s20 = smov 0   ;;  %s2321_s21 = smov 0  }
   0x2   :  { %s2323_s22 = smov 0  }
   0x3 LB: > { %s24_s23 = sadd.s32 1, %s2279_s21  ;;  %s1821_s24 = sadd.s32 4294967295, %s2283_s22   ;;  %s2283_s22 = sphi %s2323_s22, %s15_s22   ;;  %s2279_s21 = sphi %s2321_s21, %s3224_s21   ;;  %s2275_s20 = sphi %s2319_s20, %s3223_s20   ;;  %s2271_s19 = sphi %s2317_s19, %s3222_s19   ;;  %s2267_s18 = sphi %s2315_s18, %s3221_s18  }
   0x4   : > { %p25_p0 = scmp.ge.s32.totalorder %s24_s23, 2  ;;  %p109_p1 = scmp.ne.s32.totalorder %s2271_s19, %s2267_s18 }
   0x5   : > { %p110_p2 = scmp.eq.s32.totalorder %s2283_s22, 0  ;;  %p167_p4 = scmp.eq.s32.totalorder %s1821_s24, 1 }
   0x6   : > { %s3226_s23 = smov (%p25_p0, %s24_s23), 0  ;;  %s102_s26 = sadd.s32 1, %s2271_s19 }
   0x7   : > { %p111_p3 = por %p110_p2, %p109_p1  ;;  %s99_s25 = ssub.s32 %s2279_s21, %s3226_s23 }
   0x8   : > { %p100_p5 = scmp.eq.s32.totalorder %s99_s25, 0  ;;  %p2350_p6 = por %p167_p4, %p109_p1 }
   0x9   : > { %p1825_p7 = scmp.ge.s32.totalorder %s2283_s22, 2 }
   0xa   : > { %s2355_s28 = scalar_select %p100_p5, %s2271_s19, %s102_s26  }
   0xb   : > { %205 = sbr.rel (%p1825_p7) target bundleno = 60 (0x3c), region = 28 }
  0x12   : > { %208 = sbr.rel (!%p111_p3) target bundleno = 60 (0x3c), region = 32  ;;  %s210_s29 = sand.u32 (%p111_p3), 1, %s2271_s19  }
  0x13   : > { %s2008_s30 = smul.u32 (%p111_p3), 12, %s2279_s21 }
  0x14   : > { %s2106_s6 = smul.u32 (%p111_p3), 384, %s210_s29 }
  0x15   : > { %s2363_s9 = scalar_lea.vmem (%p111_p3), %s3217_s3, %s2008_s30 }
  0x16   : > { %v230_v0 = vld [vmem:[%s2363_s9] sm:$0xff] (%p111_p3)  ;;  %v232_v1 = vld [vmem:[%s2363_s9 + $0x18] sm:$0xff] (%p111_p3)  ;;  %v234_v2 = vld [vmem:[%s2363_s9 + $0x30] sm:$0xff] (%p111_p3)  ;;  %s2368_s10 = scalar_lea.vmem (%p111_p3), [#allocation3], %s2106_s6 }
  0x17   : > { %231 = vst [vmem:[%s2368_s10] sm:$0xff] (%p111_p3), %v230_v0  ;;  %233 = vst [vmem:[%s2368_s10 + $0xc] sm:$0xff] (%p111_p3), %v232_v1  ;;  %v236_v3 = vld [vmem:[%s2363_s9 + $0x48] sm:$0xff] (%p111_p3)  ;;  %v238_v4 = vld [vmem:[%s2363_s9 + $0x60] sm:$0xff] (%p111_p3) }
  0x18   : > { %235 = vst [vmem:[%s2368_s10 + $0x18] sm:$0xff] (%p111_p3), %v234_v2  ;;  %v240_v5 = vld [vmem:[%s2363_s9 + $0x78] sm:$0xff] (%p111_p3)  ;;  %237 = vst [vmem:[%s2368_s10 + $0x24] sm:$0xff] (%p111_p3), %v236_v3  ;;  %v242_v6 = vld [vmem:[%s2363_s9 + $0x90] sm:$0xff] (%p111_p3) }
  0x19   : > { %239 = vst [vmem:[%s2368_s10 + $0x30] sm:$0xff] %v238_v4  ;;  %241 = vst [vmem:[%s2368_s10 + $0x3c] sm:$0xff] %v240_v5  ;;  %v244_v7 = vld [vmem:[%s2363_s9 + $0xa8] sm:$0xff]  ;;  %v246_v8 = vld [vmem:[%s2363_s9 + $0xc0] sm:$0xff] }
  0x1a   : > { %243 = vst [vmem:[%s2368_s10 + $0x48] sm:$0xff] %v242_v6  ;;  %245 = vst [vmem:[%s2368_s10 + $0x54] sm:$0xff] %v244_v7  ;;  %v248_v9 = vld [vmem:[%s2363_s9 + $0xd8] sm:$0xff]  ;;  %v250_v10 = vld [vmem:[%s2363_s9 + $0xf0] sm:$0xff] }
  0x1b   : > { %247 = vst [vmem:[%s2368_s10 + $0x60] sm:$0xff] %v246_v8  ;;  %v252_v11 = vld [vmem:[%s2363_s9 + $0x108] sm:$0xff]  ;;  %249 = vst [vmem:[%s2368_s10 + $0x6c] sm:$0xff] %v248_v9  ;;  %v254_v12 = vld [vmem:[%s2363_s9 + $0x120] sm:$0xff] }
  0x1c   : > { %251 = vst [vmem:[%s2368_s10 + $0x78] sm:$0xff] %v250_v10  ;;  %253 = vst [vmem:[%s2368_s10 + $0x84] sm:$0xff] %v252_v11  ;;  %v256_v13 = vld [vmem:[%s2363_s9 + $0x138] sm:$0xff]  ;;  %v258_v14 = vld [vmem:[%s2363_s9 + $0x150] sm:$0xff] }
  0x1d   : > { %255 = vst [vmem:[%s2368_s10 + $0x90] sm:$0xff] %v254_v12  ;;  %257 = vst [vmem:[%s2368_s10 + $0x9c] sm:$0xff] %v256_v13  ;;  %v260_v15 = vld [vmem:[%s2363_s9 + $0x168] sm:$0xff]  ;;  %v262_v16 = vld [vmem:[%s2363_s9 + $0x180] sm:$0xff] }
  0x1e   : > { %259 = vst [vmem:[%s2368_s10 + $0xa8] sm:$0xff] %v258_v14  ;;  %v264_v17 = vld [vmem:[%s2363_s9 + $0x198] sm:$0xff]  ;;  %261 = vst [vmem:[%s2368_s10 + $0xb4] sm:$0xff] %v260_v15  ;;  %v266_v18 = vld [vmem:[%s2363_s9 + $0x1b0] sm:$0xff] }
  0x1f   : > { %263 = vst [vmem:[%s2368_s10 + $0xc0] sm:$0xff] %v262_v16  ;;  %265 = vst [vmem:[%s2368_s10 + $0xcc] sm:$0xff] %v264_v17  ;;  %v268_v19 = vld [vmem:[%s2363_s9 + $0x1c8] sm:$0xff]  ;;  %v270_v20 = vld [vmem:[%s2363_s9 + $0x1e0] sm:$0xff] }
  0x20   : > { %267 = vst [vmem:[%s2368_s10 + $0xd8] sm:$0xff] %v266_v18  ;;  %269 = vst [vmem:[%s2368_s10 + $0xe4] sm:$0xff] %v268_v19  ;;  %v272_v21 = vld [vmem:[%s2363_s9 + $0x1f8] sm:$0xff]  ;;  %v274_v22 = vld [vmem:[%s2363_s9 + $0x210] sm:$0xff] }
  0x21   : > { %271 = vst [vmem:[%s2368_s10 + $0xf0] sm:$0xff] %v270_v20  ;;  %v276_v23 = vld [vmem:[%s2363_s9 + $0x228] sm:$0xff]  ;;  %273 = vst [vmem:[%s2368_s10 + $0xfc] sm:$0xff] %v272_v21  ;;  %v278_v24 = vld [vmem:[%s2363_s9 + $0x240] sm:$0xff] }
  0x22   : > { %275 = vst [vmem:[%s2368_s10 + $0x108] sm:$0xff] %v274_v22  ;;  %277 = vst [vmem:[%s2368_s10 + $0x114] sm:$0xff] %v276_v23  ;;  %v280_v25 = vld [vmem:[%s2363_s9 + $0x258] sm:$0xff]  ;;  %v282_v26 = vld [vmem:[%s2363_s9 + $0x270] sm:$0xff] }
  0x23   : > { %279 = vst [vmem:[%s2368_s10 + $0x120] sm:$0xff] %v278_v24  ;;  %281 = vst [vmem:[%s2368_s10 + $0x12c] sm:$0xff] %v280_v25  ;;  %v284_v27 = vld [vmem:[%s2363_s9 + $0x288] sm:$0xff]  ;;  %v286_v28 = vld [vmem:[%s2363_s9 + $0x2a0] sm:$0xff] }
  0x24   : > { %283 = vst [vmem:[%s2368_s10 + $0x138] sm:$0xff] %v282_v26  ;;  %v288_v29 = vld [vmem:[%s2363_s9 + $0x2b8] sm:$0xff]  ;;  %285 = vst [vmem:[%s2368_s10 + $0x144] sm:$0xff] %v284_v27  ;;  %v290_v30 = vld [vmem:[%s2363_s9 + $0x2d0] sm:$0xff] }
  0x25   : > { %287 = vst [vmem:[%s2368_s10 + $0x150] sm:$0xff] %v286_v28  ;;  %289 = vst [vmem:[%s2368_s10 + $0x15c] sm:$0xff] %v288_v29  ;;  %v292_v31 = vld [vmem:[%s2363_s9 + $0x2e8] sm:$0xff]  ;;  %v1829_v33 = vld [vmem:[%s2363_s9 + $0x20] sm:$0xf] }
  0x26   : > { %v1827_v32 = vld [vmem:[%s2363_s9 + $0x8] sm:$0xf]  ;;  %291 = vst [vmem:[%s2368_s10 + $0x168] sm:$0xff] %v290_v30  ;;  %293 = vst [vmem:[%s2368_s10 + $0x174] sm:$0xff] %v292_v31  ;;  %v1831_v34 = vld [vmem:[%s2363_s9 + $0x38] sm:$0xf] }
  0x27   : > { %1828 = vst [vmem:[%s2368_s10 + $0x8] sm:$0xf] %v1827_v32  ;;  %v1833_v35 = vld [vmem:[%s2363_s9 + $0x50] sm:$0xf]  ;;  %1830 = vst [vmem:[%s2368_s10 + $0x14] sm:$0xf] %v1829_v33 }
  0x28   : > { %1832 = vst [vmem:[%s2368_s10 + $0x20] sm:$0xf] %v1831_v34  ;;  %1834 = vst [vmem:[%s2368_s10 + $0x2c] sm:$0xf] %v1833_v35  ;;  %v1835_v36 = vld [vmem:[%s2363_s9 + $0x68] sm:$0xf] }
  0x29   : > { %v1837_v37 = vld [vmem:[%s2363_s9 + $0x80] sm:$0xf]  ;;  %v1839_v38 = vld [vmem:[%s2363_s9 + $0x98] sm:$0xf]  ;;  %1836 = vst [vmem:[%s2368_s10 + $0x38] sm:$0xf] %v1835_v36 }
  0x2a   : > { %1838 = vst [vmem:[%s2368_s10 + $0x44] sm:$0xf] %v1837_v37  ;;  %1840 = vst [vmem:[%s2368_s10 + $0x50] sm:$0xf] %v1839_v38  ;;  %v1841_v39 = vld [vmem:[%s2363_s9 + $0xb0] sm:$0xf] }
  0x2b   : > { %v1843_v40 = vld [vmem:[%s2363_s9 + $0xc8] sm:$0xf]  ;;  %v1845_v41 = vld [vmem:[%s2363_s9 + $0xe0] sm:$0xf]  ;;  %1842 = vst [vmem:[%s2368_s10 + $0x5c] sm:$0xf] %v1841_v39 }
  0x2c   : > { %1844 = vst [vmem:[%s2368_s10 + $0x68] sm:$0xf] %v1843_v40  ;;  %1846 = vst [vmem:[%s2368_s10 + $0x74] sm:$0xf] %v1845_v41  ;;  %v1847_v42 = vld [vmem:[%s2363_s9 + $0xf8] sm:$0xf] }
  0x2d   : > { %v1849_v43 = vld [vmem:[%s2363_s9 + $0x110] sm:$0xf]  ;;  %v1851_v44 = vld [vmem:[%s2363_s9 + $0x128] sm:$0xf]  ;;  %1848 = vst [vmem:[%s2368_s10 + $0x80] sm:$0xf] %v1847_v42 }
  0x2e   : > { %1850 = vst [vmem:[%s2368_s10 + $0x8c] sm:$0xf] %v1849_v43  ;;  %1852 = vst [vmem:[%s2368_s10 + $0x98] sm:$0xf] %v1851_v44  ;;  %v1853_v45 = vld [vmem:[%s2363_s9 + $0x140] sm:$0xf] }
  0x2f   : > { %v1855_v46 = vld [vmem:[%s2363_s9 + $0x158] sm:$0xf]  ;;  %v1857_v47 = vld [vmem:[%s2363_s9 + $0x170] sm:$0xf]  ;;  %1854 = vst [vmem:[%s2368_s10 + $0xa4] sm:$0xf] %v1853_v45 }
  0x30   : > { %1856 = vst [vmem:[%s2368_s10 + $0xb0] sm:$0xf] %v1855_v46  ;;  %1858 = vst [vmem:[%s2368_s10 + $0xbc] sm:$0xf] %v1857_v47  ;;  %v1859_v48 = vld [vmem:[%s2363_s9 + $0x188] sm:$0xf] }
  0x31   : > { %v1861_v49 = vld [vmem:[%s2363_s9 + $0x1a0] sm:$0xf]  ;;  %v1863_v50 = vld [vmem:[%s2363_s9 + $0x1b8] sm:$0xf]  ;;  %1860 = vst [vmem:[%s2368_s10 + $0xc8] sm:$0xf] %v1859_v48 }
  0x32   : > { %1862 = vst [vmem:[%s2368_s10 + $0xd4] sm:$0xf] %v1861_v49  ;;  %1864 = vst [vmem:[%s2368_s10 + $0xe0] sm:$0xf] %v1863_v50  ;;  %v1865_v51 = vld [vmem:[%s2363_s9 + $0x1d0] sm:$0xf] }
  0x33   : > { %v1867_v52 = vld [vmem:[%s2363_s9 + $0x1e8] sm:$0xf]  ;;  %v1869_v53 = vld [vmem:[%s2363_s9 + $0x200] sm:$0xf]  ;;  %1866 = vst [vmem:[%s2368_s10 + $0xec] sm:$0xf] %v1865_v51 }
  0x34   : > { %1868 = vst [vmem:[%s2368_s10 + $0xf8] sm:$0xf] %v1867_v52  ;;  %1870 = vst [vmem:[%s2368_s10 + $0x104] sm:$0xf] %v1869_v53  ;;  %v1871_v54 = vld [vmem:[%s2363_s9 + $0x218] sm:$0xf] }
  0x35   : > { %v1873_v55 = vld [vmem:[%s2363_s9 + $0x230] sm:$0xf]  ;;  %v1875_v56 = vld [vmem:[%s2363_s9 + $0x248] sm:$0xf]  ;;  %1872 = vst [vmem:[%s2368_s10 + $0x110] sm:$0xf] %v1871_v54 }
  0x36   : > { %1874 = vst [vmem:[%s2368_s10 + $0x11c] sm:$0xf] %v1873_v55  ;;  %1876 = vst [vmem:[%s2368_s10 + $0x128] sm:$0xf] %v1875_v56  ;;  %v1877_v57 = vld [vmem:[%s2363_s9 + $0x260] sm:$0xf] }
  0x37   : > { %v1879_v58 = vld [vmem:[%s2363_s9 + $0x278] sm:$0xf]  ;;  %v1881_v59 = vld [vmem:[%s2363_s9 + $0x290] sm:$0xf]  ;;  %1878 = vst [vmem:[%s2368_s10 + $0x134] sm:$0xf] %v1877_v57 }
  0x38   : > { %1880 = vst [vmem:[%s2368_s10 + $0x140] sm:$0xf] %v1879_v58  ;;  %1882 = vst [vmem:[%s2368_s10 + $0x14c] sm:$0xf] %v1881_v59  ;;  %v1883_v60 = vld [vmem:[%s2363_s9 + $0x2a8] sm:$0xf] }
  0x39   : > { %v1885_v61 = vld [vmem:[%s2363_s9 + $0x2c0] sm:$0xf]  ;;  %v1887_v62 = vld [vmem:[%s2363_s9 + $0x2d8] sm:$0xf]  ;;  %1884 = vst [vmem:[%s2368_s10 + $0x158] sm:$0xf] %v1883_v60 }
  0x3a   : > { %1886 = vst [vmem:[%s2368_s10 + $0x164] sm:$0xf] %v1885_v61  ;;  %1888 = vst [vmem:[%s2368_s10 + $0x170] sm:$0xf] %v1887_v62  ;;  %v1889_v63 = vld [vmem:[%s2363_s9 + $0x2f0] sm:$0xf] }
  0x3b   : > { %1890 = vst [vmem:[%s2368_s10 + $0x17c] sm:$0xf] %v1889_v63 }
  0x3c PF: > { %p1891_p8 = scmp.ge.s32.totalorder %s2283_s22, 1  ;;  %p377_p9 = scmp.lt.s32.totalorder %s2283_s22, 3 }
  0x3e   : > { %p378_p10 = pnand %p1891_p8, %p377_p9 }
  0x3f   : > { %s384_s11 = sand.u32 (!%p378_p10), 1, %s2267_s18   ;;  %s428_s12 = smul.u32 (!%p378_p10), 3, %s2275_s20 }
  0x40   : > { %381 = sbr.rel (%p378_p10) target bundleno = 781 (0x30d), region = 62  ;;  %p1892_p12 = scmp.ne.s32.totalorder (!%p378_p10), %s2275_s20, 0 }
  0x41   : > { %s2107_s13 = smul.u32 (!%p378_p10), 384, %s384_s11  ;;  %p429_p11 = scmp.lt.s32.totalorder (!%p378_p10), %s428_s12, 5 }
  0x42   : > { %s2108_s14 = smul.u32 (!%p378_p10), 192, %s384_s11 }
  0x43   : > { %s2505_s24 = scalar_lea.vmem (!%p378_p10), [#allocation3], %s2107_s13 }
  0x44   : > { %s2507_s25 = scalar_lea.vmem (!%p378_p10), [#allocation4], %s2108_s14 }
  0x47   : > { %s3228_s12 = smov (!%p429_p11, %s428_s12), 5  ;;  %439 = sbr.rel (%p1892_p12) target bundleno = 432 (0x1b0), region = 70 }
  0x48   : > { %s431_s17 = scalar_lea.vmem %s3218_s4, %s3228_s12  ;;  %v2513_v0 = vld [vmem:[%s3214_s0] sm:$0xff] (!%p1892_p12)  ;;  %v2518_v1 = vld [vmem:[%s3214_s0 + $0x10] sm:$0xff] (!%p1892_p12)  ;;  %v2523_v2 = vld [vmem:[%s3214_s0 + $0x8] sm:$0xff] (!%p1892_p12) }
  0x49   : > { %v456_v3 = vunpack.c.l.bf16 (!%p1892_p12), %v2513_v0  ;;  %v457_v4 = vunpack.c.h.bf16 (!%p1892_p12), %v2513_v0  ;;  %v460_v5 = vunpack.c.l.bf16 (!%p1892_p12), %v2518_v1  ;;  %v461_v6 = vunpack.c.h.bf16 (!%p1892_p12), %v2518_v1  ;;  %v2532_v7 = vld [vmem:[%s3214_s0 + $0x18] sm:$0xff] (!%p1892_p12)  ;;  %v2537_v8 = vld [vmem:[%s3214_s0 + $0x20] sm:$0xff] (!%p1892_p12)  ;;  %v2546_v13 = vld [vmem:[%s3214_s0 + $0x28] sm:$0xff] (!%p1892_p12) }
  0x4a   : > { %v458_v9 = vunpack.c.l.bf16 (!%p1892_p12), %v2523_v2  ;;  %v459_v10 = vunpack.c.h.bf16 (!%p1892_p12), %v2523_v2  ;;  %v462_v11 = vunpack.c.l.bf16 (!%p1892_p12), %v2532_v7  ;;  %v463_v12 = vunpack.c.h.bf16 (!%p1892_p12), %v2532_v7  ;;  %v2571_v22 = vld [vmem:[%s3214_s0 + $0x30] sm:$0xff] (!%p1892_p12)  ;;  %v2576_v23 = vld [vmem:[%s3214_s0 + $0x38] sm:$0xff] (!%p1892_p12)  ;;  %v2593_v30 = vld [vmem:[%s3214_s0 + $0x40] sm:$0xff] (!%p1892_p12) }
  0x4b   : > { %v488_v14 = vadd.f32 (!%p1892_p12), %v457_v4, %v456_v3  ;;  %v494_v15 = vadd.f32 (!%p1892_p12), %v461_v6, %v460_v5  ;;  %v464_v16 = vunpack.c.l.bf16 (!%p1892_p12), %v2537_v8  ;;  %v465_v17 = vunpack.c.h.bf16 (!%p1892_p12), %v2537_v8  ;;  %v2598_v31 = vld [vmem:[%s3214_s0 + $0x48] sm:$0xff] (!%p1892_p12)  ;;  %v2615_v38 = vld [vmem:[%s3214_s0 + $0x50] sm:$0xff] (!%p1892_p12)  ;;  %v2620_v39 = vld [vmem:[%s3214_s0 + $0x58] sm:$0xff] (!%p1892_p12) }
  0x4c   : > { %v491_v18 = vadd.f32 (!%p1892_p12), %v459_v10, %v458_v9  ;;  %v497_v19 = vadd.f32 (!%p1892_p12), %v463_v12, %v462_v11  ;;  %v466_v20 = vunpack.c.l.bf16 (!%p1892_p12), %v2546_v13  ;;  %v467_v21 = vunpack.c.h.bf16 (!%p1892_p12), %v2546_v13  ;;  %v2637_v46 = vld [vmem:[%s3214_s0 + $0x60] sm:$0xff] (!%p1892_p12)  ;;  %v2642_v47 = vld [vmem:[%s3214_s0 + $0x68] sm:$0xff] (!%p1892_p12)  ;;  %v2659_v54 = vld [vmem:[%s3214_s0 + $0x70] sm:$0xff] (!%p1892_p12) }
  0x4d   : > { %489 = vadd.xlane.f32.xlu0 (!%p1892_p12), %v488_v14  ;;  %495 = vadd.xlane.f32.xlu1 (!%p1892_p12), %v494_v15  ;;  %v500_v24 = vadd.f32 (!%p1892_p12), %v465_v17, %v464_v16  ;;  %v468_v25 = vunpack.c.l.bf16 (!%p1892_p12), %v2571_v22  ;;  %v469_v27 = vunpack.c.h.bf16 (!%p1892_p12), %v2571_v22  ;;  %v470_v28 = vunpack.c.l.bf16 (!%p1892_p12), %v2576_v23  ;;  %v2664_v55 = vld [vmem:[%s3214_s0 + $0x78] sm:$0xff] (!%p1892_p12) }
  0x4e   : > { %v503_v26 = vadd.f32 %v467_v21, %v466_v20  ;;  %v471_v29 = vunpack.c.h.bf16 %v2576_v23  ;;  %v472_v32 = vunpack.c.l.bf16 %v2593_v30  ;;  %v473_v33 = vunpack.c.h.bf16 %v2593_v30 }
  0x4f   : > { %v506_v34 = vadd.f32 %v469_v27, %v468_v25  ;;  %v474_v36 = vunpack.c.l.bf16 %v2598_v31  ;;  %v475_v37 = vunpack.c.h.bf16 %v2598_v31  ;;  %v476_v41 = vunpack.c.l.bf16 %v2615_v38 }
  0x50   : > { %v509_v35 = vadd.f32 %v471_v29, %v470_v28  ;;  %v512_v40 = vadd.f32 %v473_v33, %v472_v32  ;;  %v477_v43 = vunpack.c.h.bf16 %v2615_v38  ;;  %v478_v44 = vunpack.c.l.bf16 %v2620_v39 }
  0x51   : > { %492 = vadd.xlane.f32.xlu0 %v491_v18  ;;  %498 = vadd.xlane.f32.xlu1 %v497_v19  ;;  %v515_v42 = vadd.f32 %v475_v37, %v474_v36  ;;  %v479_v45 = vunpack.c.h.bf16 %v2620_v39  ;;  %v480_v48 = vunpack.c.l.bf16 %v2637_v46  ;;  %v481_v49 = vunpack.c.h.bf16 %v2637_v46 }
  0x52   : > { %v518_v50 = vadd.f32 %v477_v43, %v476_v41  ;;  %v482_v52 = vunpack.c.l.bf16 %v2642_v47  ;;  %v483_v53 = vunpack.c.h.bf16 %v2642_v47  ;;  %v484_v57 = vunpack.c.l.bf16 %v2659_v54 }
  0x53   : > { %v521_v51 = vadd.f32 %v479_v45, %v478_v44  ;;  %v524_v56 = vadd.f32 %v481_v49, %v480_v48  ;;  %v485_v59 = vunpack.c.h.bf16 %v2659_v54  ;;  %v486_v60 = vunpack.c.l.bf16 %v2664_v55 }
  0x54   : > { %v527_v58 = vadd.f32 %v483_v53, %v482_v52  ;;  %v487_v61 = vunpack.c.h.bf16 %v2664_v55 }
  0x55   : > { %501 = vadd.xlane.f32.xlu0 %v500_v24  ;;  %504 = vadd.xlane.f32.xlu1 %v503_v26  ;;  %v530_v62 = vadd.f32 %v485_v59, %v484_v57 }
  0x56   : > { %v533_v63 = vadd.f32 %v487_v61, %v486_v60 }
  0x59   : > { %507 = vadd.xlane.f32.xlu0 %v506_v34  ;;  %510 = vadd.xlane.f32.xlu1 %v509_v35 }
  0x5d   : > { %513 = vadd.xlane.f32.xlu0 %v512_v40  ;;  %516 = vadd.xlane.f32.xlu1 %v515_v42 }
  0x61   : > { %519 = vadd.xlane.f32.xlu0 %v518_v50  ;;  %522 = vadd.xlane.f32.xlu1 %v521_v51 }
  0x65   : > { %525 = vadd.xlane.f32.xlu0 %v524_v56  ;;  %528 = vadd.xlane.f32.xlu1 %v527_v58 }
  0x69   : > { %531 = vadd.xlane.f32.xlu0 %v530_v62  ;;  %534 = vadd.xlane.f32.xlu1 %v533_v63 }
  0xda   : > { %v490_v14 = vpop.xlane.xlu0 %489  ;;  %v496_v15 = vpop.xlane.xlu1 %495 }
  0xdb   : > { %v537_v18 = vmul.f32 0.00390625, %v490_v14  ;;  %v539_v19 = vmul.f32 0.00390625, %v496_v15 }
  0xdd   : > { %v2688_v24 = vsub.f32 %v456_v3, %v537_v18  ;;  %v2692_v26 = vsub.f32 %v457_v4, %v537_v18  ;;  %v2696_v34 = vsub.f32 %v460_v5, %v539_v19  ;;  %v2700_v35 = vsub.f32 %v461_v6, %v539_v19 }
  0xde   : > { %v493_v40 = vpop.xlane.xlu0 %492  ;;  %v499_v42 = vpop.xlane.xlu1 %498 }
  0xdf   : > { %v538_v50 = vmul.f32 0.00390625, %v493_v40  ;;  %v540_v51 = vmul.f32 0.00390625, %v499_v42  ;;  %v585_v3 = vmul.f32 %v2688_v24, %v2688_v24  ;;  %v586_v0 = vmul.f32 %v2692_v26, %v2692_v26 }
  0xe0   : > { %v589_v4 = vmul.f32 %v2696_v34, %v2696_v34  ;;  %v590_v5 = vmul.f32 %v2700_v35, %v2700_v35 }
  0xe1   : > { %v2712_v1 = vsub.f32 %v458_v9, %v538_v50  ;;  %v2716_v6 = vsub.f32 %v459_v10, %v538_v50  ;;  %v2720_v56 = vsub.f32 %v462_v11, %v540_v51  ;;  %v2724_v58 = vsub.f32 %v463_v12, %v540_v51 }
  0xe2   : > { %v502_v62 = vpop.xlane.xlu0 %501  ;;  %v617_v63 = vadd.f32 %v586_v0, %v585_v3  ;;  %v505_v14 = vpop.xlane.xlu1 %504  ;;  %v623_v10 = vadd.f32 %v590_v5, %v589_v4 }
  0xe3   : > { %v541_v15 = vmul.f32 0.00390625, %v502_v62  ;;  %v542_v18 = vmul.f32 0.00390625, %v505_v14  ;;  %v587_v9 = vmul.f32 %v2712_v1, %v2712_v1  ;;  %v588_v2 = vmul.f32 %v2716_v6, %v2716_v6 }
  0xe4   : > { %618 = vadd.xlane.f32.xlu0 %v617_v63  ;;  %v591_v11 = vmul.f32 %v2720_v56, %v2720_v56  ;;  %v592_v7 = vmul.f32 %v2724_v58, %v2724_v58 }
  0xe5   : > { %v2736_v12 = vsub.f32 %v464_v16, %v541_v15  ;;  %v2740_v19 = vsub.f32 %v465_v17, %v541_v15  ;;  %v2744_v40 = vsub.f32 %v466_v20, %v542_v18  ;;  %v2748_v42 = vsub.f32 %v467_v21, %v542_v18 }
  0xe6   : > { %v508_v50 = vpop.xlane.xlu0 %507  ;;  %v620_v51 = vadd.f32 %v588_v2, %v587_v9  ;;  %v511_v3 = vpop.xlane.xlu1 %510  ;;  %v626_v17 = vadd.f32 %v592_v7, %v591_v11 }
  0xe7   : > { %v543_v0 = vmul.f32 0.00390625, %v508_v50  ;;  %v544_v4 = vmul.f32 0.00390625, %v511_v3  ;;  %v593_v16 = vmul.f32 %v2736_v12, %v2736_v12  ;;  %v594_v8 = vmul.f32 %v2740_v19, %v2740_v19 }
  0xe8   : > { %624 = vadd.xlane.f32.xlu0 %v623_v10  ;;  %621 = vadd.xlane.f32.xlu1 %v620_v51  ;;  %v595_v20 = vmul.f32 %v2744_v40, %v2744_v40  ;;  %v596_v13 = vmul.f32 %v2748_v42, %v2748_v42 }
  0xe9   : > { %v2760_v21 = vsub.f32 %v468_v25, %v543_v0  ;;  %v2764_v5 = vsub.f32 %v469_v27, %v543_v0  ;;  %v2768_v62 = vsub.f32 %v470_v28, %v544_v4  ;;  %v2772_v63 = vsub.f32 %v471_v29, %v544_v4 }
  0xea   : > { %v514_v14 = vpop.xlane.xlu0 %513  ;;  %v629_v15 = vadd.f32 %v594_v8, %v593_v16  ;;  %v517_v18 = vpop.xlane.xlu1 %516  ;;  %v632_v27 = vadd.f32 %v596_v13, %v595_v20 }
  0xeb   : > { %v545_v9 = vmul.f32 0.00390625, %v514_v14  ;;  %v546_v2 = vmul.f32 0.00390625, %v517_v18  ;;  %v597_v25 = vmul.f32 %v2760_v21, %v2760_v21  ;;  %v598_v22 = vmul.f32 %v2764_v5, %v2764_v5 }
  0xec   : > { %627 = vadd.xlane.f32.xlu1 %v626_v17  ;;  %630 = vadd.xlane.f32.xlu0 %v629_v15  ;;  %v599_v28 = vmul.f32 %v2768_v62, %v2768_v62  ;;  %v600_v23 = vmul.f32 %v2772_v63, %v2772_v63 }
  0xed   : > { %v2784_v29 = vsub.f32 %v472_v32, %v545_v9  ;;  %v2788_v10 = vsub.f32 %v473_v33, %v545_v9  ;;  %v2792_v11 = vsub.f32 %v474_v36, %v546_v2  ;;  %v2796_v7 = vsub.f32 %v475_v37, %v546_v2 }
  0xee   : > { %v520_v50 = vpop.xlane.xlu0 %519  ;;  %v635_v51 = vadd.f32 %v598_v22, %v597_v25  ;;  %v523_v3 = vpop.xlane.xlu1 %522  ;;  %v638_v33 = vadd.f32 %v600_v23, %v599_v28 }
  0xef   : > { %v547_v0 = vmul.f32 0.00390625, %v520_v50  ;;  %v548_v4 = vmul.f32 0.00390625, %v523_v3  ;;  %v601_v32 = vmul.f32 %v2784_v29, %v2784_v29  ;;  %v602_v30 = vmul.f32 %v2788_v10, %v2788_v10 }
  0xf0   : > { %633 = vadd.xlane.f32.xlu1 %v632_v27  ;;  %636 = vadd.xlane.f32.xlu0 %v635_v51  ;;  %v603_v36 = vmul.f32 %v2792_v11, %v2792_v11  ;;  %v604_v31 = vmul.f32 %v2796_v7, %v2796_v7 }
  0xf1   : > { %v2808_v37 = vsub.f32 %v476_v41, %v547_v0  ;;  %v2812_v16 = vsub.f32 %v477_v43, %v547_v0  ;;  %v2816_v8 = vsub.f32 %v478_v44, %v548_v4  ;;  %v2820_v17 = vsub.f32 %v479_v45, %v548_v4 }
  0xf2   : > { %v526_v20 = vpop.xlane.xlu0 %525  ;;  %v641_v13 = vadd.f32 %v602_v30, %v601_v32  ;;  %v529_v14 = vpop.xlane.xlu1 %528  ;;  %v644_v43 = vadd.f32 %v604_v31, %v603_v36  ;;  %v747_v36 = vlaneseq }
  0xf3   : > { %v549_v15 = vmul.f32 0.00390625, %v526_v20  ;;  %v550_v18 = vmul.f32 0.00390625, %v529_v14  ;;  %v605_v41 = vmul.f32 %v2808_v37, %v2808_v37  ;;  %v606_v38 = vmul.f32 %v2812_v16, %v2812_v16 }
  0xf4   : > { %639 = vadd.xlane.f32.xlu1 %v638_v33  ;;  %642 = vadd.xlane.f32.xlu0 %v641_v13  ;;  %v607_v44 = vmul.f32 %v2816_v8, %v2816_v8  ;;  %v608_v39 = vmul.f32 %v2820_v17, %v2820_v17 }
  0xf5   : > { %v2832_v45 = vsub.f32 %v480_v48, %v549_v15  ;;  %v2836_v9 = vsub.f32 %v481_v49, %v549_v15  ;;  %v2840_v2 = vsub.f32 %v482_v52, %v550_v18  ;;  %v2844_v25 = vsub.f32 %v483_v53, %v550_v18 }
  0xf6   : > { %v532_v22 = vpop.xlane.xlu0 %531  ;;  %v647_v27 = vadd.f32 %v606_v38, %v605_v41  ;;  %v535_v28 = vpop.xlane.xlu1 %534  ;;  %v650_v49 = vadd.f32 %v608_v39, %v607_v44  ;;  %v748_v18 = vshrl.u32 %v747_v36, 7 }
  0xf7   : > { %v551_v23 = vmul.f32 0.00390625, %v532_v22  ;;  %v552_v50 = vmul.f32 0.00390625, %v535_v28  ;;  %v609_v48 = vmul.f32 %v2832_v45, %v2832_v45  ;;  %v610_v46 = vmul.f32 %v2836_v9, %v2836_v9 }
  0xf8   : > { %645 = vadd.xlane.f32.xlu1 %v644_v43  ;;  %648 = vadd.xlane.f32.xlu0 %v647_v27  ;;  %v611_v52 = vmul.f32 %v2840_v2, %v2840_v2  ;;  %v612_v47 = vmul.f32 %v2844_v25, %v2844_v25  ;;  %v749_v27 = vsub.s32 0, %v748_v18  ;;  %v753_v28 = vsub.s32 1, %v748_v18 }
  0xf9   : > { %v2856_v53 = vsub.f32 %v484_v57, %v551_v23  ;;  %v2860_v51 = vsub.f32 %v485_v59, %v551_v23  ;;  %v2864_v3 = vsub.f32 %v486_v60, %v552_v50  ;;  %v2868_v0 = vsub.f32 %v487_v61, %v552_v50  ;;  %v745_v23 = vld [vmem:[%s3215_s1] sm:$0x3] }
  0xfa   : > { %v653_v4 = vadd.f32 %v610_v46, %v609_v48  ;;  %v656_v54 = vadd.f32 %v612_v47, %v611_v52  ;;  %v789_v52 = vld [vmem:[%s3216_s2] sm:$0x3] }
  0xfb   : > { %v613_v32 = vmul.f32 %v2856_v53, %v2856_v53  ;;  %v614_v57 = vmul.f32 %v2860_v51, %v2860_v51  ;;  %v615_v59 = vmul.f32 %v2864_v3, %v2864_v3  ;;  %v616_v60 = vmul.f32 %v2868_v0, %v2868_v0 }
  0xfc   : > { %651 = vadd.xlane.f32.xlu1 %v650_v49  ;;  %654 = vadd.xlane.f32.xlu0 %v653_v4 }
  0xfd   : > { %v659_v30 = vadd.f32 %v614_v57, %v613_v32  ;;  %v662_v55 = vadd.f32 %v616_v60, %v615_v59  ;;  %v2884_v32 = vrot.slane %v745_v23, %v749_v27  ;;  %v2886_v57 = vrot.slane %v745_v23, %v753_v28 }
 0x100   : > { %657 = vadd.xlane.f32.xlu1 %v656_v54  ;;  %660 = vadd.xlane.f32.xlu0 %v659_v30  ;;  %v2888_v30 = vrot.slane %v789_v52, %v749_v27 }
 0x104   : > { %663 = vadd.xlane.f32.xlu1 %v662_v55 }
 0x171   : > { %v619_v61 = vpop.xlane.xlu0 %618 }
 0x172   : > { %v665_v33 = vmul.f32 0.00390625, %v619_v61 }
 0x174   : > { %v681_v31 = vadd.f32 1e-12, %v665_v33 }
 0x175   : > { %v622_v20 = vpop.xlane.xlu1 %621  ;;  %v625_v13 = vpop.xlane.xlu0 %624 }
 0x176   : > { %2149 = vrsqrt.f32 %v681_v31  ;;  %v666_v14 = vmul.f32 0.00390625, %v622_v20  ;;  %v667_v15 = vmul.f32 0.00390625, %v625_v13  ;;  %v2892_v13 = vrot.slane %v789_v52, %v753_v28 }
 0x178   : > { %v682_v41 = vadd.f32 1e-12, %v666_v14  ;;  %v683_v38 = vadd.f32 1e-12, %v667_v15 }
 0x179   : > { %v628_v43 = vpop.xlane.xlu1 %627  ;;  %v631_v44 = vpop.xlane.xlu0 %630 }
 0x17a   : > { %2151 = vrsqrt.f32 %v682_v41  ;;  %v668_v39 = vmul.f32 0.00390625, %v628_v43  ;;  %v669_v22 = vmul.f32 0.00390625, %v631_v44 }
 0x17b   : > { %2153 = vrsqrt.f32 %v683_v38 }
 0x17c   : > { %v684_v50 = vadd.f32 1e-12, %v668_v39  ;;  %v685_v48 = vadd.f32 1e-12, %v669_v22 }
 0x17d   : > { %v634_v46 = vpop.xlane.xlu1 %633  ;;  %v637_v49 = vpop.xlane.xlu0 %636 }
 0x17e   : > { %2155 = vrsqrt.f32 %v684_v50  ;;  %v670_v47 = vmul.f32 0.00390625, %v634_v46  ;;  %v671_v4 = vmul.f32 0.00390625, %v637_v49 }
 0x17f   : > { %2157 = vrsqrt.f32 %v685_v48 }
 0x180   : > { %v2150_v54 = vpop.eup %2149  ;;  %v686_v59 = vadd.f32 1e-12, %v670_v47  ;;  %v687_v60 = vadd.f32 1e-12, %v671_v4 }
 0x181   : > { %v713_v55 = vmul.f32 %v2150_v54, %v2688_v24  ;;  %v714_v61 = vmul.f32 %v2150_v54, %v2692_v26  ;;  %v640_v33 = vpop.xlane.xlu1 %639  ;;  %v643_v36 = vpop.xlane.xlu0 %642 }
 0x182   : > { %2159 = vrsqrt.f32 %v686_v59  ;;  %v672_v31 = vmul.f32 0.00390625, %v640_v33  ;;  %v673_v20 = vmul.f32 0.00390625, %v643_v36 }
 0x183   : > { %v757_v14 = vmul.f32 %v2884_v32, %v713_v55  ;;  %v758_v15 = vmul.f32 %v2886_v57, %v714_v61  ;;  %2161 = vrsqrt.f32 %v687_v60 }
 0x184   : > { %v2152_v18 = vpop.eup %2151  ;;  %v688_v41 = vadd.f32 1e-12, %v672_v31  ;;  %v689_v38 = vadd.f32 1e-12, %v673_v20 }
 0x185   : > { %v2154_v43 = vpop.eup %2153  ;;  %v801_v24 = vadd.f32 %v2888_v30, %v757_v14  ;;  %v715_v26 = vmul.f32 %v2152_v18, %v2712_v1  ;;  %v716_v44 = vmul.f32 %v2152_v18, %v2716_v6  ;;  %v646_v39 = vpop.xlane.xlu1 %645  ;;  %v802_v50 = vadd.f32 %v2892_v13, %v758_v15 }
 0x186   : > { %v649_v22 = vpop.xlane.xlu0 %648  ;;  %v717_v27 = vmul.f32 %v2154_v43, %v2696_v34  ;;  %v718_v28 = vmul.f32 %v2154_v43, %v2700_v35  ;;  %2163 = vrsqrt.f32 %v688_v41  ;;  %v674_v23 = vmul.f32 0.00390625, %v646_v39 }
 0x187   : > { %v759_v48 = vmul.f32 %v2884_v32, %v715_v26  ;;  %v760_v46 = vmul.f32 %v2886_v57, %v716_v44  ;;  %2165 = vrsqrt.f32 %v689_v38  ;;  %v675_v47 = vmul.f32 0.00390625, %v649_v22 }
 0x188   : > { %v2156_v49 = vpop.eup %2155  ;;  %v761_v1 = vmul.f32 %v2884_v32, %v717_v27  ;;  %v762_v6 = vmul.f32 %v2886_v57, %v718_v28  ;;  %v690_v52 = vadd.f32 1e-12, %v674_v23 }
 0x189   : > { %v2158_v4 = vpop.eup %2157  ;;  %v803_v34 = vadd.f32 %v2888_v30, %v759_v48  ;;  %v804_v35 = vadd.f32 %v2892_v13, %v760_v46  ;;  %v719_v54 = vmul.f32 %v2156_v49, %v2720_v56  ;;  %v720_v59 = vmul.f32 %v2156_v49, %v2724_v58  ;;  %v652_v60 = vpop.xlane.xlu1 %651 }
 0x18a   : > { %v805_v55 = vadd.f32 %v2888_v30, %v761_v1  ;;  %v806_v61 = vadd.f32 %v2892_v13, %v762_v6  ;;  %v721_v33 = vmul.f32 %v2158_v4, %v2736_v12  ;;  %v722_v36 = vmul.f32 %v2158_v4, %v2740_v19  ;;  %v655_v38 = vpop.xlane.xlu0 %654 }
 0x18b   : > { %v833_v31 = vpack.c.bf16 %v803_v34, %v801_v24  ;;  %v834_v20 = vpack.c.bf16 %v804_v35, %v802_v50  ;;  %v763_v14 = vmul.f32 %v2884_v32, %v719_v54  ;;  %v764_v15 = vmul.f32 %v2886_v57, %v720_v59 }
 0x18c   : > { %v2160_v18 = vpop.eup %2159  ;;  %v765_v56 = vmul.f32 %v2884_v32, %v721_v33  ;;  %v766_v58 = vmul.f32 %v2886_v57, %v722_v36  ;;  %2167 = vrsqrt.f32 %v690_v52  ;;  %v691_v41 = vadd.f32 1e-12, %v675_v47 }
 0x18d   : > { %v2162_v43 = vpop.eup %2161  ;;  %849 = vst [vmem:[#allocation2] sm:$0xff] %v833_v31  ;;  %850 = vst [vmem:[#allocation2 + $0x8] sm:$0xff] %v834_v20  ;;  %v807_v12 = vadd.f32 %v2888_v30, %v763_v14  ;;  %v808_v19 = vadd.f32 %v2892_v13, %v764_v15  ;;  %v723_v24 = vmul.f32 %v2160_v18, %v2744_v40  ;;  %v658_v46 = vpop.xlane.xlu1 %657  ;;  %v676_v1 = vmul.f32 0.00390625, %v652_v60 }
 0x18e   : > { %v724_v26 = vmul.f32 %v2160_v18, %v2748_v42  ;;  %v809_v44 = vadd.f32 %v2888_v30, %v765_v56  ;;  %v810_v39 = vadd.f32 %v2892_v13, %v766_v58  ;;  %v725_v22 = vmul.f32 %v2162_v43, %v2760_v21  ;;  %v661_v35 = vpop.xlane.xlu0 %660 }
 0x18f   : > { %v726_v27 = vmul.f32 %v2162_v43, %v2764_v5  ;;  %v835_v28 = vpack.c.bf16 %v807_v12, %v805_v55  ;;  %v836_v23 = vpack.c.bf16 %v808_v19, %v806_v61  ;;  %v767_v50 = vmul.f32 %v2884_v32, %v723_v24 }
 0x190   : > { %v768_v48 = vmul.f32 %v2886_v57, %v724_v26  ;;  %v2164_v49 = vpop.eup %2163  ;;  %v769_v40 = vmul.f32 %v2884_v32, %v725_v22  ;;  %2169 = vrsqrt.f32 %v691_v41  ;;  %v692_v36 = vadd.f32 1e-12, %v676_v1 }
 0x191   : > { %v770_v42 = vmul.f32 %v2886_v57, %v726_v27  ;;  %v2166_v6 = vpop.eup %2165  ;;  %851 = vst [vmem:[#allocation2 + $0x10] sm:$0xff] %v835_v28  ;;  %852 = vst [vmem:[#allocation2 + $0x18] sm:$0xff] %v836_v23  ;;  %v811_v21 = vadd.f32 %v2888_v30, %v767_v50  ;;  %v727_v52 = vmul.f32 %v2164_v49, %v2768_v62  ;;  %v677_v31 = vmul.f32 0.00390625, %v655_v38  ;;  %v664_v20 = vpop.xlane.xlu1 %663 }
 0x192   : > { %v812_v5 = vadd.f32 %v2892_v13, %v768_v48  ;;  %v728_v47 = vmul.f32 %v2164_v49, %v2772_v63  ;;  %v729_v4 = vmul.f32 %v2166_v6, %v2784_v29  ;;  %v730_v34 = vmul.f32 %v2166_v6, %v2788_v10 }
 0x193   : > { %v837_v54 = vpack.c.bf16 %v811_v21, %v809_v44  ;;  %v771_v60 = vmul.f32 %v2884_v32, %v727_v52  ;;  %v813_v61 = vadd.f32 %v2888_v30, %v769_v40  ;;  %v814_v33 = vadd.f32 %v2892_v13, %v770_v42 }
 0x194   : > { %v838_v59 = vpack.c.bf16 %v812_v5, %v810_v39  ;;  %v772_v55 = vmul.f32 %v2886_v57, %v728_v47  ;;  %v678_v29 = vmul.f32 0.00390625, %v658_v46  ;;  %v679_v10 = vmul.f32 0.00390625, %v661_v35 }
 0x195   : > { %853 = vst [vmem:[#allocation2 + $0x20] sm:$0xff] %v837_v54  ;;  %v815_v62 = vadd.f32 %v2888_v30, %v771_v60  ;;  %v773_v15 = vmul.f32 %v2884_v32, %v729_v4  ;;  %v774_v18 = vmul.f32 %v2886_v57, %v730_v34  ;;  %2171 = vrsqrt.f32 %v692_v36 }
 0x196   : > { %854 = vst [vmem:[#allocation2 + $0x28] sm:$0xff] %v838_v59  ;;  %v816_v63 = vadd.f32 %v2892_v13, %v772_v55  ;;  %v2168_v14 = vpop.eup %2167  ;;  %v693_v56 = vadd.f32 1e-12, %v677_v31  ;;  %v694_v12 = vadd.f32 1e-12, %v678_v29  ;;  %v680_v24 = vmul.f32 0.00390625, %v664_v20 }
 0x197   : > { %v839_v58 = vpack.c.bf16 %v815_v62, %v813_v61  ;;  %v731_v38 = vmul.f32 %v2168_v14, %v2792_v11  ;;  %v732_v43 = vmul.f32 %v2168_v14, %v2796_v7  ;;  %v695_v19 = vadd.f32 1e-12, %v679_v10 }
 0x198   : > { %v840_v41 = vpack.c.bf16 %v816_v63, %v814_v33  ;;  %2173 = vrsqrt.f32 %v693_v56  ;;  %v696_v22 = vadd.f32 1e-12, %v680_v24  ;;  %v817_v27 = vadd.f32 %v2888_v30, %v773_v15 }
 0x199   : > { %855 = vst [vmem:[#allocation2 + $0x30] sm:$0xff] %v839_v58  ;;  %v775_v26 = vmul.f32 %v2884_v32, %v731_v38  ;;  %v776_v44 = vmul.f32 %v2886_v57, %v732_v43  ;;  %2175 = vrsqrt.f32 %v694_v12  ;;  %v818_v28 = vadd.f32 %v2892_v13, %v774_v18 }
 0x19a   : > { %856 = vst [vmem:[#allocation2 + $0x38] sm:$0xff] %v840_v41  ;;  %v2170_v39 = vpop.eup %2169  ;;  %2177 = vrsqrt.f32 %v695_v19 }
 0x19b   : > { %v819_v11 = vadd.f32 %v2888_v30, %v775_v26  ;;  %v820_v7 = vadd.f32 %v2892_v13, %v776_v44  ;;  %v733_v23 = vmul.f32 %v2170_v39, %v2808_v37  ;;  %v734_v50 = vmul.f32 %v2170_v39, %v2812_v16 }
 0x19c   : > { %2179 = vrsqrt.f32 %v696_v22 }
 0x19d   : > { %v841_v48 = vpack.c.bf16 %v819_v11, %v817_v27  ;;  %v842_v46 = vpack.c.bf16 %v820_v7, %v818_v28  ;;  %v777_v40 = vmul.f32 %v2884_v32, %v733_v23  ;;  %v778_v42 = vmul.f32 %v2886_v57, %v734_v50 }
 0x19f   : > { %857 = vst [vmem:[#allocation2 + $0x40] sm:$0xff] %v841_v48  ;;  %858 = vst [vmem:[#allocation2 + $0x48] sm:$0xff] %v842_v46  ;;  %v2172_v49 = vpop.eup %2171  ;;  %v821_v4 = vadd.f32 %v2888_v30, %v777_v40  ;;  %v822_v34 = vadd.f32 %v2892_v13, %v778_v42 }
 0x1a0   : > { %v735_v1 = vmul.f32 %v2172_v49, %v2816_v8  ;;  %v736_v6 = vmul.f32 %v2172_v49, %v2820_v17 }
 0x1a2   : > { %v2174_v21 = vpop.eup %2173  ;;  %v779_v37 = vmul.f32 %v2884_v32, %v735_v1  ;;  %v780_v16 = vmul.f32 %v2886_v57, %v736_v6 }
 0x1a3   : > { %v737_v5 = vmul.f32 %v2174_v21, %v2832_v45  ;;  %v738_v52 = vmul.f32 %v2174_v21, %v2836_v9  ;;  %v2176_v47 = vpop.eup %2175 }
 0x1a4   : > { %v823_v35 = vadd.f32 %v2888_v30, %v779_v37  ;;  %v824_v8 = vadd.f32 %v2892_v13, %v780_v16  ;;  %v2178_v59 = vpop.eup %2177  ;;  %v739_v60 = vmul.f32 %v2176_v47, %v2840_v2  ;;  %v740_v45 = vmul.f32 %v2176_v47, %v2844_v25 }
 0x1a5   : > { %v781_v17 = vmul.f32 %v2884_v32, %v737_v5  ;;  %v782_v54 = vmul.f32 %v2886_v57, %v738_v52  ;;  %v741_v31 = vmul.f32 %v2178_v59, %v2856_v53  ;;  %v742_v62 = vmul.f32 %v2178_v59, %v2860_v51 }
 0x1a6   : > { %v843_v55 = vpack.c.bf16 %v823_v35, %v821_v4  ;;  %v844_v9 = vpack.c.bf16 %v824_v8, %v822_v34  ;;  %v2180_v61 = vpop.eup %2179  ;;  %v783_v33 = vmul.f32 %v2884_v32, %v739_v60  ;;  %v784_v36 = vmul.f32 %v2886_v57, %v740_v45 }
 0x1a7   : > { %v825_v63 = vadd.f32 %v2888_v30, %v781_v17  ;;  %v826_v29 = vadd.f32 %v2892_v13, %v782_v54  ;;  %v743_v2 = vmul.f32 %v2180_v61, %v2864_v3  ;;  %v744_v25 = vmul.f32 %v2180_v61, %v2868_v0 }
 0x1a8   : > { %859 = vst [vmem:[#allocation2 + $0x50] sm:$0xff] %v843_v55  ;;  %860 = vst [vmem:[#allocation2 + $0x58] sm:$0xff] %v844_v9  ;;  %v827_v10 = vadd.f32 %v2888_v30, %v783_v33  ;;  %v828_v20 = vadd.f32 %v2892_v13, %v784_v36  ;;  %v785_v14 = vmul.f32 %v2884_v32, %v741_v31 }
 0x1a9   : > { %v786_v53 = vmul.f32 %v2886_v57, %v742_v62  ;;  %v787_v51 = vmul.f32 %v2884_v32, %v743_v2  ;;  %v788_v15 = vmul.f32 %v2886_v57, %v744_v25 }
 0x1aa   : > { %v845_v18 = vpack.c.bf16 %v827_v10, %v825_v63  ;;  %v846_v56 = vpack.c.bf16 %v828_v20, %v826_v29  ;;  %v829_v58 = vadd.f32 %v2888_v30, %v785_v14 }
 0x1ab   : > { %v830_v3 = vadd.f32 %v2892_v13, %v786_v53  ;;  %v831_v0 = vadd.f32 %v2888_v30, %v787_v51  ;;  %v832_v41 = vadd.f32 %v2892_v13, %v788_v15 }
 0x1ac   : > { %861 = vst [vmem:[#allocation2 + $0x60] sm:$0xff] %v845_v18  ;;  %862 = vst [vmem:[#allocation2 + $0x68] sm:$0xff] %v846_v56 }
 0x1ad   : > { %v847_v38 = vpack.c.bf16 %v831_v0, %v829_v58  ;;  %v848_v43 = vpack.c.bf16 %v832_v41, %v830_v3 }
 0x1af   : > { %863 = vst [vmem:[#allocation2 + $0x70] sm:$0xff] %v847_v38  ;;  %864 = vst [vmem:[#allocation2 + $0x78] sm:$0xff] %v848_v43 }
 0x1b0 PF: > { %v2181_v32 = vld [vmem:[%s2505_s24 + $0x4] ss:$12 sps:$4 sm:$0xff]   ;;  %v2183_v57 = vld [vmem:[%s2505_s24] ss:$12 sps:$4 sm:$0xff]   ;;  %v2184_v30 = vld [vmem:[%s2505_s24 + $0x1c] ss:$12 sps:$4 sm:$0xff]  }
 0x1b1   : > { %1218 = vmatprep.subr.bf16.mxu0 %v2181_v32  ;;  %v2186_v13 = vld [vmem:[%s2505_s24 + $0x18] ss:$12 sps:$4 sm:$0xff]   ;;  %v2187_v12 = vld [vmem:[%s2505_s24 + $0x34] ss:$12 sps:$4 sm:$0xff]   ;;  %v2189_v19 = vld [vmem:[%s2505_s24 + $0x30] ss:$12 sps:$4 sm:$0xff]   ;;  %v947_v32 = vlaneseq }
 0x1b2   : > { %1219 = vmatpush1.bf16.msra.mxu0 %v2183_v57  ;;  %v2190_v24 = vld [vmem:[%s2505_s24 + $0x4c] ss:$12 sps:$4 sm:$0xff]   ;;  %v2202_v26 = vld [vmem:[%s2505_s24 + $0xc8] ss:$12 sps:$4 sm:$0xff]   ;;  %v2193_v39 = vld [vmem:[%s2505_s24 + $0x64] ss:$12 sps:$4 sm:$0xff]  }
 0x1b3   : > { %1220 = vmatprep.subr.bf16.mxu0 %v2184_v30  ;;  %v2192_v44 = vld [vmem:[%s2505_s24 + $0x48] ss:$12 sps:$4 sm:$0xff]   ;;  %2042 = vmatprep.subr.bf16.mxu1 %v2202_v26  ;;  %v2207_v27 = vld [vmem:[%s2505_s24 + $0xe0] ss:$12 sps:$4 sm:$0xff]   ;;  %v2212_v23 = vld [vmem:[%s2505_s24 + $0xf8] ss:$12 sps:$4 sm:$0xff]  }
 0x1b4   : > { %v2205_v22 = vld [vmem:[%s2505_s24 + $0x8] ss:$12 sps:$4 sm:$0xff]   ;;  %v2195_v28 = vld [vmem:[%s2505_s24 + $0x60] ss:$12 sps:$4 sm:$0xff]   ;;  %v2198_v50 = vld [vmem:[%s2505_s24 + $0x78] ss:$12 sps:$4 sm:$0xff]  }
 0x1b5   : > { %2043 = vmatpush3.bf16.msra.mxu1 %v2205_v22  ;;  %v2196_v11 = vld [vmem:[%s2505_s24 + $0x7c] ss:$12 sps:$4 sm:$0xff]   ;;  %v2210_v7 = vld [vmem:[%s2505_s24 + $0x20] ss:$12 sps:$4 sm:$0xff]   ;;  %v2215_v48 = vld [vmem:[%s2505_s24 + $0x38] ss:$12 sps:$4 sm:$0xff]  }
 0x1b6   : > { %1221 = vmatpush1.bf16.msra.mxu0 %v2186_v13  ;;  %2044 = vmatprep.subr.bf16.mxu1 %v2207_v27  ;;  %v2199_v46 = vld [vmem:[%s2505_s24 + $0x94] ss:$12 sps:$4 sm:$0xff]   ;;  %v2217_v49 = vld [vmem:[%s2505_s24 + $0x110] ss:$12 sps:$4 sm:$0xff]   ;;  %v2203_v6 = vld [vmem:[%s2505_s24 + $0xac] ss:$12 sps:$4 sm:$0xff]  }
 0x1b7   : > { %1222 = vmatprep.subr.bf16.mxu0 %v2187_v12  ;;  %v2201_v40 = vld [vmem:[%s2505_s24 + $0x90] ss:$12 sps:$4 sm:$0xff]   ;;  %v2222_v1 = vld [vmem:[%s2505_s24 + $0x128] ss:$12 sps:$4 sm:$0xff]   ;;  %v2227_v16 = vld [vmem:[%s2505_s24 + $0x140] ss:$12 sps:$4 sm:$0xff]  }
 0x1b8   : > { %v2220_v42 = vld [vmem:[%s2505_s24 + $0x50] ss:$12 sps:$4 sm:$0xff]   ;;  %v2206_v21 = vld [vmem:[%s2505_s24 + $0xa8] ss:$12 sps:$4 sm:$0xff]   ;;  %v2211_v52 = vld [vmem:[%s2505_s24 + $0xc0] ss:$12 sps:$4 sm:$0xff]  }
 0x1b9   : > { %2045 = vmatpush3.bf16.msra.mxu1 %v2210_v7  ;;  %v2225_v37 = vld [vmem:[%s2505_s24 + $0x68] ss:$12 sps:$4 sm:$0xff]   ;;  %v2208_v5 = vld [vmem:[%s2505_s24 + $0xc4] ss:$12 sps:$4 sm:$0xff]   ;;  %v2230_v47 = vld [vmem:[%s2505_s24 + $0x80] ss:$12 sps:$4 sm:$0xff]  }
 0x1ba   : > { %1223 = vmatpush1.bf16.msra.mxu0 %v2189_v19  ;;  %2046 = vmatprep.subr.bf16.mxu1 %v2212_v23  ;;  %v2232_v4 = vld [vmem:[%s2505_s24 + $0x158] ss:$12 sps:$4 sm:$0xff]   ;;  %v2213_v34 = vld [vmem:[%s2505_s24 + $0xdc] ss:$12 sps:$4 sm:$0xff]   ;;  %v2218_v54 = vld [vmem:[%s2505_s24 + $0xf4] ss:$12 sps:$4 sm:$0xff]  }
 0x1bb   : > { %1224 = vmatprep.subr.bf16.mxu0 %v2190_v24  ;;  %v2235_v35 = vld [vmem:[%s2505_s24 + $0x98] ss:$12 sps:$4 sm:$0xff]   ;;  %v2237_v17 = vld [vmem:[%s2505_s24 + $0x170] ss:$12 sps:$4 sm:$0xff]   ;;  %v866_v59 = vld [vmem:[#allocation2 + $0x8] sm:$0xff]  ;;  %v948_v57 = vshrl.u32 %v947_v32, 7 }
 0x1bc   : > { %v2216_v8 = vld [vmem:[%s2505_s24 + $0xd8] ss:$12 sps:$4 sm:$0xff]   ;;  %1363 = vmatprep.mubr.bf16.mxu1 %v866_v59  ;;  %1250 = vmatprep.mubr.bf16.mxu0 %v866_v59  ;;  %v2240_v60 = vld [vmem:[%s2505_s24 + $0xb0] ss:$12 sps:$4 sm:$0xff]   ;;  %v2226_v61 = vld [vmem:[%s2505_s24 + $0x108] ss:$12 sps:$4 sm:$0xff]  }
 0x1bd   : > { %2047 = vmatpush3.bf16.msra.mxu1 %v2215_v48  ;;  %v2221_v45 = vld [vmem:[%s2505_s24 + $0xf0] ss:$12 sps:$4 sm:$0xff]   ;;  %v2223_v55 = vld [vmem:[%s2505_s24 + $0x10c] ss:$12 sps:$4 sm:$0xff]   ;;  %v865_v9 = vld [vmem:[#allocation2] sm:$0xff]  ;;  %v957_v30 = vsub.s32 2, %v948_v57 }
 0x1be   : > { %1225 = vmatpush1.bf16.msra.mxu0 %v2192_v44  ;;  %2048 = vmatprep.subr.bf16.mxu1 %v2217_v49  ;;  %v868_v33 = vld [vmem:[#allocation2 + $0x18] sm:$0xff]  ;;  %v2228_v36 = vld [vmem:[%s2505_s24 + $0x124] ss:$12 sps:$4 sm:$0xff]   ;;  %v2231_v31 = vld [vmem:[%s2505_s24 + $0x120] ss:$12 sps:$4 sm:$0xff]   ;;  %s2041_s12 = smul.u32 (%p2350_p6), 12, %s2275_s20 }
 0x1bf   : > { %1226 = vmatprep.subr.bf16.mxu0 %v2193_v39  ;;  %v2233_v62 = vld [vmem:[%s2505_s24 + $0x13c] ss:$12 sps:$4 sm:$0xff]   ;;  %v867_v63 = vld [vmem:[#allocation2 + $0x10] sm:$0xff]  ;;  %v2236_v29 = vld [vmem:[%s2505_s24 + $0x138] ss:$12 sps:$4 sm:$0xff]  }
 0x1c0   : > { %v870_v2 = vld [vmem:[#allocation2 + $0x28] sm:$0xff]  ;;  %v2238_v25 = vld [vmem:[%s2505_s24 + $0x154] ss:$12 sps:$4 sm:$0xff]   ;;  %v2241_v10 = vld [vmem:[%s2505_s24 + $0x150] ss:$12 sps:$4 sm:$0xff]   ;;  %s3139_s11 = scalar_lea.vmem (%p2350_p6), %s3219_s5, %s2041_s12 }
 0x1c1   : > { %2049 = vmatpush3.bf16.msra.mxu1 %v2220_v42  ;;  %v2242_v20 = vld [vmem:[%s2505_s24 + $0x16c] ss:$12 sps:$4 sm:$0xff]   ;;  %v869_v14 = vld [vmem:[#allocation2 + $0x20] sm:$0xff]  ;;  %v2244_v53 = vld [vmem:[%s2505_s24 + $0x168] ss:$12 sps:$4 sm:$0xff]  }
 0x1c2   : > { %1227 = vmatpush1.bf16.msra.mxu0 %v2195_v28  ;;  %2050 = vmatprep.subr.bf16.mxu1 %v2222_v1  ;;  %v872_v51 = vld [vmem:[#allocation2 + $0x38] sm:$0xff]  ;;  %v871_v15 = vld [vmem:[#allocation2 + $0x30] sm:$0xff]  ;;  %v874_v18 = vld [vmem:[#allocation2 + $0x48] sm:$0xff]  ;;  %v949_v1 = vsub.s32 0, %v948_v57 }
 0x1c3   : > { %1228 = vmatprep.subr.bf16.mxu0 %v2196_v11  ;;  %v873_v56 = vld [vmem:[#allocation2 + $0x40] sm:$0xff]  ;;  %v876_v58 = vld [vmem:[#allocation2 + $0x58] sm:$0xff]  ;;  %v875_v3 = vld [vmem:[#allocation2 + $0x50] sm:$0xff] }
 0x1c4   : > { %v878_v0 = vld [vmem:[#allocation2 + $0x68] sm:$0xff]  ;;  %v877_v41 = vld [vmem:[#allocation2 + $0x60] sm:$0xff]  ;;  %v880_v38 = vld [vmem:[#allocation2 + $0x78] sm:$0xff] }
 0x1c5   : > { %2051 = vmatpush3.bf16.msra.mxu1 %v2225_v37  ;;  %v879_v43 = vld [vmem:[#allocation2 + $0x70] sm:$0xff]  ;;  %v945_v13 = vld [vmem:[%s431_s17] sm:$0x7]  ;;  %v953_v37 = vsub.s32 1, %v948_v57 }
 0x1c6   : > { %1229 = vmatpush1.bf16.msra.mxu0 %v2198_v50  ;;  %2052 = vmatprep.subr.bf16.mxu1 %v2227_v16  ;;  %v3041_v19 = vrot.slane %v945_v13, %v957_v30 }
 0x1c7   : > { %1230 = vmatprep.subr.bf16.mxu0 %v2199_v46 }
 0x1c9   : > { %2053 = vmatpush3.bf16.msra.mxu1 %v2230_v47  ;;  %v3050_v47 = vrot.slane %v945_v13, %v949_v1 }
 0x1ca   : > { %1231 = vmatpush1.bf16.msra.mxu0 %v2201_v40  ;;  %2054 = vmatprep.subr.bf16.mxu1 %v2232_v4 }
 0x1cb   : > { %1232 = vmatprep.subr.bf16.mxu0 %v2203_v6 }
 0x1cd   : > { %2055 = vmatpush3.bf16.msra.mxu1 %v2235_v35  ;;  %v3053_v35 = vrot.slane %v945_v13, %v953_v37 }
 0x1ce   : > { %1233 = vmatpush1.bf16.msra.mxu0 %v2206_v21  ;;  %2056 = vmatprep.subr.bf16.mxu1 %v2237_v17 }
 0x1cf   : > { %1234 = vmatprep.subr.bf16.mxu0 %v2208_v5 }
 0x1d1   : > { %2057 = vmatpush3.bf16.msra.mxu1 %v2240_v60 }
 0x1d2   : > { %1235 = vmatpush1.bf16.msra.mxu0 %v2211_v52 }
 0x1d3   : > { %1236 = vmatprep.subr.bf16.mxu0 %v2213_v34 }
 0x1d4   : > { %1364 = vmatmul.mubr.bf16.vlgmr.msra.gmra.mrb[0].mxu1 %v865_v9 }
 0x1d5   : > { %1371 = vmatprep.mubr.bf16.mxu1 %v868_v33 }
 0x1d6   : > { %1237 = vmatpush1.bf16.msra.mxu0 %v2216_v8 }
 0x1d7   : > { %1238 = vmatprep.subr.bf16.mxu0 %v2218_v54 }
 0x1da   : > { %1239 = vmatpush1.bf16.msra.mxu0 %v2221_v45 }
 0x1db   : > { %1240 = vmatprep.subr.bf16.mxu0 %v2223_v55 }
 0x1dc   : > { %1372 = vmatmul.mubr.bf16.gmra.mrb[4].mxu1 %v867_v63 }
 0x1dd   : > { %1379 = vmatprep.mubr.bf16.mxu1 %v870_v2 }
 0x1de   : > { %1241 = vmatpush1.bf16.msra.mxu0 %v2226_v61 }
 0x1df   : > { %1242 = vmatprep.subr.bf16.mxu0 %v2228_v36 }
 0x1e2   : > { %1243 = vmatpush1.bf16.msra.mxu0 %v2231_v31 }
 0x1e3   : > { %1244 = vmatprep.subr.bf16.mxu0 %v2233_v62 }
 0x1e4   : > { %1380 = vmatmul.mubr.bf16.gmra.mrb[8].mxu1 %v869_v14 }
 0x1e5   : > { %1387 = vmatprep.mubr.bf16.mxu1 %v872_v51 }
 0x1e6   : > { %1245 = vmatpush1.bf16.msra.mxu0 %v2236_v29 }
 0x1e7   : > { %1246 = vmatprep.subr.bf16.mxu0 %v2238_v25 }
 0x1ea   : > { %1247 = vmatpush1.bf16.msra.mxu0 %v2241_v10 }
 0x1eb   : > { %1248 = vmatprep.subr.bf16.mxu0 %v2242_v20 }
 0x1ec   : > { %1388 = vmatmul.mubr.bf16.gmra.mrb[12].mxu1 %v871_v15 }
 0x1ed   : > { %1395 = vmatprep.mubr.bf16.mxu1 %v874_v18 }
 0x1ee   : > { %1249 = vmatpush1.bf16.msra.mxu0 %v2244_v53 }
 0x1f1   : > { %1251 = vmatmul.mubr.bf16.vlgmr.msra.gmra.mrb[0].mxu0 %v865_v9 }
 0x1f2   : > { %1260 = vmatprep.mubr.bf16.mxu0 %v868_v33 }
 0x1f4   : > { %1396 = vmatmul.mubr.bf16.gmra.mrb[16].mxu1 %v873_v56 }
 0x1f5   : > { %1403 = vmatprep.mubr.bf16.mxu1 %v876_v58 }
 0x1f9   : > { %1261 = vmatmul.mubr.bf16.gmra.mrb[4].mxu0 %v867_v63 }
 0x1fa   : > { %1270 = vmatprep.mubr.bf16.mxu0 %v870_v2 }
 0x1fc   : > { %1404 = vmatmul.mubr.bf16.gmra.mrb[20].mxu1 %v875_v3 }
 0x1fd   : > { %1411 = vmatprep.mubr.bf16.mxu1 %v878_v0 }
 0x201   : > { %1271 = vmatmul.mubr.bf16.gmra.mrb[8].mxu0 %v869_v14 }
 0x202   : > { %1280 = vmatprep.mubr.bf16.mxu0 %v872_v51 }
 0x204   : > { %1412 = vmatmul.mubr.bf16.gmra.mrb[24].mxu1 %v877_v41 }
 0x205   : > { %1419 = vmatprep.mubr.bf16.mxu1 %v880_v38 }
 0x209   : > { %1281 = vmatmul.mubr.bf16.gmra.mrb[12].mxu0 %v871_v15 }
 0x20a   : > { %1290 = vmatprep.mubr.bf16.mxu0 %v874_v18 }
 0x20c   : > { %1420 = vmatmul.mubr.bf16.gmra.mrb[28].mxu1 %v879_v43 }
 0x211   : > { %1291 = vmatmul.mubr.bf16.gmra.mrb[16].mxu0 %v873_v56 }
 0x212   : > { %1300 = vmatprep.mubr.bf16.mxu0 %v876_v58 }
 0x219   : > { %1301 = vmatmul.mubr.bf16.gmra.mrb[20].mxu0 %v875_v3 }
 0x21a   : > { %1310 = vmatprep.mubr.bf16.mxu0 %v878_v0 }
 0x221   : > { %1311 = vmatmul.mubr.bf16.gmra.mrb[24].mxu0 %v877_v41 }
 0x222   : > { %1320 = vmatprep.mubr.bf16.mxu0 %v880_v38 }
 0x229   : > { %1321 = vmatmul.mubr.bf16.gmra.mrb[28].mxu0 %v879_v43 }
 0x2a7   : > { %v2058_v12 = vpop.f32.mrb[0].mxu1 }
 0x2a8   : > { %v2059_v24 = vpop.f32.mrb[1].mxu1 }
 0x2a9   : > { %v2060_v26 = vadd.f32 %v2059_v24, %v2058_v12  ;;  %v2061_v44 = vpop.f32.mrb[2].mxu1 }
 0x2aa   : > { %v2062_v39 = vpop.f32.mrb[3].mxu1 }
 0x2ab   : > { %v1366_v22 = vadd.f32 %v2060_v26, %v3041_v19  ;;  %v2063_v27 = vadd.f32 %v2062_v39, %v2061_v44 }
 0x2ad   : > { %v2010_v28 = vpack.c.bf16 %v1366_v22, %v1366_v22  ;;  %v1369_v11 = vadd.f32 %v2063_v27, %v3041_v19 }
 0x2af   : > { %1589 = vst [vmem:[%s2507_s25 + $0x8] sm:$0xf] %v2010_v28  ;;  %v2012_v7 = vpack.c.bf16 %v1369_v11, %v1369_v11  ;;  %v2064_v23 = vpop.f32.mrb[4].mxu1 }
 0x2b0   : > { %v2065_v50 = vpop.f32.mrb[5].mxu1 }
 0x2b1   : > { %1591 = vst [vmem:[%s2507_s25 + $0x14] sm:$0xf] %v2012_v7  ;;  %v2066_v48 = vadd.f32 %v2065_v50, %v2064_v23  ;;  %v2067_v46 = vpop.f32.mrb[6].mxu1 }
 0x2b2   : > { %v2068_v49 = vpop.f32.mrb[7].mxu1 }
 0x2b3   : > { %v1374_v40 = vadd.f32 %v2066_v48, %v3041_v19  ;;  %v2069_v42 = vadd.f32 %v2068_v49, %v2067_v46 }
 0x2b5   : > { %v2014_v6 = vpack.c.bf16 %v1374_v40, %v1374_v40  ;;  %v1377_v21 = vadd.f32 %v2069_v42, %v3041_v19 }
 0x2b7   : > { %1593 = vst [vmem:[%s2507_s25 + $0x20] sm:$0xf] %v2014_v6  ;;  %v2016_v16 = vpack.c.bf16 %v1377_v21, %v1377_v21  ;;  %v2070_v5 = vpop.f32.mrb[8].mxu1 }
 0x2b8   : > { %v2071_v52 = vpop.f32.mrb[9].mxu1 }
 0x2b9   : > { %1595 = vst [vmem:[%s2507_s25 + $0x2c] sm:$0xf] %v2016_v16  ;;  %v2072_v4 = vadd.f32 %v2071_v52, %v2070_v5  ;;  %v2073_v34 = vpop.f32.mrb[10].mxu1 }
 0x2ba   : > { %v2074_v8 = vpop.f32.mrb[11].mxu1 }
 0x2bb   : > { %v1382_v17 = vadd.f32 %v2072_v4, %v3041_v19  ;;  %v2075_v54 = vadd.f32 %v2074_v8, %v2073_v34 }
 0x2bd   : > { %v2018_v55 = vpack.c.bf16 %v1382_v17, %v1382_v17  ;;  %v1385_v9 = vadd.f32 %v2075_v54, %v3041_v19 }
 0x2bf   : > { %1597 = vst [vmem:[%s2507_s25 + $0x38] sm:$0xf] %v2018_v55  ;;  %v2020_v62 = vpack.c.bf16 %v1385_v9, %v1385_v9  ;;  %v2076_v63 = vpop.f32.mrb[12].mxu1 }
 0x2c0   : > { %v2077_v25 = vpop.f32.mrb[13].mxu1 }
 0x2c1   : > { %1599 = vst [vmem:[%s2507_s25 + $0x44] sm:$0xf] %v2020_v62  ;;  %v2078_v10 = vadd.f32 %v2077_v25, %v2076_v63  ;;  %v2079_v20 = vpop.f32.mrb[14].mxu1 }
 0x2c2   : > { %v2080_v53 = vpop.f32.mrb[15].mxu1 }
 0x2c3   : > { %v1390_v51 = vadd.f32 %v2078_v10, %v3041_v19  ;;  %v2081_v15 = vadd.f32 %v2080_v53, %v2079_v20 }
 0x2c4   : > { %v1252_v59 = vpop.f32.mrb[0].mxu0 }
 0x2c5   : > { %v1253_v60 = vadd.f32 %v1252_v59, %v3050_v47  ;;  %v1254_v45 = vpop.f32.mrb[1].mxu0  ;;  %v2022_v3 = vpack.c.bf16 %v1390_v51, %v1390_v51  ;;  %v1393_v0 = vadd.f32 %v2081_v15, %v3041_v19 }
 0x2c6   : > { %v1255_v61 = vadd.f32 %v1254_v45, %v3053_v35  ;;  %v1256_v33 = vpop.f32.mrb[2].mxu0 }
 0x2c7   : > { %v1257_v36 = vadd.f32 %v1256_v33, %v3050_v47  ;;  %v1258_v31 = vpop.f32.mrb[3].mxu0  ;;  %1601 = vst [vmem:[%s2507_s25 + $0x50] sm:$0xf] %v2022_v3  ;;  %v2024_v57 = vpack.c.bf16 %v1393_v0, %v1393_v0  ;;  %v2082_v30 = vpop.f32.mrb[16].mxu1 }
 0x2c8   : > { %v2009_v29 = vpack.c.bf16 %v1255_v61, %v1253_v60  ;;  %v1259_v2 = vadd.f32 %v1258_v31, %v3053_v35  ;;  %v2083_v24 = vpop.f32.mrb[17].mxu1 }
 0x2c9   : > { %1603 = vst [vmem:[%s2507_s25 + $0x5c] sm:$0xf] %v2024_v57  ;;  %v2084_v26 = vadd.f32 %v2083_v24, %v2082_v30  ;;  %v2085_v44 = vpop.f32.mrb[18].mxu1 }
 0x2ca   : > { %1588 = vst [vmem:[%s2507_s25] sm:$0xff] %v2009_v29  ;;  %v2011_v14 = vpack.c.bf16 %v1259_v2, %v1257_v36  ;;  %v2086_v22 = vpop.f32.mrb[19].mxu1 }
 0x2cb   : > { %v1398_v27 = vadd.f32 %v2084_v26, %v3041_v19  ;;  %v2087_v28 = vadd.f32 %v2086_v22, %v2085_v44 }
 0x2cc   : > { %1590 = vst [vmem:[%s2507_s25 + $0xc] sm:$0xff] %v2011_v14  ;;  %v1262_v18 = vpop.f32.mrb[4].mxu0 }
 0x2cd   : > { %v1263_v56 = vadd.f32 %v1262_v18, %v3050_v47  ;;  %v1264_v58 = vpop.f32.mrb[5].mxu0  ;;  %v2026_v50 = vpack.c.bf16 %v1398_v27, %v1398_v27  ;;  %v1401_v48 = vadd.f32 %v2087_v28, %v3041_v19 }
 0x2ce   : > { %v1265_v41 = vadd.f32 %v1264_v58, %v3053_v35  ;;  %v1266_v38 = vpop.f32.mrb[6].mxu0 }
 0x2cf   : > { %v1267_v43 = vadd.f32 %v1266_v38, %v3050_v47  ;;  %v1268_v32 = vpop.f32.mrb[7].mxu0  ;;  %1605 = vst [vmem:[%s2507_s25 + $0x68] sm:$0xf] %v2026_v50  ;;  %v2028_v1 = vpack.c.bf16 %v1401_v48, %v1401_v48  ;;  %v2088_v6 = vpop.f32.mrb[20].mxu1 }
 0x2d0   : > { %v2013_v13 = vpack.c.bf16 %v1265_v41, %v1263_v56  ;;  %v1269_v12 = vadd.f32 %v1268_v32, %v3053_v35  ;;  %v2089_v16 = vpop.f32.mrb[21].mxu1 }
 0x2d1   : > { %1607 = vst [vmem:[%s2507_s25 + $0x74] sm:$0xf] %v2028_v1  ;;  %v2090_v5 = vadd.f32 %v2089_v16, %v2088_v6  ;;  %v2091_v52 = vpop.f32.mrb[22].mxu1 }
 0x2d2   : > { %1592 = vst [vmem:[%s2507_s25 + $0x18] sm:$0xff] %v2013_v13  ;;  %v2015_v39 = vpack.c.bf16 %v1269_v12, %v1267_v43  ;;  %v2092_v34 = vpop.f32.mrb[23].mxu1 }
 0x2d3   : > { %v1406_v8 = vadd.f32 %v2090_v5, %v3041_v19  ;;  %v2093_v17 = vadd.f32 %v2092_v34, %v2091_v52 }
 0x2d4   : > { %1594 = vst [vmem:[%s2507_s25 + $0x24] sm:$0xff] %v2015_v39  ;;  %v1272_v11 = vpop.f32.mrb[8].mxu0 }
 0x2d5   : > { %v1273_v7 = vadd.f32 %v1272_v11, %v3050_v47  ;;  %v1274_v23 = vpop.f32.mrb[9].mxu0  ;;  %v2030_v45 = vpack.c.bf16 %v1406_v8, %v1406_v8  ;;  %v1409_v55 = vadd.f32 %v2093_v17, %v3041_v19 }
 0x2d6   : > { %v1275_v46 = vadd.f32 %v1274_v23, %v3053_v35  ;;  %v1276_v49 = vpop.f32.mrb[10].mxu0 }
 0x2d7   : > { %v1277_v40 = vadd.f32 %v1276_v49, %v3050_v47  ;;  %v1278_v42 = vpop.f32.mrb[11].mxu0  ;;  %1609 = vst [vmem:[%s2507_s25 + $0x80] sm:$0xf] %v2030_v45  ;;  %v2032_v31 = vpack.c.bf16 %v1409_v55, %v1409_v55  ;;  %v2094_v62 = vpop.f32.mrb[24].mxu1 }
 0x2d8   : > { %v2017_v21 = vpack.c.bf16 %v1275_v46, %v1273_v7  ;;  %v1279_v37 = vadd.f32 %v1278_v42, %v3053_v35  ;;  %v2095_v2 = vpop.f32.mrb[25].mxu1 }
 0x2d9   : > { %1611 = vst [vmem:[%s2507_s25 + $0x8c] sm:$0xf] %v2032_v31  ;;  %v2096_v25 = vadd.f32 %v2095_v2, %v2094_v62  ;;  %v2097_v10 = vpop.f32.mrb[26].mxu1 }
 0x2da   : > { %1596 = vst [vmem:[%s2507_s25 + $0x30] sm:$0xff] %v2017_v21  ;;  %v2019_v4 = vpack.c.bf16 %v1279_v37, %v1277_v40  ;;  %v2098_v14 = vpop.f32.mrb[27].mxu1 }
 0x2db   : > { %v1414_v53 = vadd.f32 %v2096_v25, %v3041_v19  ;;  %v2099_v51 = vadd.f32 %v2098_v14, %v2097_v10 }
 0x2dc   : > { %1598 = vst [vmem:[%s2507_s25 + $0x3c] sm:$0xff] %v2019_v4  ;;  %v1282_v54 = vpop.f32.mrb[12].mxu0 }
 0x2dd   : > { %v1283_v59 = vadd.f32 %v1282_v54, %v3050_v47  ;;  %v1284_v60 = vpop.f32.mrb[13].mxu0  ;;  %v2034_v58 = vpack.c.bf16 %v1414_v53, %v1414_v53  ;;  %v1417_v3 = vadd.f32 %v2099_v51, %v3041_v19 }
 0x2de   : > { %v1285_v9 = vadd.f32 %v1284_v60, %v3053_v35  ;;  %v1286_v61 = vpop.f32.mrb[14].mxu0 }
 0x2df   : > { %v1287_v33 = vadd.f32 %v1286_v61, %v3050_v47  ;;  %v1288_v36 = vpop.f32.mrb[15].mxu0  ;;  %1613 = vst [vmem:[%s2507_s25 + $0x98] sm:$0xf] %v2034_v58  ;;  %v2036_v32 = vpack.c.bf16 %v1417_v3, %v1417_v3  ;;  %v2100_v57 = vpop.f32.mrb[28].mxu1 }
 0x2e0   : > { %v2021_v63 = vpack.c.bf16 %v1285_v9, %v1283_v59  ;;  %v1289_v29 = vadd.f32 %v1288_v36, %v3053_v35  ;;  %v2101_v12 = vpop.f32.mrb[29].mxu1 }
 0x2e1   : > { %1615 = vst [vmem:[%s2507_s25 + $0xa4] sm:$0xf] %v2036_v32  ;;  %v2102_v24 = vadd.f32 %v2101_v12, %v2100_v57  ;;  %v2103_v26 = vpop.f32.mrb[30].mxu1  ;;  %v1655_v2 = vld [vmem:[%s2507_s25 + $0x30] sm:$0xff] (%p2350_p6)  ;;  %v1982_v32 = vld [vmem:[%s2507_s25 + $0x38] sm:$0xf] (%p2350_p6) }
 0x2e2   : > { %1600 = vst [vmem:[%s2507_s25 + $0x48] sm:$0xff] %v2021_v63  ;;  %v2023_v20 = vpack.c.bf16 %v1289_v29, %v1287_v33  ;;  %v2104_v39 = vpop.f32.mrb[31].mxu1  ;;  %v1649_v63 = vld [vmem:[%s2507_s25 + $0xc] sm:$0xff] (%p2350_p6)  ;;  %v1653_v29 = vld [vmem:[%s2507_s25 + $0x24] sm:$0xff] (%p2350_p6)  ;;  %1656 = vst [vmem:[%s3139_s11 + $0x60] sm:$0xff] (%p2350_p6), %v1655_v2 }
 0x2e3   : > { %v1422_v22 = vadd.f32 %v2102_v24, %v3041_v19  ;;  %v2105_v27 = vadd.f32 %v2104_v39, %v2103_v26  ;;  %v1657_v25 = vld [vmem:[%s2507_s25 + $0x3c] sm:$0xff] (%p2350_p6)  ;;  %1650 = vst [vmem:[%s3139_s11 + $0x18] sm:$0xff] (%p2350_p6), %v1649_v63  ;;  %1654 = vst [vmem:[%s3139_s11 + $0x48] sm:$0xff] (%p2350_p6), %v1653_v29  ;;  %v1984_v57 = vld [vmem:[%s2507_s25 + $0x44] sm:$0xf] (%p2350_p6) }
 0x2e4   : > { %1602 = vst [vmem:[%s2507_s25 + $0x54] sm:$0xff] %v2023_v20  ;;  %v1292_v15 = vpop.f32.mrb[16].mxu0  ;;  %1658 = vst [vmem:[%s3139_s11 + $0x78] sm:$0xff] (%p2350_p6), %v1657_v25  ;;  %v1990_v12 = vld [vmem:[%s2507_s25 + $0x68] sm:$0xf] (%p2350_p6) }
 0x2e5   : > { %v1293_v18 = vadd.f32 %v1292_v15, %v3050_v47  ;;  %v1294_v56 = vpop.f32.mrb[17].mxu0  ;;  %v2038_v23 = vpack.c.bf16 %v1422_v22, %v1422_v22  ;;  %v1425_v50 = vadd.f32 %v2105_v27, %v3041_v19  ;;  %1983 = vst [vmem:[%s3139_s11 + $0x68] sm:$0xf] (%p2350_p6), %v1982_v32  ;;  %1985 = vst [vmem:[%s3139_s11 + $0x80] sm:$0xf] (%p2350_p6), %v1984_v57 }
 0x2e6   : > { %v1295_v0 = vadd.f32 %v1294_v56, %v3053_v35  ;;  %v1296_v41 = vpop.f32.mrb[18].mxu0  ;;  %v1992_v24 = vld [vmem:[%s2507_s25 + $0x74] sm:$0xf] (%p2350_p6)  ;;  %v1994_v26 = vld [vmem:[%s2507_s25 + $0x80] sm:$0xf] (%p2350_p6) }
 0x2e7   : > { %v1297_v38 = vadd.f32 %v1296_v41, %v3050_v47  ;;  %v1298_v43 = vpop.f32.mrb[19].mxu0  ;;  %1617 = vst [vmem:[%s2507_s25 + $0xb0] sm:$0xf] %v2038_v23  ;;  %v2040_v42 = vpack.c.bf16 %v1425_v50, %v1425_v50  ;;  %v1976_v41 = vld [vmem:[%s2507_s25 + $0x14] sm:$0xf] (%p2350_p6) }
 0x2e8   : > { %v2025_v30 = vpack.c.bf16 %v1295_v0, %v1293_v18  ;;  %v1299_v13 = vadd.f32 %v1298_v43, %v3053_v35  ;;  %v1974_v0 = vld [vmem:[%s2507_s25 + $0x8] sm:$0xf] (%p2350_p6)  ;;  %1977 = vst [vmem:[%s3139_s11 + $0x20] sm:$0xf] (%p2350_p6), %v1976_v41  ;;  %v1980_v43 = vld [vmem:[%s2507_s25 + $0x2c] sm:$0xf] (%p2350_p6) }
 0x2e9   : > { %1619 = vst [vmem:[%s2507_s25 + $0xbc] sm:$0xf] %v2040_v42  ;;  %v1659_v10 = vld [vmem:[%s2507_s25 + $0x48] sm:$0xff] (%p2350_p6)  ;;  %1975 = vst [vmem:[%s3139_s11 + $0x8] sm:$0xf] (%p2350_p6), %v1974_v0 }
 0x2ea   : > { %1604 = vst [vmem:[%s2507_s25 + $0x60] sm:$0xff] %v2025_v30  ;;  %v2027_v44 = vpack.c.bf16 %v1299_v13, %v1297_v38  ;;  %1660 = vst [vmem:[%s3139_s11 + $0x90] sm:$0xff] (%p2350_p6), %v1659_v10  ;;  %v1978_v38 = vld [vmem:[%s2507_s25 + $0x20] sm:$0xf] (%p2350_p6)  ;;  %v1986_v30 = vld [vmem:[%s2507_s25 + $0x50] sm:$0xf] (%p2350_p6) }
 0x2eb   : > { %v1661_v20 = vld [vmem:[%s2507_s25 + $0x54] sm:$0xff] (%p2350_p6)  ;;  %1979 = vst [vmem:[%s3139_s11 + $0x38] sm:$0xf] (%p2350_p6), %v1978_v38  ;;  %1981 = vst [vmem:[%s3139_s11 + $0x50] sm:$0xf] (%p2350_p6), %v1980_v43 }
 0x2ec   : > { %1606 = vst [vmem:[%s2507_s25 + $0x6c] sm:$0xff] %v2027_v44  ;;  %v1302_v28 = vpop.f32.mrb[20].mxu0  ;;  %1662 = vst [vmem:[%s3139_s11 + $0xa8] sm:$0xff] (%p2350_p6), %v1661_v20  ;;  %v1988_v13 = vld [vmem:[%s2507_s25 + $0x5c] sm:$0xf] (%p2350_p6) }
 0x2ed   : > { %v1303_v11 = vadd.f32 %v1302_v28, %v3050_v47  ;;  %v1304_v7 = vpop.f32.mrb[21].mxu0  ;;  %1987 = vst [vmem:[%s3139_s11 + $0x98] sm:$0xf] (%p2350_p6), %v1986_v30  ;;  %1989 = vst [vmem:[%s3139_s11 + $0xb0] sm:$0xf] (%p2350_p6), %v1988_v13 }
 0x2ee   : > { %v1305_v48 = vadd.f32 %v1304_v7, %v3053_v35  ;;  %v1306_v46 = vpop.f32.mrb[22].mxu0  ;;  %1991 = vst [vmem:[%s3139_s11 + $0xc8] sm:$0xf] (%p2350_p6), %v1990_v12  ;;  %1993 = vst [vmem:[%s3139_s11 + $0xe0] sm:$0xf] (%p2350_p6), %v1992_v24 }
 0x2ef   : > { %v1307_v49 = vadd.f32 %v1306_v46, %v3050_v47  ;;  %v1308_v40 = vpop.f32.mrb[23].mxu0  ;;  %1995 = vst [vmem:[%s3139_s11 + $0xf8] sm:$0xf] (%p2350_p6), %v1994_v26  ;;  %v1996_v44 = vld [vmem:[%s2507_s25 + $0x8c] sm:$0xf] (%p2350_p6) }
 0x2f0   : > { %v2029_v1 = vpack.c.bf16 %v1305_v48, %v1303_v11  ;;  %v1309_v6 = vadd.f32 %v1308_v40, %v3053_v35  ;;  %v1998_v39 = vld [vmem:[%s2507_s25 + $0x98] sm:$0xf] (%p2350_p6)  ;;  %v2000_v22 = vld [vmem:[%s2507_s25 + $0xa4] sm:$0xf] (%p2350_p6)  ;;  %1997 = vst [vmem:[%s3139_s11 + $0x110] sm:$0xf] (%p2350_p6), %v1996_v44 }
 0x2f1   : > { %v1663_v14 = vld [vmem:[%s2507_s25 + $0x60] sm:$0xff] (%p2350_p6)  ;;  %1999 = vst [vmem:[%s3139_s11 + $0x128] sm:$0xf] (%p2350_p6), %v1998_v39  ;;  %2001 = vst [vmem:[%s3139_s11 + $0x140] sm:$0xf] (%p2350_p6), %v2000_v22 }
 0x2f2   : > { %1608 = vst [vmem:[%s2507_s25 + $0x78] sm:$0xff] %v2029_v1  ;;  %v2031_v21 = vpack.c.bf16 %v1309_v6, %v1307_v49  ;;  %1664 = vst [vmem:[%s3139_s11 + $0xc0] sm:$0xff] (%p2350_p6), %v1663_v14  ;;  %v2002_v27 = vld [vmem:[%s2507_s25 + $0xb0] sm:$0xf] (%p2350_p6)  ;;  %v2004_v28 = vld [vmem:[%s2507_s25 + $0xbc] sm:$0xf] (%p2350_p6) }
 0x2f3   : > { %v1665_v53 = vld [vmem:[%s2507_s25 + $0x6c] sm:$0xff] (%p2350_p6)  ;;  %2003 = vst [vmem:[%s3139_s11 + $0x158] sm:$0xf] (%p2350_p6), %v2002_v27  ;;  %2005 = vst [vmem:[%s3139_s11 + $0x170] sm:$0xf] (%p2350_p6), %v2004_v28 }
 0x2f4   : > { %1610 = vst [vmem:[%s2507_s25 + $0x84] sm:$0xff] %v2031_v21  ;;  %v1312_v37 = vpop.f32.mrb[24].mxu0  ;;  %1666 = vst [vmem:[%s3139_s11 + $0xd8] sm:$0xff] (%p2350_p6), %v1665_v53 }
 0x2f5   : > { %v1313_v19 = vadd.f32 %v1312_v37, %v3050_v47  ;;  %v1314_v16 = vpop.f32.mrb[25].mxu0 }
 0x2f6   : > { %v1315_v5 = vadd.f32 %v1314_v16, %v3053_v35  ;;  %v1316_v52 = vpop.f32.mrb[26].mxu0 }
 0x2f7   : > { %v1317_v4 = vadd.f32 %v1316_v52, %v3050_v47  ;;  %v1318_v34 = vpop.f32.mrb[27].mxu0 }
 0x2f8   : > { %v2033_v8 = vpack.c.bf16 %v1315_v5, %v1313_v19  ;;  %v1319_v17 = vadd.f32 %v1318_v34, %v3053_v35 }
 0x2f9   : > { %v1667_v51 = vld [vmem:[%s2507_s25 + $0x78] sm:$0xff] (%p2350_p6) }
 0x2fa   : > { %1612 = vst [vmem:[%s2507_s25 + $0x90] sm:$0xff] %v2033_v8  ;;  %v2035_v54 = vpack.c.bf16 %v1319_v17, %v1317_v4  ;;  %1668 = vst [vmem:[%s3139_s11 + $0xf0] sm:$0xff] (%p2350_p6), %v1667_v51 }
 0x2fb   : > { %v1669_v15 = vld [vmem:[%s2507_s25 + $0x84] sm:$0xff] (%p2350_p6) }
 0x2fc   : > { %1614 = vst [vmem:[%s2507_s25 + $0x9c] sm:$0xff] %v2035_v54  ;;  %v1322_v59 = vpop.f32.mrb[28].mxu0  ;;  %1670 = vst [vmem:[%s3139_s11 + $0x108] sm:$0xff] (%p2350_p6), %v1669_v15 }
 0x2fd   : > { %v1323_v60 = vadd.f32 %v1322_v59, %v3050_v47  ;;  %v1324_v45 = vpop.f32.mrb[29].mxu0 }
 0x2fe   : > { %v1325_v55 = vadd.f32 %v1324_v45, %v3053_v35  ;;  %v1326_v9 = vpop.f32.mrb[30].mxu0  ;;  %1626 = sbr.rel (!%p2350_p6) target bundleno = 781 (0x30d), region = 74 }
 0x2ff   : > { %v1327_v61 = vadd.f32 %v1326_v9, %v3050_v47  ;;  %v1328_v33 = vpop.f32.mrb[31].mxu0  ;;  %v1647_v47 = vld [vmem:[%s2507_s25] sm:$0xff] (%p2350_p6) }
 0x300   : > { %v2037_v36 = vpack.c.bf16 %v1325_v55, %v1323_v60  ;;  %v1329_v31 = vadd.f32 %v1328_v33, %v3053_v35  ;;  %v1651_v35 = vld [vmem:[%s2507_s25 + $0x18] sm:$0xff] (%p2350_p6)  ;;  %1648 = vst [vmem:[%s3139_s11] sm:$0xff] (%p2350_p6), %v1647_v47 }
 0x301   : > { %1652 = vst [vmem:[%s3139_s11 + $0x30] sm:$0xff] (%p2350_p6), %v1651_v35  ;;  %v1671_v18 = vld [vmem:[%s2507_s25 + $0x90] sm:$0xff] (%p2350_p6) }
 0x302   : > { %1616 = vst [vmem:[%s2507_s25 + $0xa8] sm:$0xff] %v2037_v36  ;;  %v2039_v62 = vpack.c.bf16 %v1329_v31, %v1327_v61  ;;  %1672 = vst [vmem:[%s3139_s11 + $0x120] sm:$0xff] (%p2350_p6), %v1671_v18 }
 0x303   : > { %v1673_v56 = vld [vmem:[%s2507_s25 + $0x9c] sm:$0xff] (%p2350_p6) }
 0x304   : > { %1618 = vst [vmem:[%s2507_s25 + $0xb4] sm:$0xff] %v2039_v62  ;;  %1674 = vst [vmem:[%s3139_s11 + $0x138] sm:$0xff] (%p2350_p6), %v1673_v56 }
 0x309   : > { %v1675_v58 = vld [vmem:[%s2507_s25 + $0xa8] sm:$0xff] }
 0x30a   : > { %1676 = vst [vmem:[%s3139_s11 + $0x150] sm:$0xff] %v1675_v58 }
 0x30b   : > { %v1677_v3 = vld [vmem:[%s2507_s25 + $0xb4] sm:$0xff] }
 0x30c   : > { %1678 = vst [vmem:[%s3139_s11 + $0x168] sm:$0xff] %v1677_v3 }
 0x30d PF: > { %s15_s22 = sadd.s32 1, %s2283_s22   ;;  %s3221_s18 = smov %s2271_s19 }
 0x30e   : > { %p12_p13 = scmp.ge.s32.totalorder %s15_s22, 4   ;;  %s3222_s19 = smov %s2355_s28 }
 0x30f   : > { %s3223_s20 = smov %s2279_s21  ;;  %s3224_s21 = smov %s3226_s23 }
 0x310   :  { %14 = sbr.rel (!%p12_p13) target bundleno = 3 (0x3), region = 149 }

// kernel: timesformer_encoder_forward.14
= control target key start
LH: loop header
LB: loop body
LE: loop exit
PB: predicated region body
PF: predicated region fallthrough
CT: control target
= control target key end

     0   :  { %s2143_s0 = inlined_call_operand.vmem [shape: bf16[2,64,768], index: 0, kind: input, shape index: {}, may-alias: {0,1,2}]   ;;  %s2144_s1 = inlined_call_operand.vmem [shape: bf16[2,64,768], index: 1, kind: input, shape index: {}, may-alias: {0,1,2}]   ;;  %s2145_s2 = inlined_call_operand.vmem [shape: bf16[2,64,768], index: 2, kind: input, shape index: {}, may-alias: {0,1,2}]   ;;  %s2146_s3 = inlined_call_operand.vmem [shape: bf16[2,64,256], index: 3, kind: output, shape index: {}]  }
   0x1   :  { %2148 = sst [smem:[#allocation10_spill]] %s2146_s3 }
   0x2   :  { %s1755_s12 = smov 0   ;;  %s1757_s13 = smov 0  }
   0x3   :  { %s1759_s14 = smov 0   ;;  %s1761_s15 = smov 0  }
   0x4   :  { %s1763_s16 = smov 0   ;;  %s1765_s17 = smov 0  }
   0x5   :  { %s1767_s18 = smov 0   ;;  %s1769_s19 = smov 0  }
   0x6   :  { %s1771_s20 = smov 0   ;;  %s1773_s21 = smov 0  }
   0x7   :  { %s1775_s22 = smov 0  }
   0x8 LB: > { %s31_s24 = sadd.s32 1, %s1722_s20  ;;  %s39_s25 = sadd.s32 1, %s1726_s21  ;;  %s1730_s22 = sphi %s1775_s22, %s13_s22   ;;  %s1726_s21 = sphi %s1773_s21, %s2166_s21   ;;  %s1722_s20 = sphi %s1771_s20, %s2165_s20   ;;  %s1718_s19 = sphi %s1769_s19, %s2164_s19   ;;  %s1714_s18 = sphi %s1767_s18, %s2163_s18   ;;  %s1710_s17 = sphi %s1765_s17, %s2162_s17   ;;  %s1706_s16 = sphi %s1763_s16, %s2161_s16   ;;  %s1702_s15 = sphi %s1761_s15, %s2160_s15   ;;  %s1698_s14 = sphi %s1759_s14, %s2159_s14   ;;  %s1694_s13 = sphi %s1757_s13, %s2158_s13   ;;  %s1690_s12 = sphi %s1755_s12, %s2157_s12  }
   0x9   : > { %p33_p0 = scmp.ge.s32.totalorder %s31_s24, 2  ;;  %s50_s26 = sadd.s32 1, %s1710_s17 }
   0xa   : > { %p57_p1 = scmp.ne.s32.totalorder %s1710_s17, %s1706_s16  ;;  %p58_p2 = scmp.eq.s32.totalorder %s1730_s22, 0 }
   0xb   : > { %s2168_s24 = smov (%p33_p0, %s31_s24), 0  ;;  %s2170_s25 = smov (!%p33_p0, %s39_s25), %s1726_s21 }
   0xc   : > { %s46_s27 = ssub.s32 %s1722_s20, %s2168_s24  ;;  %p41_p3 = scmp.ge.s32.totalorder %s2170_s25, 2 }
   0xd   : > { %s73_s28 = sadd.s32 2, %s1722_s20  ;;  %p1828_p4 = por %p58_p2, %p57_p1 }
   0xe   : > { %s74_s30 = sadd.s32 2, %s2168_s24  ;;  %s2172_s25 = smov (%p41_p3, %s2170_s25), 0 }
   0xf   : > { %2150 = sst [smem:[#allocation9_spill]] %s2172_s25  ;;  %s78_s4 = ssub.s32 %s73_s28, %s74_s30 }
  0x10   : > { %s82_s5 = sadd.s32 1, %s1702_s15  ;;  %s43_s6 = ssub.s32 %s1726_s21, %s2172_s25 }
  0x11   : > { %p89_p5 = scmp.ne.s32.totalorder %s1702_s15, %s1698_s14  ;;  %s47_s7 = sor.u32 %s46_s27, %s43_s6 }
  0x12   : > { %s79_s8 = sor.u32 %s78_s4, %s43_s6  ;;  %p48_p6 = scmp.eq.s32.totalorder %s47_s7, 0 }
  0x13   : > { %p80_p7 = scmp.eq.s32.totalorder %s79_s8, 0  ;;  %p1842_p8 = por %p89_p5, %p58_p2 }
  0x14   : > { %s105_s10 = sadd.s32 4, %s1722_s20  ;;  %s106_s30 = sadd.s32 4, %s2168_s24 }
  0x15   : > { %s1848_s11 = scalar_select %p48_p6, %s1710_s17, %s50_s26  }
  0x16   : > { %s1851_s28 = scalar_select %p80_p7, %s1702_s15, %s82_s5  }
  0x17   : > { %s114_s23 = sadd.s32 1, %s1694_s13  ;;  %s110_s25 = ssub.s32 %s105_s10, %s106_s30 }
  0x18   : > { %p121_p9 = scmp.ne.s32.totalorder %s1694_s13, %s1690_s12  ;;  %s111_s27 = sor.u32 %s110_s25, %s43_s6 }
  0x19   : > { %s2152_s3 = sadd.s32 4294967295, %s1730_s22   ;;  %p112_p11 = scmp.eq.s32.totalorder %s111_s27, 0 }
  0x1a   : > { %p155_p10 = scmp.eq.s32.totalorder %s2152_s3, 3  ;;  %p1861_p12 = por %p121_p9, %p58_p2 }
  0x1b   : > { %s1873_s26 = scalar_select %p112_p11, %s1694_s13, %s114_s23  }
  0x1c   : > { %p1868_p13 = por %p155_p10, %p57_p1  ;;  %p1354_p0 = scmp.ge.s32.totalorder %s1730_s22, 4 }
  0x1e   : > { %177 = sbr.rel (%p1354_p0) target bundleno = 73 (0x49), region = 16 }
  0x25   : > { %180 = sbr.rel (!%p1828_p4) target bundleno = 49 (0x31), region = 20  ;;  %s182_s3 = sand.u32 (%p1828_p4), 1, %s1710_s17  }
  0x26   : > { %s1490_s25 = smul.u32 (%p1828_p4), 48, %s1726_s21  ;;  %s1355_s5 = sshll.u32 (%p1828_p4), %s182_s3, 5 }
  0x27   : > { %s184_s23 = scalar_lea.vmem (%p1828_p4), [#allocation5], %s1355_s5 }
  0x28   : > { %s189_s6 = sadd.s32 (%p1828_p4), %s1722_s20, %s1490_s25 }
  0x29   : > { %s1356_s8 = sshll.u32 (%p1828_p4), %s189_s6, 2 }
  0x2a   : > { %s191_s27 = scalar_lea.vmem (%p1828_p4), %s2143_s0, %s1356_s8 }
  0x2b   : > { %v207_v0 = vld [vmem:[%s191_s27] sm:$0xf] (%p1828_p4)  ;;  %v209_v1 = vld [vmem:[%s191_s27 + $0x18] sm:$0xf] (%p1828_p4)  ;;  %v211_v2 = vld [vmem:[%s191_s27 + $0x30] sm:$0xf] (%p1828_p4) }
  0x2c   : > { %208 = vst [vmem:[%s184_s23] sm:$0xf] %v207_v0  ;;  %210 = vst [vmem:[%s184_s23 + $0x4] sm:$0xf] %v209_v1  ;;  %v213_v3 = vld [vmem:[%s191_s27 + $0x48] sm:$0xf] }
  0x2d   : > { %212 = vst [vmem:[%s184_s23 + $0x8] sm:$0xf] %v211_v2  ;;  %v215_v4 = vld [vmem:[%s191_s27 + $0x60] sm:$0xf]  ;;  %v217_v5 = vld [vmem:[%s191_s27 + $0x78] sm:$0xf] }
  0x2e   : > { %214 = vst [vmem:[%s184_s23 + $0xc] sm:$0xf] %v213_v3  ;;  %216 = vst [vmem:[%s184_s23 + $0x10] sm:$0xf] %v215_v4  ;;  %v219_v6 = vld [vmem:[%s191_s27 + $0x90] sm:$0xf] }
  0x2f   : > { %218 = vst [vmem:[%s184_s23 + $0x14] sm:$0xf] %v217_v5  ;;  %v221_v7 = vld [vmem:[%s191_s27 + $0xa8] sm:$0xf]  ;;  %220 = vst [vmem:[%s184_s23 + $0x18] sm:$0xf] %v219_v6 }
  0x30   : > { %222 = vst [vmem:[%s184_s23 + $0x1c] sm:$0xf] %v221_v7 }
  0x31 PF: > { %261 = sbr.rel (!%p1842_p8) target bundleno = 61 (0x3d), region = 61  ;;  %s263_s29 = sand.u32 (%p1842_p8), 1, %s1702_s15  }
  0x32   : > { %s1247_s3 = smul.u32 (%p1842_p8), 48, %s1726_s21  ;;  %s1357_s25 = sshll.u32 (%p1842_p8), %s263_s29, 5 }
  0x33   : > { %s265_s27 = scalar_lea.vmem (%p1842_p8), [#allocation6], %s1357_s25 }
  0x34   : > { %s1248_s5 = sadd.s32 (%p1842_p8), %s1722_s20, %s1247_s3 }
  0x35   : > { %s1358_s6 = sshll.u32 (%p1842_p8), %s1248_s5, 2 }
  0x36   : > { %s1250_s30 = scalar_lea.vmem (%p1842_p8), %s2144_s1, %s1358_s6 }
  0x37   : > { %v1359_v8 = vld [vmem:[%s1250_s30 + $0x8] sm:$0xf] (%p1842_p8)  ;;  %v1360_v9 = vld [vmem:[%s1250_s30 + $0x20] sm:$0xf] (%p1842_p8)  ;;  %v1361_v10 = vld [vmem:[%s1250_s30 + $0x38] sm:$0xf] (%p1842_p8) }
  0x38   : > { %290 = vst [vmem:[%s265_s27] sm:$0xf] %v1359_v8  ;;  %292 = vst [vmem:[%s265_s27 + $0x4] sm:$0xf] %v1360_v9  ;;  %v1362_v11 = vld [vmem:[%s1250_s30 + $0x50] sm:$0xf] }
  0x39   : > { %294 = vst [vmem:[%s265_s27 + $0x8] sm:$0xf] %v1361_v10  ;;  %v1363_v12 = vld [vmem:[%s1250_s30 + $0x68] sm:$0xf]  ;;  %v1364_v13 = vld [vmem:[%s1250_s30 + $0x80] sm:$0xf] }
  0x3a   : > { %296 = vst [vmem:[%s265_s27 + $0xc] sm:$0xf] %v1362_v11  ;;  %298 = vst [vmem:[%s265_s27 + $0x10] sm:$0xf] %v1363_v12  ;;  %v1365_v14 = vld [vmem:[%s1250_s30 + $0x98] sm:$0xf] }
  0x3b   : > { %300 = vst [vmem:[%s265_s27 + $0x14] sm:$0xf] %v1364_v13  ;;  %v1366_v15 = vld [vmem:[%s1250_s30 + $0xb0] sm:$0xf]  ;;  %302 = vst [vmem:[%s265_s27 + $0x18] sm:$0xf] %v1365_v14 }
  0x3c   : > { %304 = vst [vmem:[%s265_s27 + $0x1c] sm:$0xf] %v1366_v15 }
  0x3d PF: > { %343 = sbr.rel (!%p1861_p12) target bundleno = 73 (0x49), region = 102  ;;  %s345_s9 = sand.u32 (%p1861_p12), 1, %s1694_s13  }
  0x3e   : > { %s1256_s23 = smul.u32 (%p1861_p12), 48, %s1726_s21  ;;  %s1367_s29 = sshll.u32 (%p1861_p12), %s345_s9, 5 }
  0x3f   : > { %s347_s10 = scalar_lea.vmem (%p1861_p12), [#allocation7], %s1367_s29 }
  0x40   : > { %s1257_s3 = sadd.s32 (%p1861_p12), %s1722_s20, %s1256_s23 }
  0x41   : > { %s1368_s25 = sshll.u32 (%p1861_p12), %s1257_s3, 2 }
  0x42   : > { %s1259_s8 = scalar_lea.vmem (%p1861_p12), %s2145_s2, %s1368_s25 }
  0x43   : > { %v1369_v16 = vld [vmem:[%s1259_s8 + $0x10] sm:$0xf] (%p1861_p12)  ;;  %v1370_v17 = vld [vmem:[%s1259_s8 + $0x28] sm:$0xf] (%p1861_p12)  ;;  %v1371_v18 = vld [vmem:[%s1259_s8 + $0x40] sm:$0xf] (%p1861_p12) }
  0x44   : > { %372 = vst [vmem:[%s347_s10] sm:$0xf] %v1369_v16  ;;  %374 = vst [vmem:[%s347_s10 + $0x4] sm:$0xf] %v1370_v17  ;;  %v1372_v19 = vld [vmem:[%s1259_s8 + $0x58] sm:$0xf] }
  0x45   : > { %376 = vst [vmem:[%s347_s10 + $0x8] sm:$0xf] %v1371_v18  ;;  %v1373_v20 = vld [vmem:[%s1259_s8 + $0x70] sm:$0xf]  ;;  %v1374_v21 = vld [vmem:[%s1259_s8 + $0x88] sm:$0xf] }
  0x46   : > { %378 = vst [vmem:[%s347_s10 + $0xc] sm:$0xf] %v1372_v19  ;;  %380 = vst [vmem:[%s347_s10 + $0x10] sm:$0xf] %v1373_v20  ;;  %v1375_v22 = vld [vmem:[%s1259_s8 + $0xa0] sm:$0xf] }
  0x47   : > { %382 = vst [vmem:[%s347_s10 + $0x14] sm:$0xf] %v1374_v21  ;;  %v1376_v23 = vld [vmem:[%s1259_s8 + $0xb8] sm:$0xf]  ;;  %384 = vst [vmem:[%s347_s10 + $0x18] sm:$0xf] %v1375_v22 }
  0x48   : > { %386 = vst [vmem:[%s347_s10 + $0x1c] sm:$0xf] %v1376_v23 }
  0x49 PF: > { %p1377_p1 = scmp.ge.s32.totalorder %s1730_s22, 1  ;;  %p424_p2 = scmp.lt.s32.totalorder %s1730_s22, 5 }
  0x4b   : > { %p425_p3 = pnand %p1377_p1, %p424_p2 }
  0x4c   : > { %s438_s4 = sand.u32 (!%p425_p3), 1, %s1698_s14   ;;  %s431_s30 = sand.u32 (!%p425_p3), 1, %s1706_s16   ;;  %vm486_vm0 = vcmask (!%p425_p3), 7168   ;;  %v1732_v32 = vmov (!%p425_p3), -inf   ;;  %vm656_vm1 = vcmask (!%p425_p3), 523264   ;;  %v1733_v57 = vmov (!%p425_p3), 0  }
  0x4d   : > { %428 = sbr.rel (%p425_p3) target bundleno = 950 (0x3b6), region = 143  ;;  %s1379_s27 = sshll.u32 (!%p425_p3), %s438_s4, 5  ;;  %489 = vst.msk [vmem:[#allocation2 + $0x10] sm:$0xff] (!%p425_p3), %vm486_vm0, %v1732_v32  ;;  %487 = vst.msk [vmem:[#allocation2] sm:$0xff] (!%p425_p3), %vm486_vm0, %v1732_v32  ;;  %1582 = vset.pattern.permute.xlu0 (!%p425_p3), %v1733_v57  ;;  %1583 = vset.pattern.permute.xlu1 (!%p425_p3), %v1733_v57  ;;  %v1734_v58 = vmov (!%p425_p3), 0.0  }
  0x4e   : > { %s1904_s9 = sshll.u32 (!%p425_p3), %s431_s30, 5  ;;  %s440_s23 = scalar_lea.vmem (!%p425_p3), [#allocation6], %s1379_s27  ;;  %488 = vst.msk [vmem:[#allocation2 + $0x8] sm:$0xff] (!%p425_p3), %vm486_vm0, %v1732_v32  ;;  %490 = vst.msk [vmem:[#allocation2 + $0x18] sm:$0xff] (!%p425_p3), %vm486_vm0, %v1732_v32 }
  0x4f   : > { %v1584_v24 = vld [vmem:[%s440_s23] sm:$0xff] (!%p425_p3)   ;;  %v1585_v25 = vld [vmem:[%s440_s23 + $0x8] sm:$0xff] (!%p425_p3)   ;;  %s433_s29 = scalar_lea.vmem (!%p425_p3), [#allocation5], %s1904_s9  ;;  %v1586_v27 = vld [vmem:[%s440_s23 + $0x10] sm:$0xff] (!%p425_p3)   ;;  %491 = vst.msk [vmem:[#allocation2 + $0x20] sm:$0xff] (!%p425_p3), %vm486_vm0, %v1732_v32  ;;  %s445_s14 = sand.u32 (!%p425_p3), 1, %s1690_s12  }
  0x50   : > { %1458 = vmatprep.subr.bf16.mxu0 (!%p425_p3), %v1584_v24  ;;  %v1588_v26 = vld [vmem:[%s433_s29] sm:$0xff] (!%p425_p3)   ;;  %v1587_v28 = vld [vmem:[%s440_s23 + $0x18] sm:$0xff] (!%p425_p3)   ;;  %v1589_v29 = vld [vmem:[%s433_s29 + $0x8] sm:$0xff] (!%p425_p3)   ;;  %492 = vst.msk [vmem:[#allocation2 + $0x28] sm:$0xff] (!%p425_p3), %vm486_vm0, %v1732_v32  ;;  %s1380_s16 = sshll.u32 (!%p425_p3), %s445_s14, 5  ;;  %s2089_s12 = scalar_lea.vmem (!%p425_p3), [#allocation8], %s1904_s9 }
  0x51   : > { %1459 = vmatpush3.bf16.xpose.msra.mxu0 (!%p425_p3), %v1584_v24  ;;  %1466 = vmatprep.mubr.bf16.mxu0 (!%p425_p3), %v1588_v26  ;;  %v1590_v30 = vld [vmem:[%s433_s29 + $0x10] sm:$0xff] (!%p425_p3)   ;;  %v1591_v31 = vld [vmem:[%s433_s29 + $0x18] sm:$0xff] (!%p425_p3)   ;;  %493 = vst.msk [vmem:[#allocation2 + $0x30] sm:$0xff] (!%p425_p3), %vm486_vm0, %v1732_v32  ;;  %494 = vst.msk [vmem:[#allocation2 + $0x38] sm:$0xff] (!%p425_p3), %vm486_vm0, %v1732_v32  ;;  %s447_s3 = scalar_lea.vmem (!%p425_p3), [#allocation7], %s1380_s16 }
  0x52   : > { %1460 = vmatprep.subr.bf16.mxu0 (!%p425_p3), %v1585_v25  ;;  %497 = vst.msk [vmem:[#allocation3 + $0x10] sm:$0xff] (!%p425_p3), %vm486_vm0, %v1734_v58  ;;  %495 = vst.msk [vmem:[#allocation3] sm:$0xff] (!%p425_p3), %vm486_vm0, %v1734_v58  ;;  %v1592_v18 = vld [vmem:[%s447_s3] sm:$0xff] (!%p425_p3)  }
  0x53   : > { %496 = vst.msk [vmem:[#allocation3 + $0x8] sm:$0xff] (!%p425_p3), %vm486_vm0, %v1734_v58  ;;  %498 = vst.msk [vmem:[#allocation3 + $0x18] sm:$0xff] (!%p425_p3), %vm486_vm0, %v1734_v58  ;;  %1474 = vmatprep.subr.bf16.mxu1 (!%p425_p3), %v1592_v18 }
  0x54   : > { %499 = vst.msk [vmem:[#allocation3 + $0x20] sm:$0xff] %vm486_vm0, %v1734_v58  ;;  %500 = vst.msk [vmem:[#allocation3 + $0x28] sm:$0xff] %vm486_vm0, %v1734_v58  ;;  %v1955_v59 = vld [vmem:[#allocation2 + $0x10] sm:$0xff]  ;;  %v1957_v60 = vld [vmem:[#allocation2] sm:$0xff]  ;;  %1475 = vmatpush3.bf16.msra.mxu1 %v1592_v18  ;;  %s1407_s25 = sshll.u32 (%p1868_p13), %s1718_s19, 4  ;;  %s2155_s10 = sld [smem:[#allocation10_spill]] (%p1868_p13) }
  0x55   : > { %501 = vst.msk [vmem:[#allocation3 + $0x30] sm:$0xff] %vm486_vm0, %v1734_v58  ;;  %502 = vst.msk [vmem:[#allocation3 + $0x38] sm:$0xff] %vm486_vm0, %v1734_v58  ;;  %v1965_v1 = vld [vmem:[#allocation2 + $0x18] sm:$0xff]  ;;  %v1972_v3 = vld [vmem:[#allocation2 + $0x8] sm:$0xff]  ;;  %s1153_s5 = sadd.s32 (%p1868_p13), %s1714_s18, %s1407_s25 }
  0x56   : > { %v1990_v10 = vld [vmem:[#allocation2 + $0x20] sm:$0xff]  ;;  %s1408_s6 = sshll.u32 (%p1868_p13), %s1153_s5, 2 }
  0x57   : > { %v1997_v13 = vld [vmem:[#allocation2 + $0x28] sm:$0xff] }
  0x58   : > { %v2002_v15 = vld [vmem:[#allocation2 + $0x30] sm:$0xff]  ;;  %v2005_v17 = vld [vmem:[#allocation2 + $0x38] sm:$0xff] }
  0x59   : > { %1461 = vmatpush3.bf16.xpose.msra.mxu0 %v1585_v25  ;;  %v1593_v25 = vld [vmem:[%s447_s3 + $0x8] sm:$0xff]  }
  0x5a   : > { %1462 = vmatprep.subr.bf16.mxu0 %v1586_v27  ;;  %1476 = vmatprep.subr.bf16.mxu1 %v1593_v25  ;;  %s1155_s4 = scalar_lea.vmem (%p1868_p13), %s2155_s10, %s1408_s6 }
  0x5b   : > { %1477 = vmatpush3.bf16.msra.mxu1 %v1593_v25 }
  0x61   : > { %1463 = vmatpush3.bf16.xpose.msra.mxu0 %v1586_v27 }
  0x62   : > { %1464 = vmatprep.subr.bf16.mxu0 %v1587_v28 }
  0x69   : > { %1465 = vmatpush3.bf16.xpose.msra.mxu0 %v1587_v28 }
  0x70   : > { %1467 = vmatmul.mubr.bf16.vlgmr.msra.gmra.mrb[0].mxu0 %v1589_v29  ;;  %v1594_v29 = vld [vmem:[%s447_s3 + $0x10] sm:$0xff]  }
  0x71   : > { %1470 = vmatprep.mubr.bf16.mxu0 %v1590_v30  ;;  %1478 = vmatprep.subr.bf16.mxu1 %v1594_v29  ;;  %v1595_v30 = vld [vmem:[%s447_s3 + $0x18] sm:$0xff]  }
  0x72   : > { %1479 = vmatpush3.bf16.msra.mxu1 %v1594_v29 }
  0x73   : > { %1480 = vmatprep.subr.bf16.mxu1 %v1595_v30 }
  0x76   : > { %1481 = vmatpush3.bf16.msra.mxu1 %v1595_v30 }
  0x78   : > { %1471 = vmatmul.mubr.bf16.gmra.mrb[4].mxu0 %v1591_v31 }
 0x143   : > { %v1468_v33 = vpop.f32.mrb[0].mxu0 }
 0x144   : > { %v1915_v34 = vmul.f32 0.088388346, %v1468_v33  ;;  %v609_v35 = vpop.f32.mrb[1].mxu0 }
 0x145   : > { %v1917_v36 = vmul.f32 0.088388346, %v609_v35  ;;  %v1469_v37 = vpop.f32.mrb[2].mxu0 }
 0x146   : > { %v1919_v38 = vmul.f32 0.088388346, %v1469_v37  ;;  %v612_v39 = vpop.f32.mrb[3].mxu0  ;;  %v663_v40 = vsel %vm656_vm1, %v1915_v34, -inf }
 0x147   : > { %v1923_v41 = vmul.f32 0.088388346, %v612_v39  ;;  %664 = vmax.xlane.f32.xlu1 %v663_v40  ;;  %v657_v42 = vsel %vm656_vm1, %v1917_v36, -inf }
 0x148   : > { %658 = vmax.xlane.f32.xlu0 %v657_v42  ;;  %v666_v43 = vsel %vm656_vm1, %v1919_v38, -inf }
 0x149   : > { %v660_v45 = vsel %vm656_vm1, %v1923_v41, -inf }
 0x14b   : > { %667 = vmax.xlane.f32.xlu1 %v666_v43  ;;  %v1472_v44 = vpop.f32.mrb[4].mxu0 }
 0x14c   : > { %661 = vmax.xlane.f32.xlu0 %v660_v45  ;;  %v625_v46 = vpop.f32.mrb[5].mxu0  ;;  %v1933_v50 = vmul.f32 0.088388346, %v1472_v44 }
 0x14d   : > { %v1931_v47 = vmul.f32 0.088388346, %v625_v46  ;;  %v1473_v48 = vpop.f32.mrb[6].mxu0 }
 0x14e   : > { %v628_v49 = vpop.f32.mrb[7].mxu0  ;;  %v1939_v53 = vmul.f32 0.088388346, %v1473_v48  ;;  %v675_v55 = vsel %vm656_vm1, %v1933_v50, -inf }
 0x14f   : > { %v1935_v51 = vmul.f32 0.088388346, %v628_v49  ;;  %v669_v52 = vsel %vm656_vm1, %v1931_v47, -inf }
 0x150   : > { %670 = vmax.xlane.f32.xlu0 %v669_v52  ;;  %v678_v56 = vsel %vm656_vm1, %v1939_v53, -inf }
 0x151   : > { %v672_v54 = vsel %vm656_vm1, %v1935_v51, -inf }
 0x152   : > { %673 = vmax.xlane.f32.xlu1 %v672_v54 }
 0x154   : > { %676 = vmax.xlane.f32.xlu0 %v675_v55 }
 0x156   : > { %679 = vmax.xlane.f32.xlu1 %v678_v56 }
 0x1d4   : > { %v665_v61 = vpop.xlane.xlu1 %664 }
 0x1d5   : > { %v1960_v62 = vmax.f32 %v1955_v59, %v665_v61  ;;  %v659_v63 = vpop.xlane.xlu0 %658 }
 0x1d6   : > { %v1963_v0 = vmax.f32 %v1957_v60, %v659_v63 }
 0x1d7   : > { %v691_v2 = vsub.f32 %v1955_v59, %v1960_v62  ;;  %1021 = vst.msk [vmem:[#allocation2 + $0x10] sm:$0xff] %vm486_vm0, %v1960_v62  ;;  %725 = vperm.xlu1 %1583, %v1960_v62   ;;  %v779_v62 = vld [vmem:[#allocation3 + $0x10] sm:$0xff] }
 0x1d8   : > { %v689_v4 = vsub.f32 %v1957_v60, %v1963_v0  ;;  %1019 = vst.msk [vmem:[#allocation2] sm:$0xff] %vm486_vm0, %v1963_v0  ;;  %v668_v5 = vpop.xlane.xlu1 %667  ;;  %715 = vperm.xlu0 %1582, %v1963_v0   ;;  %v777_v0 = vld [vmem:[#allocation3] sm:$0xff] }
 0x1d9   : > { %v1980_v6 = vmax.f32 %v1965_v1, %v668_v5  ;;  %v662_v7 = vpop.xlane.xlu0 %661 }
 0x1da   : > { %v1983_v8 = vmax.f32 %v1972_v3, %v662_v7 }
 0x1db   : > { %v692_v9 = vsub.f32 %v1965_v1, %v1980_v6  ;;  %1022 = vst.msk [vmem:[#allocation2 + $0x18] sm:$0xff] %vm486_vm0, %v1980_v6  ;;  %730 = vperm.xlu1 %1583, %v1980_v6  }
 0x1dc   : > { %v690_v11 = vsub.f32 %v1972_v3, %v1983_v8  ;;  %1020 = vst.msk [vmem:[#allocation2 + $0x8] sm:$0xff] %vm486_vm0, %v1983_v8 }
 0x1dd   : > { %v671_v12 = vpop.xlane.xlu0 %670 }
 0x1de   : > { %v2000_v14 = vmax.f32 %v1990_v10, %v671_v12 }
 0x1df   : > { %720 = vperm.xlu1 %1583, %v1983_v8   ;;  %v674_v16 = vpop.xlane.xlu1 %673 }
 0x1e0   : > { %v693_v19 = vsub.f32 %v1990_v10, %v2000_v14  ;;  %1023 = vst.msk [vmem:[#allocation2 + $0x20] sm:$0xff] %vm486_vm0, %v2000_v14  ;;  %v2012_v20 = vmax.f32 %v1997_v13, %v674_v16 }
 0x1e1   : > { %v677_v21 = vpop.xlane.xlu0 %676 }
 0x1e2   : > { %v694_v22 = vsub.f32 %v1997_v13, %v2012_v20  ;;  %1024 = vst.msk [vmem:[#allocation2 + $0x28] sm:$0xff] %vm486_vm0, %v2012_v20  ;;  %v2019_v23 = vmax.f32 %v2002_v15, %v677_v21 }
 0x1e3   : > { %v680_v24 = vpop.xlane.xlu1 %679 }
 0x1e4   : > { %v695_v26 = vsub.f32 %v2002_v15, %v2019_v23  ;;  %1025 = vst.msk [vmem:[#allocation2 + $0x30] sm:$0xff] %vm486_vm0, %v2019_v23  ;;  %v2026_v27 = vmax.f32 %v2005_v17, %v680_v24  ;;  %745 = vperm.xlu1 %1583, %v2019_v23  }
 0x1e6   : > { %v696_v28 = vsub.f32 %v2005_v17, %v2026_v27  ;;  %1026 = vst.msk [vmem:[#allocation2 + $0x38] sm:$0xff] %vm486_vm0, %v2026_v27 }
 0x1e8   : > { %735 = vperm.xlu1 %1583, %v2000_v14   ;;  %v778_v14 = vld [vmem:[#allocation3 + $0x8] sm:$0xff]  ;;  %v711_v13 = vmul.f32 1.442695, %v696_v28  ;;  %v783_v28 = vld [vmem:[#allocation3 + $0x30] sm:$0xff] }
 0x1ec   : > { %740 = vperm.xlu1 %1583, %v2012_v20  }
 0x1f0   : > { %750 = vperm.xlu1 %1583, %v2026_v27  }
 0x256   : > { %v726_v31 = vpop.permute.xlu1 %725 }
 0x257   : > { %v755_v32 = vsub.f32 %v1915_v34, %v726_v31  ;;  %v716_v33 = vpop.permute.xlu0 %715 }
 0x258   : > { %v753_v35 = vsub.f32 %v1917_v36, %v716_v33 }
 0x259   : > { %v765_v37 = vmul.f32 1.442695, %v755_v32 }
 0x25a   : > { %v761_v39 = vmul.f32 1.442695, %v753_v35  ;;  %v731_v40 = vpop.permute.xlu1 %730 }
 0x25b   : > { %1596 = vpow2.f32 %v765_v37  ;;  %v756_v42 = vsub.f32 %v1919_v38, %v731_v40  ;;  %v701_v37 = vmul.f32 1.442695, %v691_v2  ;;  %v699_v40 = vmul.f32 1.442695, %v690_v11 }
 0x25c   : > { %1598 = vpow2.f32 %v761_v39  ;;  %v697_v39 = vmul.f32 1.442695, %v689_v4  ;;  %v705_v2 = vmul.f32 1.442695, %v693_v19  ;;  %v707_v11 = vmul.f32 1.442695, %v694_v22 }
 0x25d   : > { %v767_v43 = vmul.f32 1.442695, %v756_v42  ;;  %v703_v42 = vmul.f32 1.442695, %v692_v9  ;;  %v780_v9 = vld [vmem:[#allocation3 + $0x18] sm:$0xff] }
 0x25e   : > { %v721_v44 = vpop.permute.xlu1 %720 }
 0x25f   : > { %1600 = vpow2.f32 %v767_v43  ;;  %v754_v45 = vsub.f32 %v1923_v41, %v721_v44 }
 0x261   : > { %v763_v46 = vmul.f32 1.442695, %v754_v45 }
 0x263   : > { %1602 = vpow2.f32 %v763_v46  ;;  %v746_v48 = vpop.permute.xlu1 %745  ;;  %v709_v46 = vmul.f32 1.442695, %v695_v26 }
 0x264   : > { %v759_v52 = vsub.f32 %v1933_v50, %v746_v48 }
 0x265   : > { %v1597_v49 = vpop.eup %1596 }
 0x266   : > { %v1599_v34 = vpop.eup %1598  ;;  %v799_v36 = vsel %vm656_vm1, %v1597_v49, 0.0  ;;  %v773_v57 = vmul.f32 1.442695, %v759_v52 }
 0x267   : > { %800 = vadd.xlane.f32.xlu0 %v799_v36  ;;  %v736_v54 = vpop.permute.xlu1 %735  ;;  %v793_v55 = vsel %vm656_vm1, %v1599_v34, 0.0 }
 0x268   : > { %v757_v38 = vsub.f32 %v1931_v47, %v736_v54  ;;  %794 = vadd.xlane.f32.xlu1 %v793_v55  ;;  %v782_v55 = vld [vmem:[#allocation3 + $0x28] sm:$0xff] }
 0x269   : > { %v1601_v56 = vpop.eup %1600 }
 0x26a   : > { %v769_v58 = vmul.f32 1.442695, %v757_v38  ;;  %v802_v41 = vsel %vm656_vm1, %v1601_v56, 0.0  ;;  %v891_v47 = vpack.c.bf16 %v1601_v56, %v1597_v49 }
 0x26b   : > { %v741_v61 = vpop.permute.xlu1 %740 }
 0x26c   : > { %1604 = vpow2.f32 %v769_v58  ;;  %v758_v63 = vsub.f32 %v1935_v51, %v741_v61  ;;  %803 = vadd.xlane.f32.xlu1 %v802_v41 }
 0x26d   : > { %v1603_v50 = vpop.eup %1602  ;;  %1606 = vpow2.f32 %v773_v57 }
 0x26e   : > { %v771_v5 = vmul.f32 1.442695, %v758_v63  ;;  %v796_v7 = vsel %vm656_vm1, %v1603_v50, 0.0  ;;  %v890_v12 = vpack.c.bf16 %v1603_v50, %v1599_v34  ;;  %v781_v34 = vld [vmem:[#allocation3 + $0x20] sm:$0xff]  ;;  %v784_v50 = vld [vmem:[#allocation3 + $0x38] sm:$0xff] }
 0x26f   : > { %797 = vadd.xlane.f32.xlu0 %v796_v7  ;;  %v751_v16 = vpop.permute.xlu1 %750 }
 0x270   : > { %1608 = vpow2.f32 %v771_v5  ;;  %v760_v18 = vsub.f32 %v1939_v53, %v751_v16  ;;  %1482 = vmatprep.mubr.msk.bf16.mxu1 %vm656_vm1, %v890_v12 }
 0x271   : > { %1483 = vmatmul.mubr.msk.bf16.vlgmr.msra.gmra.mrb[0].mxu1 %vm656_vm1, %v891_v47 }
 0x272   : > { %v775_v21 = vmul.f32 1.442695, %v760_v18 }
 0x274   : > { %1610 = vpow2.f32 %v775_v21 }
 0x275   : > { %1612 = vpow2.f32 %v701_v37 }
 0x276   : > { %v1605_v51 = vpop.eup %1604  ;;  %1614 = vpow2.f32 %v697_v39 }
 0x277   : > { %v805_v24 = vsel %vm656_vm1, %v1605_v51, 0.0  ;;  %v1607_v25 = vpop.eup %1606  ;;  %1616 = vpow2.f32 %v699_v40 }
 0x278   : > { %806 = vadd.xlane.f32.xlu0 %v805_v24  ;;  %v811_v30 = vsel %vm656_vm1, %v1607_v25, 0.0  ;;  %1618 = vpow2.f32 %v703_v42 }
 0x279   : > { %1620 = vpow2.f32 %v705_v2 }
 0x27a   : > { %v1609_v29 = vpop.eup %1608  ;;  %1622 = vpow2.f32 %v707_v11 }
 0x27b   : > { %v808_v31 = vsel %vm656_vm1, %v1609_v29, 0.0  ;;  %v892_v32 = vpack.c.bf16 %v1609_v29, %v1605_v51  ;;  %1624 = vpow2.f32 %v709_v46 }
 0x27c   : > { %812 = vadd.xlane.f32.xlu0 %v811_v30  ;;  %809 = vadd.xlane.f32.xlu1 %v808_v31  ;;  %1626 = vpow2.f32 %v711_v13 }
 0x27d   : > { %1486 = vmatprep.mubr.msk.bf16.mxu1 %vm656_vm1, %v892_v32 }
 0x27e   : > { %v1611_v53 = vpop.eup %1610 }
 0x27f   : > { %v814_v33 = vsel %vm656_vm1, %v1611_v53, 0.0  ;;  %v893_v35 = vpack.c.bf16 %v1611_v53, %v1607_v25  ;;  %v1613_v43 = vpop.eup %1612 }
 0x280   : > { %815 = vadd.xlane.f32.xlu1 %v814_v33  ;;  %v1615_v44 = vpop.eup %1614  ;;  %v787_v3 = vmul.f32 %v1613_v43, %v779_v62 }
 0x281   : > { %1487 = vmatmul.mubr.msk.bf16.gmra.mrb[4].mxu1 %vm656_vm1, %v893_v35  ;;  %v1617_v59 = vpop.eup %1616  ;;  %v785_v1 = vmul.f32 %v1615_v44, %v777_v0 }
 0x282   : > { %v1619_v60 = vpop.eup %1618  ;;  %v786_v20 = vmul.f32 %v1617_v59, %v778_v14 }
 0x283   : > { %v788_v10 = vmul.f32 %v1619_v60, %v780_v9  ;;  %v1621_v49 = vpop.eup %1620 }
 0x284   : > { %v1623_v36 = vpop.eup %1622  ;;  %v789_v54 = vmul.f32 %v1621_v49, %v781_v34 }
 0x285   : > { %v1625_v17 = vpop.eup %1624  ;;  %v790_v58 = vmul.f32 %v1623_v36, %v782_v55 }
 0x286   : > { %v791_v57 = vmul.f32 %v1625_v17, %v783_v28  ;;  %v1627_v41 = vpop.eup %1626 }
 0x287   : > { %v792_v12 = vmul.f32 %v1627_v41, %v784_v50 }
 0x291   : > { %854 = vperm.xlu1 %1583, %v1613_v43  }
 0x292   : > { %844 = vperm.xlu0 %1582, %v1615_v44  }
 0x296   : > { %849 = vperm.xlu0 %1582, %v1617_v59  }
 0x29a   : > { %859 = vperm.xlu0 %1582, %v1619_v60  }
 0x2f4   : > { %v801_v4 = vpop.xlane.xlu0 %800 }
 0x2f5   : > { %v819_v6 = vadd.f32 %v801_v4, %v787_v3  ;;  %v795_v8 = vpop.xlane.xlu1 %794 }
 0x2f6   : > { %v817_v45 = vadd.f32 %v795_v8, %v785_v1 }
 0x2f7   : > { %828 = vst.msk [vmem:[#allocation3 + $0x10] sm:$0xff] %vm486_vm0, %v819_v6 }
 0x2f8   : > { %826 = vst.msk [vmem:[#allocation3] sm:$0xff] %vm486_vm0, %v817_v45 }
 0x2f9   : > { %v804_v19 = vpop.xlane.xlu1 %803 }
 0x2fa   : > { %v820_v48 = vadd.f32 %v804_v19, %v788_v10 }
 0x2fc   : > { %829 = vst.msk [vmem:[#allocation3 + $0x18] sm:$0xff] %vm486_vm0, %v820_v48  ;;  %v798_v22 = vpop.xlane.xlu0 %797 }
 0x2fd   : > { %v818_v15 = vadd.f32 %v798_v22, %v786_v20 }
 0x2fe   : > { %v1040_v23 = vld [vmem:[#allocation3 + $0x10] sm:$0xff] }
 0x2ff   : > { %827 = vst.msk [vmem:[#allocation3 + $0x8] sm:$0xff] %vm486_vm0, %v818_v15  ;;  %1058 = vperm.xlu0 %1582, %v1040_v23   ;;  %v1038_v26 = vld [vmem:[#allocation3] sm:$0xff] }
 0x300   : > { %1048 = vperm.xlu1 %1583, %v1038_v26  }
 0x303   : > { %v1041_v52 = vld [vmem:[#allocation3 + $0x18] sm:$0xff] }
 0x304   : > { %1063 = vperm.xlu1 %1583, %v1041_v52  }
 0x305   : > { %v807_v27 = vpop.xlane.xlu0 %806 }
 0x306   : > { %v821_v38 = vadd.f32 %v807_v27, %v789_v54  ;;  %v1039_v56 = vld [vmem:[#allocation3 + $0x8] sm:$0xff] }
 0x308   : > { %830 = vst.msk [vmem:[#allocation3 + $0x20] sm:$0xff] %vm486_vm0, %v821_v38  ;;  %1053 = vperm.xlu1 %1583, %v1039_v56  }
 0x309   : > { %v813_v61 = vpop.xlane.xlu0 %812  ;;  %v810_v63 = vpop.xlane.xlu1 %809 }
 0x30a   : > { %v823_v5 = vadd.f32 %v813_v61, %v791_v57  ;;  %v822_v7 = vadd.f32 %v810_v63, %v790_v58 }
 0x30c   : > { %832 = vst.msk [vmem:[#allocation3 + $0x30] sm:$0xff] %vm486_vm0, %v823_v5  ;;  %831 = vst.msk [vmem:[#allocation3 + $0x28] sm:$0xff] %vm486_vm0, %v822_v7 }
 0x30d   : > { %v816_v16 = vpop.xlane.xlu1 %815 }
 0x30e   : > { %v824_v47 = vadd.f32 %v816_v16, %v792_v12 }
 0x30f   : > { %v1042_v21 = vld [vmem:[#allocation3 + $0x20] sm:$0xff] }
 0x310   : > { %833 = vst.msk [vmem:[#allocation3 + $0x38] sm:$0xff] %vm486_vm0, %v824_v47 }
 0x311   : > { %v845_v37 = vpop.permute.xlu0 %844  ;;  %v855_v40 = vpop.permute.xlu1 %854 }
 0x312   : > { %v884_v62 = vmul.f32 0.0, %v855_v40  ;;  %v882_v6 = vmul.f32 0.0, %v845_v37 }
 0x313   : > { %v1044_v18 = vld [vmem:[#allocation3 + $0x30] sm:$0xff]  ;;  %v1043_v24 = vld [vmem:[#allocation3 + $0x28] sm:$0xff] }
 0x314   : > { %1078 = vperm.xlu0 %1582, %v1044_v18  }
 0x315   : > { %v850_v39 = vpop.permute.xlu0 %849 }
 0x316   : > { %v883_v8 = vmul.f32 0.0, %v850_v39 }
 0x317   : > { %v1045_v51 = vld [vmem:[#allocation3 + $0x38] sm:$0xff] }
 0x318   : > { %1068 = vperm.xlu0 %1582, %v1042_v21   ;;  %1083 = vperm.xlu1 %1583, %v1045_v51  }
 0x319   : > { %v860_v42 = vpop.permute.xlu0 %859 }
 0x31a   : > { %v885_v0 = vmul.f32 0.0, %v860_v42 }
 0x31c   : > { %869 = vperm.xlu0 %1582, %v1623_v36   ;;  %1073 = vperm.xlu1 %1583, %v1043_v24  }
 0x320   : > { %879 = vperm.xlu0 %1582, %v1627_v41   ;;  %864 = vperm.xlu1 %1583, %v1621_v49  }
 0x324   : > { %874 = vperm.xlu1 %1583, %v1625_v17  }
 0x344   : > { %v1484_v25 = vpop.f32.mrb[0].mxu1 }
 0x345   : > { %v972_v29 = vpop.f32.mrb[1].mxu1  ;;  %v1005_v3 = vadd.f32 %v1484_v25, %v884_v62 }
 0x346   : > { %v1485_v30 = vpop.f32.mrb[2].mxu1  ;;  %v1003_v46 = vadd.f32 %v972_v29, %v882_v6 }
 0x347   : > { %v975_v31 = vpop.f32.mrb[3].mxu1  ;;  %v1006_v4 = vadd.f32 %v1485_v30, %v885_v0 }
 0x348   : > { %v1004_v10 = vadd.f32 %v975_v31, %v883_v8 }
 0x354   : > { %v1488_v32 = vpop.f32.mrb[4].mxu1 }
 0x355   : > { %v988_v53 = vpop.f32.mrb[5].mxu1 }
 0x356   : > { %v1489_v33 = vpop.f32.mrb[6].mxu1 }
 0x357   : > { %v991_v35 = vpop.f32.mrb[7].mxu1 }
 0x37e   : > { %v1059_v43 = vpop.permute.xlu0 %1058 }
 0x37f   : > { %v1049_v44 = vpop.permute.xlu1 %1048  ;;  %1628 = vrcp.f32 %v1059_v43 }
 0x383   : > { %v1064_v59 = vpop.permute.xlu1 %1063 }
 0x384   : > { %1630 = vrcp.f32 %v1064_v59 }
 0x385   : > { %1632 = vrcp.f32 %v1049_v44 }
 0x387   : > { %v1054_v60 = vpop.permute.xlu1 %1053 }
 0x388   : > { %1634 = vrcp.f32 %v1054_v60 }
 0x389   : > { %v1629_v2 = vpop.eup %1628 }
 0x38a   : > { %v1091_v9 = vmul.f32 %v1629_v2, %v1005_v3 }
 0x38e   : > { %v1631_v1 = vpop.eup %1630 }
 0x38f   : > { %v1093_v11 = vmul.f32 %v1631_v1, %v1006_v4  ;;  %v1633_v45 = vpop.eup %1632 }
 0x390   : > { %v1087_v48 = vmul.f32 %v1633_v45, %v1003_v46 }
 0x391   : > { %v1427_v14 = vpack.c.bf16 %v1093_v11, %v1091_v9 }
 0x392   : > { %v1635_v19 = vpop.eup %1634 }
 0x393   : > { %v1089_v13 = vmul.f32 %v1635_v19, %v1004_v10  ;;  %v1079_v20 = vpop.permute.xlu0 %1078  ;;  %1439 = vst [vmem:[%s2089_s12 + $0x8] sm:$0xff] %v1427_v14  }
 0x395   : > { %v1422_v22 = vpack.c.bf16 %v1089_v13, %v1087_v48 }
 0x397   : > { %v1069_v15 = vpop.permute.xlu0 %1068  ;;  %v1084_v23 = vpop.permute.xlu1 %1083  ;;  %1423 = vst [vmem:[%s2089_s12] sm:$0xff] %v1422_v22  }
 0x398   : > { %1636 = vrcp.f32 %v1069_v15 }
 0x399   : > { %1638 = vrcp.f32 %v1084_v23 }
 0x39a   : > { %v1175_v51 = vld [vmem:[%s2089_s12 + $0x8] sm:$0xf] (%p1868_p13)  ;;  %v1177_v24 = vld [vmem:[%s2089_s12 + $0xc] sm:$0xf] (%p1868_p13) }
 0x39b   : > { %v870_v26 = vpop.permute.xlu0 %869  ;;  %v1074_v49 = vpop.permute.xlu1 %1073  ;;  %1176 = vst [vmem:[%s1155_s4 + $0x10] sm:$0xf] (%p1868_p13), %v1175_v51  ;;  %1178 = vst [vmem:[%s1155_s4 + $0x18] sm:$0xf] (%p1868_p13), %v1177_v24 }
 0x39c   : > { %1640 = vrcp.f32 %v1074_v49  ;;  %v887_v17 = vmul.f32 0.0, %v870_v26 }
 0x39d   : > { %1642 = vrcp.f32 %v1079_v20 }
 0x39e   : > { %v1008_v58 = vadd.f32 %v991_v35, %v887_v17  ;;  %v1171_v18 = vld [vmem:[%s2089_s12] sm:$0xf] (%p1868_p13)  ;;  %v1173_v21 = vld [vmem:[%s2089_s12 + $0x4] sm:$0xf] (%p1868_p13) }
 0x39f   : > { %v880_v34 = vpop.permute.xlu0 %879  ;;  %v865_v52 = vpop.permute.xlu1 %864  ;;  %1172 = vst [vmem:[%s1155_s4] sm:$0xf] (%p1868_p13), %v1171_v18  ;;  %1174 = vst [vmem:[%s1155_s4 + $0x8] sm:$0xf] (%p1868_p13), %v1173_v21 }
 0x3a0   : > { %v889_v36 = vmul.f32 0.0, %v880_v34  ;;  %v886_v54 = vmul.f32 0.0, %v865_v52 }
 0x3a2   : > { %v1007_v27 = vadd.f32 %v988_v53, %v886_v54  ;;  %v1637_v55 = vpop.eup %1636  ;;  %v1010_v38 = vadd.f32 %v1489_v33, %v889_v36 }
 0x3a3   : > { %v875_v28 = vpop.permute.xlu1 %874  ;;  %v1639_v57 = vpop.eup %1638 }
 0x3a4   : > { %v888_v56 = vmul.f32 0.0, %v875_v28  ;;  %v1095_v5 = vmul.f32 %v1637_v55, %v1007_v27  ;;  %v1101_v7 = vmul.f32 %v1639_v57, %v1010_v38 }
 0x3a6   : > { %v1641_v41 = vpop.eup %1640  ;;  %v1009_v61 = vadd.f32 %v1488_v32, %v888_v56  ;;  %1148 = sbr.rel (!%p1868_p13) target bundleno = 950 (0x3b6), region = 167 }
 0x3a7   : > { %v1643_v63 = vpop.eup %1642  ;;  %v1097_v50 = vmul.f32 %v1641_v41, %v1008_v58 }
 0x3a8   : > { %v1099_v12 = vmul.f32 %v1643_v63, %v1009_v61 }
 0x3a9   : > { %v1432_v16 = vpack.c.bf16 %v1097_v50, %v1095_v5 }
 0x3aa   : > { %v1437_v47 = vpack.c.bf16 %v1101_v7, %v1099_v12 }
 0x3ab   : > { %1440 = vst [vmem:[%s2089_s12 + $0x10] sm:$0xff] %v1432_v16  }
 0x3ac   : > { %1441 = vst [vmem:[%s2089_s12 + $0x18] sm:$0xff] %v1437_v47  }
 0x3b2   : > { %v1179_v25 = vld [vmem:[%s2089_s12 + $0x10] sm:$0xf]  ;;  %v1181_v29 = vld [vmem:[%s2089_s12 + $0x14] sm:$0xf] }
 0x3b3   : > { %v1183_v30 = vld [vmem:[%s2089_s12 + $0x18] sm:$0xf]  ;;  %v1185_v31 = vld [vmem:[%s2089_s12 + $0x1c] sm:$0xf]  ;;  %1180 = vst [vmem:[%s1155_s4 + $0x20] sm:$0xf] %v1179_v25 }
 0x3b4   : > { %1182 = vst [vmem:[%s1155_s4 + $0x28] sm:$0xf] %v1181_v29  ;;  %1184 = vst [vmem:[%s1155_s4 + $0x30] sm:$0xf] %v1183_v30 }
 0x3b5   : > { %1186 = vst [vmem:[%s1155_s4 + $0x38] sm:$0xf] %v1185_v31 }
 0x3b6 PF: > { %s13_s22 = sadd.s32 1, %s1730_s22   ;;  %s2156_s30 = sld [smem:[#allocation9_spill]] }
 0x3b7   : > { %p10_p4 = scmp.ge.s32.totalorder %s13_s22, 6   ;;  %s2157_s12 = smov %s1694_s13 }
 0x3b8   : > { %s2158_s13 = smov %s1873_s26  ;;  %s2159_s14 = smov %s1702_s15 }
 0x3b9   : > { %s2160_s15 = smov %s1851_s28  ;;  %s2161_s16 = smov %s1710_s17 }
 0x3ba   : > { %s2162_s17 = smov %s1848_s11  ;;  %s2163_s18 = smov %s1722_s20 }
 0x3bb   : > { %s2164_s19 = smov %s1726_s21  ;;  %s2165_s20 = smov %s2168_s24 }
 0x3bc   : > { %s2166_s21 = smov %s2156_s30  ;;  %12 = sbr.rel (!%p10_p4) target bundleno = 8 (0x8), region = 255 }

// kernel: timesformer_encoder_forward.15
= control target key start
LH: loop header
LB: loop body
LE: loop exit
PB: predicated region body
PF: predicated region fallthrough
CT: control target
= control target key end

     0   :  { %v587_v48 = vlaneseq  ;;  %s1313_s1 = inlined_call_operand.vmem [shape: bf16[256,256], index: 1, kind: input, shape index: {}]   ;;  %s1314_s0 = inlined_call_operand.vmem [shape: bf16[128,256], index: 0, kind: input, shape index: {}]   ;;  %s1315_s2 = inlined_call_operand.vmem [shape: f32[1,256], index: 2, kind: input, shape index: {}]   ;;  %s1316_s3 = inlined_call_operand.vmem [shape: bf16[128,256], index: 3, kind: input, shape index: {}]   ;;  %s1317_s4 = inlined_call_operand.vmem [shape: bf16[128,256], index: 4, kind: output, shape index: {}]  }
   0x1   :  { %v937_v0 = vld [vmem:[%s1313_s1 + $0x4] ss:$8 sps:$4 sm:$0xff]   ;;  %v939_v1 = vld [vmem:[%s1313_s1] ss:$8 sps:$4 sm:$0xff]   ;;  %v940_v2 = vld [vmem:[%s1313_s1 + $0x14] ss:$8 sps:$4 sm:$0xff]  }
   0x2   :  { %373 = vmatprep.subr.bf16.mxu0 %v937_v0  ;;  %905 = vmatprep.subr.bf16.mxu1 %v937_v0  ;;  %v942_v3 = vld [vmem:[%s1313_s1 + $0x10] ss:$8 sps:$4 sm:$0xff]   ;;  %v943_v4 = vld [vmem:[%s1313_s1 + $0x24] ss:$8 sps:$4 sm:$0xff]   ;;  %v945_v5 = vld [vmem:[%s1313_s1 + $0x20] ss:$8 sps:$4 sm:$0xff]  }
   0x3   :  { %374 = vmatpush1.bf16.msra.mxu0 %v939_v1  ;;  %921 = vmatpush1.bf16.msra.mxu1 %v939_v1  ;;  %v946_v6 = vld [vmem:[%s1313_s1 + $0x34] ss:$8 sps:$4 sm:$0xff]   ;;  %v948_v7 = vld [vmem:[%s1313_s1 + $0x30] ss:$8 sps:$4 sm:$0xff]   ;;  %v949_v8 = vld [vmem:[%s1313_s1 + $0x44] ss:$8 sps:$4 sm:$0xff]  }
   0x4   :  { %375 = vmatprep.subr.bf16.mxu0 %v940_v2  ;;  %906 = vmatprep.subr.bf16.mxu1 %v940_v2  ;;  %v951_v9 = vld [vmem:[%s1313_s1 + $0x40] ss:$8 sps:$4 sm:$0xff]   ;;  %v952_v10 = vld [vmem:[%s1313_s1 + $0x54] ss:$8 sps:$4 sm:$0xff]   ;;  %v954_v11 = vld [vmem:[%s1313_s1 + $0x50] ss:$8 sps:$4 sm:$0xff]  }
   0x5   :  { %v955_v12 = vld [vmem:[%s1313_s1 + $0x64] ss:$8 sps:$4 sm:$0xff]   ;;  %v957_v14 = vld [vmem:[%s1313_s1 + $0x60] ss:$8 sps:$4 sm:$0xff]   ;;  %v958_v16 = vld [vmem:[%s1313_s1 + $0x74] ss:$8 sps:$4 sm:$0xff]  }
   0x6   :  { %v987_v13 = vld [vmem:[%s1314_s0 + $0x4] ss:$8 sps:$4 sm:$0xff]   ;;  %v960_v17 = vld [vmem:[%s1313_s1 + $0x70] ss:$8 sps:$4 sm:$0xff]   ;;  %v963_v19 = vld [vmem:[%s1313_s1 + $0x80] ss:$8 sps:$4 sm:$0xff]  }
   0x7   :  { %376 = vmatpush1.bf16.msra.mxu0 %v942_v3  ;;  %922 = vmatpush1.bf16.msra.mxu1 %v942_v3  ;;  %v990_v15 = vld [vmem:[%s1314_s0 + $0x44] ss:$8 sps:$4 sm:$0xff]   ;;  %v964_v20 = vld [vmem:[%s1313_s1 + $0x94] ss:$8 sps:$4 sm:$0xff]   ;;  %v966_v21 = vld [vmem:[%s1313_s1 + $0x90] ss:$8 sps:$4 sm:$0xff]  }
   0x8   :  { %377 = vmatprep.subr.bf16.mxu0 %v943_v4  ;;  %907 = vmatprep.subr.bf16.mxu1 %v943_v4  ;;  %v961_v18 = vld [vmem:[%s1313_s1 + $0x84] ss:$8 sps:$4 sm:$0xff]   ;;  %v969_v23 = vld [vmem:[%s1313_s1 + $0xa0] ss:$8 sps:$4 sm:$0xff]   ;;  %v970_v24 = vld [vmem:[%s1313_s1 + $0xb4] ss:$8 sps:$4 sm:$0xff]  }
   0x9   :  { %405 = vmatprep.mubr.bf16.mxu0 %v987_v13  ;;  %445 = vmatprep.mubr.bf16.mxu1 %v990_v15  ;;  %v967_v22 = vld [vmem:[%s1313_s1 + $0xa4] ss:$8 sps:$4 sm:$0xff]   ;;  %v972_v25 = vld [vmem:[%s1313_s1 + $0xb0] ss:$8 sps:$4 sm:$0xff]   ;;  %v975_v27 = vld [vmem:[%s1313_s1 + $0xc0] ss:$8 sps:$4 sm:$0xff]  }
   0xa   :  { %v973_v26 = vld [vmem:[%s1313_s1 + $0xc4] ss:$8 sps:$4 sm:$0xff]   ;;  %v976_v28 = vld [vmem:[%s1313_s1 + $0xd4] ss:$8 sps:$4 sm:$0xff]   ;;  %v978_v29 = vld [vmem:[%s1313_s1 + $0xd0] ss:$8 sps:$4 sm:$0xff]  }
   0xb   :  { %378 = vmatpush1.bf16.msra.mxu0 %v945_v5  ;;  %923 = vmatpush1.bf16.msra.mxu1 %v945_v5  ;;  %v979_v30 = vld [vmem:[%s1313_s1 + $0xe4] ss:$8 sps:$4 sm:$0xff]   ;;  %v981_v31 = vld [vmem:[%s1313_s1 + $0xe0] ss:$8 sps:$4 sm:$0xff]   ;;  %v982_v32 = vld [vmem:[%s1313_s1 + $0xf4] ss:$8 sps:$4 sm:$0xff]  }
   0xc   :  { %379 = vmatprep.subr.bf16.mxu0 %v946_v6  ;;  %908 = vmatprep.subr.bf16.mxu1 %v946_v6  ;;  %v984_v33 = vld [vmem:[%s1313_s1 + $0xf0] ss:$8 sps:$4 sm:$0xff]   ;;  %v985_v34 = vld [vmem:[%s1314_s0] ss:$8 sps:$4 sm:$0xff]   ;;  %v991_v36 = vld [vmem:[%s1314_s0 + $0x14] ss:$8 sps:$4 sm:$0xff]  }
   0xd   :  { %v988_v35 = vld [vmem:[%s1314_s0 + $0x40] ss:$8 sps:$4 sm:$0xff]   ;;  %v993_v37 = vld [vmem:[%s1314_s0 + $0x54] ss:$8 sps:$4 sm:$0xff]   ;;  %v995_v38 = vld [vmem:[%s1314_s0 + $0x10] ss:$8 sps:$4 sm:$0xff]  }
   0xe   :  { %v996_v39 = vld [vmem:[%s1314_s0 + $0x50] ss:$8 sps:$4 sm:$0xff]   ;;  %v997_v40 = vld [vmem:[%s1314_s0 + $0x24] ss:$8 sps:$4 sm:$0xff]   ;;  %v1001_v42 = vld [vmem:[%s1314_s0 + $0x20] ss:$8 sps:$4 sm:$0xff]  }
   0xf   :  { %380 = vmatpush1.bf16.msra.mxu0 %v948_v7  ;;  %924 = vmatpush1.bf16.msra.mxu1 %v948_v7  ;;  %v999_v41 = vld [vmem:[%s1314_s0 + $0x64] ss:$8 sps:$4 sm:$0xff]   ;;  %v1002_v43 = vld [vmem:[%s1314_s0 + $0x60] ss:$8 sps:$4 sm:$0xff]   ;;  %v1003_v44 = vld [vmem:[%s1314_s0 + $0x34] ss:$8 sps:$4 sm:$0xff]  }
  0x10   :  { %381 = vmatprep.subr.bf16.mxu0 %v949_v8  ;;  %909 = vmatprep.subr.bf16.mxu1 %v949_v8  ;;  %v1005_v45 = vld [vmem:[%s1314_s0 + $0x74] ss:$8 sps:$4 sm:$0xff]   ;;  %v1007_v46 = vld [vmem:[%s1314_s0 + $0x30] ss:$8 sps:$4 sm:$0xff]   ;;  %v588_v49 = vshrl.u32 %v587_v48, 7  ;;  %v629_v53 = vld [vmem:[%s1316_s3] sm:$0xff] }
  0x11   :  { %v1008_v47 = vld [vmem:[%s1314_s0 + $0x70] ss:$8 sps:$4 sm:$0xff]   ;;  %v585_v51 = vld [vmem:[%s1315_s2] sm:$0x3]  ;;  %v630_v57 = vld [vmem:[%s1316_s3 + $0x8] sm:$0xff]  ;;  %v645_v59 = vunpack.c.l.bf16 %v629_v53  ;;  %v646_v63 = vunpack.c.h.bf16 %v629_v53 }
  0x12   :  { %v589_v50 = vsub.s32 0, %v588_v49  ;;  %v593_v52 = vsub.s32 1, %v588_v49  ;;  %v637_v54 = vld [vmem:[%s1316_s3 + $0x40] sm:$0xff]  ;;  %v638_v58 = vld [vmem:[%s1316_s3 + $0x48] sm:$0xff]  ;;  %v647_v5 = vunpack.c.l.bf16 %v630_v57 }
  0x13   :  { %382 = vmatpush1.bf16.msra.mxu0 %v951_v9  ;;  %925 = vmatpush1.bf16.msra.mxu1 %v951_v9  ;;  %v661_v60 = vunpack.c.l.bf16 %v637_v54  ;;  %v662_v0 = vunpack.c.h.bf16 %v637_v54  ;;  %v663_v6 = vunpack.c.l.bf16 %v638_v58 }
  0x14   :  { %383 = vmatprep.subr.bf16.mxu0 %v952_v10  ;;  %910 = vmatprep.subr.bf16.mxu1 %v952_v10  ;;  %v1187_v55 = vrot.slane %v585_v51, %v589_v50  ;;  %v1189_v56 = vrot.slane %v585_v51, %v593_v52 }
  0x17   :  { %384 = vmatpush1.bf16.msra.mxu0 %v954_v11  ;;  %926 = vmatpush1.bf16.msra.mxu1 %v954_v11  ;;  %v648_v11 = vunpack.c.h.bf16 %v630_v57 }
  0x18   :  { %385 = vmatprep.subr.bf16.mxu0 %v955_v12  ;;  %911 = vmatprep.subr.bf16.mxu1 %v955_v12  ;;  %v664_v12 = vunpack.c.h.bf16 %v638_v58 }
  0x1b   :  { %386 = vmatpush1.bf16.msra.mxu0 %v957_v14  ;;  %927 = vmatpush1.bf16.msra.mxu1 %v957_v14 }
  0x1c   :  { %387 = vmatprep.subr.bf16.mxu0 %v958_v16  ;;  %912 = vmatprep.subr.bf16.mxu1 %v958_v16 }
  0x1f   :  { %388 = vmatpush1.bf16.msra.mxu0 %v960_v17  ;;  %928 = vmatpush1.bf16.msra.mxu1 %v960_v17 }
  0x20   :  { %389 = vmatprep.subr.bf16.mxu0 %v961_v18  ;;  %913 = vmatprep.subr.bf16.mxu1 %v961_v18 }
  0x23   :  { %390 = vmatpush1.bf16.msra.mxu0 %v963_v19  ;;  %929 = vmatpush1.bf16.msra.mxu1 %v963_v19 }
  0x24   :  { %391 = vmatprep.subr.bf16.mxu0 %v964_v20  ;;  %914 = vmatprep.subr.bf16.mxu1 %v964_v20 }
  0x27   :  { %392 = vmatpush1.bf16.msra.mxu0 %v966_v21  ;;  %930 = vmatpush1.bf16.msra.mxu1 %v966_v21 }
  0x28   :  { %393 = vmatprep.subr.bf16.mxu0 %v967_v22  ;;  %915 = vmatprep.subr.bf16.mxu1 %v967_v22 }
  0x2b   :  { %394 = vmatpush1.bf16.msra.mxu0 %v969_v23  ;;  %931 = vmatpush1.bf16.msra.mxu1 %v969_v23  ;;  %v631_v23 = vld [vmem:[%s1316_s3 + $0x10] sm:$0xff] }
  0x2c   :  { %395 = vmatprep.subr.bf16.mxu0 %v970_v24  ;;  %916 = vmatprep.subr.bf16.mxu1 %v970_v24  ;;  %v639_v24 = vld [vmem:[%s1316_s3 + $0x50] sm:$0xff] }
  0x2f   :  { %396 = vmatpush1.bf16.msra.mxu0 %v972_v25  ;;  %932 = vmatpush1.bf16.msra.mxu1 %v972_v25 }
  0x30   :  { %397 = vmatprep.subr.bf16.mxu0 %v973_v26  ;;  %917 = vmatprep.subr.bf16.mxu1 %v973_v26 }
  0x33   :  { %398 = vmatpush1.bf16.msra.mxu0 %v975_v27  ;;  %933 = vmatpush1.bf16.msra.mxu1 %v975_v27 }
  0x34   :  { %399 = vmatprep.subr.bf16.mxu0 %v976_v28  ;;  %918 = vmatprep.subr.bf16.mxu1 %v976_v28 }
  0x37   :  { %400 = vmatpush1.bf16.msra.mxu0 %v978_v29  ;;  %934 = vmatpush1.bf16.msra.mxu1 %v978_v29 }
  0x38   :  { %401 = vmatprep.subr.bf16.mxu0 %v979_v30  ;;  %919 = vmatprep.subr.bf16.mxu1 %v979_v30 }
  0x3b   :  { %402 = vmatpush1.bf16.msra.mxu0 %v981_v31  ;;  %935 = vmatpush1.bf16.msra.mxu1 %v981_v31  ;;  %v632_v31 = vld [vmem:[%s1316_s3 + $0x18] sm:$0xff] }
  0x3c   :  { %403 = vmatprep.subr.bf16.mxu0 %v982_v32  ;;  %920 = vmatprep.subr.bf16.mxu1 %v982_v32  ;;  %v640_v32 = vld [vmem:[%s1316_s3 + $0x58] sm:$0xff]  ;;  %v652_v51 = vunpack.c.h.bf16 %v632_v31 }
  0x3d   :  { %v668_v52 = vunpack.c.h.bf16 %v640_v32 }
  0x3f   :  { %404 = vmatpush1.bf16.msra.mxu0 %v984_v33  ;;  %936 = vmatpush1.bf16.msra.mxu1 %v984_v33  ;;  %v649_v33 = vunpack.c.l.bf16 %v631_v23 }
  0x42   :  { %406 = vmatmul.mubr.bf16.vlgmr.msra.gmra.mrb[0].mxu0 %v985_v34  ;;  %446 = vmatmul.mubr.bf16.vlgmr.msra.gmra.mrb[0].mxu1 %v988_v35  ;;  %v665_v34 = vunpack.c.l.bf16 %v639_v24 }
  0x43   :  { %415 = vmatprep.mubr.bf16.mxu0 %v991_v36  ;;  %455 = vmatprep.mubr.bf16.mxu1 %v993_v37 }
  0x4a   :  { %416 = vmatmul.mubr.bf16.gmra.mrb[4].mxu0 %v995_v38  ;;  %456 = vmatmul.mubr.bf16.gmra.mrb[4].mxu1 %v996_v39  ;;  %v650_v39 = vunpack.c.h.bf16 %v631_v23 }
  0x4b   :  { %425 = vmatprep.mubr.bf16.mxu0 %v997_v40  ;;  %465 = vmatprep.mubr.bf16.mxu1 %v999_v41  ;;  %v666_v40 = vunpack.c.h.bf16 %v639_v24 }
  0x52   :  { %426 = vmatmul.mubr.bf16.gmra.mrb[8].mxu0 %v1001_v42  ;;  %466 = vmatmul.mubr.bf16.gmra.mrb[8].mxu1 %v1002_v43 }
  0x53   :  { %435 = vmatprep.mubr.bf16.mxu0 %v1003_v44  ;;  %475 = vmatprep.mubr.bf16.mxu1 %v1005_v45  ;;  %v651_v45 = vunpack.c.l.bf16 %v632_v31 }
  0x5a   :  { %436 = vmatmul.mubr.bf16.gmra.mrb[12].mxu0 %v1007_v46  ;;  %476 = vmatmul.mubr.bf16.gmra.mrb[12].mxu1 %v1008_v47  ;;  %v667_v46 = vunpack.c.l.bf16 %v640_v32 }
 0x115   :  { %v407_v61 = vpop.f32.mrb[0].mxu0  ;;  %v447_v62 = vpop.f32.mrb[0].mxu1 }
 0x116   :  { %v597_v1 = vadd.f32 %v1187_v55, %v407_v61  ;;  %v613_v2 = vadd.f32 %v1187_v55, %v447_v62  ;;  %v409_v3 = vpop.f32.mrb[1].mxu0  ;;  %v449_v4 = vpop.f32.mrb[1].mxu1 }
 0x117   :  { %v598_v7 = vadd.f32 %v1189_v56, %v409_v3  ;;  %v614_v8 = vadd.f32 %v1189_v56, %v449_v4  ;;  %v411_v9 = vpop.f32.mrb[2].mxu0  ;;  %v451_v10 = vpop.f32.mrb[2].mxu1 }
 0x118   :  { %v677_v13 = vadd.f32 %v645_v59, %v597_v1  ;;  %v693_v14 = vadd.f32 %v661_v60, %v613_v2  ;;  %v599_v15 = vadd.f32 %v1187_v55, %v411_v9  ;;  %v615_v16 = vadd.f32 %v1187_v55, %v451_v10  ;;  %v413_v17 = vpop.f32.mrb[3].mxu0  ;;  %v453_v18 = vpop.f32.mrb[3].mxu1  ;;  %v633_v1 = vld [vmem:[%s1316_s3 + $0x20] sm:$0xff]  ;;  %v634_v9 = vld [vmem:[%s1316_s3 + $0x28] sm:$0xff] }
 0x119   :  { %v678_v19 = vadd.f32 %v646_v63, %v598_v7  ;;  %v694_v20 = vadd.f32 %v662_v0, %v614_v8  ;;  %v600_v21 = vadd.f32 %v1189_v56, %v413_v17  ;;  %v616_v22 = vadd.f32 %v1189_v56, %v453_v18  ;;  %v641_v2 = vld [vmem:[%s1316_s3 + $0x60] sm:$0xff]  ;;  %v642_v10 = vld [vmem:[%s1316_s3 + $0x68] sm:$0xff] }
 0x11a   :  { %v679_v25 = vadd.f32 %v647_v5, %v599_v15  ;;  %v695_v26 = vadd.f32 %v663_v6, %v615_v16  ;;  %v654_v17 = vunpack.c.h.bf16 %v633_v1  ;;  %v670_v18 = vunpack.c.h.bf16 %v641_v2 }
 0x11b   :  { %v889_v27 = vpack.c.bf16 %v678_v19, %v677_v13  ;;  %v897_v28 = vpack.c.bf16 %v694_v20, %v693_v14  ;;  %v680_v29 = vadd.f32 %v648_v11, %v600_v21  ;;  %v696_v30 = vadd.f32 %v664_v12, %v616_v22 }
 0x11c   :  { %v653_v11 = vunpack.c.l.bf16 %v633_v1  ;;  %v669_v12 = vunpack.c.l.bf16 %v641_v2  ;;  %v655_v23 = vunpack.c.l.bf16 %v634_v9  ;;  %v671_v24 = vunpack.c.l.bf16 %v642_v10 }
 0x11d   :  { %805 = vst [vmem:[%s1317_s4] sm:$0xff] %v889_v27  ;;  %813 = vst [vmem:[%s1317_s4 + $0x40] sm:$0xff] %v897_v28  ;;  %v890_v35 = vpack.c.bf16 %v680_v29, %v679_v25  ;;  %v898_v36 = vpack.c.bf16 %v696_v30, %v695_v26  ;;  %v417_v37 = vpop.f32.mrb[4].mxu0  ;;  %v457_v38 = vpop.f32.mrb[4].mxu1  ;;  %v656_v29 = vunpack.c.h.bf16 %v634_v9  ;;  %v672_v30 = vunpack.c.h.bf16 %v642_v10 }
 0x11e   :  { %v601_v41 = vadd.f32 %v1187_v55, %v417_v37  ;;  %v617_v42 = vadd.f32 %v1187_v55, %v457_v38  ;;  %v419_v43 = vpop.f32.mrb[5].mxu0  ;;  %v459_v44 = vpop.f32.mrb[5].mxu1 }
 0x11f   :  { %806 = vst [vmem:[%s1317_s4 + $0x8] sm:$0xff] %v890_v35  ;;  %814 = vst [vmem:[%s1317_s4 + $0x48] sm:$0xff] %v898_v36  ;;  %v602_v47 = vadd.f32 %v1189_v56, %v419_v43  ;;  %v618_v48 = vadd.f32 %v1189_v56, %v459_v44  ;;  %v421_v49 = vpop.f32.mrb[6].mxu0  ;;  %v461_v50 = vpop.f32.mrb[6].mxu1 }
 0x120   :  { %v681_v53 = vadd.f32 %v649_v33, %v601_v41  ;;  %v697_v54 = vadd.f32 %v665_v34, %v617_v42  ;;  %v603_v57 = vadd.f32 %v1187_v55, %v421_v49  ;;  %v619_v58 = vadd.f32 %v1187_v55, %v461_v50  ;;  %v423_v59 = vpop.f32.mrb[7].mxu0  ;;  %v463_v60 = vpop.f32.mrb[7].mxu1  ;;  %v635_v41 = vld [vmem:[%s1316_s3 + $0x30] sm:$0xff]  ;;  %v636_v49 = vld [vmem:[%s1316_s3 + $0x38] sm:$0xff] }
 0x121   :  { %v682_v61 = vadd.f32 %v650_v39, %v602_v47  ;;  %v698_v62 = vadd.f32 %v666_v40, %v618_v48  ;;  %v604_v63 = vadd.f32 %v1189_v56, %v423_v59  ;;  %v620_v0 = vadd.f32 %v1189_v56, %v463_v60  ;;  %v643_v42 = vld [vmem:[%s1316_s3 + $0x70] sm:$0xff]  ;;  %v644_v50 = vld [vmem:[%s1316_s3 + $0x78] sm:$0xff] }
 0x122   :  { %v683_v3 = vadd.f32 %v651_v45, %v603_v57  ;;  %v699_v4 = vadd.f32 %v667_v46, %v619_v58  ;;  %v658_v59 = vunpack.c.h.bf16 %v635_v41  ;;  %v674_v60 = vunpack.c.h.bf16 %v643_v42 }
 0x123   :  { %v891_v5 = vpack.c.bf16 %v682_v61, %v681_v53  ;;  %v899_v6 = vpack.c.bf16 %v698_v62, %v697_v54  ;;  %v684_v7 = vadd.f32 %v652_v51, %v604_v63  ;;  %v700_v8 = vadd.f32 %v668_v52, %v620_v0 }
 0x124   :  { %v657_v51 = vunpack.c.l.bf16 %v635_v41  ;;  %v673_v52 = vunpack.c.l.bf16 %v643_v42  ;;  %v659_v1 = vunpack.c.l.bf16 %v636_v49  ;;  %v675_v2 = vunpack.c.l.bf16 %v644_v50 }
 0x125   :  { %807 = vst [vmem:[%s1317_s4 + $0x10] sm:$0xff] %v891_v5  ;;  %815 = vst [vmem:[%s1317_s4 + $0x50] sm:$0xff] %v899_v6  ;;  %v892_v13 = vpack.c.bf16 %v684_v7, %v683_v3  ;;  %v900_v14 = vpack.c.bf16 %v700_v8, %v699_v4  ;;  %v427_v15 = vpop.f32.mrb[8].mxu0  ;;  %v467_v16 = vpop.f32.mrb[8].mxu1  ;;  %v660_v7 = vunpack.c.h.bf16 %v636_v49  ;;  %v676_v8 = vunpack.c.h.bf16 %v644_v50 }
 0x126   :  { %v605_v19 = vadd.f32 %v1187_v55, %v427_v15  ;;  %v621_v20 = vadd.f32 %v1187_v55, %v467_v16  ;;  %v429_v21 = vpop.f32.mrb[9].mxu0  ;;  %v469_v22 = vpop.f32.mrb[9].mxu1 }
 0x127   :  { %808 = vst [vmem:[%s1317_s4 + $0x18] sm:$0xff] %v892_v13  ;;  %816 = vst [vmem:[%s1317_s4 + $0x58] sm:$0xff] %v900_v14  ;;  %v606_v25 = vadd.f32 %v1189_v56, %v429_v21  ;;  %v622_v26 = vadd.f32 %v1189_v56, %v469_v22  ;;  %v431_v27 = vpop.f32.mrb[10].mxu0  ;;  %v471_v28 = vpop.f32.mrb[10].mxu1 }
 0x128   :  { %v685_v31 = vadd.f32 %v653_v11, %v605_v19  ;;  %v701_v32 = vadd.f32 %v669_v12, %v621_v20  ;;  %v607_v33 = vadd.f32 %v1187_v55, %v431_v27  ;;  %v623_v34 = vadd.f32 %v1187_v55, %v471_v28  ;;  %v433_v35 = vpop.f32.mrb[11].mxu0  ;;  %v473_v36 = vpop.f32.mrb[11].mxu1 }
 0x129   :  { %v686_v37 = vadd.f32 %v654_v17, %v606_v25  ;;  %v702_v38 = vadd.f32 %v670_v18, %v622_v26  ;;  %v608_v39 = vadd.f32 %v1189_v56, %v433_v35  ;;  %v624_v40 = vadd.f32 %v1189_v56, %v473_v36 }
 0x12a   :  { %v687_v43 = vadd.f32 %v655_v23, %v607_v33  ;;  %v703_v44 = vadd.f32 %v671_v24, %v623_v34 }
 0x12b   :  { %v893_v45 = vpack.c.bf16 %v686_v37, %v685_v31  ;;  %v901_v46 = vpack.c.bf16 %v702_v38, %v701_v32  ;;  %v688_v47 = vadd.f32 %v656_v29, %v608_v39  ;;  %v704_v48 = vadd.f32 %v672_v30, %v624_v40 }
 0x12d   :  { %809 = vst [vmem:[%s1317_s4 + $0x20] sm:$0xff] %v893_v45  ;;  %817 = vst [vmem:[%s1317_s4 + $0x60] sm:$0xff] %v901_v46  ;;  %v894_v53 = vpack.c.bf16 %v688_v47, %v687_v43  ;;  %v902_v54 = vpack.c.bf16 %v704_v48, %v703_v44  ;;  %v437_v57 = vpop.f32.mrb[12].mxu0  ;;  %v477_v58 = vpop.f32.mrb[12].mxu1 }
 0x12e   :  { %v609_v61 = vadd.f32 %v1187_v55, %v437_v57  ;;  %v625_v62 = vadd.f32 %v1187_v55, %v477_v58  ;;  %v439_v63 = vpop.f32.mrb[13].mxu0  ;;  %v479_v0 = vpop.f32.mrb[13].mxu1 }
 0x12f   :  { %810 = vst [vmem:[%s1317_s4 + $0x28] sm:$0xff] %v894_v53  ;;  %818 = vst [vmem:[%s1317_s4 + $0x68] sm:$0xff] %v902_v54  ;;  %v610_v3 = vadd.f32 %v1189_v56, %v439_v63  ;;  %v626_v4 = vadd.f32 %v1189_v56, %v479_v0  ;;  %v441_v5 = vpop.f32.mrb[14].mxu0  ;;  %v481_v6 = vpop.f32.mrb[14].mxu1 }
 0x130   :  { %v689_v9 = vadd.f32 %v657_v51, %v609_v61  ;;  %v705_v10 = vadd.f32 %v673_v52, %v625_v62  ;;  %v611_v11 = vadd.f32 %v1187_v55, %v441_v5  ;;  %v627_v12 = vadd.f32 %v1187_v55, %v481_v6  ;;  %v443_v13 = vpop.f32.mrb[15].mxu0  ;;  %v483_v14 = vpop.f32.mrb[15].mxu1 }
 0x131   :  { %v690_v15 = vadd.f32 %v658_v59, %v610_v3  ;;  %v706_v16 = vadd.f32 %v674_v60, %v626_v4  ;;  %v612_v17 = vadd.f32 %v1189_v56, %v443_v13  ;;  %v628_v18 = vadd.f32 %v1189_v56, %v483_v14 }
 0x132   :  { %v691_v19 = vadd.f32 %v659_v1, %v611_v11  ;;  %v707_v20 = vadd.f32 %v675_v2, %v627_v12 }
 0x133   :  { %v895_v21 = vpack.c.bf16 %v690_v15, %v689_v9  ;;  %v903_v22 = vpack.c.bf16 %v706_v16, %v705_v10  ;;  %v692_v23 = vadd.f32 %v660_v7, %v612_v17  ;;  %v708_v24 = vadd.f32 %v676_v8, %v628_v18 }
 0x135   :  { %811 = vst [vmem:[%s1317_s4 + $0x30] sm:$0xff] %v895_v21  ;;  %819 = vst [vmem:[%s1317_s4 + $0x70] sm:$0xff] %v903_v22  ;;  %v896_v55 = vpack.c.bf16 %v692_v23, %v691_v19  ;;  %v904_v25 = vpack.c.bf16 %v708_v24, %v707_v20 }
 0x137   :  { %812 = vst [vmem:[%s1317_s4 + $0x38] sm:$0xff] %v896_v55  ;;  %820 = vst [vmem:[%s1317_s4 + $0x78] sm:$0xff] %v904_v25 }

// kernel: timesformer_encoder_forward.16
= control target key start
LH: loop header
LB: loop body
LE: loop exit
PB: predicated region body
PF: predicated region fallthrough
CT: control target
= control target key end

     0   :  { %s3770_s0 = inlined_call_operand.vmem [shape: bf16[128,256], index: 0, kind: input, shape index: {}]   ;;  %s3771_s3 = inlined_call_operand.vmem [shape: bf16[256,512], index: 3, kind: input, shape index: {}]   ;;  %s3772_s1 = inlined_call_operand.vmem [shape: f32[1,256], index: 1, kind: input, shape index: {}]   ;;  %s3773_s2 = inlined_call_operand.vmem [shape: f32[1,256], index: 2, kind: input, shape index: {}]   ;;  %s3774_s4 = inlined_call_operand.vmem [shape: f32[1,512], index: 4, kind: input, shape index: {}]   ;;  %s3775_s5 = inlined_call_operand.vmem [shape: bf16[128,512], index: 5, kind: output, shape index: {}]  }
   0x1   :  { %v2318_v0 = vld [vmem:[%s3770_s0] sm:$0xff]  ;;  %v2323_v1 = vld [vmem:[%s3770_s0 + $0x10] sm:$0xff]  ;;  %v2328_v2 = vld [vmem:[%s3770_s0 + $0x8] sm:$0xff] }
   0x2   :  { %v40_v3 = vunpack.c.l.bf16 %v2318_v0  ;;  %v41_v4 = vunpack.c.h.bf16 %v2318_v0  ;;  %v44_v5 = vunpack.c.l.bf16 %v2323_v1  ;;  %v45_v6 = vunpack.c.h.bf16 %v2323_v1  ;;  %v2337_v7 = vld [vmem:[%s3770_s0 + $0x18] sm:$0xff]  ;;  %v2342_v8 = vld [vmem:[%s3770_s0 + $0x20] sm:$0xff]  ;;  %v2351_v13 = vld [vmem:[%s3770_s0 + $0x28] sm:$0xff] }
   0x3   :  { %v42_v9 = vunpack.c.l.bf16 %v2328_v2  ;;  %v43_v10 = vunpack.c.h.bf16 %v2328_v2  ;;  %v46_v11 = vunpack.c.l.bf16 %v2337_v7  ;;  %v47_v12 = vunpack.c.h.bf16 %v2337_v7  ;;  %v2376_v22 = vld [vmem:[%s3770_s0 + $0x30] sm:$0xff]  ;;  %v2381_v23 = vld [vmem:[%s3770_s0 + $0x38] sm:$0xff]  ;;  %v2398_v30 = vld [vmem:[%s3770_s0 + $0x40] sm:$0xff] }
   0x4   :  { %v72_v14 = vadd.f32 %v41_v4, %v40_v3  ;;  %v78_v15 = vadd.f32 %v45_v6, %v44_v5  ;;  %v48_v16 = vunpack.c.l.bf16 %v2342_v8  ;;  %v49_v17 = vunpack.c.h.bf16 %v2342_v8  ;;  %v2403_v31 = vld [vmem:[%s3770_s0 + $0x48] sm:$0xff]  ;;  %v2420_v38 = vld [vmem:[%s3770_s0 + $0x50] sm:$0xff]  ;;  %v2425_v39 = vld [vmem:[%s3770_s0 + $0x58] sm:$0xff] }
   0x5   :  { %v75_v18 = vadd.f32 %v43_v10, %v42_v9  ;;  %v81_v19 = vadd.f32 %v47_v12, %v46_v11  ;;  %v50_v20 = vunpack.c.l.bf16 %v2351_v13  ;;  %v51_v21 = vunpack.c.h.bf16 %v2351_v13  ;;  %v2442_v46 = vld [vmem:[%s3770_s0 + $0x60] sm:$0xff]  ;;  %v2447_v47 = vld [vmem:[%s3770_s0 + $0x68] sm:$0xff]  ;;  %v2464_v54 = vld [vmem:[%s3770_s0 + $0x70] sm:$0xff] }
   0x6   :  { %73 = vadd.xlane.f32.xlu0 %v72_v14  ;;  %79 = vadd.xlane.f32.xlu1 %v78_v15  ;;  %v84_v24 = vadd.f32 %v49_v17, %v48_v16  ;;  %v52_v25 = vunpack.c.l.bf16 %v2376_v22  ;;  %v53_v27 = vunpack.c.h.bf16 %v2376_v22  ;;  %v54_v28 = vunpack.c.l.bf16 %v2381_v23  ;;  %v2469_v55 = vld [vmem:[%s3770_s0 + $0x78] sm:$0xff]  ;;  %v2029_v14 = vld [vmem:[%s3771_s3 + $0x4] ss:$16 sps:$4 sm:$0xff]  }
   0x7   :  { %v87_v26 = vadd.f32 %v51_v21, %v50_v20  ;;  %v55_v29 = vunpack.c.h.bf16 %v2381_v23  ;;  %v56_v32 = vunpack.c.l.bf16 %v2398_v30  ;;  %v57_v33 = vunpack.c.h.bf16 %v2398_v30  ;;  %v2031_v15 = vld [vmem:[%s3771_s3 + $0xc] ss:$16 sps:$4 sm:$0xff]   ;;  %871 = vmatprep.subr.bf16.mxu0 %v2029_v14  ;;  %v2053_v14 = vld [vmem:[%s3771_s3 + $0x84] ss:$16 sps:$4 sm:$0xff]  }
   0x8   :  { %v90_v34 = vadd.f32 %v53_v27, %v52_v25  ;;  %v58_v36 = vunpack.c.l.bf16 %v2403_v31  ;;  %v59_v37 = vunpack.c.h.bf16 %v2403_v31  ;;  %v60_v41 = vunpack.c.l.bf16 %v2420_v38  ;;  %984 = vmatprep.subr.bf16.mxu1 %v2031_v15  ;;  %v2055_v15 = vld [vmem:[%s3771_s3 + $0x8c] ss:$16 sps:$4 sm:$0xff]  }
   0x9   :  { %v93_v35 = vadd.f32 %v55_v29, %v54_v28  ;;  %v96_v40 = vadd.f32 %v57_v33, %v56_v32  ;;  %v61_v43 = vunpack.c.h.bf16 %v2420_v38  ;;  %v62_v44 = vunpack.c.l.bf16 %v2425_v39 }
   0xa   :  { %76 = vadd.xlane.f32.xlu0 %v75_v18  ;;  %82 = vadd.xlane.f32.xlu1 %v81_v19  ;;  %v99_v42 = vadd.f32 %v59_v37, %v58_v36  ;;  %v63_v45 = vunpack.c.h.bf16 %v2425_v39  ;;  %v64_v48 = vunpack.c.l.bf16 %v2442_v46  ;;  %v65_v49 = vunpack.c.h.bf16 %v2442_v46  ;;  %v2033_v18 = vld [vmem:[%s3771_s3] ss:$16 sps:$4 sm:$0xff]   ;;  %v2034_v19 = vld [vmem:[%s3771_s3 + $0x8] ss:$16 sps:$4 sm:$0xff]  }
   0xb   :  { %v102_v50 = vadd.f32 %v61_v43, %v60_v41  ;;  %v66_v52 = vunpack.c.l.bf16 %v2447_v47  ;;  %v67_v53 = vunpack.c.h.bf16 %v2447_v47  ;;  %v68_v57 = vunpack.c.l.bf16 %v2464_v54  ;;  %872 = vmatpush1.bf16.msra.mxu0 %v2033_v18  ;;  %985 = vmatpush1.bf16.msra.mxu1 %v2034_v19  ;;  %v2057_v18 = vld [vmem:[%s3771_s3 + $0x80] ss:$16 sps:$4 sm:$0xff]   ;;  %v2058_v19 = vld [vmem:[%s3771_s3 + $0x88] ss:$16 sps:$4 sm:$0xff]  }
   0xc   :  { %v105_v51 = vadd.f32 %v63_v45, %v62_v44  ;;  %v108_v56 = vadd.f32 %v65_v49, %v64_v48  ;;  %v69_v59 = vunpack.c.h.bf16 %v2464_v54  ;;  %v70_v60 = vunpack.c.l.bf16 %v2469_v55  ;;  %v2094_v47 = vld [vmem:[%s3771_s3 + $0x148] ss:$16 sps:$4 sm:$0xff]  }
   0xd   :  { %v111_v58 = vadd.f32 %v67_v53, %v66_v52  ;;  %v71_v61 = vunpack.c.h.bf16 %v2469_v55  ;;  %v2100_v55 = vld [vmem:[%s3771_s3 + $0x168] ss:$16 sps:$4 sm:$0xff]  }
   0xe   :  { %85 = vadd.xlane.f32.xlu0 %v84_v24  ;;  %88 = vadd.xlane.f32.xlu1 %v87_v26  ;;  %v114_v62 = vadd.f32 %v69_v59, %v68_v57  ;;  %v2035_v24 = vld [vmem:[%s3771_s3 + $0x24] ss:$16 sps:$4 sm:$0xff]   ;;  %v2037_v26 = vld [vmem:[%s3771_s3 + $0x2c] ss:$16 sps:$4 sm:$0xff]  }
   0xf   :  { %v117_v63 = vadd.f32 %v71_v61, %v70_v60  ;;  %873 = vmatprep.subr.bf16.mxu0 %v2035_v24  ;;  %986 = vmatprep.subr.bf16.mxu1 %v2037_v26  ;;  %v2059_v24 = vld [vmem:[%s3771_s3 + $0xa4] ss:$16 sps:$4 sm:$0xff]   ;;  %v2061_v26 = vld [vmem:[%s3771_s3 + $0xac] ss:$16 sps:$4 sm:$0xff]  }
  0x12   :  { %91 = vadd.xlane.f32.xlu0 %v90_v34  ;;  %94 = vadd.xlane.f32.xlu1 %v93_v35  ;;  %v2039_v34 = vld [vmem:[%s3771_s3 + $0x20] ss:$16 sps:$4 sm:$0xff]   ;;  %v2040_v35 = vld [vmem:[%s3771_s3 + $0x28] ss:$16 sps:$4 sm:$0xff]  }
  0x13   :  { %874 = vmatpush1.bf16.msra.mxu0 %v2039_v34  ;;  %987 = vmatpush1.bf16.msra.mxu1 %v2040_v35  ;;  %v2063_v34 = vld [vmem:[%s3771_s3 + $0xa0] ss:$16 sps:$4 sm:$0xff]   ;;  %v2064_v35 = vld [vmem:[%s3771_s3 + $0xa8] ss:$16 sps:$4 sm:$0xff]  }
  0x16   :  { %97 = vadd.xlane.f32.xlu0 %v96_v40  ;;  %100 = vadd.xlane.f32.xlu1 %v99_v42  ;;  %v2041_v40 = vld [vmem:[%s3771_s3 + $0x44] ss:$16 sps:$4 sm:$0xff]   ;;  %v2043_v42 = vld [vmem:[%s3771_s3 + $0x4c] ss:$16 sps:$4 sm:$0xff]  }
  0x17   :  { %875 = vmatprep.subr.bf16.mxu0 %v2041_v40  ;;  %988 = vmatprep.subr.bf16.mxu1 %v2043_v42  ;;  %v2065_v40 = vld [vmem:[%s3771_s3 + $0xc4] ss:$16 sps:$4 sm:$0xff]   ;;  %v2067_v42 = vld [vmem:[%s3771_s3 + $0xcc] ss:$16 sps:$4 sm:$0xff]  }
  0x1a   :  { %103 = vadd.xlane.f32.xlu0 %v102_v50  ;;  %106 = vadd.xlane.f32.xlu1 %v105_v51  ;;  %v2045_v50 = vld [vmem:[%s3771_s3 + $0x40] ss:$16 sps:$4 sm:$0xff]   ;;  %v2046_v51 = vld [vmem:[%s3771_s3 + $0x48] ss:$16 sps:$4 sm:$0xff]  }
  0x1b   :  { %876 = vmatpush1.bf16.msra.mxu0 %v2045_v50  ;;  %989 = vmatpush1.bf16.msra.mxu1 %v2046_v51  ;;  %v2069_v50 = vld [vmem:[%s3771_s3 + $0xc0] ss:$16 sps:$4 sm:$0xff]   ;;  %v2070_v51 = vld [vmem:[%s3771_s3 + $0xc8] ss:$16 sps:$4 sm:$0xff]  }
  0x1e   :  { %109 = vadd.xlane.f32.xlu0 %v108_v56  ;;  %112 = vadd.xlane.f32.xlu1 %v111_v58  ;;  %v2047_v56 = vld [vmem:[%s3771_s3 + $0x64] ss:$16 sps:$4 sm:$0xff]   ;;  %v2049_v58 = vld [vmem:[%s3771_s3 + $0x6c] ss:$16 sps:$4 sm:$0xff]  }
  0x1f   :  { %877 = vmatprep.subr.bf16.mxu0 %v2047_v56  ;;  %990 = vmatprep.subr.bf16.mxu1 %v2049_v58  ;;  %v2071_v56 = vld [vmem:[%s3771_s3 + $0xe4] ss:$16 sps:$4 sm:$0xff]   ;;  %v2073_v58 = vld [vmem:[%s3771_s3 + $0xec] ss:$16 sps:$4 sm:$0xff]  }
  0x22   :  { %115 = vadd.xlane.f32.xlu0 %v114_v62  ;;  %118 = vadd.xlane.f32.xlu1 %v117_v63  ;;  %v2051_v62 = vld [vmem:[%s3771_s3 + $0x60] ss:$16 sps:$4 sm:$0xff]   ;;  %v2052_v63 = vld [vmem:[%s3771_s3 + $0x68] ss:$16 sps:$4 sm:$0xff]  }
  0x23   :  { %878 = vmatpush1.bf16.msra.mxu0 %v2051_v62  ;;  %991 = vmatpush1.bf16.msra.mxu1 %v2052_v63  ;;  %v2075_v62 = vld [vmem:[%s3771_s3 + $0xe0] ss:$16 sps:$4 sm:$0xff]   ;;  %v2076_v63 = vld [vmem:[%s3771_s3 + $0xe8] ss:$16 sps:$4 sm:$0xff]  }
  0x24   :  { %879 = vmatprep.subr.bf16.mxu0 %v2053_v14  ;;  %992 = vmatprep.subr.bf16.mxu1 %v2055_v15  ;;  %v2077_v14 = vld [vmem:[%s3771_s3 + $0x104] ss:$16 sps:$4 sm:$0xff]   ;;  %v2079_v15 = vld [vmem:[%s3771_s3 + $0x10c] ss:$16 sps:$4 sm:$0xff]  }
  0x27   :  { %880 = vmatpush1.bf16.msra.mxu0 %v2057_v18  ;;  %993 = vmatpush1.bf16.msra.mxu1 %v2058_v19  ;;  %v2081_v18 = vld [vmem:[%s3771_s3 + $0x100] ss:$16 sps:$4 sm:$0xff]   ;;  %v2082_v19 = vld [vmem:[%s3771_s3 + $0x108] ss:$16 sps:$4 sm:$0xff]  }
  0x28   :  { %881 = vmatprep.subr.bf16.mxu0 %v2059_v24  ;;  %994 = vmatprep.subr.bf16.mxu1 %v2061_v26 }
  0x2b   :  { %882 = vmatpush1.bf16.msra.mxu0 %v2063_v34  ;;  %995 = vmatpush1.bf16.msra.mxu1 %v2064_v35 }
  0x2c   :  { %883 = vmatprep.subr.bf16.mxu0 %v2065_v40  ;;  %996 = vmatprep.subr.bf16.mxu1 %v2067_v42 }
  0x2f   :  { %884 = vmatpush1.bf16.msra.mxu0 %v2069_v50  ;;  %997 = vmatpush1.bf16.msra.mxu1 %v2070_v51 }
  0x30   :  { %885 = vmatprep.subr.bf16.mxu0 %v2071_v56  ;;  %998 = vmatprep.subr.bf16.mxu1 %v2073_v58 }
  0x33   :  { %886 = vmatpush1.bf16.msra.mxu0 %v2075_v62  ;;  %999 = vmatpush1.bf16.msra.mxu1 %v2076_v63 }
  0x34   :  { %887 = vmatprep.subr.bf16.mxu0 %v2077_v14  ;;  %1000 = vmatprep.subr.bf16.mxu1 %v2079_v15 }
  0x37   :  { %888 = vmatpush1.bf16.msra.mxu0 %v2081_v18  ;;  %1001 = vmatpush1.bf16.msra.mxu1 %v2082_v19 }
  0x93   :  { %v74_v24 = vpop.xlane.xlu0 %73  ;;  %v80_v26 = vpop.xlane.xlu1 %79 }
  0x94   :  { %v121_v34 = vmul.f32 0.00390625, %v74_v24  ;;  %v123_v35 = vmul.f32 0.00390625, %v80_v26 }
  0x96   :  { %v2601_v40 = vsub.f32 %v40_v3, %v121_v34  ;;  %v2605_v42 = vsub.f32 %v41_v4, %v121_v34  ;;  %v2609_v50 = vsub.f32 %v44_v5, %v123_v35  ;;  %v2613_v51 = vsub.f32 %v45_v6, %v123_v35 }
  0x97   :  { %v77_v56 = vpop.xlane.xlu0 %76  ;;  %v83_v58 = vpop.xlane.xlu1 %82 }
  0x98   :  { %v122_v62 = vmul.f32 0.00390625, %v77_v56  ;;  %v124_v63 = vmul.f32 0.00390625, %v83_v58  ;;  %v169_v3 = vmul.f32 %v2601_v40, %v2601_v40  ;;  %v170_v0 = vmul.f32 %v2605_v42, %v2605_v42 }
  0x99   :  { %v173_v4 = vmul.f32 %v2609_v50, %v2609_v50  ;;  %v174_v5 = vmul.f32 %v2613_v51, %v2613_v51 }
  0x9a   :  { %v2625_v1 = vsub.f32 %v42_v9, %v122_v62  ;;  %v2629_v6 = vsub.f32 %v43_v10, %v122_v62  ;;  %v2633_v14 = vsub.f32 %v46_v11, %v124_v63  ;;  %v2637_v15 = vsub.f32 %v47_v12, %v124_v63 }
  0x9b   :  { %v86_v18 = vpop.xlane.xlu0 %85  ;;  %v201_v19 = vadd.f32 %v170_v0, %v169_v3  ;;  %v89_v24 = vpop.xlane.xlu1 %88  ;;  %v207_v10 = vadd.f32 %v174_v5, %v173_v4 }
  0x9c   :  { %v125_v26 = vmul.f32 0.00390625, %v86_v18  ;;  %v126_v34 = vmul.f32 0.00390625, %v89_v24  ;;  %v171_v9 = vmul.f32 %v2625_v1, %v2625_v1  ;;  %v172_v2 = vmul.f32 %v2629_v6, %v2629_v6 }
  0x9d   :  { %202 = vadd.xlane.f32.xlu0 %v201_v19  ;;  %v175_v11 = vmul.f32 %v2633_v14, %v2633_v14  ;;  %v176_v7 = vmul.f32 %v2637_v15, %v2637_v15 }
  0x9e   :  { %v2649_v12 = vsub.f32 %v48_v16, %v125_v26  ;;  %v2653_v35 = vsub.f32 %v49_v17, %v125_v26  ;;  %v2657_v56 = vsub.f32 %v50_v20, %v126_v34  ;;  %v2661_v58 = vsub.f32 %v51_v21, %v126_v34 }
  0x9f   :  { %v92_v62 = vpop.xlane.xlu0 %91  ;;  %v204_v63 = vadd.f32 %v172_v2, %v171_v9  ;;  %v95_v3 = vpop.xlane.xlu1 %94  ;;  %v210_v17 = vadd.f32 %v176_v7, %v175_v11 }
  0xa0   :  { %v127_v0 = vmul.f32 0.00390625, %v92_v62  ;;  %v128_v4 = vmul.f32 0.00390625, %v95_v3  ;;  %v177_v16 = vmul.f32 %v2649_v12, %v2649_v12  ;;  %v178_v8 = vmul.f32 %v2653_v35, %v2653_v35 }
  0xa1   :  { %208 = vadd.xlane.f32.xlu0 %v207_v10  ;;  %205 = vadd.xlane.f32.xlu1 %v204_v63  ;;  %v179_v20 = vmul.f32 %v2657_v56, %v2657_v56  ;;  %v180_v13 = vmul.f32 %v2661_v58, %v2661_v58 }
  0xa2   :  { %v2673_v21 = vsub.f32 %v52_v25, %v127_v0  ;;  %v2677_v5 = vsub.f32 %v53_v27, %v127_v0  ;;  %v2681_v18 = vsub.f32 %v54_v28, %v128_v4  ;;  %v2685_v19 = vsub.f32 %v55_v29, %v128_v4 }
  0xa3   :  { %v98_v24 = vpop.xlane.xlu0 %97  ;;  %v213_v26 = vadd.f32 %v178_v8, %v177_v16  ;;  %v101_v34 = vpop.xlane.xlu1 %100  ;;  %v216_v27 = vadd.f32 %v180_v13, %v179_v20  ;;  %v2085_v16 = vld [vmem:[%s3771_s3 + $0x12c] ss:$16 sps:$4 sm:$0xff]  }
  0xa4   :  { %v129_v9 = vmul.f32 0.00390625, %v98_v24  ;;  %v130_v2 = vmul.f32 0.00390625, %v101_v34  ;;  %v181_v25 = vmul.f32 %v2673_v21, %v2673_v21  ;;  %v182_v22 = vmul.f32 %v2677_v5, %v2677_v5  ;;  %v2087_v24 = vld [vmem:[%s3771_s3 + $0x120] ss:$16 sps:$4 sm:$0xff]   ;;  %1002 = vmatprep.subr.bf16.mxu1 %v2085_v16 }
  0xa5   :  { %211 = vadd.xlane.f32.xlu1 %v210_v17  ;;  %214 = vadd.xlane.f32.xlu0 %v213_v26  ;;  %v183_v28 = vmul.f32 %v2681_v18, %v2681_v18  ;;  %v184_v23 = vmul.f32 %v2685_v19, %v2685_v19 }
  0xa6   :  { %v2697_v29 = vsub.f32 %v56_v32, %v129_v9  ;;  %v2701_v10 = vsub.f32 %v57_v33, %v129_v9  ;;  %v2705_v11 = vsub.f32 %v58_v36, %v130_v2  ;;  %v2709_v7 = vsub.f32 %v59_v37, %v130_v2  ;;  %v2083_v37 = vld [vmem:[%s3771_s3 + $0x124] ss:$16 sps:$4 sm:$0xff]  }
  0xa7   :  { %v104_v62 = vpop.xlane.xlu0 %103  ;;  %v219_v63 = vadd.f32 %v182_v22, %v181_v25  ;;  %v107_v3 = vpop.xlane.xlu1 %106  ;;  %v222_v33 = vadd.f32 %v184_v23, %v183_v28  ;;  %889 = vmatprep.subr.bf16.mxu0 %v2083_v37 }
  0xa8   :  { %v131_v0 = vmul.f32 0.00390625, %v104_v62  ;;  %v132_v4 = vmul.f32 0.00390625, %v107_v3  ;;  %v185_v32 = vmul.f32 %v2697_v29, %v2697_v29  ;;  %v186_v30 = vmul.f32 %v2701_v10, %v2701_v10  ;;  %890 = vmatpush1.bf16.msra.mxu0 %v2087_v24  ;;  %v2089_v62 = vld [vmem:[%s3771_s3 + $0x144] ss:$16 sps:$4 sm:$0xff]  }
  0xa9   :  { %217 = vadd.xlane.f32.xlu1 %v216_v27  ;;  %220 = vadd.xlane.f32.xlu0 %v219_v63  ;;  %v187_v36 = vmul.f32 %v2705_v11, %v2705_v11  ;;  %v188_v31 = vmul.f32 %v2709_v7, %v2709_v7  ;;  %v2095_v24 = vld [vmem:[%s3771_s3 + $0x164] ss:$16 sps:$4 sm:$0xff]  }
  0xaa   :  { %v2727_v8 = vsub.f32 %v60_v41, %v131_v0  ;;  %v2731_v17 = vsub.f32 %v61_v43, %v131_v0  ;;  %v2735_v20 = vsub.f32 %v62_v44, %v132_v4  ;;  %v2739_v13 = vsub.f32 %v63_v45, %v132_v4  ;;  %v2088_v41 = vld [vmem:[%s3771_s3 + $0x128] ss:$16 sps:$4 sm:$0xff]   ;;  %891 = vmatprep.subr.bf16.mxu0 %v2089_v62  ;;  %v2111_v62 = vld [vmem:[%s3771_s3 + $0x1a0] ss:$16 sps:$4 sm:$0xff]  }
  0xab   :  { %v110_v26 = vpop.xlane.xlu0 %109  ;;  %v225_v38 = vadd.f32 %v186_v30, %v185_v32  ;;  %v113_v43 = vpop.xlane.xlu1 %112  ;;  %1003 = vmatpush1.bf16.msra.mxu1 %v2088_v41  ;;  %v228_v9 = vadd.f32 %v188_v31, %v187_v36 }
  0xac   :  { %v133_v34 = vmul.f32 0.00390625, %v110_v26  ;;  %v134_v44 = vmul.f32 0.00390625, %v113_v43  ;;  %v189_v39 = vmul.f32 %v2727_v8, %v2727_v8  ;;  %v190_v45 = vmul.f32 %v2731_v17, %v2731_v17 }
  0xad   :  { %223 = vadd.xlane.f32.xlu1 %v222_v33  ;;  %226 = vadd.xlane.f32.xlu0 %v225_v38  ;;  %v191_v2 = vmul.f32 %v2735_v20, %v2735_v20  ;;  %v192_v25 = vmul.f32 %v2739_v13, %v2739_v13 }
  0xae   :  { %v2757_v22 = vsub.f32 %v64_v48, %v133_v34  ;;  %v2761_v27 = vsub.f32 %v65_v49, %v133_v34  ;;  %v2765_v28 = vsub.f32 %v66_v52, %v134_v44  ;;  %v2769_v23 = vsub.f32 %v67_v53, %v134_v44  ;;  %v2091_v48 = vld [vmem:[%s3771_s3 + $0x14c] ss:$16 sps:$4 sm:$0xff]   ;;  %v2093_v52 = vld [vmem:[%s3771_s3 + $0x140] ss:$16 sps:$4 sm:$0xff]   ;;  %v2101_v34 = vld [vmem:[%s3771_s3 + $0x184] ss:$16 sps:$4 sm:$0xff]  }
  0xaf   :  { %v116_v63 = vpop.xlane.xlu0 %115  ;;  %v231_v46 = vadd.f32 %v190_v45, %v189_v39  ;;  %v119_v49 = vpop.xlane.xlu1 %118  ;;  %1004 = vmatprep.subr.bf16.mxu1 %v2091_v48  ;;  %v234_v32 = vadd.f32 %v192_v25, %v191_v2  ;;  %892 = vmatpush1.bf16.msra.mxu0 %v2093_v52  ;;  %v2103_v44 = vld [vmem:[%s3771_s3 + $0x18c] ss:$16 sps:$4 sm:$0xff]   ;;  %v2105_v39 = vld [vmem:[%s3771_s3 + $0x180] ss:$16 sps:$4 sm:$0xff]   ;;  %v2106_v45 = vld [vmem:[%s3771_s3 + $0x188] ss:$16 sps:$4 sm:$0xff]  }
  0xb0   :  { %v135_v53 = vmul.f32 0.00390625, %v116_v63  ;;  %v136_v3 = vmul.f32 0.00390625, %v119_v49  ;;  %v193_v0 = vmul.f32 %v2757_v22, %v2757_v22  ;;  %v194_v4 = vmul.f32 %v2761_v27, %v2761_v27  ;;  %1005 = vmatpush1.bf16.msra.mxu1 %v2094_v47  ;;  %893 = vmatprep.subr.bf16.mxu0 %v2095_v24  ;;  %v2107_v2 = vld [vmem:[%s3771_s3 + $0x1a4] ss:$16 sps:$4 sm:$0xff]   ;;  %v2109_v25 = vld [vmem:[%s3771_s3 + $0x1ac] ss:$16 sps:$4 sm:$0xff]  }
  0xb1   :  { %229 = vadd.xlane.f32.xlu1 %v228_v9  ;;  %232 = vadd.xlane.f32.xlu0 %v231_v46  ;;  %v195_v30 = vmul.f32 %v2765_v28, %v2765_v28  ;;  %v196_v33 = vmul.f32 %v2769_v23, %v2769_v23  ;;  %v2112_v48 = vld [vmem:[%s3771_s3 + $0x1a8] ss:$16 sps:$4 sm:$0xff]   ;;  %v2113_v63 = vld [vmem:[%s3771_s3 + $0x1c4] ss:$16 sps:$4 sm:$0xff]   ;;  %v2115_v46 = vld [vmem:[%s3771_s3 + $0x1cc] ss:$16 sps:$4 sm:$0xff]  }
  0xb2   :  { %v2793_v36 = vsub.f32 %v68_v57, %v135_v53  ;;  %v2797_v31 = vsub.f32 %v69_v59, %v135_v53  ;;  %v2801_v37 = vsub.f32 %v70_v60, %v136_v3  ;;  %v2805_v16 = vsub.f32 %v71_v61, %v136_v3  ;;  %v2097_v57 = vld [vmem:[%s3771_s3 + $0x16c] ss:$16 sps:$4 sm:$0xff]   ;;  %v2099_v59 = vld [vmem:[%s3771_s3 + $0x160] ss:$16 sps:$4 sm:$0xff]   ;;  %v2118_v52 = vld [vmem:[%s3771_s3 + $0x1c8] ss:$16 sps:$4 sm:$0xff]  }
  0xb3   :  { %v237_v54 = vadd.f32 %v194_v4, %v193_v0  ;;  %v240_v41 = vadd.f32 %v196_v33, %v195_v30  ;;  %1006 = vmatprep.subr.bf16.mxu1 %v2097_v57  ;;  %894 = vmatpush1.bf16.msra.mxu0 %v2099_v59  ;;  %v2117_v49 = vld [vmem:[%s3771_s3 + $0x1c0] ss:$16 sps:$4 sm:$0xff]   ;;  %v2119_v47 = vld [vmem:[%s3771_s3 + $0x1e4] ss:$16 sps:$4 sm:$0xff]   ;;  %v2121_v53 = vld [vmem:[%s3771_s3 + $0x1ec] ss:$16 sps:$4 sm:$0xff]   ;;  %v331_v33 = vlaneseq }
  0xb4   :  { %v197_v60 = vmul.f32 %v2793_v36, %v2793_v36  ;;  %v198_v61 = vmul.f32 %v2797_v31, %v2797_v31  ;;  %v199_v26 = vmul.f32 %v2801_v37, %v2801_v37  ;;  %v200_v38 = vmul.f32 %v2805_v16, %v2805_v16  ;;  %1007 = vmatpush1.bf16.msra.mxu1 %v2100_v55  ;;  %v2123_v3 = vld [vmem:[%s3771_s3 + $0x1e0] ss:$16 sps:$4 sm:$0xff]   ;;  %v2124_v0 = vld [vmem:[%s3771_s3 + $0x1e8] ss:$16 sps:$4 sm:$0xff]  }
  0xb5   :  { %235 = vadd.xlane.f32.xlu1 %v234_v32  ;;  %238 = vadd.xlane.f32.xlu0 %v237_v54 }
  0xb6   :  { %v243_v43 = vadd.f32 %v198_v61, %v197_v60  ;;  %895 = vmatprep.subr.bf16.mxu0 %v2101_v34  ;;  %1008 = vmatprep.subr.bf16.mxu1 %v2103_v44  ;;  %v246_v9 = vadd.f32 %v200_v38, %v199_v26  ;;  %v2875_v61 = vshrl.u32 %v331_v33, 7 }
  0xb7   :  { %896 = vmatpush1.bf16.msra.mxu0 %v2105_v39 }
  0xb8   :  { %1009 = vmatpush1.bf16.msra.mxu1 %v2106_v45  ;;  %897 = vmatprep.subr.bf16.mxu0 %v2107_v2  ;;  %v2878_v39 = vsub.s32 0, %v2875_v61  ;;  %v2881_v45 = vsub.s32 1, %v2875_v61 }
  0xb9   :  { %241 = vadd.xlane.f32.xlu1 %v240_v41  ;;  %244 = vadd.xlane.f32.xlu0 %v243_v43 }
  0xba   :  { %1010 = vmatprep.subr.bf16.mxu1 %v2109_v25  ;;  %v329_v25 = vld [vmem:[%s3772_s1] sm:$0x3] }
  0xbb   :  { %898 = vmatpush1.bf16.msra.mxu0 %v2111_v62 }
  0xbc   :  { %1011 = vmatpush1.bf16.msra.mxu1 %v2112_v48  ;;  %899 = vmatprep.subr.bf16.mxu0 %v2113_v63 }
  0xbd   :  { %247 = vadd.xlane.f32.xlu1 %v246_v9  ;;  %1012 = vmatprep.subr.bf16.mxu1 %v2115_v46 }
  0xbf   :  { %900 = vmatpush1.bf16.msra.mxu0 %v2117_v49  ;;  %v2887_v49 = vrot.slane %v329_v25, %v2878_v39 }
  0xc0   :  { %1013 = vmatpush1.bf16.msra.mxu1 %v2118_v52  ;;  %901 = vmatprep.subr.bf16.mxu0 %v2119_v47  ;;  %v2890_v52 = vrot.slane %v329_v25, %v2881_v45  ;;  %v373_v47 = vld [vmem:[%s3773_s2] sm:$0x3] }
  0xc1   :  { %1014 = vmatprep.subr.bf16.mxu1 %v2121_v53  ;;  %v2898_v33 = vrot.slane %v373_v47, %v2878_v39 }
  0xc3   :  { %902 = vmatpush1.bf16.msra.mxu0 %v2123_v3 }
  0xc4   :  { %1015 = vmatpush1.bf16.msra.mxu1 %v2124_v0 }
 0x12a   :  { %v203_v4 = vpop.xlane.xlu0 %202 }
 0x12b   :  { %v249_v32 = vmul.f32 0.00390625, %v203_v4 }
 0x12d   :  { %v265_v30 = vadd.f32 1e-12, %v249_v32 }
 0x12e   :  { %v206_v24 = vpop.xlane.xlu1 %205  ;;  %v209_v57 = vpop.xlane.xlu0 %208 }
 0x12f   :  { %2125 = vrsqrt.f32 %v265_v30  ;;  %v250_v54 = vmul.f32 0.00390625, %v206_v24  ;;  %v251_v59 = vmul.f32 0.00390625, %v209_v57 }
 0x131   :  { %v266_v55 = vadd.f32 1e-12, %v250_v54  ;;  %v267_v60 = vadd.f32 1e-12, %v251_v59  ;;  %v2902_v59 = vrot.slane %v373_v47, %v2881_v45 }
 0x132   :  { %v212_v41 = vpop.xlane.xlu1 %211  ;;  %v215_v26 = vpop.xlane.xlu0 %214 }
 0x133   :  { %2127 = vrsqrt.f32 %v266_v55  ;;  %v252_v38 = vmul.f32 0.00390625, %v212_v41  ;;  %v253_v43 = vmul.f32 0.00390625, %v215_v26 }
 0x134   :  { %2129 = vrsqrt.f32 %v267_v60 }
 0x135   :  { %v268_v34 = vadd.f32 1e-12, %v252_v38  ;;  %v269_v44 = vadd.f32 1e-12, %v253_v43 }
 0x136   :  { %v218_v9 = vpop.xlane.xlu1 %217  ;;  %v221_v2 = vpop.xlane.xlu0 %220 }
 0x137   :  { %2131 = vrsqrt.f32 %v268_v34  ;;  %v254_v62 = vmul.f32 0.00390625, %v218_v9  ;;  %v255_v48 = vmul.f32 0.00390625, %v221_v2 }
 0x138   :  { %2133 = vrsqrt.f32 %v269_v44 }
 0x139   :  { %v2126_v63 = vpop.eup %2125  ;;  %v270_v46 = vadd.f32 1e-12, %v254_v62  ;;  %v271_v53 = vadd.f32 1e-12, %v255_v48 }
 0x13a   :  { %v224_v3 = vpop.xlane.xlu1 %223  ;;  %v298_v0 = vmul.f32 %v2126_v63, %v2605_v42  ;;  %v297_v4 = vmul.f32 %v2126_v63, %v2601_v40  ;;  %v227_v30 = vpop.xlane.xlu0 %226 }
 0x13b   :  { %2135 = vrsqrt.f32 %v270_v46  ;;  %v256_v32 = vmul.f32 0.00390625, %v224_v3  ;;  %v257_v26 = vmul.f32 0.00390625, %v227_v30 }
 0x13c   :  { %v342_v54 = vmul.f32 %v2890_v52, %v298_v0  ;;  %v341_v55 = vmul.f32 %v2887_v49, %v297_v4  ;;  %2137 = vrsqrt.f32 %v271_v53 }
 0x13d   :  { %v2128_v24 = vpop.eup %2127  ;;  %v272_v57 = vadd.f32 1e-12, %v256_v32  ;;  %v273_v53 = vadd.f32 1e-12, %v257_v26 }
 0x13e   :  { %v2130_v60 = vpop.eup %2129  ;;  %v230_v42 = vpop.xlane.xlu1 %229  ;;  %v300_v40 = vmul.f32 %v2128_v24, %v2629_v6  ;;  %v299_v41 = vmul.f32 %v2128_v24, %v2625_v1  ;;  %v386_v25 = vadd.f32 %v2902_v59, %v342_v54  ;;  %v385_v62 = vadd.f32 %v2898_v33, %v341_v55 }
 0x13f   :  { %2139 = vrsqrt.f32 %v272_v57  ;;  %v258_v38 = vmul.f32 0.00390625, %v230_v42  ;;  %v302_v43 = vmul.f32 %v2130_v60, %v2613_v51  ;;  %v301_v3 = vmul.f32 %v2130_v60, %v2609_v50  ;;  %v233_v0 = vpop.xlane.xlu0 %232 }
 0x140   :  { %v344_v34 = vmul.f32 %v2890_v52, %v300_v40  ;;  %v343_v44 = vmul.f32 %v2887_v49, %v299_v41  ;;  %v259_v60 = vmul.f32 0.00390625, %v233_v0 }
 0x141   :  { %v2132_v9 = vpop.eup %2131  ;;  %v274_v2 = vadd.f32 1e-12, %v258_v38  ;;  %v346_v48 = vmul.f32 %v2890_v52, %v302_v43  ;;  %v345_v42 = vmul.f32 %v2887_v49, %v301_v3 }
 0x142   :  { %v236_v6 = vpop.xlane.xlu1 %235  ;;  %v388_v1 = vadd.f32 %v2902_v59, %v344_v34  ;;  %v387_v63 = vadd.f32 %v2898_v33, %v343_v44  ;;  %v304_v46 = vmul.f32 %v2132_v9, %v2637_v15  ;;  %v303_v51 = vmul.f32 %v2132_v9, %v2633_v14  ;;  %v2134_v47 = vpop.eup %2133 }
 0x143   :  { %2141 = vrsqrt.f32 %v274_v2  ;;  %v260_v57 = vmul.f32 0.00390625, %v236_v6  ;;  %v390_v54 = vadd.f32 %v2902_v59, %v346_v48  ;;  %v306_v15 = vmul.f32 %v2134_v47, %v2653_v35  ;;  %v239_v48 = vpop.xlane.xlu0 %238 }
 0x144   :  { %v418_v4 = vpack.c.bf16 %v388_v1, %v386_v25  ;;  %v417_v32 = vpack.c.bf16 %v387_v63, %v385_v62  ;;  %v348_v30 = vmul.f32 %v2890_v52, %v304_v46  ;;  %v347_v55 = vmul.f32 %v2887_v49, %v303_v51 }
 0x145   :  { %v2136_v24 = vpop.eup %2135  ;;  %2143 = vrsqrt.f32 %v273_v53  ;;  %v350_v26 = vmul.f32 %v2890_v52, %v306_v15  ;;  %v276_v43 = vadd.f32 1e-12, %v260_v57  ;;  %v389_v2 = vadd.f32 %v2898_v33, %v345_v42 }
 0x146   :  { %903 = vmatprep.mubr.bf16.mxu0 %v418_v4  ;;  %1016 = vmatprep.mubr.bf16.mxu1 %v418_v4  ;;  %v392_v14 = vadd.f32 %v2902_v59, %v348_v30  ;;  %v308_v50 = vmul.f32 %v2136_v24, %v2661_v58  ;;  %v2138_v40 = vpop.eup %2137  ;;  %v391_v34 = vadd.f32 %v2898_v33, %v347_v55  ;;  %v242_v9 = vpop.xlane.xlu1 %241  ;;  %v275_v58 = vadd.f32 1e-12, %v259_v60 }
 0x147   :  { %904 = vmatmul.mubr.bf16.vlgmr.msra.gmra.mrb[0].mxu0 %v417_v32  ;;  %1017 = vmatmul.mubr.bf16.vlgmr.msra.gmra.mrb[0].mxu1 %v417_v32  ;;  %v307_v35 = vmul.f32 %v2136_v24, %v2657_v56  ;;  %v305_v62 = vmul.f32 %v2134_v47, %v2649_v12  ;;  %v394_v6 = vadd.f32 %v2902_v59, %v350_v26  ;;  %2145 = vrsqrt.f32 %v276_v43 }
 0x148   :  { %v420_v41 = vpack.c.bf16 %v392_v14, %v390_v54  ;;  %v352_v44 = vmul.f32 %v2890_v52, %v308_v50  ;;  %v310_v1 = vmul.f32 %v2138_v40, %v2677_v5  ;;  %v262_v46 = vmul.f32 0.00390625, %v242_v9  ;;  %v245_v50 = vpop.xlane.xlu0 %244 }
 0x149   :  { %v2140_v38 = vpop.eup %2139  ;;  %v419_v51 = vpack.c.bf16 %v391_v34, %v389_v2  ;;  %v351_v53 = vmul.f32 %v2887_v49, %v307_v35  ;;  %2147 = vrsqrt.f32 %v275_v58  ;;  %v261_v4 = vmul.f32 0.00390625, %v239_v48 }
 0x14a   :  { %913 = vmatprep.mubr.bf16.mxu0 %v420_v41  ;;  %1026 = vmatprep.mubr.bf16.mxu1 %v420_v41  ;;  %v396_v25 = vadd.f32 %v2902_v59, %v352_v44  ;;  %v312_v63 = vmul.f32 %v2140_v38, %v2685_v19  ;;  %v349_v12 = vmul.f32 %v2887_v49, %v305_v62  ;;  %v278_v47 = vadd.f32 1e-12, %v262_v46  ;;  %v248_v24 = vpop.xlane.xlu1 %247 }
 0x14b   :  { %v354_v5 = vmul.f32 %v2890_v52, %v310_v1  ;;  %v395_v32 = vadd.f32 %v2898_v33, %v351_v53  ;;  %v311_v30 = vmul.f32 %v2140_v38, %v2681_v18  ;;  %v277_v55 = vadd.f32 1e-12, %v261_v4 }
 0x14c   :  { %v422_v56 = vpack.c.bf16 %v396_v25, %v394_v6  ;;  %v356_v3 = vmul.f32 %v2890_v52, %v312_v63  ;;  %v393_v14 = vadd.f32 %v2898_v33, %v349_v12  ;;  %v309_v15 = vmul.f32 %v2138_v40, %v2673_v21 }
 0x14d   :  { %v2142_v0 = vpop.eup %2141  ;;  %v398_v60 = vadd.f32 %v2902_v59, %v354_v5  ;;  %2149 = vrsqrt.f32 %v278_v47  ;;  %v264_v41 = vmul.f32 0.00390625, %v248_v24  ;;  %v355_v18 = vmul.f32 %v2887_v49, %v311_v30 }
 0x14e   :  { %v400_v57 = vadd.f32 %v2902_v59, %v356_v3  ;;  %v316_v54 = vmul.f32 %v2142_v0, %v2709_v7  ;;  %v421_v26 = vpack.c.bf16 %v395_v32, %v393_v14  ;;  %2151 = vrsqrt.f32 %v277_v55 }
 0x14f   :  { %914 = vmatmul.mubr.bf16.gmra.mrb[4].mxu0 %v419_v51  ;;  %1027 = vmatmul.mubr.bf16.gmra.mrb[4].mxu1 %v419_v51  ;;  %v2144_v19 = vpop.eup %2143  ;;  %v263_v7 = vmul.f32 0.00390625, %v245_v50  ;;  %v353_v21 = vmul.f32 %v2887_v49, %v309_v15  ;;  %v280_v44 = vadd.f32 1e-12, %v264_v41  ;;  %v399_v9 = vadd.f32 %v2898_v33, %v355_v18 }
 0x150   :  { %923 = vmatprep.mubr.bf16.mxu0 %v422_v56  ;;  %1036 = vmatprep.mubr.bf16.mxu1 %v422_v56  ;;  %v314_v42 = vmul.f32 %v2144_v19, %v2701_v10  ;;  %v424_v38 = vpack.c.bf16 %v400_v57, %v398_v60  ;;  %v360_v43 = vmul.f32 %v2890_v52, %v316_v54 }
 0x151   :  { %v2146_v34 = vpop.eup %2145  ;;  %v315_v35 = vmul.f32 %v2142_v0, %v2705_v11  ;;  %v279_v25 = vadd.f32 1e-12, %v263_v7  ;;  %v397_v62 = vadd.f32 %v2898_v33, %v353_v21  ;;  %v313_v48 = vmul.f32 %v2144_v19, %v2697_v29 }
 0x152   :  { %v358_v40 = vmul.f32 %v2890_v52, %v314_v42  ;;  %v404_v58 = vadd.f32 %v2902_v59, %v360_v43  ;;  %v320_v2 = vmul.f32 %v2146_v34, %v2739_v13  ;;  %2153 = vrsqrt.f32 %v280_v44 }
 0x153   :  { %v2148_v10 = vpop.eup %2147  ;;  %v423_v63 = vpack.c.bf16 %v399_v9, %v397_v62  ;;  %v359_v46 = vmul.f32 %v2887_v49, %v315_v35  ;;  %2155 = vrsqrt.f32 %v279_v25  ;;  %v357_v13 = vmul.f32 %v2887_v49, %v313_v48 }
 0x154   :  { %v402_v6 = vadd.f32 %v2902_v59, %v358_v40  ;;  %v318_v1 = vmul.f32 %v2148_v10, %v2731_v17  ;;  %v364_v11 = vmul.f32 %v2890_v52, %v320_v2  ;;  %v319_v3 = vmul.f32 %v2146_v34, %v2735_v20 }
 0x155   :  { %v403_v17 = vadd.f32 %v2898_v33, %v359_v46  ;;  %v401_v12 = vadd.f32 %v2898_v33, %v357_v13  ;;  %v317_v5 = vmul.f32 %v2148_v10, %v2727_v8  ;;  %v545_v2 = vsub.s32 3, %v2875_v61 }
 0x156   :  { %v426_v51 = vpack.c.bf16 %v404_v58, %v402_v6  ;;  %v362_v29 = vmul.f32 %v2890_v52, %v318_v1  ;;  %v408_v0 = vadd.f32 %v2902_v59, %v364_v11  ;;  %v363_v30 = vmul.f32 %v2887_v49, %v319_v3 }
 0x157   :  { %924 = vmatmul.mubr.bf16.gmra.mrb[8].mxu0 %v421_v26  ;;  %1037 = vmatmul.mubr.bf16.gmra.mrb[8].mxu1 %v421_v26  ;;  %v2150_v53 = vpop.eup %2149  ;;  %v425_v32 = vpack.c.bf16 %v403_v17, %v401_v12  ;;  %v361_v20 = vmul.f32 %v2887_v49, %v317_v5 }
 0x158   :  { %933 = vmatprep.mubr.bf16.mxu0 %v424_v38  ;;  %1046 = vmatprep.mubr.bf16.mxu1 %v424_v38  ;;  %v2152_v56 = vpop.eup %2151  ;;  %v324_v4 = vmul.f32 %v2150_v53, %v2769_v23  ;;  %v406_v19 = vadd.f32 %v2902_v59, %v362_v29  ;;  %v407_v55 = vadd.f32 %v2898_v33, %v363_v30 }
 0x159   :  { %v322_v47 = vmul.f32 %v2152_v56, %v2761_v27  ;;  %v323_v27 = vmul.f32 %v2150_v53, %v2765_v28  ;;  %v405_v50 = vadd.f32 %v2898_v33, %v361_v20  ;;  %v321_v60 = vmul.f32 %v2152_v56, %v2757_v22 }
 0x15a   :  { %v428_v24 = vpack.c.bf16 %v408_v0, %v406_v19  ;;  %v368_v57 = vmul.f32 %v2890_v52, %v324_v4 }
 0x15b   :  { %v366_v23 = vmul.f32 %v2890_v52, %v322_v47  ;;  %v427_v26 = vpack.c.bf16 %v407_v55, %v405_v50  ;;  %v367_v18 = vmul.f32 %v2887_v49, %v323_v27  ;;  %v365_v28 = vmul.f32 %v2887_v49, %v321_v60 }
 0x15c   :  { %v2154_v54 = vpop.eup %2153  ;;  %v412_v14 = vadd.f32 %v2902_v59, %v368_v57 }
 0x15d   :  { %v2156_v8 = vpop.eup %2155  ;;  %v328_v15 = vmul.f32 %v2154_v54, %v2805_v16  ;;  %v410_v42 = vadd.f32 %v2902_v59, %v366_v23  ;;  %v411_v22 = vadd.f32 %v2898_v33, %v367_v18  ;;  %v327_v34 = vmul.f32 %v2154_v54, %v2801_v37 }
 0x15e   :  { %v326_v41 = vmul.f32 %v2156_v8, %v2797_v31  ;;  %v409_v7 = vadd.f32 %v2898_v33, %v365_v28  ;;  %v325_v21 = vmul.f32 %v2156_v8, %v2793_v36  ;;  %v541_v36 = vsub.s32 2, %v2875_v61 }
 0x15f   :  { %934 = vmatmul.mubr.bf16.gmra.mrb[12].mxu0 %v423_v63  ;;  %1047 = vmatmul.mubr.bf16.gmra.mrb[12].mxu1 %v423_v63  ;;  %v430_v38 = vpack.c.bf16 %v412_v14, %v410_v42  ;;  %v372_v43 = vmul.f32 %v2890_v52, %v328_v15  ;;  %v371_v44 = vmul.f32 %v2887_v49, %v327_v34 }
 0x160   :  { %943 = vmatprep.mubr.bf16.mxu0 %v426_v51  ;;  %1056 = vmatprep.mubr.bf16.mxu1 %v426_v51  ;;  %v370_v16 = vmul.f32 %v2890_v52, %v326_v41  ;;  %v429_v10 = vpack.c.bf16 %v411_v22, %v409_v7  ;;  %v369_v52 = vmul.f32 %v2887_v49, %v325_v21 }
 0x161   :  { %v416_v31 = vadd.f32 %v2902_v59, %v372_v43  ;;  %v415_v37 = vadd.f32 %v2898_v33, %v371_v44 }
 0x162   :  { %v414_v40 = vadd.f32 %v2902_v59, %v370_v16  ;;  %v413_v35 = vadd.f32 %v2898_v33, %v369_v52  ;;  %v529_v59 = vld [vmem:[%s3774_s4] sm:$0xf] }
 0x163   :  { %v3003_v25 = vrot.slane %v529_v59, %v2878_v39  ;;  %v3005_v49 = vrot.slane %v529_v59, %v541_v36  ;;  %v3008_v62 = vrot.slane %v529_v59, %v2881_v45  ;;  %v3010_v33 = vrot.slane %v529_v59, %v545_v2 }
 0x164   :  { %v432_v9 = vpack.c.bf16 %v416_v31, %v414_v40  ;;  %v431_v58 = vpack.c.bf16 %v415_v37, %v413_v35 }
 0x167   :  { %944 = vmatmul.mubr.bf16.gmra.mrb[16].mxu0 %v425_v32  ;;  %1057 = vmatmul.mubr.bf16.gmra.mrb[16].mxu1 %v425_v32 }
 0x168   :  { %953 = vmatprep.mubr.bf16.mxu0 %v428_v24  ;;  %1066 = vmatprep.mubr.bf16.mxu1 %v428_v24 }
 0x16f   :  { %954 = vmatmul.mubr.bf16.gmra.mrb[20].mxu0 %v427_v26  ;;  %1067 = vmatmul.mubr.bf16.gmra.mrb[20].mxu1 %v427_v26 }
 0x170   :  { %963 = vmatprep.mubr.bf16.mxu0 %v430_v38  ;;  %1076 = vmatprep.mubr.bf16.mxu1 %v430_v38 }
 0x177   :  { %964 = vmatmul.mubr.bf16.gmra.mrb[24].mxu0 %v429_v10  ;;  %1077 = vmatmul.mubr.bf16.gmra.mrb[24].mxu1 %v429_v10 }
 0x178   :  { %973 = vmatprep.mubr.bf16.mxu0 %v432_v9  ;;  %1086 = vmatprep.mubr.bf16.mxu1 %v432_v9 }
 0x17f   :  { %974 = vmatmul.mubr.bf16.gmra.mrb[28].mxu0 %v431_v58  ;;  %1087 = vmatmul.mubr.bf16.gmra.mrb[28].mxu1 %v431_v58 }
 0x21a   :  { %v905_v48 = vpop.f32.mrb[0].mxu0  ;;  %v1018_v6 = vpop.f32.mrb[0].mxu1 }
 0x21b   :  { %v3013_v1 = vadd.f32 %v905_v48, %v3003_v25  ;;  %v3016_v63 = vadd.f32 %v1018_v6, %v3005_v49  ;;  %v907_v46 = vpop.f32.mrb[1].mxu0  ;;  %v1020_v61 = vpop.f32.mrb[1].mxu1 }
 0x21c   :  { %v3019_v39 = vadd.f32 %v907_v46, %v3008_v62  ;;  %v3022_v51 = vadd.f32 %v1020_v61, %v3010_v33  ;;  %v909_v45 = vpop.f32.mrb[2].mxu0  ;;  %v1022_v11 = vpop.f32.mrb[2].mxu1 }
 0x21d   :  { %v1097_v53 = vmul.f32 %v3013_v1, %v3013_v1  ;;  %v1099_v13 = vmul.f32 %v3016_v63, %v3016_v63  ;;  %v3029_v29 = vadd.f32 %v909_v45, %v3003_v25  ;;  %v3032_v56 = vadd.f32 %v1022_v11, %v3005_v49  ;;  %v911_v17 = vpop.f32.mrb[3].mxu0  ;;  %v1024_v3 = vpop.f32.mrb[3].mxu1 }
 0x21e   :  { %v1098_v0 = vmul.f32 %v3019_v39, %v3019_v39  ;;  %v1100_v4 = vmul.f32 %v3022_v51, %v3022_v51  ;;  %v3039_v12 = vadd.f32 %v911_v17, %v3008_v62  ;;  %v3042_v5 = vadd.f32 %v1024_v3, %v3010_v33 }
 0x21f   :  { %v1161_v19 = vmul.f32 %v1097_v53, %v3013_v1  ;;  %v1163_v47 = vmul.f32 %v1099_v13, %v3016_v63  ;;  %v1101_v32 = vmul.f32 %v3029_v29, %v3029_v29  ;;  %v1103_v30 = vmul.f32 %v3032_v56, %v3032_v56 }
 0x220   :  { %v1162_v24 = vmul.f32 %v1098_v0, %v3019_v39  ;;  %v1164_v57 = vmul.f32 %v1100_v4, %v3022_v51  ;;  %v1102_v54 = vmul.f32 %v3039_v12, %v3039_v12  ;;  %v1104_v20 = vmul.f32 %v3042_v5, %v3042_v5 }
 0x221   :  { %v1225_v23 = vmul.f32 0.044715, %v1161_v19  ;;  %v1227_v8 = vmul.f32 0.044715, %v1163_v47  ;;  %v1165_v55 = vmul.f32 %v1101_v32, %v3029_v29  ;;  %v1167_v27 = vmul.f32 %v1103_v30, %v3032_v56 }
 0x222   :  { %v1226_v14 = vmul.f32 0.044715, %v1162_v24  ;;  %v1228_v15 = vmul.f32 0.044715, %v1164_v57  ;;  %v1166_v50 = vmul.f32 %v1102_v54, %v3039_v12  ;;  %v1168_v60 = vmul.f32 %v1104_v20, %v3042_v5  ;;  %v915_v42 = vpop.f32.mrb[4].mxu0  ;;  %v1028_v41 = vpop.f32.mrb[4].mxu1 }
 0x223   :  { %v1289_v26 = vadd.f32 %v1225_v23, %v3013_v1  ;;  %v1291_v18 = vadd.f32 %v1227_v8, %v3016_v63  ;;  %v1229_v38 = vmul.f32 0.044715, %v1165_v55  ;;  %v1231_v43 = vmul.f32 0.044715, %v1167_v27  ;;  %v917_v28 = vpop.f32.mrb[5].mxu0  ;;  %v1030_v16 = vpop.f32.mrb[5].mxu1 }
 0x224   :  { %v1290_v22 = vadd.f32 %v1226_v14, %v3019_v39  ;;  %v1292_v34 = vadd.f32 %v1228_v15, %v3022_v51  ;;  %v1230_v31 = vmul.f32 0.044715, %v1166_v50  ;;  %v1232_v7 = vmul.f32 0.044715, %v1168_v60  ;;  %v919_v21 = vpop.f32.mrb[6].mxu0  ;;  %v1032_v40 = vpop.f32.mrb[6].mxu1 }
 0x225   :  { %v1353_v10 = vmul.f32 0.7978846, %v1289_v26  ;;  %v1355_v44 = vmul.f32 0.7978846, %v1291_v18  ;;  %v1293_v9 = vadd.f32 %v1229_v38, %v3029_v29  ;;  %v1295_v52 = vadd.f32 %v1231_v43, %v3032_v56  ;;  %v921_v37 = vpop.f32.mrb[7].mxu0  ;;  %v1034_v35 = vpop.f32.mrb[7].mxu1 }
 0x226   :  { %v1354_v58 = vmul.f32 0.7978846, %v1290_v22  ;;  %v1356_v36 = vmul.f32 0.7978846, %v1292_v34  ;;  %v1294_v59 = vadd.f32 %v1230_v31, %v3039_v12  ;;  %v1296_v2 = vadd.f32 %v1232_v7, %v3042_v5 }
 0x227   :  { %2157 = vtanh.f32 %v1353_v10  ;;  %v1357_v48 = vmul.f32 0.7978846, %v1293_v9  ;;  %v1359_v6 = vmul.f32 0.7978846, %v1295_v52  ;;  %v3069_v46 = vadd.f32 %v915_v42, %v3003_v25 }
 0x228   :  { %2159 = vtanh.f32 %v1355_v44  ;;  %v1358_v61 = vmul.f32 0.7978846, %v1294_v59  ;;  %v1360_v45 = vmul.f32 0.7978846, %v1296_v2  ;;  %v3072_v11 = vadd.f32 %v1028_v41, %v3005_v49 }
 0x229   :  { %2161 = vtanh.f32 %v1354_v58  ;;  %v1105_v53 = vmul.f32 %v3069_v46, %v3069_v46  ;;  %v3077_v13 = vadd.f32 %v917_v28, %v3008_v62  ;;  %v3080_v17 = vadd.f32 %v1030_v16, %v3010_v33 }
 0x22a   :  { %2163 = vtanh.f32 %v1356_v36  ;;  %v1107_v3 = vmul.f32 %v3072_v11, %v3072_v11  ;;  %v3085_v0 = vadd.f32 %v919_v21, %v3003_v25  ;;  %v3088_v4 = vadd.f32 %v1032_v40, %v3005_v49  ;;  %v3090_v19 = vpop.f32.mrb[8].mxu0  ;;  %v3092_v47 = vpop.f32.mrb[8].mxu1 }
 0x22b   :  { %2165 = vtanh.f32 %v1357_v48  ;;  %v1169_v32 = vmul.f32 %v1105_v53, %v3069_v46  ;;  %v1106_v30 = vmul.f32 %v3077_v13, %v3077_v13  ;;  %v1108_v24 = vmul.f32 %v3080_v17, %v3080_v17  ;;  %v3099_v57 = vpop.f32.mrb[9].mxu0  ;;  %v3101_v54 = vpop.f32.mrb[9].mxu1 }
 0x22c   :  { %2167 = vtanh.f32 %v1359_v6  ;;  %v1171_v20 = vmul.f32 %v1107_v3, %v3072_v11  ;;  %v1109_v23 = vmul.f32 %v3085_v0, %v3085_v0  ;;  %v1111_v8 = vmul.f32 %v3088_v4, %v3088_v4  ;;  %v3108_v55 = vpop.f32.mrb[10].mxu0  ;;  %v3110_v27 = vpop.f32.mrb[10].mxu1 }
 0x22d   :  { %2169 = vtanh.f32 %v1358_v61  ;;  %v1233_v14 = vmul.f32 0.044715, %v1169_v32  ;;  %v1170_v15 = vmul.f32 %v1106_v30, %v3077_v13  ;;  %v1172_v50 = vmul.f32 %v1108_v24, %v3080_v17  ;;  %v3114_v60 = vpop.f32.mrb[11].mxu0  ;;  %v3116_v42 = vpop.f32.mrb[11].mxu1 }
 0x22e   :  { %2171 = vtanh.f32 %v1360_v45  ;;  %v1235_v41 = vmul.f32 0.044715, %v1171_v20  ;;  %v1173_v26 = vmul.f32 %v1109_v23, %v3085_v0  ;;  %v1175_v18 = vmul.f32 %v1111_v8, %v3088_v4 }
 0x22f   :  { %v1297_v38 = vadd.f32 %v1233_v14, %v3069_v46  ;;  %v1234_v43 = vmul.f32 0.044715, %v1170_v15  ;;  %v1236_v28 = vmul.f32 0.044715, %v1172_v50  ;;  %v3122_v16 = vadd.f32 %v921_v37, %v3008_v62 }
 0x230   :  { %v1299_v22 = vadd.f32 %v1235_v41, %v3072_v11  ;;  %v1237_v34 = vmul.f32 0.044715, %v1173_v26  ;;  %v1239_v31 = vmul.f32 0.044715, %v1175_v18  ;;  %v3126_v7 = vadd.f32 %v1034_v35, %v3010_v33 }
 0x231   :  { %v2158_v21 = vpop.eup %2157  ;;  %v1361_v40 = vmul.f32 0.7978846, %v1297_v38  ;;  %v1298_v10 = vadd.f32 %v1234_v43, %v3077_v13  ;;  %v1300_v44 = vadd.f32 %v1236_v28, %v3080_v17  ;;  %v1110_v9 = vmul.f32 %v3122_v16, %v3122_v16 }
 0x232   :  { %v2160_v52 = vpop.eup %2159  ;;  %v1481_v58 = vadd.f32 1.0, %v2158_v21  ;;  %v1363_v37 = vmul.f32 0.7978846, %v1299_v22  ;;  %v1301_v36 = vadd.f32 %v1237_v34, %v3085_v0  ;;  %v1303_v59 = vadd.f32 %v1239_v31, %v3088_v4  ;;  %v3134_v2 = vpop.f32.mrb[12].mxu0 }
 0x233   :  { %v3136_v35 = vpop.f32.mrb[12].mxu1  ;;  %v2162_v48 = vpop.eup %2161  ;;  %v1483_v6 = vadd.f32 1.0, %v2160_v52  ;;  %2173 = vtanh.f32 %v1361_v40  ;;  %v1362_v61 = vmul.f32 0.7978846, %v1298_v10  ;;  %v1364_v45 = vmul.f32 0.7978846, %v1300_v44 }
 0x234   :  { %v3138_v53 = vpop.f32.mrb[13].mxu0  ;;  %v2164_v3 = vpop.eup %2163  ;;  %v1545_v32 = vmul.f32 0.5, %v1481_v58  ;;  %v1482_v30 = vadd.f32 1.0, %v2162_v48  ;;  %2175 = vtanh.f32 %v1363_v37  ;;  %v1365_v24 = vmul.f32 0.7978846, %v1301_v36 }
 0x235   :  { %v3140_v20 = vpop.f32.mrb[13].mxu1  ;;  %v3142_v23 = vpop.f32.mrb[14].mxu0  ;;  %v1547_v14 = vmul.f32 0.5, %v1483_v6  ;;  %v1484_v15 = vadd.f32 1.0, %v2164_v3  ;;  %2177 = vtanh.f32 %v1362_v61  ;;  %v1367_v50 = vmul.f32 0.7978846, %v1303_v59 }
 0x236   :  { %v2166_v8 = vpop.eup %2165  ;;  %v3144_v41 = vpop.f32.mrb[14].mxu1  ;;  %v1609_v38 = vmul.f32 %v1545_v32, %v3013_v1  ;;  %v1546_v43 = vmul.f32 0.5, %v1482_v30  ;;  %2179 = vtanh.f32 %v1364_v45  ;;  %v1174_v59 = vmul.f32 %v1110_v9, %v3122_v16 }
 0x237   :  { %v3146_v26 = vpop.f32.mrb[15].mxu0  ;;  %v2168_v18 = vpop.eup %2167  ;;  %v1485_v28 = vadd.f32 1.0, %v2166_v8  ;;  %v1611_v31 = vmul.f32 %v1547_v14, %v3016_v63  ;;  %v1548_v21 = vmul.f32 0.5, %v1484_v15  ;;  %2181 = vtanh.f32 %v1365_v24 }
 0x238   :  { %v3149_v22 = vpop.f32.mrb[15].mxu1  ;;  %v2170_v34 = vpop.eup %2169  ;;  %v1487_v40 = vadd.f32 1.0, %v2168_v18  ;;  %v1610_v44 = vmul.f32 %v1546_v43, %v3019_v39  ;;  %2183 = vtanh.f32 %v1367_v50  ;;  %v1112_v63 = vmul.f32 %v3126_v7, %v3126_v7 }
 0x239   :  { %v2172_v10 = vpop.eup %2171  ;;  %v1549_v52 = vmul.f32 0.5, %v1485_v28  ;;  %v1486_v58 = vadd.f32 1.0, %v2170_v34  ;;  %v1612_v37 = vmul.f32 %v1548_v21, %v3022_v51  ;;  %v1238_v51 = vmul.f32 0.044715, %v1174_v59 }
 0x23a   :  { %v1551_v1 = vmul.f32 0.5, %v1487_v40  ;;  %v1488_v36 = vadd.f32 1.0, %v2172_v10  ;;  %v1997_v48 = vpack.c.bf16 %v1610_v44, %v1609_v38  ;;  %v3158_v45 = vpop.f32.mrb[16].mxu0  ;;  %v3160_v3 = vpop.f32.mrb[16].mxu1  ;;  %v1176_v9 = vmul.f32 %v1112_v63, %v3126_v7 }
 0x23b   :  { %v1613_v6 = vmul.f32 %v1549_v52, %v3029_v29  ;;  %v1550_v61 = vmul.f32 0.5, %v1486_v58  ;;  %v1998_v39 = vpack.c.bf16 %v1612_v37, %v1611_v31  ;;  %v3163_v24 = vpop.f32.mrb[17].mxu0  ;;  %v3165_v8 = vpop.f32.mrb[17].mxu1  ;;  %v3174_v14 = vadd.f32 %v3090_v19, %v3003_v25 }
 0x23c   :  { %v1615_v32 = vmul.f32 %v1551_v1, %v3032_v56  ;;  %v1552_v30 = vmul.f32 0.5, %v1488_v36  ;;  %1865 = vst [vmem:[%s3775_s5] sm:$0xff] %v1997_v48  ;;  %v3178_v56 = vadd.f32 %v3092_v47, %v3005_v49  ;;  %v3180_v15 = vpop.f32.mrb[18].mxu0  ;;  %v3182_v50 = vpop.f32.mrb[18].mxu1  ;;  %v1302_v38 = vadd.f32 %v1238_v51, %v3122_v16 }
 0x23d   :  { %v1614_v29 = vmul.f32 %v1550_v61, %v3039_v12  ;;  %v2174_v18 = vpop.eup %2173  ;;  %1866 = vst [vmem:[%s3775_s5 + $0x8] sm:$0xff] %v1998_v39  ;;  %v3191_v19 = vadd.f32 %v3099_v57, %v3008_v62  ;;  %v3195_v47 = vadd.f32 %v3101_v54, %v3010_v33  ;;  %v3197_v43 = vpop.f32.mrb[19].mxu0  ;;  %v1240_v40 = vmul.f32 0.044715, %v1176_v9 }
 0x23e   :  { %v1616_v12 = vmul.f32 %v1552_v30, %v3042_v5  ;;  %v3199_v28 = vpop.f32.mrb[19].mxu1  ;;  %v2176_v34 = vpop.eup %2175  ;;  %v1489_v21 = vadd.f32 1.0, %v2174_v18  ;;  %v1113_v5 = vmul.f32 %v3174_v14, %v3174_v14  ;;  %v1366_v57 = vmul.f32 0.7978846, %v1302_v38 }
 0x23f   :  { %v1999_v31 = vpack.c.bf16 %v1614_v29, %v1613_v6  ;;  %v2178_v10 = vpop.eup %2177  ;;  %v1491_v52 = vadd.f32 1.0, %v2176_v34  ;;  %v1115_v58 = vmul.f32 %v3178_v56, %v3178_v56  ;;  %v1304_v36 = vadd.f32 %v1240_v40, %v3126_v7 }
 0x240   :  { %v2000_v44 = vpack.c.bf16 %v1616_v12, %v1615_v32  ;;  %v2180_v54 = vpop.eup %2179  ;;  %v1553_v37 = vmul.f32 0.5, %v1489_v21  ;;  %v1490_v1 = vadd.f32 1.0, %v2178_v10  ;;  %v1177_v59 = vmul.f32 %v1113_v5, %v3174_v14 }
 0x241   :  { %1867 = vst [vmem:[%s3775_s5 + $0x10] sm:$0xff] %v1999_v31  ;;  %v2182_v48 = vpop.eup %2181  ;;  %v1555_v6 = vmul.f32 0.5, %v1491_v52  ;;  %v1492_v61 = vadd.f32 1.0, %v2180_v54  ;;  %2185 = vtanh.f32 %v1366_v57  ;;  %v1179_v63 = vmul.f32 %v1115_v58, %v3178_v56 }
 0x242   :  { %1868 = vst [vmem:[%s3775_s5 + $0x18] sm:$0xff] %v2000_v44  ;;  %v2184_v39 = vpop.eup %2183  ;;  %v1617_v32 = vmul.f32 %v1553_v37, %v3069_v46  ;;  %v1554_v30 = vmul.f32 0.5, %v1490_v1  ;;  %v1493_v51 = vadd.f32 1.0, %v2182_v48  ;;  %v1368_v29 = vmul.f32 0.7978846, %v1304_v36  ;;  %v3215_v9 = vpop.f32.mrb[20].mxu0 }
 0x243   :  { %v3217_v18 = vpop.f32.mrb[20].mxu1  ;;  %v1619_v12 = vmul.f32 %v1555_v6, %v3072_v11  ;;  %v1556_v38 = vmul.f32 0.5, %v1492_v61  ;;  %v1495_v34 = vadd.f32 1.0, %v2184_v39  ;;  %v1241_v31 = vmul.f32 0.044715, %v1177_v59  ;;  %v3220_v21 = vpop.f32.mrb[21].mxu0 }
 0x244   :  { %v3222_v40 = vpop.f32.mrb[21].mxu1  ;;  %v1618_v5 = vmul.f32 %v1554_v30, %v3077_v13  ;;  %v1557_v10 = vmul.f32 0.5, %v1493_v51  ;;  %2187 = vtanh.f32 %v1368_v29  ;;  %v1243_v46 = vmul.f32 0.044715, %v1179_v63  ;;  %v3225_v44 = vpop.f32.mrb[22].mxu0 }
 0x245   :  { %v3227_v52 = vpop.f32.mrb[22].mxu1  ;;  %v1620_v57 = vmul.f32 %v1556_v38, %v3080_v17  ;;  %v1559_v58 = vmul.f32 0.5, %v1495_v34  ;;  %v1305_v11 = vadd.f32 %v1241_v31, %v3174_v14  ;;  %v1114_v54 = vmul.f32 %v3191_v19, %v3191_v19  ;;  %v3233_v37 = vpop.f32.mrb[23].mxu0 }
 0x246   :  { %v3235_v1 = vpop.f32.mrb[23].mxu1  ;;  %v2001_v13 = vpack.c.bf16 %v1618_v5, %v1617_v32  ;;  %v3238_v36 = vmul.f32 %v1557_v10, %v3085_v0  ;;  %v1307_v59 = vadd.f32 %v1243_v46, %v3178_v56  ;;  %v1116_v48 = vmul.f32 %v3195_v47, %v3195_v47 }
 0x247   :  { %v2002_v17 = vpack.c.bf16 %v1620_v57, %v1619_v12  ;;  %v3244_v6 = vmul.f32 %v1559_v58, %v3088_v4  ;;  %v1369_v61 = vmul.f32 0.7978846, %v1305_v11  ;;  %v1178_v63 = vmul.f32 %v1114_v54, %v3191_v19 }
 0x248   :  { %1869 = vst [vmem:[%s3775_s5 + $0x20] sm:$0xff] %v2001_v13  ;;  %v1371_v39 = vmul.f32 0.7978846, %v1307_v59  ;;  %v1180_v0 = vmul.f32 %v1116_v48, %v3195_v47  ;;  %v3253_v32 = vadd.f32 %v3108_v55, %v3003_v25  ;;  %v3257_v30 = vadd.f32 %v3110_v27, %v3005_v49 }
 0x249   :  { %1870 = vst [vmem:[%s3775_s5 + $0x28] sm:$0xff] %v2002_v17  ;;  %2189 = vtanh.f32 %v1369_v61  ;;  %v1242_v4 = vmul.f32 0.044715, %v1178_v63  ;;  %v3264_v51 = vadd.f32 %v3114_v60, %v3008_v62  ;;  %v3268_v29 = vadd.f32 %v3116_v42, %v3010_v33 }
 0x24a   :  { %2191 = vtanh.f32 %v1371_v39  ;;  %v1244_v55 = vmul.f32 0.044715, %v1180_v0  ;;  %v1117_v27 = vmul.f32 %v3253_v32, %v3253_v32  ;;  %v1119_v12 = vmul.f32 %v3257_v30, %v3257_v30  ;;  %v3274_v38 = vpop.f32.mrb[24].mxu0  ;;  %v3276_v34 = vpop.f32.mrb[24].mxu1 }
 0x24b   :  { %v2186_v31 = vpop.eup %2185  ;;  %v1306_v60 = vadd.f32 %v1242_v4, %v3191_v19  ;;  %v1118_v5 = vmul.f32 %v3264_v51, %v3264_v51  ;;  %v1120_v42 = vmul.f32 %v3268_v29, %v3268_v29  ;;  %v3285_v10 = vadd.f32 %v3134_v2, %v3003_v25  ;;  %v3287_v46 = vpop.f32.mrb[25].mxu0 }
 0x24c   :  { %v3289_v57 = vpop.f32.mrb[25].mxu1  ;;  %v1494_v58 = vadd.f32 1.0, %v2186_v31  ;;  %v1308_v11 = vadd.f32 %v1244_v55, %v3195_v47  ;;  %v1181_v54 = vmul.f32 %v1117_v27, %v3253_v32  ;;  %v1183_v13 = vmul.f32 %v1119_v12, %v3257_v30  ;;  %v3294_v59 = vpop.f32.mrb[26].mxu0 }
 0x24d   :  { %3776 = vst [vmem:[#allocation3_spill] sm:$0xff] %v3289_v57  ;;  %3777 = vst [vmem:[#allocation4_spill] sm:$0xff] %v3294_v59  ;;  %v3296_v48 = vpop.f32.mrb[26].mxu1  ;;  %v1370_v17 = vmul.f32 0.7978846, %v1306_v60  ;;  %v1182_v61 = vmul.f32 %v1118_v5, %v3264_v51  ;;  %v1184_v2 = vmul.f32 %v1120_v42, %v3268_v29  ;;  %v1121_v63 = vmul.f32 %v3285_v10, %v3285_v10  ;;  %v3302_v39 = vpop.f32.mrb[27].mxu0 }
 0x24e   :  { %3778 = vst [vmem:[#allocation5_spill] sm:$0xff] %v3296_v48  ;;  %3779 = vst [vmem:[#allocation6_spill] sm:$0xff] %v3302_v39  ;;  %v3304_v0 = vpop.f32.mrb[27].mxu1  ;;  %v2188_v4 = vpop.eup %2187  ;;  %v1558_v55 = vmul.f32 0.5, %v1494_v58  ;;  %v1372_v27 = vmul.f32 0.7978846, %v1308_v11  ;;  %v3308_v31 = vadd.f32 %v3136_v35, %v3005_v49 }
 0x24f   :  { %3780 = vst [vmem:[#allocation7_spill] sm:$0xff] %v3304_v0  ;;  %v1245_v12 = vmul.f32 0.044715, %v1181_v54  ;;  %v1496_v60 = vadd.f32 1.0, %v2188_v4  ;;  %2193 = vtanh.f32 %v1370_v17  ;;  %v1247_v5 = vmul.f32 0.044715, %v1183_v13 }
 0x250   :  { %v1246_v48 = vmul.f32 0.044715, %v1182_v61  ;;  %v1622_v42 = vmul.f32 %v1558_v55, %v3122_v16  ;;  %2195 = vtanh.f32 %v1372_v27  ;;  %v1248_v39 = vmul.f32 0.044715, %v1184_v2 }
 0x251   :  { %v1309_v59 = vadd.f32 %v1245_v12, %v3253_v32  ;;  %v1560_v57 = vmul.f32 0.5, %v1496_v60  ;;  %v1311_v0 = vadd.f32 %v1247_v5, %v3257_v30  ;;  %v1185_v11 = vmul.f32 %v1121_v63, %v3285_v10 }
 0x252   :  { %v1310_v58 = vadd.f32 %v1246_v48, %v3264_v51  ;;  %v2003_v35 = vpack.c.bf16 %v1622_v42, %v3238_v36  ;;  %v1312_v17 = vadd.f32 %v1248_v39, %v3268_v29  ;;  %v1123_v13 = vmul.f32 %v3308_v31, %v3308_v31  ;;  %v3319_v16 = vpop.f32.mrb[28].mxu0  ;;  %v3321_v61 = vpop.f32.mrb[28].mxu1 }
 0x253   :  { %v1373_v54 = vmul.f32 0.7978846, %v1309_v59  ;;  %v2190_v2 = vpop.eup %2189  ;;  %v1624_v4 = vmul.f32 %v1560_v57, %v3126_v7  ;;  %v1375_v55 = vmul.f32 0.7978846, %v1311_v0  ;;  %v1249_v48 = vmul.f32 0.044715, %v1185_v11 }
 0x254   :  { %v1374_v27 = vmul.f32 0.7978846, %v1310_v58  ;;  %v2192_v12 = vpop.eup %2191  ;;  %1871 = vst [vmem:[%s3775_s5 + $0x30] sm:$0xff] %v2003_v35  ;;  %v1497_v36 = vadd.f32 1.0, %v2190_v2  ;;  %v1376_v59 = vmul.f32 0.7978846, %v1312_v17  ;;  %v1187_v63 = vmul.f32 %v1123_v13, %v3308_v31 }
 0x255   :  { %2197 = vtanh.f32 %v1373_v54  ;;  %v3328_v39 = vpop.f32.mrb[29].mxu0  ;;  %v3330_v60 = vpop.f32.mrb[29].mxu1  ;;  %v2004_v5 = vpack.c.bf16 %v1624_v4, %v3244_v6  ;;  %v1499_v7 = vadd.f32 1.0, %v2192_v12  ;;  %v1313_v57 = vadd.f32 %v1249_v48, %v3285_v10 }
 0x256   :  { %3781 = vst [vmem:[#allocation8_spill] sm:$0xff] %v3328_v39  ;;  %3782 = vst [vmem:[#allocation9_spill] sm:$0xff] %v3330_v60  ;;  %2199 = vtanh.f32 %v1375_v55  ;;  %v3334_v0 = vpop.f32.mrb[30].mxu0  ;;  %v3336_v42 = vpop.f32.mrb[30].mxu1  ;;  %v1561_v58 = vmul.f32 0.5, %v1497_v36  ;;  %v3340_v35 = vadd.f32 %v3138_v53, %v3008_v62  ;;  %v3351_v2 = vadd.f32 %v3140_v20, %v3010_v33 }
 0x257   :  { %3783 = vst [vmem:[#allocation10_spill] sm:$0xff] %v3334_v0  ;;  %3784 = vst [vmem:[#allocation11_spill] sm:$0xff] %v3336_v42  ;;  %2201 = vtanh.f32 %v1374_v27  ;;  %v1251_v11 = vmul.f32 0.044715, %v1187_v63  ;;  %v3342_v54 = vpop.f32.mrb[31].mxu0  ;;  %v3344_v17 = vpop.f32.mrb[31].mxu1  ;;  %v3359_v27 = vadd.f32 %v3142_v23, %v3003_v25  ;;  %v3366_v20 = vadd.f32 %v3144_v41, %v3005_v49 }
 0x258   :  { %3785 = vst [vmem:[#allocation12_spill] sm:$0xff] %v3342_v54  ;;  %3786 = vst [vmem:[#allocation13_spill] sm:$0xff] %v3344_v17  ;;  %v1563_v6 = vmul.f32 0.5, %v1499_v7  ;;  %2203 = vtanh.f32 %v1376_v59  ;;  %v1377_v13 = vmul.f32 0.7978846, %v1313_v57  ;;  %v1625_v4 = vmul.f32 %v1561_v58, %v3174_v14 }
 0x259   :  { %1872 = vst [vmem:[%s3775_s5 + $0x38] sm:$0xff] %v2004_v5  ;;  %v1315_v53 = vadd.f32 %v1251_v11, %v3308_v31  ;;  %v1122_v55 = vmul.f32 %v3340_v35, %v3340_v35  ;;  %v2194_v48 = vpop.eup %2193  ;;  %v1124_v36 = vmul.f32 %v3351_v2, %v3351_v2  ;;  %v1125_v23 = vmul.f32 %v3359_v27, %v3359_v27 }
 0x25a   :  { %v1627_v12 = vmul.f32 %v1563_v6, %v3178_v56  ;;  %2205 = vtanh.f32 %v1377_v13  ;;  %v2196_v14 = vpop.eup %2195  ;;  %v1498_v59 = vadd.f32 1.0, %v2194_v48  ;;  %v1127_v56 = vmul.f32 %v3366_v20, %v3366_v20 }
 0x25b   :  { %v1379_v63 = vmul.f32 0.7978846, %v1315_v53  ;;  %v1186_v5 = vmul.f32 %v1122_v55, %v3340_v35  ;;  %v1500_v7 = vadd.f32 1.0, %v2196_v14  ;;  %v1188_v57 = vmul.f32 %v1124_v36, %v3351_v2 }
 0x25c   :  { %v3376_v58 = vadd.f32 %v3146_v26, %v3008_v62  ;;  %v1562_v41 = vmul.f32 0.5, %v1498_v59  ;;  %v1189_v6 = vmul.f32 %v1125_v23, %v3359_v27  ;;  %v1191_v55 = vmul.f32 %v1127_v56, %v3366_v20 }
 0x25d   :  { %2207 = vtanh.f32 %v1379_v63  ;;  %v1250_v11 = vmul.f32 0.044715, %v1186_v5  ;;  %v1564_v13 = vmul.f32 0.5, %v1500_v7  ;;  %v1252_v53 = vmul.f32 0.044715, %v1188_v57 }
 0x25e   :  { %v1126_v48 = vmul.f32 %v3376_v58, %v3376_v58  ;;  %v1626_v14 = vmul.f32 %v1562_v41, %v3191_v19  ;;  %v1253_v54 = vmul.f32 0.044715, %v1189_v6  ;;  %v3386_v26 = vadd.f32 %v3149_v22, %v3010_v33 }
 0x25f   :  { %v2198_v36 = vpop.eup %2197  ;;  %v1314_v17 = vadd.f32 %v1250_v11, %v3340_v35  ;;  %v1628_v63 = vmul.f32 %v1564_v13, %v3195_v47  ;;  %v1316_v23 = vadd.f32 %v1252_v53, %v3351_v2  ;;  %v1255_v7 = vmul.f32 0.044715, %v1191_v55 }
 0x260   :  { %v2200_v59 = vpop.eup %2199  ;;  %v1501_v5 = vadd.f32 1.0, %v2198_v36  ;;  %v2005_v56 = vpack.c.bf16 %v1626_v14, %v1625_v4  ;;  %v1317_v19 = vadd.f32 %v1253_v54, %v3359_v27  ;;  %v1190_v14 = vmul.f32 %v1126_v48, %v3376_v58 }
 0x261   :  { %v2202_v57 = vpop.eup %2201  ;;  %v1503_v42 = vadd.f32 1.0, %v2200_v59  ;;  %v1378_v0 = vmul.f32 0.7978846, %v1314_v17  ;;  %v2006_v11 = vpack.c.bf16 %v1628_v63, %v1627_v12  ;;  %v1380_v39 = vmul.f32 0.7978846, %v1316_v23 }
 0x262   :  { %v2204_v41 = vpop.eup %2203  ;;  %v1565_v6 = vmul.f32 0.5, %v1501_v5  ;;  %v1502_v60 = vadd.f32 1.0, %v2202_v57  ;;  %1873 = vst [vmem:[%s3775_s5 + $0x40] sm:$0xff] %v2005_v56  ;;  %v1381_v13 = vmul.f32 0.7978846, %v1317_v19  ;;  %v1319_v4 = vadd.f32 %v1255_v7, %v3366_v20 }
 0x263   :  { %v1567_v22 = vmul.f32 0.5, %v1503_v42  ;;  %v1504_v47 = vadd.f32 1.0, %v2204_v41  ;;  %2209 = vtanh.f32 %v1378_v0  ;;  %1874 = vst [vmem:[%s3775_s5 + $0x48] sm:$0xff] %v2006_v11  ;;  %v1128_v59 = vmul.f32 %v3386_v26, %v3386_v26 }
 0x264   :  { %v2206_v53 = vpop.eup %2205  ;;  %v1629_v54 = vmul.f32 %v1565_v6, %v3253_v32  ;;  %v1566_v17 = vmul.f32 0.5, %v1502_v60  ;;  %2211 = vtanh.f32 %v1380_v39  ;;  %v1383_v0 = vmul.f32 0.7978846, %v1319_v4 }
 0x265   :  { %v1631_v12 = vmul.f32 %v1567_v22, %v3257_v30  ;;  %v1568_v55 = vmul.f32 0.5, %v1504_v47  ;;  %v1505_v36 = vadd.f32 1.0, %v2206_v53  ;;  %2213 = vtanh.f32 %v1381_v13 }
 0x266   :  { %v1630_v42 = vmul.f32 %v1566_v17, %v3264_v51  ;;  %v3407_v39 = vadd.f32 %v3158_v45, %v3003_v25  ;;  %v3411_v30 = vadd.f32 %v3160_v3, %v3005_v49  ;;  %2215 = vtanh.f32 %v1383_v0 }
 0x267   :  { %v2208_v63 = vpop.eup %2207  ;;  %v1632_v32 = vmul.f32 %v1568_v55, %v3268_v29  ;;  %v1569_v60 = vmul.f32 0.5, %v1505_v36  ;;  %v1254_v23 = vmul.f32 0.044715, %v1190_v14  ;;  %v1192_v57 = vmul.f32 %v1128_v59, %v3386_v26 }
 0x268   :  { %v2007_v5 = vpack.c.bf16 %v1630_v42, %v1629_v54  ;;  %v1507_v51 = vadd.f32 1.0, %v2208_v63  ;;  %v1129_v29 = vmul.f32 %v3407_v39, %v3407_v39  ;;  %v1131_v56 = vmul.f32 %v3411_v30, %v3411_v30 }
 0x269   :  { %v2008_v48 = vpack.c.bf16 %v1632_v32, %v1631_v12  ;;  %v1633_v7 = vmul.f32 %v1569_v60, %v3285_v10  ;;  %v1318_v3 = vadd.f32 %v1254_v23, %v3376_v58  ;;  %v3425_v19 = vadd.f32 %v3163_v24, %v3008_v62 }
 0x26a   :  { %1875 = vst [vmem:[%s3775_s5 + $0x50] sm:$0xff] %v2007_v5  ;;  %v1571_v45 = vmul.f32 0.5, %v1507_v51  ;;  %v1256_v10 = vmul.f32 0.044715, %v1192_v57  ;;  %v1193_v41 = vmul.f32 %v1129_v29, %v3407_v39  ;;  %v3433_v11 = vadd.f32 %v3165_v8, %v3010_v33 }
 0x26b   :  { %1876 = vst [vmem:[%s3775_s5 + $0x58] sm:$0xff] %v2008_v48  ;;  %v3437_v6 = vadd.f32 %v3180_v15, %v3003_v25  ;;  %v1382_v47 = vmul.f32 0.7978846, %v1318_v3  ;;  %v1195_v24 = vmul.f32 %v1131_v56, %v3411_v30  ;;  %v1130_v13 = vmul.f32 %v3425_v19, %v3425_v19 }
 0x26c   :  { %v1635_v22 = vmul.f32 %v1571_v45, %v3308_v31  ;;  %v1320_v54 = vadd.f32 %v1256_v10, %v3386_v26  ;;  %v1257_v17 = vmul.f32 0.044715, %v1193_v41  ;;  %v1132_v8 = vmul.f32 %v3433_v11, %v3433_v11 }
 0x26d   :  { %v2210_v53 = vpop.eup %2209  ;;  %v1133_v4 = vmul.f32 %v3437_v6, %v3437_v6  ;;  %2217 = vtanh.f32 %v1382_v47  ;;  %v1259_v31 = vmul.f32 0.044715, %v1195_v24  ;;  %v1194_v55 = vmul.f32 %v1130_v13, %v3425_v19 }
 0x26e   :  { %v2212_v15 = vpop.eup %2211  ;;  %v1506_v12 = vadd.f32 1.0, %v2210_v53  ;;  %v1384_v0 = vmul.f32 0.7978846, %v1320_v54  ;;  %v1321_v14 = vadd.f32 %v1257_v17, %v3407_v39  ;;  %v1196_v59 = vmul.f32 %v1132_v8, %v3433_v11 }
 0x26f   :  { %v2214_v36 = vpop.eup %2213  ;;  %v1508_v42 = vadd.f32 1.0, %v2212_v15  ;;  %v1323_v60 = vadd.f32 %v1259_v31, %v3411_v30  ;;  %v1258_v5 = vmul.f32 0.044715, %v1194_v55  ;;  %v3489_v31 = vadd.f32 %v3217_v18, %v3005_v49 }
 0x270   :  { %v1570_v63 = vmul.f32 0.5, %v1506_v12  ;;  %v1509_v32 = vadd.f32 1.0, %v2214_v36  ;;  %2219 = vtanh.f32 %v1384_v0  ;;  %v1385_v23 = vmul.f32 0.7978846, %v1321_v14  ;;  %v2216_v57 = vpop.eup %2215 }
 0x271   :  { %v1572_v51 = vmul.f32 0.5, %v1508_v42  ;;  %v1260_v48 = vmul.f32 0.044715, %v1196_v59  ;;  %v1387_v3 = vmul.f32 0.7978846, %v1323_v60  ;;  %v1322_v56 = vadd.f32 %v1258_v5, %v3425_v19 }
 0x272   :  { %v1634_v29 = vmul.f32 %v1570_v63, %v3340_v35  ;;  %v1573_v45 = vmul.f32 0.5, %v1509_v32  ;;  %v1511_v41 = vadd.f32 1.0, %v2216_v57  ;;  %2221 = vtanh.f32 %v1385_v23 }
 0x273   :  { %v1636_v10 = vmul.f32 %v1572_v51, %v3351_v2  ;;  %v1324_v47 = vadd.f32 %v1260_v48, %v3433_v11  ;;  %2223 = vtanh.f32 %v1387_v3  ;;  %v1386_v53 = vmul.f32 0.7978846, %v1322_v56 }
 0x274   :  { %v2009_v24 = vpack.c.bf16 %v1634_v29, %v1633_v7  ;;  %v1637_v13 = vmul.f32 %v1573_v45, %v3359_v27  ;;  %v1575_v17 = vmul.f32 0.5, %v1511_v41  ;;  %v1197_v35 = vmul.f32 %v1133_v4, %v3437_v6 }
 0x275   :  { %v2010_v54 = vpack.c.bf16 %v1636_v10, %v1635_v22  ;;  %v1388_v8 = vmul.f32 0.7978846, %v1324_v47  ;;  %2225 = vtanh.f32 %v1386_v53  ;;  %v3463_v2 = vadd.f32 %v3182_v50, %v3005_v49 }
 0x276   :  { %1877 = vst [vmem:[%s3775_s5 + $0x60] sm:$0xff] %v2009_v24  ;;  %v3467_v7 = vadd.f32 %v3197_v43, %v3008_v62  ;;  %v3471_v27 = vadd.f32 %v3199_v28, %v3010_v33  ;;  %v1639_v22 = vmul.f32 %v1575_v17, %v3366_v20  ;;  %v1261_v4 = vmul.f32 0.044715, %v1197_v35 }
 0x277   :  { %1878 = vst [vmem:[%s3775_s5 + $0x68] sm:$0xff] %v2010_v54  ;;  %2227 = vtanh.f32 %v1388_v8  ;;  %v3479_v50 = vadd.f32 %v3215_v9, %v3003_v25  ;;  %v2218_v15 = vpop.eup %2217  ;;  %v1135_v43 = vmul.f32 %v3463_v2, %v3463_v2  ;;  %v3496_v36 = vadd.f32 %v3220_v21, %v3008_v62 }
 0x278   :  { %v1134_v28 = vmul.f32 %v3467_v7, %v3467_v7  ;;  %v1136_v12 = vmul.f32 %v3471_v27, %v3471_v27  ;;  %v1510_v20 = vadd.f32 1.0, %v2218_v15  ;;  %v1325_v55 = vadd.f32 %v1261_v4, %v3437_v6 }
 0x279   :  { %v1137_v9 = vmul.f32 %v3479_v50, %v3479_v50  ;;  %v1199_v42 = vmul.f32 %v1135_v43, %v3463_v2  ;;  %v1139_v18 = vmul.f32 %v3489_v31, %v3489_v31  ;;  %v1138_v5 = vmul.f32 %v3496_v36, %v3496_v36 }
 0x27a   :  { %v1198_v0 = vmul.f32 %v1134_v28, %v3467_v7  ;;  %v1200_v14 = vmul.f32 %v1136_v12, %v3471_v27  ;;  %v2220_v59 = vpop.eup %2219  ;;  %v1574_v63 = vmul.f32 0.5, %v1510_v20  ;;  %v1389_v32 = vmul.f32 0.7978846, %v1325_v55 }
 0x27b   :  { %v1201_v60 = vmul.f32 %v1137_v9, %v3479_v50  ;;  %v1512_v51 = vadd.f32 1.0, %v2220_v59  ;;  %v1263_v21 = vmul.f32 0.044715, %v1199_v42  ;;  %v1203_v48 = vmul.f32 %v1139_v18, %v3489_v31 }
 0x27c   :  { %v1262_v23 = vmul.f32 0.044715, %v1198_v0  ;;  %v2222_v57 = vpop.eup %2221  ;;  %v1638_v29 = vmul.f32 %v1574_v63, %v3376_v58  ;;  %2229 = vtanh.f32 %v1389_v32  ;;  %v1264_v45 = vmul.f32 0.044715, %v1200_v14 }
 0x27d   :  { %v1265_v3 = vmul.f32 0.044715, %v1201_v60  ;;  %v2224_v56 = vpop.eup %2223  ;;  %v1576_v10 = vmul.f32 0.5, %v1512_v51  ;;  %v1513_v41 = vadd.f32 1.0, %v2222_v57  ;;  %v1327_v47 = vadd.f32 %v1263_v21, %v3463_v2 }
 0x27e   :  { %v1326_v24 = vadd.f32 %v1262_v23, %v3467_v7  ;;  %v2011_v53 = vpack.c.bf16 %v1638_v29, %v1637_v13  ;;  %v1515_v54 = vadd.f32 1.0, %v2224_v56  ;;  %v1328_v17 = vadd.f32 %v1264_v45, %v3471_v27 }
 0x27f   :  { %v1329_v8 = vadd.f32 %v1265_v3, %v3479_v50  ;;  %v2226_v35 = vpop.eup %2225  ;;  %v1640_v4 = vmul.f32 %v1576_v10, %v3386_v26  ;;  %v1577_v58 = vmul.f32 0.5, %v1513_v41  ;;  %v1391_v15 = vmul.f32 0.7978846, %v1327_v47 }
 0x280   :  { %v1390_v43 = vmul.f32 0.7978846, %v1326_v24  ;;  %1879 = vst [vmem:[%s3775_s5 + $0x70] sm:$0xff] %v2011_v53  ;;  %v1579_v12 = vmul.f32 0.5, %v1515_v54  ;;  %v1514_v20 = vadd.f32 1.0, %v2226_v35  ;;  %v1202_v63 = vmul.f32 %v1138_v5, %v3496_v36 }
 0x281   :  { %v2228_v28 = vpop.eup %2227  ;;  %v1392_v55 = vmul.f32 0.7978846, %v1328_v17  ;;  %v1393_v13 = vmul.f32 0.7978846, %v1329_v8  ;;  %v2012_v9 = vpack.c.bf16 %v1640_v4, %v1639_v22  ;;  %v1641_v42 = vmul.f32 %v1577_v58, %v3407_v39 }
 0x282   :  { %v1516_v0 = vadd.f32 1.0, %v2228_v28  ;;  %2231 = vtanh.f32 %v1391_v15  ;;  %v1643_v14 = vmul.f32 %v1579_v12, %v3411_v30  ;;  %v1578_v26 = vmul.f32 0.5, %v1514_v20 }
 0x283   :  { %2233 = vtanh.f32 %v1390_v43  ;;  %v1267_v18 = vmul.f32 0.044715, %v1203_v48  ;;  %1880 = vst [vmem:[%s3775_s5 + $0x78] sm:$0xff] %v2012_v9  ;;  %v3524_v22 = vadd.f32 %v3222_v40, %v3010_v33  ;;  %v3530_v32 = vadd.f32 %v3225_v44, %v3003_v25 }
 0x284   :  { %v1580_v59 = vmul.f32 0.5, %v1516_v0  ;;  %2235 = vtanh.f32 %v1392_v55  ;;  %v1642_v39 = vmul.f32 %v1578_v26, %v3425_v19  ;;  %v1266_v51 = vmul.f32 0.044715, %v1202_v63 }
 0x285   :  { %2237 = vtanh.f32 %v1393_v13  ;;  %v1331_v30 = vadd.f32 %v1267_v18, %v3489_v31  ;;  %v1140_v21 = vmul.f32 %v3524_v22, %v3524_v22  ;;  %v3537_v5 = vadd.f32 %v3227_v52, %v3005_v49 }
 0x286   :  { %v1644_v60 = vmul.f32 %v1580_v59, %v3433_v11  ;;  %v2230_v40 = vpop.eup %2229  ;;  %v2013_v23 = vpack.c.bf16 %v1642_v39, %v1641_v42  ;;  %v1141_v48 = vmul.f32 %v3530_v32, %v3530_v32  ;;  %v3543_v44 = vadd.f32 %v3233_v37, %v3008_v62 }
 0x287   :  { %v1395_v19 = vmul.f32 0.7978846, %v1331_v30  ;;  %v1517_v11 = vadd.f32 1.0, %v2230_v40  ;;  %v1330_v29 = vadd.f32 %v1266_v51, %v3496_v36  ;;  %v1204_v45 = vmul.f32 %v1140_v21, %v3524_v22 }
 0x288   :  { %v2014_v57 = vpack.c.bf16 %v1644_v60, %v1643_v14  ;;  %1881 = vst [vmem:[%s3775_s5 + $0x80] sm:$0xff] %v2013_v23  ;;  %v1205_v52 = vmul.f32 %v1141_v48, %v3530_v32  ;;  %v1143_v3 = vmul.f32 %v3537_v5, %v3537_v5  ;;  %v1142_v37 = vmul.f32 %v3543_v44, %v3543_v44 }
 0x289   :  { %2239 = vtanh.f32 %v1395_v19  ;;  %v1581_v56 = vmul.f32 0.5, %v1517_v11  ;;  %v1394_v10 = vmul.f32 0.7978846, %v1330_v29  ;;  %v1268_v41 = vmul.f32 0.044715, %v1204_v45 }
 0x28a   :  { %1882 = vst [vmem:[%s3775_s5 + $0x88] sm:$0xff] %v2014_v57  ;;  %v3560_v47 = vadd.f32 %v3235_v1, %v3010_v33  ;;  %v1269_v24 = vmul.f32 0.044715, %v1205_v52  ;;  %v1207_v53 = vmul.f32 %v1143_v3, %v3537_v5  ;;  %v1206_v54 = vmul.f32 %v1142_v37, %v3543_v44 }
 0x28b   :  { %v3566_v17 = vadd.f32 %v3274_v38, %v3003_v25  ;;  %v1645_v35 = vmul.f32 %v1581_v56, %v3437_v6  ;;  %2241 = vtanh.f32 %v1394_v10  ;;  %v1332_v4 = vadd.f32 %v1268_v41, %v3524_v22  ;;  %v3788_v41 = vld [vmem:[#allocation4_spill] sm:$0xff] }
 0x28c   :  { %v2232_v8 = vpop.eup %2231  ;;  %v1144_v58 = vmul.f32 %v3560_v47, %v3560_v47  ;;  %v1333_v43 = vadd.f32 %v1269_v24, %v3530_v32  ;;  %v1271_v28 = vmul.f32 0.044715, %v1207_v53  ;;  %v1270_v12 = vmul.f32 0.044715, %v1206_v54 }
 0x28d   :  { %v2234_v1 = vpop.eup %2233  ;;  %v1519_v15 = vadd.f32 1.0, %v2232_v8  ;;  %v1396_v13 = vmul.f32 0.7978846, %v1332_v4  ;;  %v1145_v6 = vmul.f32 %v3566_v17, %v3566_v17  ;;  %v3584_v11 = vadd.f32 %v3276_v34, %v3005_v49 }
 0x28e   :  { %v2236_v20 = vpop.eup %2235  ;;  %v1518_v55 = vadd.f32 1.0, %v2234_v1  ;;  %v1208_v38 = vmul.f32 %v1144_v58, %v3560_v47  ;;  %v1397_v14 = vmul.f32 0.7978846, %v1333_v43  ;;  %v1335_v26 = vadd.f32 %v1271_v28, %v3537_v5 }
 0x28f   :  { %v2238_v9 = vpop.eup %2237  ;;  %v1583_v42 = vmul.f32 0.5, %v1519_v15  ;;  %v1520_v0 = vadd.f32 1.0, %v2236_v20  ;;  %2243 = vtanh.f32 %v1396_v13  ;;  %v1334_v63 = vadd.f32 %v1270_v12, %v3543_v44  ;;  %v3789_v13 = vld [vmem:[#allocation5_spill] sm:$0xff] }
 0x290   :  { %v1582_v18 = vmul.f32 0.5, %v1518_v55  ;;  %v1521_v59 = vadd.f32 1.0, %v2238_v9  ;;  %2245 = vtanh.f32 %v1397_v14  ;;  %v1399_v60 = vmul.f32 0.7978846, %v1335_v26 }
 0x291   :  { %v1647_v39 = vmul.f32 %v1583_v42, %v3463_v2  ;;  %v1584_v30 = vmul.f32 0.5, %v1520_v0  ;;  %v1398_v40 = vmul.f32 0.7978846, %v1334_v63  ;;  %v1272_v23 = vmul.f32 0.044715, %v1208_v38 }
 0x292   :  { %v1646_v51 = vmul.f32 %v1582_v18, %v3467_v7  ;;  %v1585_v21 = vmul.f32 0.5, %v1521_v59  ;;  %2247 = vtanh.f32 %v1399_v60  ;;  %v1209_v57 = vmul.f32 %v1145_v6, %v3566_v17 }
 0x293   :  { %v2240_v19 = vpop.eup %2239  ;;  %v1648_v48 = vmul.f32 %v1584_v30, %v3471_v27  ;;  %2249 = vtanh.f32 %v1398_v40  ;;  %v1336_v7 = vadd.f32 %v1272_v23, %v3560_v47  ;;  %v1147_v37 = vmul.f32 %v3584_v11, %v3584_v11 }
 0x294   :  { %v2015_v29 = vpack.c.bf16 %v1646_v51, %v1645_v35  ;;  %v1649_v2 = vmul.f32 %v1585_v21, %v3479_v50  ;;  %v1523_v45 = vadd.f32 1.0, %v2240_v19  ;;  %v1273_v3 = vmul.f32 0.044715, %v1209_v57  ;;  %v3787_v50 = vld [vmem:[#allocation3_spill] sm:$0xff] }
 0x295   :  { %v2016_v52 = vpack.c.bf16 %v1648_v48, %v1647_v39  ;;  %v2242_v27 = vpop.eup %2241  ;;  %v3595_v34 = vadd.f32 %v3287_v46, %v3008_v62  ;;  %v3599_v10 = vadd.f32 %v3787_v50, %v3010_v33  ;;  %v3603_v24 = vadd.f32 %v3788_v41, %v3003_v25  ;;  %v3790_v41 = vld [vmem:[#allocation6_spill] sm:$0xff] }
 0x296   :  { %1883 = vst [vmem:[%s3775_s5 + $0x90] sm:$0xff] %v2015_v29  ;;  %v1587_v56 = vmul.f32 0.5, %v1523_v45  ;;  %v1522_v53 = vadd.f32 1.0, %v2242_v27  ;;  %v1400_v54 = vmul.f32 0.7978846, %v1336_v7  ;;  %v1337_v8 = vadd.f32 %v1273_v3, %v3566_v17 }
 0x297   :  { %1884 = vst [vmem:[%s3775_s5 + $0x98] sm:$0xff] %v2016_v52  ;;  %v1211_v35 = vmul.f32 %v1147_v37, %v3584_v11  ;;  %v1146_v4 = vmul.f32 %v3595_v34, %v3595_v34  ;;  %v1148_v58 = vmul.f32 %v3599_v10, %v3599_v10  ;;  %v1149_v1 = vmul.f32 %v3603_v24, %v3603_v24 }
 0x298   :  { %v1651_v46 = vmul.f32 %v1587_v56, %v3489_v31  ;;  %v1586_v15 = vmul.f32 0.5, %v1522_v53  ;;  %2251 = vtanh.f32 %v1400_v54  ;;  %v1401_v43 = vmul.f32 0.7978846, %v1337_v8  ;;  %v3791_v53 = vld [vmem:[#allocation7_spill] sm:$0xff] }
 0x299   :  { %v1275_v28 = vmul.f32 0.044715, %v1211_v35  ;;  %v2244_v12 = vpop.eup %2243  ;;  %v1210_v20 = vmul.f32 %v1146_v4, %v3595_v34  ;;  %v1212_v55 = vmul.f32 %v1148_v58, %v3599_v10  ;;  %v1213_v31 = vmul.f32 %v1149_v1, %v3603_v24 }
 0x29a   :  { %v3622_v38 = vadd.f32 %v3789_v13, %v3005_v49  ;;  %v2246_v6 = vpop.eup %2245  ;;  %v1650_v9 = vmul.f32 %v1586_v15, %v3496_v36  ;;  %v1524_v42 = vadd.f32 1.0, %v2244_v12  ;;  %2253 = vtanh.f32 %v1401_v43 }
 0x29b   :  { %v1339_v0 = vadd.f32 %v1275_v28, %v3584_v11  ;;  %v1525_v14 = vadd.f32 1.0, %v2246_v6  ;;  %v1274_v26 = vmul.f32 0.044715, %v1210_v20  ;;  %v1276_v18 = vmul.f32 0.044715, %v1212_v55 }
 0x29c   :  { %v1151_v59 = vmul.f32 %v3622_v38, %v3622_v38  ;;  %v2248_v63 = vpop.eup %2247  ;;  %v2017_v39 = vpack.c.bf16 %v1650_v9, %v1649_v2  ;;  %v1588_v30 = vmul.f32 0.5, %v1524_v42  ;;  %v1277_v51 = vmul.f32 0.044715, %v1213_v31  ;;  %v3792_v9 = vld [vmem:[#allocation8_spill] sm:$0xff] }
 0x29d   :  { %v1403_v60 = vmul.f32 0.7978846, %v1339_v0  ;;  %v2250_v21 = vpop.eup %2249  ;;  %v1589_v40 = vmul.f32 0.5, %v1525_v14  ;;  %v1527_v23 = vadd.f32 1.0, %v2248_v63  ;;  %v1338_v36 = vadd.f32 %v1274_v26, %v3595_v34 }
 0x29e   :  { %v1340_v19 = vadd.f32 %v1276_v18, %v3599_v10  ;;  %1885 = vst [vmem:[%s3775_s5 + $0xa0] sm:$0xff] %v2017_v39  ;;  %v1652_v48 = vmul.f32 %v1588_v30, %v3524_v22  ;;  %v1526_v57 = vadd.f32 1.0, %v2250_v21  ;;  %v1341_v29 = vadd.f32 %v1277_v51, %v3603_v24 }
 0x29f   :  { %2255 = vtanh.f32 %v1403_v60  ;;  %v1653_v2 = vmul.f32 %v1589_v40, %v3530_v32  ;;  %v1591_v45 = vmul.f32 0.5, %v1527_v23  ;;  %v1402_v52 = vmul.f32 0.7978846, %v1338_v36 }
 0x2a0   :  { %v1404_v7 = vmul.f32 0.7978846, %v1340_v19  ;;  %v2018_v3 = vpack.c.bf16 %v1652_v48, %v1651_v46  ;;  %v1590_v37 = vmul.f32 0.5, %v1526_v57  ;;  %v1405_v27 = vmul.f32 0.7978846, %v1341_v29  ;;  %v3793_v57 = vld [vmem:[#allocation9_spill] sm:$0xff] }
 0x2a1   :  { %v1215_v56 = vmul.f32 %v1151_v59, %v3622_v38  ;;  %v1655_v50 = vmul.f32 %v1591_v45, %v3537_v5  ;;  %2257 = vtanh.f32 %v1402_v52  ;;  %v3640_v22 = vadd.f32 %v3790_v41, %v3008_v62 }
 0x2a2   :  { %v3644_v54 = vadd.f32 %v3791_v53, %v3010_v33  ;;  %v2252_v32 = vpop.eup %2251  ;;  %1886 = vst [vmem:[%s3775_s5 + $0xa8] sm:$0xff] %v2018_v3  ;;  %v1654_v8 = vmul.f32 %v1590_v37, %v3543_v44  ;;  %2259 = vtanh.f32 %v1404_v7  ;;  %v3652_v5 = vadd.f32 %v3319_v16, %v3003_v25 }
 0x2a3   :  { %v1279_v35 = vmul.f32 0.044715, %v1215_v56  ;;  %v1528_v46 = vadd.f32 1.0, %v2252_v32  ;;  %2261 = vtanh.f32 %v1405_v27  ;;  %v1150_v4 = vmul.f32 %v3640_v22, %v3640_v22 }
 0x2a4   :  { %v1152_v58 = vmul.f32 %v3644_v54, %v3644_v54  ;;  %v2254_v1 = vpop.eup %2253  ;;  %v2019_v15 = vpack.c.bf16 %v1654_v8, %v1653_v2  ;;  %v1153_v44 = vmul.f32 %v3652_v5, %v3652_v5  ;;  %v3663_v28 = vadd.f32 %v3321_v61, %v3005_v49  ;;  %v3794_v2 = vld [vmem:[#allocation10_spill] sm:$0xff] }
 0x2a5   :  { %v1343_v43 = vadd.f32 %v1279_v35, %v3622_v38  ;;  %v1592_v16 = vmul.f32 0.5, %v1528_v46  ;;  %v1529_v12 = vadd.f32 1.0, %v2254_v1  ;;  %v1214_v20 = vmul.f32 %v1150_v4, %v3640_v22 }
 0x2a6   :  { %v1216_v55 = vmul.f32 %v1152_v58, %v3644_v54  ;;  %1887 = vst [vmem:[%s3775_s5 + $0xb0] sm:$0xff] %v2019_v15  ;;  %v1217_v13 = vmul.f32 %v1153_v44, %v3652_v5  ;;  %v1155_v6 = vmul.f32 %v3663_v28, %v3663_v28  ;;  %v3675_v61 = vadd.f32 %v3792_v9, %v3008_v62  ;;  %v3795_v44 = vld [vmem:[#allocation11_spill] sm:$0xff] }
 0x2a7   :  { %v1407_v31 = vmul.f32 0.7978846, %v1343_v43  ;;  %v1656_v42 = vmul.f32 %v1592_v16, %v3560_v47  ;;  %v1278_v0 = vmul.f32 0.044715, %v1214_v20  ;;  %v1593_v30 = vmul.f32 0.5, %v1529_v12 }
 0x2a8   :  { %v1280_v14 = vmul.f32 0.044715, %v1216_v55  ;;  %v1281_v18 = vmul.f32 0.044715, %v1217_v13  ;;  %v1219_v59 = vmul.f32 %v1155_v6, %v3663_v28  ;;  %v1154_v63 = vmul.f32 %v3675_v61, %v3675_v61 }
 0x2a9   :  { %v2256_v26 = vpop.eup %2255  ;;  %2263 = vtanh.f32 %v1407_v31  ;;  %v2020_v39 = vpack.c.bf16 %v1656_v42, %v1655_v50  ;;  %v1342_v51 = vadd.f32 %v1278_v0, %v3640_v22  ;;  %v3690_v29 = vadd.f32 %v3793_v57, %v3010_v33  ;;  %v3797_v0 = vld [vmem:[#allocation13_spill] sm:$0xff] }
 0x2aa   :  { %v1531_v60 = vadd.f32 1.0, %v2256_v26  ;;  %v1344_v21 = vadd.f32 %v1280_v14, %v3644_v54  ;;  %v1345_v40 = vadd.f32 %v1281_v18, %v3652_v5  ;;  %v1283_v47 = vmul.f32 0.044715, %v1219_v59 }
 0x2ab   :  { %v1218_v23 = vmul.f32 %v1154_v63, %v3675_v61  ;;  %v2258_v36 = vpop.eup %2257  ;;  %1888 = vst [vmem:[%s3775_s5 + $0xb8] sm:$0xff] %v2020_v39  ;;  %v1406_v48 = vmul.f32 0.7978846, %v1342_v51  ;;  %v3694_v45 = vadd.f32 %v3794_v2, %v3003_v25  ;;  %v1657_v50 = vmul.f32 %v1593_v30, %v3566_v17 }
 0x2ac   :  { %v1595_v19 = vmul.f32 0.5, %v1531_v60  ;;  %v2260_v52 = vpop.eup %2259  ;;  %v1530_v7 = vadd.f32 1.0, %v2258_v36  ;;  %v1408_v3 = vmul.f32 0.7978846, %v1344_v21  ;;  %v1409_v37 = vmul.f32 0.7978846, %v1345_v40 }
 0x2ad   :  { %v1347_v27 = vadd.f32 %v1283_v47, %v3663_v28  ;;  %v2262_v56 = vpop.eup %2261  ;;  %v1532_v41 = vadd.f32 1.0, %v2260_v52  ;;  %2265 = vtanh.f32 %v1406_v48  ;;  %v1282_v53 = vmul.f32 0.044715, %v1218_v23 }
 0x2ae   :  { %v1659_v32 = vmul.f32 %v1595_v19, %v3584_v11  ;;  %v1594_v8 = vmul.f32 0.5, %v1530_v7  ;;  %2267 = vtanh.f32 %v1408_v3  ;;  %v1156_v4 = vmul.f32 %v3690_v29, %v3690_v29 }
 0x2af   :  { %v1411_v35 = vmul.f32 0.7978846, %v1347_v27  ;;  %v1596_v46 = vmul.f32 0.5, %v1532_v41  ;;  %2269 = vtanh.f32 %v1409_v37  ;;  %v1346_v25 = vadd.f32 %v1282_v53, %v3675_v61 }
 0x2b0   :  { %v1658_v58 = vmul.f32 %v1594_v8, %v3595_v34  ;;  %v1533_v1 = vadd.f32 1.0, %v2262_v56  ;;  %v1157_v17 = vmul.f32 %v3694_v45, %v3694_v45  ;;  %v1220_v43 = vmul.f32 %v1156_v4, %v3690_v29  ;;  %v3796_v34 = vld [vmem:[#allocation12_spill] sm:$0xff] }
 0x2b1   :  { %2271 = vtanh.f32 %v1411_v35  ;;  %v1660_v15 = vmul.f32 %v1596_v46, %v3599_v10  ;;  %v1410_v11 = vmul.f32 0.7978846, %v1346_v25  ;;  %v3709_v16 = vadd.f32 %v3795_v44, %v3005_v49 }
 0x2b2   :  { %v2021_v20 = vpack.c.bf16 %v1658_v58, %v1657_v50  ;;  %v1221_v55 = vmul.f32 %v1157_v17, %v3694_v45  ;;  %v3714_v31 = vadd.f32 %v3796_v34, %v3008_v62  ;;  %v1284_v9 = vmul.f32 0.044715, %v1220_v43 }
 0x2b3   :  { %v2264_v12 = vpop.eup %2263  ;;  %v2022_v13 = vpack.c.bf16 %v1660_v15, %v1659_v32  ;;  %2273 = vtanh.f32 %v1410_v11  ;;  %v1159_v49 = vmul.f32 %v3709_v16, %v3709_v16  ;;  %v3725_v14 = vadd.f32 %v3797_v0, %v3010_v33 }
 0x2b4   :  { %v1535_v6 = vadd.f32 1.0, %v2264_v12  ;;  %1889 = vst [vmem:[%s3775_s5 + $0xc0] sm:$0xff] %v2021_v20  ;;  %v1285_v10 = vmul.f32 0.044715, %v1221_v55  ;;  %v1158_v42 = vmul.f32 %v3714_v31, %v3714_v31  ;;  %v1597_v62 = vmul.f32 0.5, %v1533_v1 }
 0x2b5   :  { %1890 = vst [vmem:[%s3775_s5 + $0xc8] sm:$0xff] %v2022_v13  ;;  %v1348_v26 = vadd.f32 %v1284_v9, %v3690_v29  ;;  %v1223_v59 = vmul.f32 %v1159_v49, %v3709_v16  ;;  %v1160_v39 = vmul.f32 %v3725_v14, %v3725_v14 }
 0x2b6   :  { %v1349_v18 = vadd.f32 %v1285_v10, %v3694_v45  ;;  %v1222_v63 = vmul.f32 %v1158_v42, %v3714_v31  ;;  %v1599_v60 = vmul.f32 0.5, %v1535_v6  ;;  %v1661_v19 = vmul.f32 %v1597_v62, %v3603_v24 }
 0x2b7   :  { %v2266_v30 = vpop.eup %2265  ;;  %v1412_v33 = vmul.f32 0.7978846, %v1348_v26  ;;  %v1287_v47 = vmul.f32 0.044715, %v1223_v59  ;;  %v1224_v23 = vmul.f32 %v1160_v39, %v3725_v14 }
 0x2b8   :  { %v2268_v51 = vpop.eup %2267  ;;  %v1534_v21 = vadd.f32 1.0, %v2266_v30  ;;  %v1413_v40 = vmul.f32 0.7978846, %v1349_v18  ;;  %v1286_v57 = vmul.f32 0.044715, %v1222_v63  ;;  %v1663_v37 = vmul.f32 %v1599_v60, %v3622_v38 }
 0x2b9   :  { %v2270_v36 = vpop.eup %2269  ;;  %v1536_v48 = vadd.f32 1.0, %v2268_v51  ;;  %2275 = vtanh.f32 %v1412_v33  ;;  %v1351_v3 = vadd.f32 %v1287_v47, %v3709_v16  ;;  %v1288_v50 = vmul.f32 0.044715, %v1224_v23 }
 0x2ba   :  { %v1598_v52 = vmul.f32 0.5, %v1534_v21  ;;  %v1537_v7 = vadd.f32 1.0, %v2270_v36  ;;  %2277 = vtanh.f32 %v1413_v40  ;;  %v1350_v56 = vadd.f32 %v1286_v57, %v3714_v31 }
 0x2bb   :  { %v2272_v2 = vpop.eup %2271  ;;  %v1600_v27 = vmul.f32 0.5, %v1536_v48  ;;  %v1415_v32 = vmul.f32 0.7978846, %v1351_v3  ;;  %v1352_v46 = vadd.f32 %v1288_v50, %v3725_v14 }
 0x2bc   :  { %v1662_v41 = vmul.f32 %v1598_v52, %v3640_v22  ;;  %v1601_v53 = vmul.f32 0.5, %v1537_v7  ;;  %v1414_v35 = vmul.f32 0.7978846, %v1350_v56  ;;  %v1539_v4 = vadd.f32 1.0, %v2272_v2 }
 0x2bd   :  { %v2274_v24 = vpop.eup %2273  ;;  %v1664_v8 = vmul.f32 %v1600_v27, %v3644_v54  ;;  %2279 = vtanh.f32 %v1415_v32  ;;  %v1416_v38 = vmul.f32 0.7978846, %v1352_v46 }
 0x2be   :  { %v2023_v25 = vpack.c.bf16 %v1662_v41, %v1661_v19  ;;  %v1538_v58 = vadd.f32 1.0, %v2274_v24  ;;  %2281 = vtanh.f32 %v1414_v35  ;;  %v1665_v22 = vmul.f32 %v1601_v53, %v3652_v5 }
 0x2bf   :  { %v2024_v1 = vpack.c.bf16 %v1664_v8, %v1663_v37  ;;  %2283 = vtanh.f32 %v1416_v38  ;;  %v1603_v54 = vmul.f32 0.5, %v1539_v4 }
 0x2c0   :  { %1891 = vst [vmem:[%s3775_s5 + $0xd0] sm:$0xff] %v2023_v25  ;;  %v1602_v17 = vmul.f32 0.5, %v1538_v58 }
 0x2c1   :  { %1892 = vst [vmem:[%s3775_s5 + $0xd8] sm:$0xff] %v2024_v1  ;;  %v1667_v55 = vmul.f32 %v1603_v54, %v3663_v28 }
 0x2c2   :  { %v1666_v15 = vmul.f32 %v1602_v17, %v3675_v61 }
 0x2c3   :  { %v2276_v11 = vpop.eup %2275 }
 0x2c4   :  { %v2278_v43 = vpop.eup %2277  ;;  %v2025_v44 = vpack.c.bf16 %v1666_v15, %v1665_v22  ;;  %v1540_v12 = vadd.f32 1.0, %v2276_v11 }
 0x2c5   :  { %v1541_v20 = vadd.f32 1.0, %v2278_v43 }
 0x2c6   :  { %1893 = vst [vmem:[%s3775_s5 + $0xe0] sm:$0xff] %v2025_v44  ;;  %v1604_v5 = vmul.f32 0.5, %v1540_v12 }
 0x2c7   :  { %v2280_v34 = vpop.eup %2279  ;;  %v1605_v6 = vmul.f32 0.5, %v1541_v20 }
 0x2c8   :  { %v1668_v13 = vmul.f32 %v1604_v5, %v3690_v29  ;;  %v2282_v9 = vpop.eup %2281  ;;  %v1543_v10 = vadd.f32 1.0, %v2280_v34 }
 0x2c9   :  { %v1542_v61 = vadd.f32 1.0, %v2282_v9  ;;  %v2284_v42 = vpop.eup %2283  ;;  %v1669_v28 = vmul.f32 %v1605_v6, %v3694_v45 }
 0x2ca   :  { %v2026_v49 = vpack.c.bf16 %v1668_v13, %v1667_v55  ;;  %v1607_v0 = vmul.f32 0.5, %v1543_v10  ;;  %v1544_v26 = vadd.f32 1.0, %v2284_v42 }
 0x2cb   :  { %v1606_v62 = vmul.f32 0.5, %v1542_v61 }
 0x2cc   :  { %1894 = vst [vmem:[%s3775_s5 + $0xe8] sm:$0xff] %v2026_v49  ;;  %v1671_v18 = vmul.f32 %v1607_v0, %v3709_v16  ;;  %v1608_v29 = vmul.f32 0.5, %v1544_v26 }
 0x2cd   :  { %v1670_v59 = vmul.f32 %v1606_v62, %v3714_v31 }
 0x2ce   :  { %v1672_v39 = vmul.f32 %v1608_v29, %v3725_v14 }
 0x2cf   :  { %v2027_v63 = vpack.c.bf16 %v1670_v59, %v1669_v28 }
 0x2d0   :  { %v2028_v30 = vpack.c.bf16 %v1672_v39, %v1671_v18 }
 0x2d1   :  { %1895 = vst [vmem:[%s3775_s5 + $0xf0] sm:$0xff] %v2027_v63 }
 0x2d2   :  { %1896 = vst [vmem:[%s3775_s5 + $0xf8] sm:$0xff] %v2028_v30 }

// kernel: timesformer_encoder_forward.17
= control target key start
LH: loop header
LB: loop body
LE: loop exit
PB: predicated region body
PF: predicated region fallthrough
CT: control target
= control target key end

     0   :  { %s1978_s1 = inlined_call_operand.vmem [shape: bf16[512,256], index: 1, kind: input, shape index: {}]   ;;  %s1979_s0 = inlined_call_operand.vmem [shape: bf16[128,512], index: 0, kind: input, shape index: {}]   ;;  %s1980_s2 = inlined_call_operand.vmem [shape: f32[1,256], index: 2, kind: input, shape index: {}]   ;;  %s1981_s3 = inlined_call_operand.vmem [shape: bf16[128,256], index: 3, kind: input, shape index: {}]   ;;  %s1982_s4 = inlined_call_operand.vmem [shape: bf16[128,256], index: 4, kind: output, shape index: {}]  }
   0x1   :  { %v1386_v0 = vld [vmem:[%s1978_s1 + $0x4] ss:$8 sps:$4 sm:$0xff]   ;;  %v1390_v2 = vld [vmem:[%s1978_s1] ss:$8 sps:$4 sm:$0xff]   ;;  %v1392_v4 = vld [vmem:[%s1978_s1 + $0x14] ss:$8 sps:$4 sm:$0xff]  }
   0x2   :  { %v1388_v1 = vld [vmem:[%s1978_s1 + $0x104] ss:$8 sps:$4 sm:$0xff]   ;;  %661 = vmatprep.subr.bf16.mxu1 %v1386_v0  ;;  %v1391_v3 = vld [vmem:[%s1978_s1 + $0x100] ss:$8 sps:$4 sm:$0xff]   ;;  %v1394_v5 = vld [vmem:[%s1978_s1 + $0x114] ss:$8 sps:$4 sm:$0xff]  }
   0x3   :  { %774 = vmatprep.subr.bf16.mxu0 %v1388_v1  ;;  %662 = vmatpush1.bf16.msra.mxu1 %v1390_v2  ;;  %v1396_v6 = vld [vmem:[%s1978_s1 + $0x10] ss:$8 sps:$4 sm:$0xff]   ;;  %v1398_v8 = vld [vmem:[%s1978_s1 + $0x24] ss:$8 sps:$4 sm:$0xff]   ;;  %v1402_v10 = vld [vmem:[%s1978_s1 + $0x20] ss:$8 sps:$4 sm:$0xff]  }
   0x4   :  { %775 = vmatpush1.bf16.msra.mxu0 %v1391_v3  ;;  %663 = vmatprep.subr.bf16.mxu1 %v1392_v4  ;;  %v1397_v7 = vld [vmem:[%s1978_s1 + $0x110] ss:$8 sps:$4 sm:$0xff]   ;;  %v1400_v9 = vld [vmem:[%s1978_s1 + $0x124] ss:$8 sps:$4 sm:$0xff]   ;;  %v1403_v11 = vld [vmem:[%s1978_s1 + $0x120] ss:$8 sps:$4 sm:$0xff]  }
   0x5   :  { %776 = vmatprep.subr.bf16.mxu0 %v1394_v5  ;;  %v1404_v12 = vld [vmem:[%s1978_s1 + $0x34] ss:$8 sps:$4 sm:$0xff]   ;;  %v1408_v14 = vld [vmem:[%s1978_s1 + $0x30] ss:$8 sps:$4 sm:$0xff]   ;;  %v1410_v16 = vld [vmem:[%s1978_s1 + $0x44] ss:$8 sps:$4 sm:$0xff]  }
   0x6   :  { %v1406_v13 = vld [vmem:[%s1978_s1 + $0x134] ss:$8 sps:$4 sm:$0xff]   ;;  %v1409_v15 = vld [vmem:[%s1978_s1 + $0x130] ss:$8 sps:$4 sm:$0xff]   ;;  %v1412_v17 = vld [vmem:[%s1978_s1 + $0x144] ss:$8 sps:$4 sm:$0xff]  }
   0x7   :  { %664 = vmatpush1.bf16.msra.mxu1 %v1396_v6  ;;  %v1414_v18 = vld [vmem:[%s1978_s1 + $0x40] ss:$8 sps:$4 sm:$0xff]   ;;  %v1416_v20 = vld [vmem:[%s1978_s1 + $0x54] ss:$8 sps:$4 sm:$0xff]   ;;  %v1420_v22 = vld [vmem:[%s1978_s1 + $0x50] ss:$8 sps:$4 sm:$0xff]  }
   0x8   :  { %777 = vmatpush1.bf16.msra.mxu0 %v1397_v7  ;;  %665 = vmatprep.subr.bf16.mxu1 %v1398_v8  ;;  %v1415_v19 = vld [vmem:[%s1978_s1 + $0x140] ss:$8 sps:$4 sm:$0xff]   ;;  %v1418_v21 = vld [vmem:[%s1978_s1 + $0x154] ss:$8 sps:$4 sm:$0xff]   ;;  %v1421_v23 = vld [vmem:[%s1978_s1 + $0x150] ss:$8 sps:$4 sm:$0xff]  }
   0x9   :  { %778 = vmatprep.subr.bf16.mxu0 %v1400_v9  ;;  %v1422_v24 = vld [vmem:[%s1978_s1 + $0x64] ss:$8 sps:$4 sm:$0xff]   ;;  %v1426_v26 = vld [vmem:[%s1978_s1 + $0x60] ss:$8 sps:$4 sm:$0xff]   ;;  %v1428_v28 = vld [vmem:[%s1978_s1 + $0x74] ss:$8 sps:$4 sm:$0xff]  }
   0xa   :  { %v1424_v25 = vld [vmem:[%s1978_s1 + $0x164] ss:$8 sps:$4 sm:$0xff]   ;;  %v1427_v27 = vld [vmem:[%s1978_s1 + $0x160] ss:$8 sps:$4 sm:$0xff]   ;;  %v1430_v29 = vld [vmem:[%s1978_s1 + $0x174] ss:$8 sps:$4 sm:$0xff]  }
   0xb   :  { %666 = vmatpush1.bf16.msra.mxu1 %v1402_v10  ;;  %v1432_v30 = vld [vmem:[%s1978_s1 + $0x70] ss:$8 sps:$4 sm:$0xff]   ;;  %v1434_v32 = vld [vmem:[%s1978_s1 + $0x84] ss:$8 sps:$4 sm:$0xff]   ;;  %v1438_v34 = vld [vmem:[%s1978_s1 + $0x80] ss:$8 sps:$4 sm:$0xff]  }
   0xc   :  { %779 = vmatpush1.bf16.msra.mxu0 %v1403_v11  ;;  %667 = vmatprep.subr.bf16.mxu1 %v1404_v12  ;;  %v1433_v31 = vld [vmem:[%s1978_s1 + $0x170] ss:$8 sps:$4 sm:$0xff]   ;;  %v1436_v33 = vld [vmem:[%s1978_s1 + $0x184] ss:$8 sps:$4 sm:$0xff]   ;;  %v1439_v35 = vld [vmem:[%s1978_s1 + $0x180] ss:$8 sps:$4 sm:$0xff]  }
   0xd   :  { %780 = vmatprep.subr.bf16.mxu0 %v1406_v13  ;;  %v1440_v36 = vld [vmem:[%s1978_s1 + $0x94] ss:$8 sps:$4 sm:$0xff]   ;;  %v1444_v38 = vld [vmem:[%s1978_s1 + $0x90] ss:$8 sps:$4 sm:$0xff]   ;;  %v1446_v40 = vld [vmem:[%s1978_s1 + $0xa4] ss:$8 sps:$4 sm:$0xff]  }
   0xe   :  { %v1442_v37 = vld [vmem:[%s1978_s1 + $0x194] ss:$8 sps:$4 sm:$0xff]   ;;  %v1445_v39 = vld [vmem:[%s1978_s1 + $0x190] ss:$8 sps:$4 sm:$0xff]   ;;  %v1448_v41 = vld [vmem:[%s1978_s1 + $0x1a4] ss:$8 sps:$4 sm:$0xff]  }
   0xf   :  { %668 = vmatpush1.bf16.msra.mxu1 %v1408_v14  ;;  %v1450_v42 = vld [vmem:[%s1978_s1 + $0xa0] ss:$8 sps:$4 sm:$0xff]   ;;  %v1452_v44 = vld [vmem:[%s1978_s1 + $0xb4] ss:$8 sps:$4 sm:$0xff]   ;;  %v1456_v46 = vld [vmem:[%s1978_s1 + $0xb0] ss:$8 sps:$4 sm:$0xff]  }
  0x10   :  { %781 = vmatpush1.bf16.msra.mxu0 %v1409_v15  ;;  %669 = vmatprep.subr.bf16.mxu1 %v1410_v16  ;;  %v1451_v43 = vld [vmem:[%s1978_s1 + $0x1a0] ss:$8 sps:$4 sm:$0xff]   ;;  %v1454_v45 = vld [vmem:[%s1978_s1 + $0x1b4] ss:$8 sps:$4 sm:$0xff]   ;;  %v1457_v47 = vld [vmem:[%s1978_s1 + $0x1b0] ss:$8 sps:$4 sm:$0xff]  }
  0x11   :  { %782 = vmatprep.subr.bf16.mxu0 %v1412_v17  ;;  %v1458_v48 = vld [vmem:[%s1978_s1 + $0xc4] ss:$8 sps:$4 sm:$0xff]   ;;  %v1462_v52 = vld [vmem:[%s1978_s1 + $0xc0] ss:$8 sps:$4 sm:$0xff]   ;;  %v1464_v54 = vld [vmem:[%s1978_s1 + $0xd4] ss:$8 sps:$4 sm:$0xff]  }
  0x12   :  { %v1484_v49 = vld [vmem:[%s1979_s0 + $0x4] ss:$16 sps:$4 sm:$0xff]   ;;  %v1487_v51 = vld [vmem:[%s1979_s0 + $0xc] ss:$16 sps:$4 sm:$0xff]   ;;  %v1463_v53 = vld [vmem:[%s1978_s1 + $0x1c0] ss:$8 sps:$4 sm:$0xff]  }
  0x13   :  { %670 = vmatpush1.bf16.msra.mxu1 %v1414_v18  ;;  %v1460_v50 = vld [vmem:[%s1978_s1 + $0x1c4] ss:$8 sps:$4 sm:$0xff]   ;;  %693 = vmatprep.mubr.bf16.mxu1 %v1484_v49  ;;  %v1466_v55 = vld [vmem:[%s1978_s1 + $0x1d4] ss:$8 sps:$4 sm:$0xff]   ;;  %v1468_v56 = vld [vmem:[%s1978_s1 + $0xd0] ss:$8 sps:$4 sm:$0xff]  }
  0x14   :  { %783 = vmatpush1.bf16.msra.mxu0 %v1415_v19  ;;  %671 = vmatprep.subr.bf16.mxu1 %v1416_v20  ;;  %v1469_v57 = vld [vmem:[%s1978_s1 + $0x1d0] ss:$8 sps:$4 sm:$0xff]   ;;  %v1470_v58 = vld [vmem:[%s1978_s1 + $0xe4] ss:$8 sps:$4 sm:$0xff]   ;;  %v1474_v60 = vld [vmem:[%s1978_s1 + $0xe0] ss:$8 sps:$4 sm:$0xff]  }
  0x15   :  { %784 = vmatprep.subr.bf16.mxu0 %v1418_v21  ;;  %806 = vmatprep.mubr.bf16.mxu0 %v1487_v51  ;;  %v1472_v59 = vld [vmem:[%s1978_s1 + $0x1e4] ss:$8 sps:$4 sm:$0xff]   ;;  %v1475_v61 = vld [vmem:[%s1978_s1 + $0x1e0] ss:$8 sps:$4 sm:$0xff]   ;;  %v1476_v62 = vld [vmem:[%s1978_s1 + $0xf4] ss:$8 sps:$4 sm:$0xff]  }
  0x16   :  { %v1478_v63 = vld [vmem:[%s1978_s1 + $0x1f4] ss:$8 sps:$4 sm:$0xff]   ;;  %v1480_v0 = vld [vmem:[%s1978_s1 + $0xf0] ss:$8 sps:$4 sm:$0xff]  }
  0x17   :  { %672 = vmatpush1.bf16.msra.mxu1 %v1420_v22  ;;  %v1481_v1 = vld [vmem:[%s1978_s1 + $0x1f0] ss:$8 sps:$4 sm:$0xff]   ;;  %v1488_v4 = vld [vmem:[%s1979_s0 + $0x24] ss:$16 sps:$4 sm:$0xff]   ;;  %v1490_v5 = vld [vmem:[%s1979_s0 + $0x2c] ss:$16 sps:$4 sm:$0xff]  }
  0x18   :  { %785 = vmatpush1.bf16.msra.mxu0 %v1421_v23  ;;  %673 = vmatprep.subr.bf16.mxu1 %v1422_v24  ;;  %v1482_v2 = vld [vmem:[%s1979_s0] ss:$16 sps:$4 sm:$0xff]   ;;  %v1485_v3 = vld [vmem:[%s1979_s0 + $0x8] ss:$16 sps:$4 sm:$0xff]   ;;  %v1494_v8 = vld [vmem:[%s1979_s0 + $0x44] ss:$16 sps:$4 sm:$0xff]  }
  0x19   :  { %786 = vmatprep.subr.bf16.mxu0 %v1424_v25  ;;  %v1492_v6 = vld [vmem:[%s1979_s0 + $0x20] ss:$16 sps:$4 sm:$0xff]   ;;  %v1493_v7 = vld [vmem:[%s1979_s0 + $0x28] ss:$16 sps:$4 sm:$0xff]   ;;  %v1496_v9 = vld [vmem:[%s1979_s0 + $0x4c] ss:$16 sps:$4 sm:$0xff]  }
  0x1a   :  { %v1498_v10 = vld [vmem:[%s1979_s0 + $0x40] ss:$16 sps:$4 sm:$0xff]   ;;  %v1499_v11 = vld [vmem:[%s1979_s0 + $0x48] ss:$16 sps:$4 sm:$0xff]   ;;  %v1500_v12 = vld [vmem:[%s1979_s0 + $0x64] ss:$16 sps:$4 sm:$0xff]  }
  0x1b   :  { %674 = vmatpush1.bf16.msra.mxu1 %v1426_v26  ;;  %v1502_v13 = vld [vmem:[%s1979_s0 + $0x6c] ss:$16 sps:$4 sm:$0xff]   ;;  %v1504_v14 = vld [vmem:[%s1979_s0 + $0x60] ss:$16 sps:$4 sm:$0xff]   ;;  %v1505_v15 = vld [vmem:[%s1979_s0 + $0x68] ss:$16 sps:$4 sm:$0xff]  }
  0x1c   :  { %787 = vmatpush1.bf16.msra.mxu0 %v1427_v27  ;;  %675 = vmatprep.subr.bf16.mxu1 %v1428_v28  ;;  %v1506_v16 = vld [vmem:[%s1979_s0 + $0x84] ss:$16 sps:$4 sm:$0xff]   ;;  %v1508_v17 = vld [vmem:[%s1979_s0 + $0x8c] ss:$16 sps:$4 sm:$0xff]   ;;  %v1510_v18 = vld [vmem:[%s1979_s0 + $0x80] ss:$16 sps:$4 sm:$0xff]  }
  0x1d   :  { %788 = vmatprep.subr.bf16.mxu0 %v1430_v29  ;;  %v1511_v19 = vld [vmem:[%s1979_s0 + $0x88] ss:$16 sps:$4 sm:$0xff]   ;;  %v1512_v20 = vld [vmem:[%s1979_s0 + $0xa4] ss:$16 sps:$4 sm:$0xff]   ;;  %v1514_v21 = vld [vmem:[%s1979_s0 + $0xac] ss:$16 sps:$4 sm:$0xff]  }
  0x1e   :  { %v1516_v22 = vld [vmem:[%s1979_s0 + $0xa0] ss:$16 sps:$4 sm:$0xff]   ;;  %v1517_v23 = vld [vmem:[%s1979_s0 + $0xa8] ss:$16 sps:$4 sm:$0xff]   ;;  %v1518_v24 = vld [vmem:[%s1979_s0 + $0xc4] ss:$16 sps:$4 sm:$0xff]  }
  0x1f   :  { %676 = vmatpush1.bf16.msra.mxu1 %v1432_v30  ;;  %v1520_v25 = vld [vmem:[%s1979_s0 + $0xcc] ss:$16 sps:$4 sm:$0xff]   ;;  %v1522_v26 = vld [vmem:[%s1979_s0 + $0xc0] ss:$16 sps:$4 sm:$0xff]   ;;  %v1523_v27 = vld [vmem:[%s1979_s0 + $0xc8] ss:$16 sps:$4 sm:$0xff]  }
  0x20   :  { %789 = vmatpush1.bf16.msra.mxu0 %v1433_v31  ;;  %677 = vmatprep.subr.bf16.mxu1 %v1434_v32  ;;  %v1524_v28 = vld [vmem:[%s1979_s0 + $0xe4] ss:$16 sps:$4 sm:$0xff]   ;;  %v1526_v29 = vld [vmem:[%s1979_s0 + $0xec] ss:$16 sps:$4 sm:$0xff]   ;;  %v1528_v30 = vld [vmem:[%s1979_s0 + $0xe0] ss:$16 sps:$4 sm:$0xff]   ;;  %v988_v32 = vlaneseq }
  0x21   :  { %790 = vmatprep.subr.bf16.mxu0 %v1436_v33  ;;  %v1529_v31 = vld [vmem:[%s1979_s0 + $0xe8] ss:$16 sps:$4 sm:$0xff]  }
  0x22   :  { %v989_v33 = vshrl.u32 %v988_v32, 7 }
  0x23   :  { %678 = vmatpush1.bf16.msra.mxu1 %v1438_v34 }
  0x24   :  { %791 = vmatpush1.bf16.msra.mxu0 %v1439_v35  ;;  %679 = vmatprep.subr.bf16.mxu1 %v1440_v36  ;;  %v990_v34 = vsub.s32 0, %v989_v33  ;;  %v986_v35 = vld [vmem:[%s1980_s2] sm:$0x3]  ;;  %v994_v36 = vsub.s32 1, %v989_v33  ;;  %v1035_v33 = vld [vmem:[%s1981_s3 + $0x28] sm:$0xff] }
  0x25   :  { %792 = vmatprep.subr.bf16.mxu0 %v1442_v37  ;;  %v1030_v37 = vld [vmem:[%s1981_s3] sm:$0xff] }
  0x27   :  { %680 = vmatpush1.bf16.msra.mxu1 %v1444_v38  ;;  %v1849_v38 = vrot.slane %v986_v35, %v990_v34 }
  0x28   :  { %793 = vmatpush1.bf16.msra.mxu0 %v1445_v39  ;;  %681 = vmatprep.subr.bf16.mxu1 %v1446_v40 }
  0x29   :  { %794 = vmatprep.subr.bf16.mxu0 %v1448_v41  ;;  %v1851_v41 = vrot.slane %v986_v35, %v994_v36 }
  0x2b   :  { %682 = vmatpush1.bf16.msra.mxu1 %v1450_v42  ;;  %v1031_v42 = vld [vmem:[%s1981_s3 + $0x8] sm:$0xff] }
  0x2c   :  { %795 = vmatpush1.bf16.msra.mxu0 %v1451_v43  ;;  %683 = vmatprep.subr.bf16.mxu1 %v1452_v44  ;;  %v1046_v44 = vunpack.c.l.bf16 %v1030_v37 }
  0x2d   :  { %796 = vmatprep.subr.bf16.mxu0 %v1454_v45 }
  0x2f   :  { %684 = vmatpush1.bf16.msra.mxu1 %v1456_v46 }
  0x30   :  { %797 = vmatpush1.bf16.msra.mxu0 %v1457_v47  ;;  %685 = vmatprep.subr.bf16.mxu1 %v1458_v48  ;;  %v1047_v48 = vunpack.c.h.bf16 %v1030_v37 }
  0x31   :  { %798 = vmatprep.subr.bf16.mxu0 %v1460_v50 }
  0x33   :  { %686 = vmatpush1.bf16.msra.mxu1 %v1462_v52 }
  0x34   :  { %799 = vmatpush1.bf16.msra.mxu0 %v1463_v53  ;;  %687 = vmatprep.subr.bf16.mxu1 %v1464_v54  ;;  %v1048_v53 = vunpack.c.l.bf16 %v1031_v42 }
  0x35   :  { %800 = vmatprep.subr.bf16.mxu0 %v1466_v55 }
  0x37   :  { %688 = vmatpush1.bf16.msra.mxu1 %v1468_v56 }
  0x38   :  { %801 = vmatpush1.bf16.msra.mxu0 %v1469_v57  ;;  %689 = vmatprep.subr.bf16.mxu1 %v1470_v58  ;;  %v1049_v58 = vunpack.c.h.bf16 %v1031_v42 }
  0x39   :  { %802 = vmatprep.subr.bf16.mxu0 %v1472_v59 }
  0x3b   :  { %690 = vmatpush1.bf16.msra.mxu1 %v1474_v60 }
  0x3c   :  { %803 = vmatpush1.bf16.msra.mxu0 %v1475_v61  ;;  %691 = vmatprep.subr.bf16.mxu1 %v1476_v62 }
  0x3d   :  { %804 = vmatprep.subr.bf16.mxu0 %v1478_v63  ;;  %v1032_v63 = vld [vmem:[%s1981_s3 + $0x10] sm:$0xff] }
  0x3f   :  { %692 = vmatpush1.bf16.msra.mxu1 %v1480_v0 }
  0x40   :  { %805 = vmatpush1.bf16.msra.mxu0 %v1481_v1 }
  0x42   :  { %694 = vmatmul.mubr.bf16.vlgmr.msra.gmra.mrb[0].mxu1 %v1482_v2 }
  0x43   :  { %807 = vmatmul.mubr.bf16.vlgmr.msra.gmra.mrb[0].mxu0 %v1485_v3  ;;  %703 = vmatprep.mubr.bf16.mxu1 %v1488_v4 }
  0x44   :  { %816 = vmatprep.mubr.bf16.mxu0 %v1490_v5  ;;  %v1033_v5 = vld [vmem:[%s1981_s3 + $0x18] sm:$0xff] }
  0x4a   :  { %704 = vmatmul.mubr.bf16.gmra.mrb[4].mxu1 %v1492_v6 }
  0x4b   :  { %817 = vmatmul.mubr.bf16.gmra.mrb[4].mxu0 %v1493_v7  ;;  %713 = vmatprep.mubr.bf16.mxu1 %v1494_v8  ;;  %v1050_v7 = vunpack.c.l.bf16 %v1032_v63 }
  0x4c   :  { %826 = vmatprep.mubr.bf16.mxu0 %v1496_v9 }
  0x52   :  { %714 = vmatmul.mubr.bf16.gmra.mrb[8].mxu1 %v1498_v10 }
  0x53   :  { %827 = vmatmul.mubr.bf16.gmra.mrb[8].mxu0 %v1499_v11  ;;  %723 = vmatprep.mubr.bf16.mxu1 %v1500_v12  ;;  %v1051_v12 = vunpack.c.h.bf16 %v1032_v63  ;;  %v1037_v63 = vld [vmem:[%s1981_s3 + $0x38] sm:$0xff] }
  0x54   :  { %836 = vmatprep.mubr.bf16.mxu0 %v1502_v13 }
  0x5a   :  { %724 = vmatmul.mubr.bf16.gmra.mrb[12].mxu1 %v1504_v14 }
  0x5b   :  { %837 = vmatmul.mubr.bf16.gmra.mrb[12].mxu0 %v1505_v15  ;;  %733 = vmatprep.mubr.bf16.mxu1 %v1506_v16 }
  0x5c   :  { %846 = vmatprep.mubr.bf16.mxu0 %v1508_v17  ;;  %v1052_v17 = vunpack.c.l.bf16 %v1033_v5 }
  0x62   :  { %734 = vmatmul.mubr.bf16.gmra.mrb[16].mxu1 %v1510_v18 }
  0x63   :  { %847 = vmatmul.mubr.bf16.gmra.mrb[16].mxu0 %v1511_v19  ;;  %743 = vmatprep.mubr.bf16.mxu1 %v1512_v20 }
  0x64   :  { %856 = vmatprep.mubr.bf16.mxu0 %v1514_v21 }
  0x6a   :  { %744 = vmatmul.mubr.bf16.gmra.mrb[20].mxu1 %v1516_v22  ;;  %v1053_v22 = vunpack.c.h.bf16 %v1033_v5 }
  0x6b   :  { %857 = vmatmul.mubr.bf16.gmra.mrb[20].mxu0 %v1517_v23  ;;  %753 = vmatprep.mubr.bf16.mxu1 %v1518_v24 }
  0x6c   :  { %866 = vmatprep.mubr.bf16.mxu0 %v1520_v25 }
  0x72   :  { %754 = vmatmul.mubr.bf16.gmra.mrb[24].mxu1 %v1522_v26 }
  0x73   :  { %867 = vmatmul.mubr.bf16.gmra.mrb[24].mxu0 %v1523_v27  ;;  %763 = vmatprep.mubr.bf16.mxu1 %v1524_v28  ;;  %v1034_v27 = vld [vmem:[%s1981_s3 + $0x20] sm:$0xff] }
  0x74   :  { %876 = vmatprep.mubr.bf16.mxu0 %v1526_v29  ;;  %v1054_v35 = vunpack.c.l.bf16 %v1034_v27  ;;  %v1055_v42 = vunpack.c.h.bf16 %v1034_v27  ;;  %v1039_v27 = vld [vmem:[%s1981_s3 + $0x48] sm:$0xff] }
  0x7a   :  { %764 = vmatmul.mubr.bf16.gmra.mrb[28].mxu1 %v1528_v30 }
  0x7b   :  { %877 = vmatmul.mubr.bf16.gmra.mrb[28].mxu0 %v1529_v31 }
 0x115   :  { %v695_v39 = vpop.f32.mrb[0].mxu1 }
 0x116   :  { %v808_v40 = vpop.f32.mrb[0].mxu0  ;;  %v697_v45 = vpop.f32.mrb[1].mxu1 }
 0x117   :  { %v809_v43 = vadd.f32 %v808_v40, %v695_v39  ;;  %v810_v46 = vpop.f32.mrb[1].mxu0  ;;  %v699_v49 = vpop.f32.mrb[2].mxu1 }
 0x118   :  { %v811_v47 = vadd.f32 %v810_v46, %v697_v45  ;;  %v812_v50 = vpop.f32.mrb[2].mxu0  ;;  %v701_v54 = vpop.f32.mrb[3].mxu1 }
 0x119   :  { %v998_v51 = vadd.f32 %v1849_v38, %v809_v43  ;;  %v813_v52 = vadd.f32 %v812_v50, %v699_v49  ;;  %v814_v55 = vpop.f32.mrb[3].mxu0 }
 0x11a   :  { %v999_v56 = vadd.f32 %v1851_v41, %v811_v47  ;;  %v815_v57 = vadd.f32 %v814_v55, %v701_v54  ;;  %v1056_v47 = vunpack.c.l.bf16 %v1035_v33 }
 0x11b   :  { %v1078_v59 = vadd.f32 %v1046_v44, %v998_v51  ;;  %v1000_v60 = vadd.f32 %v1849_v38, %v813_v52  ;;  %v1057_v52 = vunpack.c.h.bf16 %v1035_v33 }
 0x11c   :  { %v1079_v61 = vadd.f32 %v1047_v48, %v999_v56  ;;  %v1001_v62 = vadd.f32 %v1851_v41, %v815_v57  ;;  %v1036_v57 = vld [vmem:[%s1981_s3 + $0x30] sm:$0xff] }
 0x11d   :  { %v1080_v0 = vadd.f32 %v1048_v53, %v1000_v60  ;;  %v705_v3 = vpop.f32.mrb[4].mxu1 }
 0x11e   :  { %v1338_v1 = vpack.c.bf16 %v1079_v61, %v1078_v59  ;;  %v1081_v2 = vadd.f32 %v1049_v58, %v1001_v62  ;;  %v818_v4 = vpop.f32.mrb[4].mxu0  ;;  %v707_v8 = vpop.f32.mrb[5].mxu1 }
 0x11f   :  { %v819_v6 = vadd.f32 %v818_v4, %v705_v3  ;;  %v820_v9 = vpop.f32.mrb[5].mxu0  ;;  %v709_v13 = vpop.f32.mrb[6].mxu1 }
 0x120   :  { %1206 = vst [vmem:[%s1982_s4] sm:$0xff] %v1338_v1  ;;  %v1339_v10 = vpack.c.bf16 %v1081_v2, %v1080_v0  ;;  %v821_v11 = vadd.f32 %v820_v9, %v707_v8  ;;  %v822_v14 = vpop.f32.mrb[6].mxu0  ;;  %v711_v18 = vpop.f32.mrb[7].mxu1  ;;  %v1058_v1 = vunpack.c.l.bf16 %v1036_v57 }
 0x121   :  { %v1002_v15 = vadd.f32 %v1849_v38, %v819_v6  ;;  %v823_v16 = vadd.f32 %v822_v14, %v709_v13  ;;  %v824_v19 = vpop.f32.mrb[7].mxu0  ;;  %v1059_v6 = vunpack.c.h.bf16 %v1036_v57  ;;  %v1041_v57 = vld [vmem:[%s1981_s3 + $0x58] sm:$0xff] }
 0x122   :  { %1207 = vst [vmem:[%s1982_s4 + $0x8] sm:$0xff] %v1339_v10  ;;  %v1003_v20 = vadd.f32 %v1851_v41, %v821_v11  ;;  %v825_v21 = vadd.f32 %v824_v19, %v711_v18  ;;  %v1060_v11 = vunpack.c.l.bf16 %v1037_v63 }
 0x123   :  { %v1082_v23 = vadd.f32 %v1050_v7, %v1002_v15  ;;  %v1004_v24 = vadd.f32 %v1849_v38, %v823_v16  ;;  %v1061_v16 = vunpack.c.h.bf16 %v1037_v63 }
 0x124   :  { %v1083_v25 = vadd.f32 %v1051_v12, %v1003_v20  ;;  %v1005_v26 = vadd.f32 %v1851_v41, %v825_v21  ;;  %v1038_v21 = vld [vmem:[%s1981_s3 + $0x40] sm:$0xff] }
 0x125   :  { %v1084_v28 = vadd.f32 %v1052_v17, %v1004_v24  ;;  %v715_v31 = vpop.f32.mrb[8].mxu1 }
 0x126   :  { %v1340_v29 = vpack.c.bf16 %v1083_v25, %v1082_v23  ;;  %v1085_v30 = vadd.f32 %v1053_v22, %v1005_v26  ;;  %v828_v32 = vpop.f32.mrb[8].mxu0  ;;  %v717_v36 = vpop.f32.mrb[9].mxu1 }
 0x127   :  { %v829_v34 = vadd.f32 %v828_v32, %v715_v31  ;;  %v830_v37 = vpop.f32.mrb[9].mxu0  ;;  %v719_v43 = vpop.f32.mrb[10].mxu1 }
 0x128   :  { %1208 = vst [vmem:[%s1982_s4 + $0x10] sm:$0xff] %v1340_v29  ;;  %v1341_v39 = vpack.c.bf16 %v1085_v30, %v1084_v28  ;;  %v831_v40 = vadd.f32 %v830_v37, %v717_v36  ;;  %v832_v44 = vpop.f32.mrb[10].mxu0  ;;  %v721_v48 = vpop.f32.mrb[11].mxu1  ;;  %v1062_v29 = vunpack.c.l.bf16 %v1038_v21 }
 0x129   :  { %v1006_v45 = vadd.f32 %v1849_v38, %v829_v34  ;;  %v833_v46 = vadd.f32 %v832_v44, %v719_v43  ;;  %v834_v49 = vpop.f32.mrb[11].mxu0  ;;  %v1063_v34 = vunpack.c.h.bf16 %v1038_v21  ;;  %v1043_v21 = vld [vmem:[%s1981_s3 + $0x68] sm:$0xff] }
 0x12a   :  { %1209 = vst [vmem:[%s1982_s4 + $0x18] sm:$0xff] %v1341_v39  ;;  %v1007_v50 = vadd.f32 %v1851_v41, %v831_v40  ;;  %v835_v51 = vadd.f32 %v834_v49, %v721_v48  ;;  %v1064_v40 = vunpack.c.l.bf16 %v1039_v27 }
 0x12b   :  { %v1086_v53 = vadd.f32 %v1054_v35, %v1006_v45  ;;  %v1008_v54 = vadd.f32 %v1849_v38, %v833_v46  ;;  %v1065_v46 = vunpack.c.h.bf16 %v1039_v27 }
 0x12c   :  { %v1087_v55 = vadd.f32 %v1055_v42, %v1007_v50  ;;  %v1009_v56 = vadd.f32 %v1851_v41, %v835_v51  ;;  %v1040_v51 = vld [vmem:[%s1981_s3 + $0x50] sm:$0xff] }
 0x12d   :  { %v1088_v58 = vadd.f32 %v1056_v47, %v1008_v54  ;;  %v725_v61 = vpop.f32.mrb[12].mxu1 }
 0x12e   :  { %v1342_v59 = vpack.c.bf16 %v1087_v55, %v1086_v53  ;;  %v1089_v60 = vadd.f32 %v1057_v52, %v1009_v56  ;;  %v838_v62 = vpop.f32.mrb[12].mxu0  ;;  %v727_v2 = vpop.f32.mrb[13].mxu1 }
 0x12f   :  { %v839_v0 = vadd.f32 %v838_v62, %v725_v61  ;;  %v840_v3 = vpop.f32.mrb[13].mxu0  ;;  %v729_v7 = vpop.f32.mrb[14].mxu1 }
 0x130   :  { %1210 = vst [vmem:[%s1982_s4 + $0x20] sm:$0xff] %v1342_v59  ;;  %v1343_v4 = vpack.c.bf16 %v1089_v60, %v1088_v58  ;;  %v841_v5 = vadd.f32 %v840_v3, %v727_v2  ;;  %v842_v8 = vpop.f32.mrb[14].mxu0  ;;  %v731_v12 = vpop.f32.mrb[15].mxu1  ;;  %v1066_v59 = vunpack.c.l.bf16 %v1040_v51 }
 0x131   :  { %v1010_v9 = vadd.f32 %v1849_v38, %v839_v0  ;;  %v843_v10 = vadd.f32 %v842_v8, %v729_v7  ;;  %v844_v13 = vpop.f32.mrb[15].mxu0  ;;  %v1067_v0 = vunpack.c.h.bf16 %v1040_v51  ;;  %v1045_v51 = vld [vmem:[%s1981_s3 + $0x78] sm:$0xff] }
 0x132   :  { %1211 = vst [vmem:[%s1982_s4 + $0x28] sm:$0xff] %v1343_v4  ;;  %v1011_v14 = vadd.f32 %v1851_v41, %v841_v5  ;;  %v845_v15 = vadd.f32 %v844_v13, %v731_v12  ;;  %v1068_v5 = vunpack.c.l.bf16 %v1041_v57 }
 0x133   :  { %v1090_v17 = vadd.f32 %v1058_v1, %v1010_v9  ;;  %v1012_v18 = vadd.f32 %v1849_v38, %v843_v10  ;;  %v1069_v10 = vunpack.c.h.bf16 %v1041_v57 }
 0x134   :  { %v1091_v19 = vadd.f32 %v1059_v6, %v1011_v14  ;;  %v1013_v20 = vadd.f32 %v1851_v41, %v845_v15  ;;  %v1042_v15 = vld [vmem:[%s1981_s3 + $0x60] sm:$0xff] }
 0x135   :  { %v1092_v22 = vadd.f32 %v1060_v11, %v1012_v18  ;;  %v735_v25 = vpop.f32.mrb[16].mxu1 }
 0x136   :  { %v1344_v23 = vpack.c.bf16 %v1091_v19, %v1090_v17  ;;  %v1093_v24 = vadd.f32 %v1061_v16, %v1013_v20  ;;  %v848_v26 = vpop.f32.mrb[16].mxu0  ;;  %v737_v30 = vpop.f32.mrb[17].mxu1 }
 0x137   :  { %v849_v28 = vadd.f32 %v848_v26, %v735_v25  ;;  %v850_v31 = vpop.f32.mrb[17].mxu0  ;;  %v739_v35 = vpop.f32.mrb[18].mxu1 }
 0x138   :  { %1212 = vst [vmem:[%s1982_s4 + $0x30] sm:$0xff] %v1344_v23  ;;  %v1345_v32 = vpack.c.bf16 %v1093_v24, %v1092_v22  ;;  %v851_v33 = vadd.f32 %v850_v31, %v737_v30  ;;  %v852_v36 = vpop.f32.mrb[18].mxu0  ;;  %v741_v42 = vpop.f32.mrb[19].mxu1  ;;  %v1070_v23 = vunpack.c.l.bf16 %v1042_v15 }
 0x139   :  { %v1014_v37 = vadd.f32 %v1849_v38, %v849_v28  ;;  %v853_v39 = vadd.f32 %v852_v36, %v739_v35  ;;  %v854_v43 = vpop.f32.mrb[19].mxu0  ;;  %v1071_v28 = vunpack.c.h.bf16 %v1042_v15 }
 0x13a   :  { %1213 = vst [vmem:[%s1982_s4 + $0x38] sm:$0xff] %v1345_v32  ;;  %v1015_v44 = vadd.f32 %v1851_v41, %v851_v33  ;;  %v855_v45 = vadd.f32 %v854_v43, %v741_v42  ;;  %v1072_v33 = vunpack.c.l.bf16 %v1043_v21 }
 0x13b   :  { %v1094_v47 = vadd.f32 %v1062_v29, %v1014_v37  ;;  %v1016_v48 = vadd.f32 %v1849_v38, %v853_v39  ;;  %v1073_v39 = vunpack.c.h.bf16 %v1043_v21 }
 0x13c   :  { %v1095_v49 = vadd.f32 %v1063_v34, %v1015_v44  ;;  %v1017_v50 = vadd.f32 %v1851_v41, %v855_v45  ;;  %v1044_v45 = vld [vmem:[%s1981_s3 + $0x70] sm:$0xff] }
 0x13d   :  { %v1096_v52 = vadd.f32 %v1064_v40, %v1016_v48  ;;  %v745_v55 = vpop.f32.mrb[20].mxu1 }
 0x13e   :  { %v1346_v53 = vpack.c.bf16 %v1095_v49, %v1094_v47  ;;  %v1097_v54 = vadd.f32 %v1065_v46, %v1017_v50  ;;  %v858_v56 = vpop.f32.mrb[20].mxu0  ;;  %v747_v60 = vpop.f32.mrb[21].mxu1 }
 0x13f   :  { %v859_v58 = vadd.f32 %v858_v56, %v745_v55  ;;  %v860_v61 = vpop.f32.mrb[21].mxu0  ;;  %v749_v1 = vpop.f32.mrb[22].mxu1 }
 0x140   :  { %1214 = vst [vmem:[%s1982_s4 + $0x40] sm:$0xff] %v1346_v53  ;;  %v1347_v62 = vpack.c.bf16 %v1097_v54, %v1096_v52  ;;  %v861_v63 = vadd.f32 %v860_v61, %v747_v60  ;;  %v862_v2 = vpop.f32.mrb[22].mxu0  ;;  %v751_v6 = vpop.f32.mrb[23].mxu1  ;;  %v1074_v53 = vunpack.c.l.bf16 %v1044_v45 }
 0x141   :  { %v1018_v3 = vadd.f32 %v1849_v38, %v859_v58  ;;  %v863_v4 = vadd.f32 %v862_v2, %v749_v1  ;;  %v864_v7 = vpop.f32.mrb[23].mxu0  ;;  %v1075_v58 = vunpack.c.h.bf16 %v1044_v45 }
 0x142   :  { %1215 = vst [vmem:[%s1982_s4 + $0x48] sm:$0xff] %v1347_v62  ;;  %v1019_v8 = vadd.f32 %v1851_v41, %v861_v63  ;;  %v865_v9 = vadd.f32 %v864_v7, %v751_v6  ;;  %v1076_v63 = vunpack.c.l.bf16 %v1045_v51 }
 0x143   :  { %v1098_v11 = vadd.f32 %v1066_v59, %v1018_v3  ;;  %v1020_v12 = vadd.f32 %v1849_v38, %v863_v4  ;;  %v1077_v4 = vunpack.c.h.bf16 %v1045_v51 }
 0x144   :  { %v1099_v13 = vadd.f32 %v1067_v0, %v1019_v8  ;;  %v1021_v14 = vadd.f32 %v1851_v41, %v865_v9 }
 0x145   :  { %v1100_v16 = vadd.f32 %v1068_v5, %v1020_v12  ;;  %v755_v19 = vpop.f32.mrb[24].mxu1 }
 0x146   :  { %v1348_v17 = vpack.c.bf16 %v1099_v13, %v1098_v11  ;;  %v1101_v18 = vadd.f32 %v1069_v10, %v1021_v14  ;;  %v868_v20 = vpop.f32.mrb[24].mxu0  ;;  %v757_v24 = vpop.f32.mrb[25].mxu1 }
 0x147   :  { %v869_v22 = vadd.f32 %v868_v20, %v755_v19  ;;  %v870_v25 = vpop.f32.mrb[25].mxu0  ;;  %v759_v29 = vpop.f32.mrb[26].mxu1 }
 0x148   :  { %1216 = vst [vmem:[%s1982_s4 + $0x50] sm:$0xff] %v1348_v17  ;;  %v1349_v26 = vpack.c.bf16 %v1101_v18, %v1100_v16  ;;  %v871_v27 = vadd.f32 %v870_v25, %v757_v24  ;;  %v872_v30 = vpop.f32.mrb[26].mxu0  ;;  %v761_v34 = vpop.f32.mrb[27].mxu1 }
 0x149   :  { %v1022_v31 = vadd.f32 %v1849_v38, %v869_v22  ;;  %v873_v32 = vadd.f32 %v872_v30, %v759_v29  ;;  %v874_v35 = vpop.f32.mrb[27].mxu0 }
 0x14a   :  { %1217 = vst [vmem:[%s1982_s4 + $0x58] sm:$0xff] %v1349_v26  ;;  %v1023_v36 = vadd.f32 %v1851_v41, %v871_v27  ;;  %v875_v37 = vadd.f32 %v874_v35, %v761_v34 }
 0x14b   :  { %v1102_v40 = vadd.f32 %v1070_v23, %v1022_v31  ;;  %v1024_v42 = vadd.f32 %v1849_v38, %v873_v32 }
 0x14c   :  { %v1103_v43 = vadd.f32 %v1071_v28, %v1023_v36  ;;  %v1025_v44 = vadd.f32 %v1851_v41, %v875_v37 }
 0x14d   :  { %v1104_v46 = vadd.f32 %v1072_v33, %v1024_v42  ;;  %v765_v49 = vpop.f32.mrb[28].mxu1 }
 0x14e   :  { %v1350_v47 = vpack.c.bf16 %v1103_v43, %v1102_v40  ;;  %v1105_v48 = vadd.f32 %v1073_v39, %v1025_v44  ;;  %v878_v50 = vpop.f32.mrb[28].mxu0  ;;  %v767_v54 = vpop.f32.mrb[29].mxu1 }
 0x14f   :  { %v879_v52 = vadd.f32 %v878_v50, %v765_v49  ;;  %v880_v55 = vpop.f32.mrb[29].mxu0  ;;  %v769_v59 = vpop.f32.mrb[30].mxu1 }
 0x150   :  { %1218 = vst [vmem:[%s1982_s4 + $0x60] sm:$0xff] %v1350_v47  ;;  %v1351_v56 = vpack.c.bf16 %v1105_v48, %v1104_v46  ;;  %v881_v57 = vadd.f32 %v880_v55, %v767_v54  ;;  %v882_v60 = vpop.f32.mrb[30].mxu0  ;;  %v771_v0 = vpop.f32.mrb[31].mxu1 }
 0x151   :  { %v1026_v61 = vadd.f32 %v1849_v38, %v879_v52  ;;  %v883_v62 = vadd.f32 %v882_v60, %v769_v59  ;;  %v884_v1 = vpop.f32.mrb[31].mxu0 }
 0x152   :  { %1219 = vst [vmem:[%s1982_s4 + $0x68] sm:$0xff] %v1351_v56  ;;  %v1027_v2 = vadd.f32 %v1851_v41, %v881_v57  ;;  %v885_v3 = vadd.f32 %v884_v1, %v771_v0 }
 0x153   :  { %v1106_v5 = vadd.f32 %v1074_v53, %v1026_v61  ;;  %v1028_v6 = vadd.f32 %v1849_v38, %v883_v62 }
 0x154   :  { %v1107_v7 = vadd.f32 %v1075_v58, %v1027_v2  ;;  %v1029_v8 = vadd.f32 %v1851_v41, %v885_v3 }
 0x155   :  { %v1108_v9 = vadd.f32 %v1076_v63, %v1028_v6 }
 0x156   :  { %v1352_v10 = vpack.c.bf16 %v1107_v7, %v1106_v5  ;;  %v1109_v11 = vadd.f32 %v1077_v4, %v1029_v8 }
 0x158   :  { %1220 = vst [vmem:[%s1982_s4 + $0x70] sm:$0xff] %v1352_v10  ;;  %v1353_v12 = vpack.c.bf16 %v1109_v11, %v1108_v9 }
 0x15a   :  { %1221 = vst [vmem:[%s1982_s4 + $0x78] sm:$0xff] %v1353_v12 }

// kernel: timesformer_encoder_forward.23
= control target key start
LH: loop header
LB: loop body
LE: loop exit
PB: predicated region body
PF: predicated region fallthrough
CT: control target
= control target key end

     0   :  { %10 = vsyncpa [#allocation3], 0  ;;  %s921_s0 = inlined_call_operand.vmem [shape: bf16[2,64,256], index: 0, kind: input, shape index: {}]   ;;  %s922_s1 = inlined_call_operand.vmem [shape: f32[1,256], index: 1, kind: input, shape index: {}]   ;;  %s923_s2 = inlined_call_operand.vmem [shape: f32[1,256], index: 2, kind: input, shape index: {}]   ;;  %s924_s3 = inlined_call_operand.vmem [shape: bf16[256,128], index: 3, kind: input, shape index: {}]   ;;  %s925_s4 = inlined_call_operand.vmem [shape: f32[1,128], index: 4, kind: input, shape index: {}]   ;;  %s926_s5 = inlined_call_operand.hbm [shape: f32[2,1,128], index: 5, kind: output, shape index: {}]  }
   0x1   :  { %12 = vsyncpa [#allocation3 + $0x1], 0  ;;  %s764_s18 = smov 0   ;;  %s766_s19 = smov 0  }
   0x2   :  { %s768_s20 = smov 0   ;;  %s770_s21 = smov 0  }
   0x3 LB: > { %s785_s22 = sadd.s32 4294967295, %s731_s21   ;;  %s562_s23 = sadd.s32 4294967294, %s731_s21   ;;  %s731_s21 = sphi %s770_s21, %s932_s21   ;;  %s727_s20 = sphi %s768_s20, %s931_s20   ;;  %s723_s19 = sphi %s766_s19, %s930_s19   ;;  %s719_s18 = sphi %s764_s18, %s929_s18  }
   0x4   : > { %s789_s24 = sadd.s32 1, %s731_s21   ;;  %s135_s25 = sadd.s32 1, %s727_s20 }
   0x5   : > { %s132_s26 = ssub.s32 %s731_s21, %s789_s24  ;;  %p145_p0 = scmp.ne.s32.totalorder %s727_s20, %s723_s19 }
   0x6   : > { %p133_p1 = scmp.eq.s32.totalorder %s132_s26, 0  ;;  %p146_p2 = scmp.eq.s32.totalorder %s785_s22, 1 }
   0x7   : > { %p151_p3 = scmp.ne.s32.totalorder %s723_s19, %s719_s18  ;;  %p152_p4 = scmp.eq.s32.totalorder %s562_s23, 1 }
   0x8   : > { %s800_s27 = scalar_select %p133_p1, %s727_s20, %s135_s25  }
   0x9   : > { %p802_p5 = por %p146_p2, %p145_p0  ;;  %p806_p6 = por %p152_p4, %p151_p3 }
   0xa   : > { %p565_p7 = scmp.ge.s32.totalorder %s731_s21, 1  ;;  %p190_p8 = scmp.lt.s32.totalorder %s731_s21, 3 }
   0xc   : > { %p191_p9 = pnand %p565_p7, %p190_p8 }
   0xd   : > { %p217_p10 = scmp.lt.s32.totalorder (!%p191_p9), %s785_s22, 1  ;;  %v649_v53 = vld [vmem:[%s924_s3 + $0x40] sm:$0xff] (!%p191_p9)   ;;  %v651_v55 = vld [vmem:[%s924_s3 + $0x48] sm:$0xff] (!%p191_p9)   ;;  %s215_s16 = sand.u32 (!%p191_p9), 1, %s723_s19  }
   0xe   : > { %194 = sbr.rel (%p191_p9) target bundleno = 616 (0x268), region = 40  ;;  %v650_v54 = vld [vmem:[%s924_s3] sm:$0xff] (!%p191_p9)   ;;  %588 = vmatprep.subr.bf16.mxu0 (!%p191_p9), %v649_v53  ;;  %v652_v56 = vld [vmem:[%s924_s3 + $0x8] sm:$0xff] (!%p191_p9)   ;;  %s584_s17 = sshll.u32 (!%p191_p9), %s785_s22, 4 }
   0xf   : > { %589 = vmatpush3.bf16.msra.mxu0 (!%p191_p9), %v650_v54  ;;  %s216_s23 = scalar_lea.vmem (!%p191_p9), [#allocation2], %s215_s16  ;;  %s495_s7 = scalar_lea.sflag (!%p191_p9), [#allocation3], %s215_s16 }
  0x10   : > { %590 = vmatprep.subr.bf16.mxu0 (!%p191_p9), %v651_v55  ;;  %s507_s25 = sshll.u32 (!%p191_p9), %s216_s23, 4  ;;  %s881_s25 = int_to_ptr.vmem [resolvable:$true] %s507_s25 }
  0x11   : > { %s669_s8 = scalar_lea.vmem (!%p191_p9), %s881_s25, 16 }
  0x12   : > { %p670_p11 = scmp.ne.s32.totalorder (!%p191_p9), %s881_s25, %s669_s8 }
  0x13   : > { %591 = vmatpush3.bf16.msra.mxu0 (!%p191_p9), %v652_v56 }
  0x14   : > { %p671_p12 = pnand (!%p191_p9), %p670_p11, %p802_p5 }
  0x15   : > { %s218_s30 = scalar_select %p217_p10, %s785_s22, 1 }
  0x16   : > { %p672_p13 = pneg %p671_p12  ;;  %s733_s22 = smov [#allocation2]  }
  0x17   : > { %s587_s6 = sshll.u32 %s218_s30, 6 }
  0x18   : > { %s221_s9 = scalar_lea.vmem %s921_s0, %s587_s6  ;;  %s879_s6 = scalar_lea.hbm %s926_s5, %s584_s17 }
  0x19   : > { %v223_v0 = vld [vmem:[%s221_s9] sm:$0xff]  ;;  %v224_v1 = vld [vmem:[%s221_s9 + $0x8] sm:$0xff]  ;;  %v225_v2 = vld [vmem:[%s221_s9 + $0x10] sm:$0xff] }
  0x1a   : > { %v231_v3 = vunpack.c.l.bf16 %v223_v0  ;;  %v232_v4 = vunpack.c.h.bf16 %v223_v0  ;;  %v233_v5 = vunpack.c.l.bf16 %v224_v1  ;;  %v234_v6 = vunpack.c.h.bf16 %v224_v1  ;;  %v226_v7 = vld [vmem:[%s221_s9 + $0x18] sm:$0xff]  ;;  %v227_v8 = vld [vmem:[%s221_s9 + $0x20] sm:$0xff]  ;;  %v228_v11 = vld [vmem:[%s221_s9 + $0x28] sm:$0xff] }
  0x1b   : > { %v235_v9 = vunpack.c.l.bf16 %v225_v2  ;;  %v236_v10 = vunpack.c.h.bf16 %v225_v2  ;;  %v237_v12 = vunpack.c.l.bf16 %v226_v7  ;;  %v238_v13 = vunpack.c.h.bf16 %v226_v7  ;;  %v229_v20 = vld [vmem:[%s221_s9 + $0x30] sm:$0xff]  ;;  %v230_v25 = vld [vmem:[%s221_s9 + $0x38] sm:$0xff]  ;;  %v660_v7 = vld [vmem:[%s924_s3 + $0x28] sm:$0xff]   ;;  %s673_s9 = sshll.u32 %s733_s22, 4  ;;  %s674_s9 = int_to_ptr.vmem [resolvable:$false] %s673_s9 }
  0x1c   : > { %v247_v14 = vadd.f32 %v233_v5, %v231_v3  ;;  %v260_v15 = vadd.f32 %v234_v6, %v232_v4  ;;  %v239_v16 = vunpack.c.l.bf16 %v227_v8  ;;  %v240_v17 = vunpack.c.h.bf16 %v227_v8  ;;  %v653_v0 = vld [vmem:[%s924_s3 + $0x50] sm:$0xff]   ;;  %v655_v2 = vld [vmem:[%s924_s3 + $0x58] sm:$0xff]   ;;  %v657_v4 = vld [vmem:[%s924_s3 + $0x60] sm:$0xff]   ;;  %s675_s10 = scalar_lea.vmem %s674_s9, 32  ;;  %p676_p0 = scmp.lt.s32.totalorder %s881_s25, %s674_s9 }
  0x1d   : > { %v241_v21 = vunpack.c.l.bf16 %v228_v11  ;;  %v242_v22 = vunpack.c.h.bf16 %v228_v11  ;;  %v243_v26 = vunpack.c.l.bf16 %v229_v20  ;;  %v244_v27 = vunpack.c.h.bf16 %v229_v20  ;;  %v654_v1 = vld [vmem:[%s924_s3 + $0x10] sm:$0xff]   ;;  %592 = vmatprep.subr.bf16.mxu0 %v653_v0  ;;  %v656_v3 = vld [vmem:[%s924_s3 + $0x18] sm:$0xff]   ;;  %v658_v5 = vld [vmem:[%s924_s3 + $0x20] sm:$0xff]   ;;  %p677_p1 = scmp.lt.s32.totalorder %s675_s10, %s669_s8 }
  0x1e   : > { %v248_v18 = vadd.f32 %v247_v14, %v235_v9  ;;  %v261_v19 = vadd.f32 %v260_v15, %v236_v10  ;;  %v245_v30 = vunpack.c.l.bf16 %v230_v25  ;;  %v246_v31 = vunpack.c.h.bf16 %v230_v25  ;;  %593 = vmatpush3.bf16.msra.mxu0 %v654_v1  ;;  %v659_v6 = vld [vmem:[%s924_s3 + $0x68] sm:$0xff]   ;;  %v661_v8 = vld [vmem:[%s924_s3 + $0x70] sm:$0xff]   ;;  %v663_v10 = vld [vmem:[%s924_s3 + $0x78] sm:$0xff]  }
  0x1f   : > { %594 = vmatprep.subr.bf16.mxu0 %v655_v2  ;;  %v662_v9 = vld [vmem:[%s924_s3 + $0x30] sm:$0xff]   ;;  %v664_v11 = vld [vmem:[%s924_s3 + $0x38] sm:$0xff]   ;;  %v295_v14 = vlaneseq  ;;  %v307_v20 = vld [vmem:[%s923_s2] sm:$0x3]  ;;  %p678_p2 = por %p677_p1, %p676_p0 }
  0x20   : > { %v249_v23 = vadd.f32 %v248_v18, %v237_v12  ;;  %v262_v24 = vadd.f32 %v261_v19, %v238_v13  ;;  %v293_v19 = vld [vmem:[%s922_s1] sm:$0x3] }
  0x21   : > { %p679_p3 = pnand %p678_p2, %p672_p13 }
  0x22   : > { %v250_v28 = vadd.f32 %v249_v23, %v239_v16  ;;  %v263_v29 = vadd.f32 %v262_v24, %v240_v17  ;;  %595 = vmatpush3.bf16.msra.mxu0 %v656_v3  ;;  %v296_v16 = vshrl.u32 %v295_v14, 7 }
  0x23   : > { %596 = vmatprep.subr.bf16.mxu0 %v657_v4 }
  0x24   : > { %v251_v32 = vadd.f32 %v250_v28, %v241_v21  ;;  %v264_v33 = vadd.f32 %v263_v29, %v242_v22  ;;  %v297_v17 = vsub.s32 0, %v296_v16  ;;  %v301_v18 = vsub.s32 1, %v296_v16 }
  0x26   : > { %v252_v34 = vadd.f32 %v251_v32, %v243_v26  ;;  %v265_v35 = vadd.f32 %v264_v33, %v244_v27  ;;  %597 = vmatpush3.bf16.msra.mxu0 %v658_v5  ;;  %v298_v21 = vrot.slane %v293_v19, %v297_v17  ;;  %v302_v22 = vrot.slane %v293_v19, %v301_v18 }
  0x27   : > { %598 = vmatprep.subr.bf16.mxu0 %v659_v6  ;;  %v312_v25 = vrot.slane %v307_v20, %v297_v17  ;;  %v316_v26 = vrot.slane %v307_v20, %v301_v18 }
  0x28   : > { %v253_v36 = vadd.f32 %v252_v34, %v245_v30  ;;  %v266_v37 = vadd.f32 %v265_v35, %v246_v31  ;;  %v355_v35 = vld [vmem:[%s925_s4] sm:$0x1] }
  0x2a   : > { %v254_v38 = vrot.slane %v253_v36, 4  ;;  %v267_v39 = vrot.slane %v266_v37, 4  ;;  %599 = vmatpush3.bf16.msra.mxu0 %v660_v7 }
  0x2b   : > { %600 = vmatprep.subr.bf16.mxu0 %v661_v8 }
  0x2c   : > { %v255_v40 = vadd.f32 %v254_v38, %v253_v36  ;;  %v268_v41 = vadd.f32 %v267_v39, %v266_v37 }
  0x2e   : > { %v256_v42 = vrot.slane %v255_v40, 2  ;;  %v269_v43 = vrot.slane %v268_v41, 2  ;;  %601 = vmatpush3.bf16.msra.mxu0 %v662_v9 }
  0x2f   : > { %602 = vmatprep.subr.bf16.mxu0 %v663_v10 }
  0x30   : > { %v257_v44 = vadd.f32 %v256_v42, %v255_v40  ;;  %v270_v45 = vadd.f32 %v269_v43, %v268_v41 }
  0x32   : > { %v258_v46 = vrot.slane %v257_v44, 1  ;;  %v271_v47 = vrot.slane %v270_v45, 1  ;;  %603 = vmatpush3.bf16.msra.mxu0 %v664_v11 }
  0x34   : > { %v259_v48 = vadd.f32 %v258_v46, %v257_v44  ;;  %v272_v49 = vadd.f32 %v271_v47, %v270_v45 }
  0x36   : > { %v274_v50 = vmul.f32 0.015625, %v259_v48  ;;  %v275_v51 = vmul.f32 0.015625, %v272_v49 }
  0x38   : > { %v276_v52 = vadd.f32 %v275_v51, %v274_v50 }
  0x3a   : > { %277 = vadd.xlane.f32.xlu0 %v276_v52 }
  0xc7   : > { %v278_v57 = vpop.xlane.xlu0 %277 }
  0xc8   : > { %v280_v58 = vmul.f32 0.00390625, %v278_v57 }
  0xca   : > { %v281_v59 = vsub.f32 %v274_v50, %v280_v58  ;;  %v282_v60 = vsub.f32 %v275_v51, %v280_v58 }
  0xcc   : > { %v283_v61 = vmul.f32 %v281_v59, %v281_v59  ;;  %v284_v62 = vmul.f32 %v282_v60, %v282_v60 }
  0xce   : > { %v285_v63 = vadd.f32 %v284_v62, %v283_v61 }
  0xd0   : > { %286 = vadd.xlane.f32.xlu0 %v285_v63 }
 0x15d   : > { %v287_v12 = vpop.xlane.xlu0 %286 }
 0x15e   : > { %v288_v13 = vmul.f32 0.00390625, %v287_v12 }
 0x160   : > { %v289_v15 = vadd.f32 1e-05, %v288_v13 }
 0x162   : > { %665 = vrsqrt.f32 %v289_v15 }
 0x16c   : > { %v666_v23 = vpop.eup %665 }
 0x16d   : > { %v292_v24 = vmul.f32 %v666_v23, %v282_v60  ;;  %v291_v27 = vmul.f32 %v666_v23, %v281_v59 }
 0x16f   : > { %v306_v28 = vmul.f32 %v302_v22, %v292_v24  ;;  %v305_v29 = vmul.f32 %v298_v21, %v291_v27 }
 0x171   : > { %v320_v30 = vadd.f32 %v316_v26, %v306_v28  ;;  %v319_v31 = vadd.f32 %v312_v25, %v305_v29 }
 0x173   : > { %v322_v32 = vpack.c.bf16 %v320_v30, %v320_v30  ;;  %v321_v33 = vpack.c.bf16 %v319_v31, %v319_v31 }
 0x175   : > { %484 = vmatprep.mubr.bf16.mxu0 %v322_v32 }
 0x176   : > { %485 = vmatmul.mubr.bf16.vlgmr.msra.gmra.mrb[0].mxu0 %v321_v33 }
 0x249   : > { %v604_v34 = vpop.f32.mrb[0].mxu0 }
 0x24a   : > { %v605_v36 = vpop.f32.mrb[1].mxu0 }
 0x24b   : > { %v606_v37 = vadd.f32 %v605_v36, %v604_v34  ;;  %v607_v38 = vpop.f32.mrb[2].mxu0 }
 0x24c   : > { %v608_v39 = vpop.f32.mrb[3].mxu0 }
 0x24d   : > { %v487_v40 = vadd.f32 %v606_v37, %v355_v35 }
 0x24f   : > { %667 = vtanh.f32 %v487_v40 }
 0x259   : > { %v668_v41 = vpop.eup %667 }
 0x25a   : > { %493 = vst [vmem:[%s216_s23] sm:$0x1] %v668_v41 }
 0x25b   : > { %682 = shalt.err (!%p679_p3)
}
 0x25c   : > { %s683_s11 = scalar_lea.hbm %s879_s6, 16  ;;  %s687_s14 = scalar_lea.hbm %s926_s5, 32 }
 0x25d   : > { %p684_p4 = scmp.ne.s32.totalorder %s879_s6, %s683_s11  ;;  %p688_p9 = scmp.lt.u32.totalorder %s879_s6, %s926_s5 }
 0x25e   : > { %p689_p10 = scmp.lt.u32.totalorder %s687_s14, %s683_s11  ;;  %p691_p12 = scmp.lt.u32.totalorder %s683_s11, %s879_s6 }
 0x25f   : > { %p685_p7 = pnand %p684_p4, %p802_p5 }
 0x260   : > { %p690_p11 = por %p689_p10, %p688_p9 }
 0x261   : > { %p686_p8 = pneg %p685_p7 }
 0x262   : > { %p692_p13 = por %p691_p12, %p690_p11 }
 0x264   : > { %p693_p0 = pnand %p692_p13, %p686_p8 }
 0x266   : > { %696 = shalt.err (!%p693_p0)
}
 0x267   : > { %610 = dma.vmem_to_hbm [thread:$0]  (%p802_p5), %s881_s25, 16, %s879_s6, %s495_s7  }
 0x268 PF: > { %p616_p1 = scmp.ge.s32.totalorder %s731_s21, 2  ;;  %s519_s17 = sand.u32 1, %s719_s18  }
 0x269   : > { %s520_s23 = scalar_lea.sflag [#allocation3], %s519_s17 }
 0x26a   : > { %p613_p2 = pnand %p616_p1, %p806_p6 }
 0x26c   : > { %714 = dma.done.wait (!%p613_p2), %s520_s23, 16  }
 0x26d   : > { %716 = vsyncadd (!%p613_p2), %s520_s23, 4294967280  ;;  %p15_p3 = scmp.ge.s32.totalorder %s789_s24, 4   ;;  %s929_s18 = smov %s723_s19 }
 0x26e   : > { %s930_s19 = smov %s727_s20  ;;  %s931_s20 = smov %s800_s27 }
 0x26f   : > { %s932_s21 = smov %s789_s24  ;;  %17 = sbr.rel (!%p15_p3) target bundleno = 3 (0x3), region = 75 }
 0x276   :  { %524 = vsyncpa [#allocation3], 1 }
 0x277   :  { %526 = vsyncpa [#allocation3 + $0x1], 1 }

</bundles_post_ra>
